<compile_context>
chip_gen: v6e
topology: v6e:2x2x1
jax: 0.10.0
libtpu: 0.0.40
codegen_flags: <defaults>
</compile_context>

<pallas_src>
import jax
import jax.numpy as jnp
import numpy as np
from jax.experimental import pallas as pl
from jax.experimental.pallas import tpu as pltpu

# ---------------------------------------------------------------------------
# Small synthetic configuration (consistent with the module's __init__).
# ---------------------------------------------------------------------------
N_MEL = 8                 # n_mel_channels
N_FLOWS = 4               # n_flows
N_GROUP = 8               # n_group (even)
N_EARLY_EVERY = 4
N_EARLY_SIZE = 2
WN_N_LAYERS = 2           # WN_config
WN_N_CHANNELS = 32
WN_KERNEL_SIZE = 3
UPSAMPLE_K = 1024         # ConvTranspose1d kernel_size (fixed by the module)
UPSAMPLE_STRIDE = 256     # ConvTranspose1d stride (fixed by the module)
SIGMA = 1.0


# ---------------------------------------------------------------------------
# Deterministic parameter initialisation (synthetic; shapes from __init__).
# ---------------------------------------------------------------------------
def init_params(key):
    keys = jax.random.split(key, 64)
    ki = iter(keys)
    p = {}
    # ConvTranspose1d(n_mel, n_mel, 1024, stride=256): weight [Cin, Cout, K]
    p["up_w"] = 0.01 * jax.random.normal(next(ki), (N_MEL, N_MEL, UPSAMPLE_K), jnp.float32)
    p["up_b"] = 0.01 * jax.random.normal(next(ki), (N_MEL,), jnp.float32)

    n_half = N_GROUP // 2
    n_remaining = N_GROUP
    n_cond = N_MEL * N_GROUP
    nc = WN_N_CHANNELS
    flows = []
    for k in range(N_FLOWS):
        if k % N_EARLY_EVERY == 0 and k > 0:
            n_half -= N_EARLY_SIZE // 2
            n_remaining -= N_EARLY_SIZE
        f = {"n_half": n_half, "n_remaining": n_remaining}
        # Invertible1x1Conv: orthogonal W (QR of a Gaussian), det > 0.
        A = jax.random.normal(next(ki), (n_remaining, n_remaining), jnp.float32)
        W = jnp.linalg.qr(A)[0]
        W = W.at[:, 0].multiply(jnp.where(jnp.linalg.det(W) < 0, -1.0, 1.0))
        f["W_inv"] = jnp.linalg.inv(W)          # infer() uses the inverse
        # WN(n_half, n_mel*n_group, n_layers, n_channels, kernel_size)
        f["start_w"] = 0.1 * jax.random.normal(next(ki), (nc, n_half), jnp.float32)
        f["start_b"] = 0.1 * jax.random.normal(next(ki), (nc, 1), jnp.float32)
        f["in_w"]    = 0.1 * jax.random.normal(next(ki), (WN_N_LAYERS, WN_KERNEL_SIZE, 2 * nc, nc), jnp.float32)
        f["in_b"]    = 0.1 * jax.random.normal(next(ki), (WN_N_LAYERS, 2 * nc, 1), jnp.float32)
        f["cond_w"]  = 0.1 * jax.random.normal(next(ki), (WN_N_LAYERS, 2 * nc, n_cond), jnp.float32)
        f["cond_b"]  = 0.1 * jax.random.normal(next(ki), (WN_N_LAYERS, 2 * nc, 1), jnp.float32)
        f["res_w"]   = 0.1 * jax.random.normal(next(ki), (WN_N_LAYERS - 1, nc, nc), jnp.float32)
        f["res_b"]   = 0.1 * jax.random.normal(next(ki), (WN_N_LAYERS - 1, nc, 1), jnp.float32)
        f["skip_w"]  = 0.1 * jax.random.normal(next(ki), (WN_N_LAYERS, nc, nc), jnp.float32)
        f["skip_b"]  = 0.1 * jax.random.normal(next(ki), (WN_N_LAYERS, nc, 1), jnp.float32)
        f["end_w"]   = 0.05 * jax.random.normal(next(ki), (2 * n_half, nc), jnp.float32)
        f["end_b"]   = 0.05 * jax.random.normal(next(ki), (2 * n_half, 1), jnp.float32)
        flows.append(f)
    p["flows"] = flows
    p["n_remaining_channels"] = n_remaining
    return p


# ---------------------------------------------------------------------------
# Pallas kernel 1: ConvTranspose1d upsample as a single M = B*T phase matmul.
# Output columns are pre-ordered (q, mel, g) so a free reshape gives the
# frame-major conditioning input U[b, frame, mel*N_GROUP + g].
# ---------------------------------------------------------------------------
def _upsample_kernel(xs_ref, w_ref, b_ref, o_ref):
    x = xs_ref[...].astype(jnp.bfloat16)         # MXU operand in bf16
    o_ref[...] = (jnp.dot(x, w_ref[...], preferred_element_type=jnp.float32)
                  + b_ref[...])


def upsample_cond_input(spect, up_w, up_b):
    """spect [B, Cmel, T_spec] -> U [B, n_frames, N_MEL*N_GROUP] (frame-major),
    with U[b, f, mel*N_GROUP + g] == upsampled[b, mel, f*N_GROUP + g]."""
    B, C, T = spect.shape
    Cin, Cout, K = up_w.shape
    stride = UPSAMPLE_STRIDE
    ntaps = K // stride                       # 4
    q_count = stride // N_GROUP               # output frames per spec frame
    assert K % stride == 0 and stride % N_GROUP == 0

    # xs[b*T + t, d*Cin + ci] = spect[b, ci, t - d]  (zero for t < d)  -- glue.
    cols = [jnp.pad(spect, ((0, 0), (0, 0), (d, 0)))[:, :, :T] for d in range(ntaps)]
    xs = jnp.stack(cols, axis=1)                                   # [B, ntaps, C, T]
    xs = jnp.transpose(xs, (0, 3, 1, 2)).reshape(B * T, ntaps * C)

    # W_mat[d*Cin+ci, q*(Cout*G) + mel*G + g] = up_w[ci, mel, d*stride + q*G + g]
    Wr = up_w.reshape(Cin, Cout, ntaps, q_count, N_GROUP)
    W_mat = jnp.transpose(Wr, (2, 0, 3, 1, 4)).reshape(
        ntaps * Cin, q_count * Cout * N_GROUP).astype(jnp.bfloat16)
    bias_row = jnp.tile(jnp.repeat(up_b, N_GROUP), q_count)[None, :]   # [1, N]

    BT = B * T
    N = q_count * Cout * N_GROUP
    TM = 256 if BT % 256 == 0 else (128 if BT % 128 == 0 else BT)

    out = pl.pallas_call(
        _upsample_kernel,
        out_shape=jax.ShapeDtypeStruct((BT, N), jnp.float32),
        grid=(BT // TM,),
        in_specs=[
            pl.BlockSpec((TM, ntaps * Cin), lambda m: (m, 0)),
            pl.BlockSpec((ntaps * Cin, N), lambda m: (0, 0)),
            pl.BlockSpec((1, N), lambda m: (0, 0)),
        ],
        out_specs=pl.BlockSpec((TM, N), lambda m: (m, 0)),
        compiler_params=pltpu.CompilerParams(dimension_semantics=("parallel",)),
    )(xs, W_mat, bias_row)
    # [B*T, q*C*G] -> [B, T*q, C*G]: pure row-major reshape (no transpose pass).
    return out.reshape(B, T * q_count, Cout * N_GROUP)


# ---------------------------------------------------------------------------
# Pallas kernel 2: precompute ALL flows'/layers' conditioning projections in
# one stacked NT matmul, producing channel-major cond slabs [B, J, n_frames].
# ---------------------------------------------------------------------------
def _cond_kernel(u_ref, w_ref, b_ref, o_ref):
    u = u_ref[0].astype(jnp.bfloat16)                    # [TILE_F, Cc]
    o_ref[0] = jax.lax.dot_general(
        w_ref[...], u, (((1,), (1,)), ((), ())),         # W @ U^T (NT matmul)
        preferred_element_type=jnp.float32) + b_ref[...]


def precompute_cond(U, flows):
    """cond[b, k*L*2nc + l*2nc + j, f] = (cond_w[k][l] @ spect_cond[b])[j, f] + cond_b."""
    B, n_frames, Cc = U.shape
    condW = jnp.concatenate([f["cond_w"].reshape(-1, Cc) for f in flows], axis=0)
    condB = jnp.concatenate([f["cond_b"].reshape(-1, 1) for f in flows], axis=0)
    J = condW.shape[0]
    condW = condW.astype(jnp.bfloat16)
    TILE_F = 128 if n_frames % 128 == 0 else n_frames
    return pl.pallas_call(
        _cond_kernel,
        out_shape=jax.ShapeDtypeStruct((B, J, n_frames), jnp.float32),
        grid=(B, n_frames // TILE_F),
        in_specs=[
            pl.BlockSpec((1, TILE_F, Cc), lambda b, t: (b, t, 0)),
            pl.BlockSpec((J, Cc), lambda b, t: (0, 0)),
            pl.BlockSpec((J, 1), lambda b, t: (0, 0)),
        ],
        out_specs=pl.BlockSpec((1, J, TILE_F), lambda b, t: (b, 0, t)),
        compiler_params=pltpu.CompilerParams(
            dimension_semantics=("parallel", "parallel")),
    )(U, condW, condB)


# ---------------------------------------------------------------------------
# Pallas kernel 3: one full inverse flow step (WN forward + affine-coupling
# inverse + invertible-1x1-conv inverse), one batch element per grid step.
# ---------------------------------------------------------------------------
def make_flow_kernel(parity_even, n_half, n_channels, n_layers, T):
    d_max = 2 ** (n_layers - 1)          # max dilation

    def kernel(audio_ref, cond_ref, winv_ref,
               start_w_ref, start_b_ref, inw_ref, inb_ref,
               res_w_ref, res_b_ref, skip_w_ref, skip_b_ref,
               end_w_ref, end_b_ref, out_ref, hpad_ref):
        f32, bf16 = jnp.float32, jnp.bfloat16
        audio = audio_ref[0]                      # [n_remaining, T]
        if parity_even:                           # k % 2 == 0
            a0 = audio[:n_half, :]
            a1 = audio[n_half:, :]
        else:
            a1 = audio[:n_half, :]
            a0 = audio[n_half:, :]

        # ---- WN forward on (a0, precomputed cond) ----
        h = (jnp.dot(start_w_ref[...], a0.astype(bf16),
                     preferred_element_type=f32) + start_b_ref[...])
        hpad_ref[...] = jnp.zeros_like(hpad_ref)   # zero halo columns once
        skip_total = None
        for i in range(n_layers):
            d = 2 ** i
            # Dilated conv: the +-d shifted operands are static slices of a
            # zero-padded VMEM scratch; the 3 taps are fused into one K=3*nc dot.
            hpad_ref[:, d_max:d_max + T] = h
            xl = hpad_ref[:, d_max - d:d_max - d + T]     # h[:, t-d], zero pad
            xr = hpad_ref[:, d_max + d:d_max + d + T]     # h[:, t+d], zero pad
            xstack = jnp.concatenate([xl, h, xr], axis=0).astype(bf16)  # [3nc, T]
            pre = (jnp.dot(inw_ref[i], xstack, preferred_element_type=f32)
                   + inb_ref[i])
            acts = pre + cond_ref[0, i * 2 * n_channels:(i + 1) * 2 * n_channels, :]
            # fused_add_tanh_sigmoid_multiply (f32: no bf16 VPU/EUP on v5e)
            g = jnp.tanh(acts[:n_channels, :]) * jax.nn.sigmoid(acts[n_channels:, :])
            gb = g.astype(bf16)
            if i < n_layers - 1:
                h = (jnp.dot(res_w_ref[i], gb, preferred_element_type=f32)
                     + res_b_ref[i] + h)
            sk = jnp.dot(skip_w_ref[i], gb, preferred_element_type=f32) + skip_b_ref[i]
            skip_total = sk if i == 0 else skip_total + sk
        wn_out = (jnp.dot(end_w_ref[...], skip_total.astype(bf16),
                          preferred_element_type=f32) + end_b_ref[...])

        # ---- affine coupling inverse: a1 = (a1 - b) * exp(-s) ----
        b_ = wn_out[:n_half, :]
        s_ = wn_out[n_half:, :]
        a1_new = (a1 - b_) * jnp.exp(-s_)
        if parity_even:
            new_audio = jnp.concatenate([a0, a1_new], axis=0)
        else:
            new_audio = jnp.concatenate([a1_new, a0], axis=0)

        # ---- invertible 1x1 conv, reverse: W^{-1} @ audio ----
        out_ref[0] = jnp.dot(winv_ref[...], new_audio.astype(bf16),
                             preferred_element_type=f32)

    return kernel


def flow_step(k, audio, cond_all, f):
    # TODO(synk): for seconds-long audio, tile the time axis with a +-(sum of
    # dilations) halo so per-block VMEM stays under v7x's 64 MiB.
    B, n_rem, T = audio.shape
    nc, L = WN_N_CHANNELS, WN_N_LAYERS
    Lc = L * 2 * nc                              # cond channels per flow
    bf16 = jnp.bfloat16
    kernel = make_flow_kernel(k % 2 == 0, f["n_half"], nc, L, T)

    # fused tap weight [L, 2nc, 3nc]: column blocks = (t-d, t, t+d) taps
    inw_fused = jnp.concatenate(
        [f["in_w"][:, 0], f["in_w"][:, 1], f["in_w"][:, 2]], axis=2).astype(bf16)
    params = [f["W_inv"].astype(bf16),
              f["start_w"].astype(bf16), f["start_b"],
              inw_fused, f["in_b"],
              f["res_w"].astype(bf16), f["res_b"],
              f["skip_w"].astype(bf16), f["skip_b"],
              f["end_w"].astype(bf16), f["end_b"]]

    def _const_spec(x):
        nd = x.ndim
        return pl.BlockSpec(x.shape, lambda b, _n=nd: (0,) * _n)

    in_specs = ([pl.BlockSpec((1, n_rem, T), lambda b: (b, 0, 0)),
                 pl.BlockSpec((1, Lc, T), lambda b, _k=k: (b, _k, 0))]
                + [_const_spec(x) for x in params])
    d_max = 2 ** (L - 1)
    return pl.pallas_call(
        kernel,
        out_shape=jax.ShapeDtypeStruct((B, n_rem, T), jnp.float32),
        grid=(B,),
        in_specs=in_specs,
        out_specs=pl.BlockSpec((1, n_rem, T), lambda b: (b, 0, 0)),
        scratch_shapes=[pltpu.VMEM((nc, T + 2 * d_max), jnp.float32)],
        compiler_params=pltpu.CompilerParams(dimension_semantics=("parallel",)),
    )(audio, cond_all, *params)


# ---------------------------------------------------------------------------
# WaveGlow.infer() wrapper (Pallas path).
# ---------------------------------------------------------------------------
def waveglow_infer(spect, audio_init, params, sigma=SIGMA):
    B = spect.shape[0]
    U = upsample_cond_input(spect, params["up_w"], params["up_b"])  # [B, F, 64]
    cond_all = precompute_cond(U, params["flows"])  # [B, N_FLOWS*L*2nc, F]
    n_frames = U.shape[1]
    # TODO(synk): torch .normal_() RNG is not bit-reproducible in JAX; the
    # Gaussian noise is generated with jax.random and passed in (audio_init).
    audio = audio_init
    for k in reversed(range(N_FLOWS)):
        audio = flow_step(k, audio, cond_all, params["flows"][k])
        if k % N_EARLY_EVERY == 0 and k > 0:
            z = jax.random.normal(jax.random.fold_in(jax.random.PRNGKey(123), k),
                                  (B, N_EARLY_SIZE, n_frames), jnp.float32)
            audio = jnp.concatenate([sigma * z, audio], axis=1)
    return jnp.transpose(audio, (0, 2, 1)).reshape(B, -1)


# ---------------------------------------------------------------------------
# Pure-JAX reference (numerical cross-check; mirrors the kernels' bf16 MXU
# operand casts with f32 accumulation so the comparison is tight).
# ---------------------------------------------------------------------------
def _qdot(eq, a, b):
    return jnp.einsum(eq, a.astype(jnp.bfloat16), b.astype(jnp.bfloat16),
                      preferred_element_type=jnp.float32)


def ref_upsample(spect, W, b):
    B, Cin, T = spect.shape
    Cout, K, stride = W.shape[1], W.shape[2], UPSAMPLE_STRIDE
    out = jnp.zeros((B, Cout, (T - 1) * stride + K), jnp.float32) + b[None, :, None]
    for j in range(T):
        out = out.at[:, :, j * stride:j * stride + K].add(
            _qdot("bi,iok->bok", spect[:, :, j], W))
    return out[:, :, :T * stride]   # == [:, :, :-(K - stride)]


def _ref_1x1(w, b, x):
    return _qdot("oi,bit->bot", w, x) + b[None]


def ref_flow_step(k, audio, spect_cond, f):
    n_half = f["n_half"]
    T = audio.shape[2]
    if k % 2 == 0:
        a0, a1 = audio[:, :n_half], audio[:, n_half:]
    else:
        a1, a0 = audio[:, :n_half], audio[:, n_half:]
    h = _ref_1x1(f["start_w"], f["start_b"], a0)
    skip_total = None
    for i in range(WN_N_LAYERS):
        d = 2 ** i
        xp = jnp.pad(h, ((0, 0), (0, 0), (d, d)))
        pre = f["in_b"][i][None]
        for j in range(WN_KERNEL_SIZE):
            pre = pre + _qdot("oi,bit->bot", f["in_w"][i, j], xp[:, :, j * d:j * d + T])
        acts = pre + _ref_1x1(f["cond_w"][i], f["cond_b"][i], spect_cond)
        g = jnp.tanh(acts[:, :WN_N_CHANNELS]) * jax.nn.sigmoid(acts[:, WN_N_CHANNELS:])
        if i < WN_N_LAYERS - 1:
            h = _ref_1x1(f["res_w"][i], f["res_b"][i], g) + h
        sk = _ref_1x1(f["skip_w"][i], f["skip_b"][i], g)
        skip_total = sk if i == 0 else skip_total + sk
    wn_out = _ref_1x1(f["end_w"], f["end_b"], skip_total)
    b_, s_ = wn_out[:, :n_half], wn_out[:, n_half:]
    a1 = (a1 - b_) * jnp.exp(-s_)
    audio = jnp.concatenate([a0, a1], 1) if k % 2 == 0 else jnp.concatenate([a1, a0], 1)
    return _qdot("oi,bit->bot", f["W_inv"], audio)


def ref_infer(spect, audio_init, params, sigma=SIGMA):
    B = spect.shape[0]
    up = ref_upsample(spect, params["up_w"], params["up_b"])   # [B, Cmel, T_audio]
    n_frames = up.shape[2] // N_GROUP
    sc = up.reshape(B, N_MEL, n_frames, N_GROUP)
    sc = jnp.transpose(sc, (0, 1, 3, 2)).reshape(B, N_MEL * N_GROUP, n_frames)
    audio = audio_init
    for k in reversed(range(N_FLOWS)):
        audio = ref_flow_step(k, audio, sc, params["flows"][k])
        if k % N_EARLY_EVERY == 0 and k > 0:
            z = jax.random.normal(jax.random.fold_in(jax.random.PRNGKey(123), k),
                                  (B, N_EARLY_SIZE, n_frames), jnp.float32)
            audio = jnp.concatenate([sigma * z, audio], axis=1)
    return jnp.transpose(audio, (0, 2, 1)).reshape(B, -1)


# ---------------------------------------------------------------------------
if __name__ == "__main__":
    key = jax.random.PRNGKey(0)
    k_params, k_spect, k_audio = jax.random.split(key, 3)

    params = init_params(k_params)

    B, T_SPEC = 2, 4
    n_frames = T_SPEC * UPSAMPLE_STRIDE // N_GROUP          # 128
    spect = jax.random.normal(k_spect, (B, N_MEL, T_SPEC), jnp.float32)
    audio_init = SIGMA * jax.random.normal(
        k_audio, (B, params["n_remaining_channels"], n_frames), jnp.float32)

    infer = jax.jit(lambda s, a: waveglow_infer(s, a, params))
    out = jax.block_until_ready(infer(spect, audio_init))
    assert out.shape == (B, T_SPEC * UPSAMPLE_STRIDE)

    ref = jax.block_until_ready(ref_infer(spect, audio_init, params))
    np.testing.assert_allclose(np.asarray(out), np.asarray(ref), rtol=2e-2, atol=2e-2)

    print("KERNEL_OK")
</pallas_src>

<mosaic_0001>
module attributes {stable_mosaic.version = 11 : i64} {
  func.func @_upsample_kernel(%arg0: i32, %arg1: memref<8x32xf32, #tpu.memory_space<vmem>>, %arg2: memref<32x2048xbf16, #tpu.memory_space<vmem>>, %arg3: memref<1x2048xf32, #tpu.memory_space<vmem>>, %arg4: memref<8x2048xf32, #tpu.memory_space<vmem>>) attributes {dimension_semantics = [#tpu.dimension_semantics<parallel>], iteration_bounds = array<i64: 1>, scalar_prefetch = 0 : i64, scratch_operands = 0 : i64, tpu.core_type = #tpu.core_type<tc>, window_params = [{transform_indices = @transform_0, window_bounds = array<i64: 8, 32>}, {pipeline_mode = #tpu.pipeline_mode<synchronous>, transform_indices = @transform_1, window_bounds = array<i64: 32, 2048>}, {pipeline_mode = #tpu.pipeline_mode<synchronous>, transform_indices = @transform_2, window_bounds = array<i64: 1, 2048>}, {transform_indices = @transform_3, window_bounds = array<i64: 8, 2048>}]} {
    %c0 = arith.constant 0 : index
    %c0_0 = arith.constant 0 : index
    %0 = vector.load %arg1[%c0, %c0_0] : memref<8x32xf32, #tpu.memory_space<vmem>>, vector<8x32xf32>
    %1 = arith.truncf %0 : vector<8x32xf32> to vector<8x32xbf16>
    %c0_1 = arith.constant 0 : index
    %c0_2 = arith.constant 0 : index
    %2 = vector.load %arg2[%c0_1, %c0_2] : memref<32x2048xbf16, #tpu.memory_space<vmem>>, vector<32x2048xbf16>
    %cst = arith.constant dense<0.000000e+00> : vector<8x2048xf32>
    %3 = tpu.matmul %1, %2, %cst {dimension_numbers = #tpu.dot_dimension_numbers<[1], [0], [0], [1], [0, 0, 1, 1], [], []>} : vector<8x32xbf16>, vector<32x2048xbf16>, vector<8x2048xf32> -> vector<8x2048xf32>
    %c0_3 = arith.constant 0 : index
    %c0_4 = arith.constant 0 : index
    %4 = vector.load %arg3[%c0_3, %c0_4] : memref<1x2048xf32, #tpu.memory_space<vmem>>, vector<1x2048xf32>
    %5 = vector.broadcast %4 : vector<1x2048xf32> to vector<8x2048xf32>
    %6 = arith.addf %3, %5 : vector<8x2048xf32>
    %c0_5 = arith.constant 0 : index
    %c0_6 = arith.constant 0 : index
    %7 = vector.load %arg4[%c0_5, %c0_6] : memref<8x2048xf32, #tpu.memory_space<vmem>>, vector<8x2048xf32>
    tpu.vector_store %arg4[%c0_5, %c0_6], %6 {strides = array<i32>} : memref<8x2048xf32, #tpu.memory_space<vmem>>, vector<8x2048xf32>,
    return
  }
  func.func @transform_0(%arg0: i32) -> (i32, i32) {
    %c0_i32 = arith.constant 0 : i32
    %c0_i32_0 = arith.constant 0 : i32
    return %arg0, %c0_i32 : i32, i32
  }
  func.func @transform_1(%arg0: i32) -> (i32, i32) {
    %c0_i32 = arith.constant 0 : i32
    %c0_i32_0 = arith.constant 0 : i32
    %c0_i32_1 = arith.constant 0 : i32
    return %c0_i32, %c0_i32_0 : i32, i32
  }
  func.func @transform_2(%arg0: i32) -> (i32, i32) {
    %c0_i32 = arith.constant 0 : i32
    %c0_i32_0 = arith.constant 0 : i32
    %c0_i32_1 = arith.constant 0 : i32
    return %c0_i32, %c0_i32_0 : i32, i32
  }
  func.func @transform_3(%arg0: i32) -> (i32, i32) {
    %c0_i32 = arith.constant 0 : i32
    %c0_i32_0 = arith.constant 0 : i32
    return %arg0, %c0_i32 : i32, i32
  }
}

module attributes {stable_mosaic.version = 11 : i64} {
  func.func @_cond_kernel(%arg0: i32, %arg1: i32, %arg2: memref<1x128x64xf32, #tpu.memory_space<vmem>>, %arg3: memref<512x64xbf16, #tpu.memory_space<vmem>>, %arg4: memref<512x1xf32, #tpu.memory_space<vmem>>, %arg5: memref<1x512x128xf32, #tpu.memory_space<vmem>>) attributes {dimension_semantics = [#tpu.dimension_semantics<parallel>, #tpu.dimension_semantics<parallel>], iteration_bounds = array<i64: 2, 1>, scalar_prefetch = 0 : i64, scratch_operands = 0 : i64, tpu.core_type = #tpu.core_type<tc>, window_params = [{transform_indices = @transform_0, window_bounds = array<i64: 1, 128, 64>}, {pipeline_mode = #tpu.pipeline_mode<synchronous>, transform_indices = @transform_1, window_bounds = array<i64: 512, 64>}, {pipeline_mode = #tpu.pipeline_mode<synchronous>, transform_indices = @transform_2, window_bounds = array<i64: 512, 1>}, {transform_indices = @transform_3, window_bounds = array<i64: 1, 512, 128>}]} {
    %c0 = arith.constant 0 : index
    %c0_0 = arith.constant 0 : index
    %c0_1 = arith.constant 0 : index
    %0 = vector.load %arg2[%c0, %c0_0, %c0_1] : memref<1x128x64xf32, #tpu.memory_space<vmem>>, vector<1x128x64xf32>
    %1 = vector.shape_cast %0 : vector<1x128x64xf32> to vector<128x64xf32>
    %2 = arith.truncf %1 : vector<128x64xf32> to vector<128x64xbf16>
    %c0_2 = arith.constant 0 : index
    %c0_3 = arith.constant 0 : index
    %3 = vector.load %arg3[%c0_2, %c0_3] : memref<512x64xbf16, #tpu.memory_space<vmem>>, vector<512x64xbf16>
    %cst = arith.constant dense<0.000000e+00> : vector<512x128xf32>
    %4 = tpu.matmul %3, %2, %cst {dimension_numbers = #tpu.dot_dimension_numbers<[1], [1], [0], [0], [0, 0, 1, 0], [], []>} : vector<512x64xbf16>, vector<128x64xbf16>, vector<512x128xf32> -> vector<512x128xf32>
    %c0_4 = arith.constant 0 : index
    %c0_5 = arith.constant 0 : index
    %5 = vector.load %arg4[%c0_4, %c0_5] : memref<512x1xf32, #tpu.memory_space<vmem>>, vector<512x1xf32>
    %6 = vector.broadcast %5 : vector<512x1xf32> to vector<512x128xf32>
    %7 = arith.addf %4, %6 : vector<512x128xf32>
    %c0_6 = arith.constant 0 : index
    %c0_7 = arith.constant 0 : index
    %c0_8 = arith.constant 0 : index
    %8 = vector.load %arg5[%c0_6, %c0_7, %c0_8] : memref<1x512x128xf32, #tpu.memory_space<vmem>>, vector<1x512x128xf32>
    %9 = vector.shape_cast %8 : vector<1x512x128xf32> to vector<512x128xf32>
    %10 = vector.shape_cast %7 : vector<512x128xf32> to vector<1x512x128xf32>
    tpu.vector_store %arg5[%c0_6, %c0_7, %c0_8], %10 {strides = array<i32>} : memref<1x512x128xf32, #tpu.memory_space<vmem>>, vector<1x512x128xf32>,
    return
  }
  func.func @transform_0(%arg0: i32, %arg1: i32) -> (i32, i32, i32) {
    %c0_i32 = arith.constant 0 : i32
    %c0_i32_0 = arith.constant 0 : i32
    return %arg0, %arg1, %c0_i32 : i32, i32, i32
  }
  func.func @transform_1(%arg0: i32, %arg1: i32) -> (i32, i32) {
    %c0_i32 = arith.constant 0 : i32
    %c0_i32_0 = arith.constant 0 : i32
    %c0_i32_1 = arith.constant 0 : i32
    return %c0_i32, %c0_i32_0 : i32, i32
  }
  func.func @transform_2(%arg0: i32, %arg1: i32) -> (i32, i32) {
    %c0_i32 = arith.constant 0 : i32
    %c0_i32_0 = arith.constant 0 : i32
    %c0_i32_1 = arith.constant 0 : i32
    return %c0_i32, %c0_i32_0 : i32, i32
  }
  func.func @transform_3(%arg0: i32, %arg1: i32) -> (i32, i32, i32) {
    %c0_i32 = arith.constant 0 : i32
    %c0_i32_0 = arith.constant 0 : i32
    return %arg0, %c0_i32, %arg1 : i32, i32, i32
  }
}

module attributes {stable_mosaic.version = 11 : i64} {
  func.func @kernel(%arg0: i32, %arg1: memref<1x8x128xf32, #tpu.memory_space<vmem>>, %arg2: memref<1x128x128xf32, #tpu.memory_space<vmem>>, %arg3: memref<8x8xbf16, #tpu.memory_space<vmem>>, %arg4: memref<32x4xbf16, #tpu.memory_space<vmem>>, %arg5: memref<32x1xf32, #tpu.memory_space<vmem>>, %arg6: memref<2x64x96xbf16, #tpu.memory_space<vmem>>, %arg7: memref<2x64x1xf32, #tpu.memory_space<vmem>>, %arg8: memref<1x32x32xbf16, #tpu.memory_space<vmem>>, %arg9: memref<1x32x1xf32, #tpu.memory_space<vmem>>, %arg10: memref<2x32x32xbf16, #tpu.memory_space<vmem>>, %arg11: memref<2x32x1xf32, #tpu.memory_space<vmem>>, %arg12: memref<8x32xbf16, #tpu.memory_space<vmem>>, %arg13: memref<8x1xf32, #tpu.memory_space<vmem>>, %arg14: memref<1x8x128xf32, #tpu.memory_space<vmem>>, %arg15: memref<32x132xf32, #tpu.memory_space<vmem>>) attributes {dimension_semantics = [#tpu.dimension_semantics<parallel>], iteration_bounds = array<i64: 2>, scalar_prefetch = 0 : i64, scratch_operands = 1 : i64, tpu.core_type = #tpu.core_type<tc>, window_params = [{transform_indices = @transform_0, window_bounds = array<i64: 1, 8, 128>}, {transform_indices = @transform_1, window_bounds = array<i64: 1, 128, 128>}, {pipeline_mode = #tpu.pipeline_mode<synchronous>, transform_indices = @transform_2, window_bounds = array<i64: 8, 8>}, {pipeline_mode = #tpu.pipeline_mode<synchronous>, transform_indices = @transform_3, window_bounds = array<i64: 32, 4>}, {pipeline_mode = #tpu.pipeline_mode<synchronous>, transform_indices = @transform_4, window_bounds = array<i64: 32, 1>}, {pipeline_mode = #tpu.pipeline_mode<synchronous>, transform_indices = @transform_5, window_bounds = array<i64: 2, 64, 96>}, {pipeline_mode = #tpu.pipeline_mode<synchronous>, transform_indices = @transform_6, window_bounds = array<i64: 2, 64, 1>}, {pipeline_mode = #tpu.pipeline_mode<synchronous>, transform_indices = @transform_7, window_bounds = array<i64: 1, 32, 32>}, {pipeline_mode = #tpu.pipeline_mode<synchronous>, transform_indices = @transform_8, window_bounds = array<i64: 1, 32, 1>}, {pipeline_mode = #tpu.pipeline_mode<synchronous>, transform_indices = @transform_9, window_bounds = array<i64: 2, 32, 32>}, {pipeline_mode = #tpu.pipeline_mode<synchronous>, transform_indices = @transform_10, window_bounds = array<i64: 2, 32, 1>}, {pipeline_mode = #tpu.pipeline_mode<synchronous>, transform_indices = @transform_11, window_bounds = array<i64: 8, 32>}, {pipeline_mode = #tpu.pipeline_mode<synchronous>, transform_indices = @transform_12, window_bounds = array<i64: 8, 1>}, {transform_indices = @transform_13, window_bounds = array<i64: 1, 8, 128>}]} {
    %c0 = arith.constant 0 : index
    %c0_0 = arith.constant 0 : index
    %c0_1 = arith.constant 0 : index
    %0 = vector.load %arg1[%c0, %c0_0, %c0_1] : memref<1x8x128xf32, #tpu.memory_space<vmem>>, vector<1x8x128xf32>
    %1 = vector.shape_cast %0 : vector<1x8x128xf32> to vector<8x128xf32>
    %2 = vector.extract_strided_slice %1 {offsets = [0, 0], sizes = [4, 128], strides = [1, 1]} : vector<8x128xf32> to vector<4x128xf32>
    %3 = vector.extract_strided_slice %1 {offsets = [4, 0], sizes = [4, 128], strides = [1, 1]} : vector<8x128xf32> to vector<4x128xf32>
    %c0_2 = arith.constant 0 : index
    %c0_3 = arith.constant 0 : index
    %4 = vector.load %arg4[%c0_2, %c0_3] : memref<32x4xbf16, #tpu.memory_space<vmem>>, vector<32x4xbf16>
    %5 = arith.truncf %3 : vector<4x128xf32> to vector<4x128xbf16>
    %cst = arith.constant dense<0.000000e+00> : vector<32x128xf32>
    %6 = tpu.matmul %4, %5, %cst {dimension_numbers = #tpu.dot_dimension_numbers<[1], [0], [0], [1], [0, 0, 1, 1], [], []>} : vector<32x4xbf16>, vector<4x128xbf16>, vector<32x128xf32> -> vector<32x128xf32>
    %c0_4 = arith.constant 0 : index
    %c0_5 = arith.constant 0 : index
    %7 = vector.load %arg5[%c0_4, %c0_5] : memref<32x1xf32, #tpu.memory_space<vmem>>, vector<32x1xf32>
    %8 = vector.broadcast %7 : vector<32x1xf32> to vector<32x128xf32>
    %9 = arith.addf %6, %8 : vector<32x128xf32>
    %cst_6 = arith.constant 0.000000e+00 : f32
    %10 = vector.broadcast %cst_6 : f32 to vector<32x132xf32>
    %c0_7 = arith.constant 0 : index
    %c0_8 = arith.constant 0 : index
    %11 = vector.load %arg15[%c0_7, %c0_8] : memref<32x132xf32, #tpu.memory_space<vmem>>, vector<32x132xf32>
    tpu.vector_store %arg15[%c0_7, %c0_8], %10 {strides = array<i32>} : memref<32x132xf32, #tpu.memory_space<vmem>>, vector<32x132xf32>,
    %c0_9 = arith.constant 0 : index
    %c2 = arith.constant 2 : index
    %12 = vector.load %arg15[%c0_9, %c2] : memref<32x132xf32, #tpu.memory_space<vmem>>, vector<32x128xf32>
    tpu.vector_store %arg15[%c0_9, %c2], %9 {strides = array<i32>} : memref<32x132xf32, #tpu.memory_space<vmem>>, vector<32x128xf32>,
    %c0_10 = arith.constant 0 : index
    %c1 = arith.constant 1 : index
    %13 = vector.load %arg15[%c0_10, %c1] : memref<32x132xf32, #tpu.memory_space<vmem>>, vector<32x128xf32>
    %c0_11 = arith.constant 0 : index
    %c3 = arith.constant 3 : index
    %14 = vector.load %arg15[%c0_11, %c3] : memref<32x132xf32, #tpu.memory_space<vmem>>, vector<32x128xf32>
    %15 = tpu.concatenate %13, %9, %14 in 0 : vector<32x128xf32>, vector<32x128xf32>, vector<32x128xf32> -> vector<96x128xf32>
    %16 = arith.truncf %15 : vector<96x128xf32> to vector<96x128xbf16>
    %c0_12 = arith.constant 0 : index
    %c0_13 = arith.constant 0 : index
    %c0_14 = arith.constant 0 : index
    %17 = vector.load %arg6[%c0_12, %c0_13, %c0_14] : memref<2x64x96xbf16, #tpu.memory_space<vmem>>, vector<1x64x96xbf16>
    %18 = vector.shape_cast %17 : vector<1x64x96xbf16> to vector<64x96xbf16>
    %cst_15 = arith.constant dense<0.000000e+00> : vector<64x128xf32>
    %19 = tpu.matmul %18, %16, %cst_15 {dimension_numbers = #tpu.dot_dimension_numbers<[1], [0], [0], [1], [0, 0, 1, 1], [], []>} : vector<64x96xbf16>, vector<96x128xbf16>, vector<64x128xf32> -> vector<64x128xf32>
    %c0_16 = arith.constant 0 : index
    %c0_17 = arith.constant 0 : index
    %c0_18 = arith.constant 0 : index
    %20 = vector.load %arg7[%c0_16, %c0_17, %c0_18] : memref<2x64x1xf32, #tpu.memory_space<vmem>>, vector<1x64x1xf32>
    %21 = vector.shape_cast %20 : vector<1x64x1xf32> to vector<64x1xf32>
    %22 = vector.broadcast %21 : vector<64x1xf32> to vector<64x128xf32>
    %23 = arith.addf %19, %22 : vector<64x128xf32>
    %c0_19 = arith.constant 0 : index
    %c0_20 = arith.constant 0 : index
    %c0_21 = arith.constant 0 : index
    %24 = vector.load %arg2[%c0_19, %c0_20, %c0_21] : memref<1x128x128xf32, #tpu.memory_space<vmem>>, vector<1x64x128xf32>
    %25 = vector.shape_cast %24 : vector<1x64x128xf32> to vector<64x128xf32>
    %26 = arith.addf %23, %25 : vector<64x128xf32>
    %27 = vector.extract_strided_slice %26 {offsets = [0, 0], sizes = [32, 128], strides = [1, 1]} : vector<64x128xf32> to vector<32x128xf32>
    %28 = math.tanh %27 : vector<32x128xf32>
    %29 = vector.extract_strided_slice %26 {offsets = [32, 0], sizes = [32, 128], strides = [1, 1]} : vector<64x128xf32> to vector<32x128xf32>
    %30 = arith.negf %29 : vector<32x128xf32>
    %31 = math.exp %30 : vector<32x128xf32>
    %cst_22 = arith.constant 1.000000e+00 : f32
    %32 = vector.broadcast %cst_22 : f32 to vector<32x128xf32>
    %33 = arith.addf %32, %31 : vector<32x128xf32>
    %34 = arith.divf %32, %33 : vector<32x128xf32>
    %35 = arith.mulf %28, %34 : vector<32x128xf32>
    %36 = arith.truncf %35 : vector<32x128xf32> to vector<32x128xbf16>
    %c0_23 = arith.constant 0 : index
    %c0_24 = arith.constant 0 : index
    %c0_25 = arith.constant 0 : index
    %37 = vector.load %arg8[%c0_23, %c0_24, %c0_25] : memref<1x32x32xbf16, #tpu.memory_space<vmem>>, vector<1x32x32xbf16>
    %38 = vector.shape_cast %37 : vector<1x32x32xbf16> to vector<32x32xbf16>
    %cst_26 = arith.constant dense<0.000000e+00> : vector<32x128xf32>
    %39 = tpu.matmul %38, %36, %cst_26 {dimension_numbers = #tpu.dot_dimension_numbers<[1], [0], [0], [1], [0, 0, 1, 1], [], []>} : vector<32x32xbf16>, vector<32x128xbf16>, vector<32x128xf32> -> vector<32x128xf32>
    %c0_27 = arith.constant 0 : index
    %c0_28 = arith.constant 0 : index
    %c0_29 = arith.constant 0 : index
    %40 = vector.load %arg9[%c0_27, %c0_28, %c0_29] : memref<1x32x1xf32, #tpu.memory_space<vmem>>, vector<1x32x1xf32>
    %41 = vector.shape_cast %40 : vector<1x32x1xf32> to vector<32x1xf32>
    %42 = vector.broadcast %41 : vector<32x1xf32> to vector<32x128xf32>
    %43 = arith.addf %39, %42 : vector<32x128xf32>
    %44 = arith.addf %43, %9 : vector<32x128xf32>
    %c0_30 = arith.constant 0 : index
    %c0_31 = arith.constant 0 : index
    %c0_32 = arith.constant 0 : index
    %45 = vector.load %arg10[%c0_30, %c0_31, %c0_32] : memref<2x32x32xbf16, #tpu.memory_space<vmem>>, vector<1x32x32xbf16>
    %46 = vector.shape_cast %45 : vector<1x32x32xbf16> to vector<32x32xbf16>
    %cst_33 = arith.constant dense<0.000000e+00> : vector<32x128xf32>
    %47 = tpu.matmul %46, %36, %cst_33 {dimension_numbers = #tpu.dot_dimension_numbers<[1], [0], [0], [1], [0, 0, 1, 1], [], []>} : vector<32x32xbf16>, vector<32x128xbf16>, vector<32x128xf32> -> vector<32x128xf32>
    %c0_34 = arith.constant 0 : index
    %c0_35 = arith.constant 0 : index
    %c0_36 = arith.constant 0 : index
    %48 = vector.load %arg11[%c0_34, %c0_35, %c0_36] : memref<2x32x1xf32, #tpu.memory_space<vmem>>, vector<1x32x1xf32>
    %49 = vector.shape_cast %48 : vector<1x32x1xf32> to vector<32x1xf32>
    %50 = vector.broadcast %49 : vector<32x1xf32> to vector<32x128xf32>
    %51 = arith.addf %47, %50 : vector<32x128xf32>
    %c0_37 = arith.constant 0 : index
    %c2_38 = arith.constant 2 : index
    %52 = vector.load %arg15[%c0_37, %c2_38] : memref<32x132xf32, #tpu.memory_space<vmem>>, vector<32x128xf32>
    tpu.vector_store %arg15[%c0_37, %c2_38], %44 {strides = array<i32>} : memref<32x132xf32, #tpu.memory_space<vmem>>, vector<32x128xf32>,
    %c0_39 = arith.constant 0 : index
    %c0_40 = arith.constant 0 : index
    %53 = vector.load %arg15[%c0_39, %c0_40] : memref<32x132xf32, #tpu.memory_space<vmem>>, vector<32x128xf32>
    %c0_41 = arith.constant 0 : index
    %c4 = arith.constant 4 : index
    %54 = vector.load %arg15[%c0_41, %c4] : memref<32x132xf32, #tpu.memory_space<vmem>>, vector<32x128xf32>
    %55 = tpu.concatenate %53, %44, %54 in 0 : vector<32x128xf32>, vector<32x128xf32>, vector<32x128xf32> -> vector<96x128xf32>
    %56 = arith.truncf %55 : vector<96x128xf32> to vector<96x128xbf16>
    %c1_42 = arith.constant 1 : index
    %c0_43 = arith.constant 0 : index
    %c0_44 = arith.constant 0 : index
    %57 = vector.load %arg6[%c1_42, %c0_43, %c0_44] : memref<2x64x96xbf16, #tpu.memory_space<vmem>>, vector<1x64x96xbf16>
    %58 = vector.shape_cast %57 : vector<1x64x96xbf16> to vector<64x96xbf16>
    %cst_45 = arith.constant dense<0.000000e+00> : vector<64x128xf32>
    %59 = tpu.matmul %58, %56, %cst_45 {dimension_numbers = #tpu.dot_dimension_numbers<[1], [0], [0], [1], [0, 0, 1, 1], [], []>} : vector<64x96xbf16>, vector<96x128xbf16>, vector<64x128xf32> -> vector<64x128xf32>
    %c1_46 = arith.constant 1 : index
    %c0_47 = arith.constant 0 : index
    %c0_48 = arith.constant 0 : index
    %60 = vector.load %arg7[%c1_46, %c0_47, %c0_48] : memref<2x64x1xf32, #tpu.memory_space<vmem>>, vector<1x64x1xf32>
    %61 = vector.shape_cast %60 : vector<1x64x1xf32> to vector<64x1xf32>
    %62 = vector.broadcast %61 : vector<64x1xf32> to vector<64x128xf32>
    %63 = arith.addf %59, %62 : vector<64x128xf32>
    %c0_49 = arith.constant 0 : index
    %c64 = arith.constant 64 : index
    %c0_50 = arith.constant 0 : index
    %64 = vector.load %arg2[%c0_49, %c64, %c0_50] : memref<1x128x128xf32, #tpu.memory_space<vmem>>, vector<1x64x128xf32>
    %65 = vector.shape_cast %64 : vector<1x64x128xf32> to vector<64x128xf32>
    %66 = arith.addf %63, %65 : vector<64x128xf32>
    %67 = vector.extract_strided_slice %66 {offsets = [0, 0], sizes = [32, 128], strides = [1, 1]} : vector<64x128xf32> to vector<32x128xf32>
    %68 = math.tanh %67 : vector<32x128xf32>
    %69 = vector.extract_strided_slice %66 {offsets = [32, 0], sizes = [32, 128], strides = [1, 1]} : vector<64x128xf32> to vector<32x128xf32>
    %70 = arith.negf %69 : vector<32x128xf32>
    %71 = math.exp %70 : vector<32x128xf32>
    %cst_51 = arith.constant 1.000000e+00 : f32
    %72 = vector.broadcast %cst_51 : f32 to vector<32x128xf32>
    %73 = arith.addf %72, %71 : vector<32x128xf32>
    %74 = arith.divf %72, %73 : vector<32x128xf32>
    %75 = arith.mulf %68, %74 : vector<32x128xf32>
    %76 = arith.truncf %75 : vector<32x128xf32> to vector<32x128xbf16>
    %c1_52 = arith.constant 1 : index
    %c0_53 = arith.constant 0 : index
    %c0_54 = arith.constant 0 : index
    %77 = vector.load %arg10[%c1_52, %c0_53, %c0_54] : memref<2x32x32xbf16, #tpu.memory_space<vmem>>, vector<1x32x32xbf16>
    %78 = vector.shape_cast %77 : vector<1x32x32xbf16> to vector<32x32xbf16>
    %cst_55 = arith.constant dense<0.000000e+00> : vector<32x128xf32>
    %79 = tpu.matmul %78, %76, %cst_55 {dimension_numbers = #tpu.dot_dimension_numbers<[1], [0], [0], [1], [0, 0, 1, 1], [], []>} : vector<32x32xbf16>, vector<32x128xbf16>, vector<32x128xf32> -> vector<32x128xf32>
    %c1_56 = arith.constant 1 : index
    %c0_57 = arith.constant 0 : index
    %c0_58 = arith.constant 0 : index
    %80 = vector.load %arg11[%c1_56, %c0_57, %c0_58] : memref<2x32x1xf32, #tpu.memory_space<vmem>>, vector<1x32x1xf32>
    %81 = vector.shape_cast %80 : vector<1x32x1xf32> to vector<32x1xf32>
    %82 = vector.broadcast %81 : vector<32x1xf32> to vector<32x128xf32>
    %83 = arith.addf %79, %82 : vector<32x128xf32>
    %84 = arith.addf %51, %83 : vector<32x128xf32>
    %c0_59 = arith.constant 0 : index
    %c0_60 = arith.constant 0 : index
    %85 = vector.load %arg12[%c0_59, %c0_60] : memref<8x32xbf16, #tpu.memory_space<vmem>>, vector<8x32xbf16>
    %86 = arith.truncf %84 : vector<32x128xf32> to vector<32x128xbf16>
    %cst_61 = arith.constant dense<0.000000e+00> : vector<8x128xf32>
    %87 = tpu.matmul %85, %86, %cst_61 {dimension_numbers = #tpu.dot_dimension_numbers<[1], [0], [0], [1], [0, 0, 1, 1], [], []>} : vector<8x32xbf16>, vector<32x128xbf16>, vector<8x128xf32> -> vector<8x128xf32>
    %c0_62 = arith.constant 0 : index
    %c0_63 = arith.constant 0 : index
    %88 = vector.load %arg13[%c0_62, %c0_63] : memref<8x1xf32, #tpu.memory_space<vmem>>, vector<8x1xf32>
    %89 = vector.broadcast %88 : vector<8x1xf32> to vector<8x128xf32>
    %90 = arith.addf %87, %89 : vector<8x128xf32>
    %91 = vector.extract_strided_slice %90 {offsets = [0, 0], sizes = [4, 128], strides = [1, 1]} : vector<8x128xf32> to vector<4x128xf32>
    %92 = vector.extract_strided_slice %90 {offsets = [4, 0], sizes = [4, 128], strides = [1, 1]} : vector<8x128xf32> to vector<4x128xf32>
    %93 = arith.subf %2, %91 : vector<4x128xf32>
    %cst_64 = arith.constant 0.000000e+00 : f32
    %94 = vector.broadcast %cst_64 : f32 to vector<4x128xf32>
    %95 = arith.subf %94, %92 : vector<4x128xf32>
    %96 = math.exp %95 : vector<4x128xf32>
    %97 = arith.mulf %93, %96 : vector<4x128xf32>
    %98 = tpu.concatenate %97, %3 in 0 : vector<4x128xf32>, vector<4x128xf32> -> vector<8x128xf32>
    %c0_65 = arith.constant 0 : index
    %c0_66 = arith.constant 0 : index
    %99 = vector.load %arg3[%c0_65, %c0_66] : memref<8x8xbf16, #tpu.memory_space<vmem>>, vector<8x8xbf16>
    %100 = arith.truncf %98 : vector<8x128xf32> to vector<8x128xbf16>
    %cst_67 = arith.constant dense<0.000000e+00> : vector<8x128xf32>
    %101 = tpu.matmul %99, %100, %cst_67 {dimension_numbers = #tpu.dot_dimension_numbers<[1], [0], [0], [1], [0, 0, 1, 1], [], []>} : vector<8x8xbf16>, vector<8x128xbf16>, vector<8x128xf32> -> vector<8x128xf32>
    %c0_68 = arith.constant 0 : index
    %c0_69 = arith.constant 0 : index
    %c0_70 = arith.constant 0 : index
    %102 = vector.load %arg14[%c0_68, %c0_69, %c0_70] : memref<1x8x128xf32, #tpu.memory_space<vmem>>, vector<1x8x128xf32>
    %103 = vector.shape_cast %102 : vector<1x8x128xf32> to vector<8x128xf32>
    %104 = vector.shape_cast %101 : vector<8x128xf32> to vector<1x8x128xf32>
    tpu.vector_store %arg14[%c0_68, %c0_69, %c0_70], %104 {strides = array<i32>} : memref<1x8x128xf32, #tpu.memory_space<vmem>>, vector<1x8x128xf32>,
    return
  }
  func.func @transform_0(%arg0: i32) -> (i32, i32, i32) {
    %c0_i32 = arith.constant 0 : i32
    %c0_i32_0 = arith.constant 0 : i32
    %c0_i32_1 = arith.constant 0 : i32
    return %arg0, %c0_i32, %c0_i32_0 : i32, i32, i32
  }
  func.func @transform_1(%arg0: i32) -> (i32, i32, i32) {
    %c3_i32 = arith.constant 3 : i32
    %c0_i32 = arith.constant 0 : i32
    %c0_i32_0 = arith.constant 0 : i32
    return %arg0, %c3_i32, %c0_i32 : i32, i32, i32
  }
  func.func @transform_2(%arg0: i32) -> (i32, i32) {
    %c0_i32 = arith.constant 0 : i32
    %c0_i32_0 = arith.constant 0 : i32
    %c0_i32_1 = arith.constant 0 : i32
    return %c0_i32, %c0_i32_0 : i32, i32
  }
  func.func @transform_3(%arg0: i32) -> (i32, i32) {
    %c0_i32 = arith.constant 0 : i32
    %c0_i32_0 = arith.constant 0 : i32
    %c0_i32_1 = arith.constant 0 : i32
    return %c0_i32, %c0_i32_0 : i32, i32
  }
  func.func @transform_4(%arg0: i32) -> (i32, i32) {
    %c0_i32 = arith.constant 0 : i32
    %c0_i32_0 = arith.constant 0 : i32
    %c0_i32_1 = arith.constant 0 : i32
    return %c0_i32, %c0_i32_0 : i32, i32
  }
  func.func @transform_5(%arg0: i32) -> (i32, i32, i32) {
    %c0_i32 = arith.constant 0 : i32
    %c0_i32_0 = arith.constant 0 : i32
    %c0_i32_1 = arith.constant 0 : i32
    %c0_i32_2 = arith.constant 0 : i32
    return %c0_i32, %c0_i32_0, %c0_i32_1 : i32, i32, i32
  }
  func.func @transform_6(%arg0: i32) -> (i32, i32, i32) {
    %c0_i32 = arith.constant 0 : i32
    %c0_i32_0 = arith.constant 0 : i32
    %c0_i32_1 = arith.constant 0 : i32
    %c0_i32_2 = arith.constant 0 : i32
    return %c0_i32, %c0_i32_0, %c0_i32_1 : i32, i32, i32
  }
  func.func @transform_7(%arg0: i32) -> (i32, i32, i32) {
    %c0_i32 = arith.constant 0 : i32
    %c0_i32_0 = arith.constant 0 : i32
    %c0_i32_1 = arith.constant 0 : i32
    %c0_i32_2 = arith.constant 0 : i32
    return %c0_i32, %c0_i32_0, %c0_i32_1 : i32, i32, i32
  }
  func.func @transform_8(%arg0: i32) -> (i32, i32, i32) {
    %c0_i32 = arith.constant 0 : i32
    %c0_i32_0 = arith.constant 0 : i32
    %c0_i32_1 = arith.constant 0 : i32
    %c0_i32_2 = arith.constant 0 : i32
    return %c0_i32, %c0_i32_0, %c0_i32_1 : i32, i32, i32
  }
  func.func @transform_9(%arg0: i32) -> (i32, i32, i32) {
    %c0_i32 = arith.constant 0 : i32
    %c0_i32_0 = arith.constant 0 : i32
    %c0_i32_1 = arith.constant 0 : i32
    %c0_i32_2 = arith.constant 0 : i32
    return %c0_i32, %c0_i32_0, %c0_i32_1 : i32, i32, i32
  }
  func.func @transform_10(%arg0: i32) -> (i32, i32, i32) {
    %c0_i32 = arith.constant 0 : i32
    %c0_i32_0 = arith.constant 0 : i32
    %c0_i32_1 = arith.constant 0 : i32
    %c0_i32_2 = arith.constant 0 : i32
    return %c0_i32, %c0_i32_0, %c0_i32_1 : i32, i32, i32
  }
  func.func @transform_11(%arg0: i32) -> (i32, i32) {
    %c0_i32 = arith.constant 0 : i32
    %c0_i32_0 = arith.constant 0 : i32
    %c0_i32_1 = arith.constant 0 : i32
    return %c0_i32, %c0_i32_0 : i32, i32
  }
  func.func @transform_12(%arg0: i32) -> (i32, i32) {
    %c0_i32 = arith.constant 0 : i32
    %c0_i32_0 = arith.constant 0 : i32
    %c0_i32_1 = arith.constant 0 : i32
    return %c0_i32, %c0_i32_0 : i32, i32
  }
  func.func @transform_13(%arg0: i32) -> (i32, i32, i32) {
    %c0_i32 = arith.constant 0 : i32
    %c0_i32_0 = arith.constant 0 : i32
    %c0_i32_1 = arith.constant 0 : i32
    return %arg0, %c0_i32, %c0_i32_0 : i32, i32, i32
  }
}

module attributes {stable_mosaic.version = 11 : i64} {
  func.func @kernel(%arg0: i32, %arg1: memref<1x8x128xf32, #tpu.memory_space<vmem>>, %arg2: memref<1x128x128xf32, #tpu.memory_space<vmem>>, %arg3: memref<8x8xbf16, #tpu.memory_space<vmem>>, %arg4: memref<32x4xbf16, #tpu.memory_space<vmem>>, %arg5: memref<32x1xf32, #tpu.memory_space<vmem>>, %arg6: memref<2x64x96xbf16, #tpu.memory_space<vmem>>, %arg7: memref<2x64x1xf32, #tpu.memory_space<vmem>>, %arg8: memref<1x32x32xbf16, #tpu.memory_space<vmem>>, %arg9: memref<1x32x1xf32, #tpu.memory_space<vmem>>, %arg10: memref<2x32x32xbf16, #tpu.memory_space<vmem>>, %arg11: memref<2x32x1xf32, #tpu.memory_space<vmem>>, %arg12: memref<8x32xbf16, #tpu.memory_space<vmem>>, %arg13: memref<8x1xf32, #tpu.memory_space<vmem>>, %arg14: memref<1x8x128xf32, #tpu.memory_space<vmem>>, %arg15: memref<32x132xf32, #tpu.memory_space<vmem>>) attributes {dimension_semantics = [#tpu.dimension_semantics<parallel>], iteration_bounds = array<i64: 2>, scalar_prefetch = 0 : i64, scratch_operands = 1 : i64, tpu.core_type = #tpu.core_type<tc>, window_params = [{transform_indices = @transform_0, window_bounds = array<i64: 1, 8, 128>}, {transform_indices = @transform_1, window_bounds = array<i64: 1, 128, 128>}, {pipeline_mode = #tpu.pipeline_mode<synchronous>, transform_indices = @transform_2, window_bounds = array<i64: 8, 8>}, {pipeline_mode = #tpu.pipeline_mode<synchronous>, transform_indices = @transform_3, window_bounds = array<i64: 32, 4>}, {pipeline_mode = #tpu.pipeline_mode<synchronous>, transform_indices = @transform_4, window_bounds = array<i64: 32, 1>}, {pipeline_mode = #tpu.pipeline_mode<synchronous>, transform_indices = @transform_5, window_bounds = array<i64: 2, 64, 96>}, {pipeline_mode = #tpu.pipeline_mode<synchronous>, transform_indices = @transform_6, window_bounds = array<i64: 2, 64, 1>}, {pipeline_mode = #tpu.pipeline_mode<synchronous>, transform_indices = @transform_7, window_bounds = array<i64: 1, 32, 32>}, {pipeline_mode = #tpu.pipeline_mode<synchronous>, transform_indices = @transform_8, window_bounds = array<i64: 1, 32, 1>}, {pipeline_mode = #tpu.pipeline_mode<synchronous>, transform_indices = @transform_9, window_bounds = array<i64: 2, 32, 32>}, {pipeline_mode = #tpu.pipeline_mode<synchronous>, transform_indices = @transform_10, window_bounds = array<i64: 2, 32, 1>}, {pipeline_mode = #tpu.pipeline_mode<synchronous>, transform_indices = @transform_11, window_bounds = array<i64: 8, 32>}, {pipeline_mode = #tpu.pipeline_mode<synchronous>, transform_indices = @transform_12, window_bounds = array<i64: 8, 1>}, {transform_indices = @transform_13, window_bounds = array<i64: 1, 8, 128>}]} {
    %c0 = arith.constant 0 : index
    %c0_0 = arith.constant 0 : index
    %c0_1 = arith.constant 0 : index
    %0 = vector.load %arg1[%c0, %c0_0, %c0_1] : memref<1x8x128xf32, #tpu.memory_space<vmem>>, vector<1x8x128xf32>
    %1 = vector.shape_cast %0 : vector<1x8x128xf32> to vector<8x128xf32>
    %2 = vector.extract_strided_slice %1 {offsets = [0, 0], sizes = [4, 128], strides = [1, 1]} : vector<8x128xf32> to vector<4x128xf32>
    %3 = vector.extract_strided_slice %1 {offsets = [4, 0], sizes = [4, 128], strides = [1, 1]} : vector<8x128xf32> to vector<4x128xf32>
    %c0_2 = arith.constant 0 : index
    %c0_3 = arith.constant 0 : index
    %4 = vector.load %arg4[%c0_2, %c0_3] : memref<32x4xbf16, #tpu.memory_space<vmem>>, vector<32x4xbf16>
    %5 = arith.truncf %2 : vector<4x128xf32> to vector<4x128xbf16>
    %cst = arith.constant dense<0.000000e+00> : vector<32x128xf32>
    %6 = tpu.matmul %4, %5, %cst {dimension_numbers = #tpu.dot_dimension_numbers<[1], [0], [0], [1], [0, 0, 1, 1], [], []>} : vector<32x4xbf16>, vector<4x128xbf16>, vector<32x128xf32> -> vector<32x128xf32>
    %c0_4 = arith.constant 0 : index
    %c0_5 = arith.constant 0 : index
    %7 = vector.load %arg5[%c0_4, %c0_5] : memref<32x1xf32, #tpu.memory_space<vmem>>, vector<32x1xf32>
    %8 = vector.broadcast %7 : vector<32x1xf32> to vector<32x128xf32>
    %9 = arith.addf %6, %8 : vector<32x128xf32>
    %cst_6 = arith.constant 0.000000e+00 : f32
    %10 = vector.broadcast %cst_6 : f32 to vector<32x132xf32>
    %c0_7 = arith.constant 0 : index
    %c0_8 = arith.constant 0 : index
    %11 = vector.load %arg15[%c0_7, %c0_8] : memref<32x132xf32, #tpu.memory_space<vmem>>, vector<32x132xf32>
    tpu.vector_store %arg15[%c0_7, %c0_8], %10 {strides = array<i32>} : memref<32x132xf32, #tpu.memory_space<vmem>>, vector<32x132xf32>,
    %c0_9 = arith.constant 0 : index
    %c2 = arith.constant 2 : index
    %12 = vector.load %arg15[%c0_9, %c2] : memref<32x132xf32, #tpu.memory_space<vmem>>, vector<32x128xf32>
    tpu.vector_store %arg15[%c0_9, %c2], %9 {strides = array<i32>} : memref<32x132xf32, #tpu.memory_space<vmem>>, vector<32x128xf32>,
    %c0_10 = arith.constant 0 : index
    %c1 = arith.constant 1 : index
    %13 = vector.load %arg15[%c0_10, %c1] : memref<32x132xf32, #tpu.memory_space<vmem>>, vector<32x128xf32>
    %c0_11 = arith.constant 0 : index
    %c3 = arith.constant 3 : index
    %14 = vector.load %arg15[%c0_11, %c3] : memref<32x132xf32, #tpu.memory_space<vmem>>, vector<32x128xf32>
    %15 = tpu.concatenate %13, %9, %14 in 0 : vector<32x128xf32>, vector<32x128xf32>, vector<32x128xf32> -> vector<96x128xf32>
    %16 = arith.truncf %15 : vector<96x128xf32> to vector<96x128xbf16>
    %c0_12 = arith.constant 0 : index
    %c0_13 = arith.constant 0 : index
    %c0_14 = arith.constant 0 : index
    %17 = vector.load %arg6[%c0_12, %c0_13, %c0_14] : memref<2x64x96xbf16, #tpu.memory_space<vmem>>, vector<1x64x96xbf16>
    %18 = vector.shape_cast %17 : vector<1x64x96xbf16> to vector<64x96xbf16>
    %cst_15 = arith.constant dense<0.000000e+00> : vector<64x128xf32>
    %19 = tpu.matmul %18, %16, %cst_15 {dimension_numbers = #tpu.dot_dimension_numbers<[1], [0], [0], [1], [0, 0, 1, 1], [], []>} : vector<64x96xbf16>, vector<96x128xbf16>, vector<64x128xf32> -> vector<64x128xf32>
    %c0_16 = arith.constant 0 : index
    %c0_17 = arith.constant 0 : index
    %c0_18 = arith.constant 0 : index
    %20 = vector.load %arg7[%c0_16, %c0_17, %c0_18] : memref<2x64x1xf32, #tpu.memory_space<vmem>>, vector<1x64x1xf32>
    %21 = vector.shape_cast %20 : vector<1x64x1xf32> to vector<64x1xf32>
    %22 = vector.broadcast %21 : vector<64x1xf32> to vector<64x128xf32>
    %23 = arith.addf %19, %22 : vector<64x128xf32>
    %c0_19 = arith.constant 0 : index
    %c0_20 = arith.constant 0 : index
    %c0_21 = arith.constant 0 : index
    %24 = vector.load %arg2[%c0_19, %c0_20, %c0_21] : memref<1x128x128xf32, #tpu.memory_space<vmem>>, vector<1x64x128xf32>
    %25 = vector.shape_cast %24 : vector<1x64x128xf32> to vector<64x128xf32>
    %26 = arith.addf %23, %25 : vector<64x128xf32>
    %27 = vector.extract_strided_slice %26 {offsets = [0, 0], sizes = [32, 128], strides = [1, 1]} : vector<64x128xf32> to vector<32x128xf32>
    %28 = math.tanh %27 : vector<32x128xf32>
    %29 = vector.extract_strided_slice %26 {offsets = [32, 0], sizes = [32, 128], strides = [1, 1]} : vector<64x128xf32> to vector<32x128xf32>
    %30 = arith.negf %29 : vector<32x128xf32>
    %31 = math.exp %30 : vector<32x128xf32>
    %cst_22 = arith.constant 1.000000e+00 : f32
    %32 = vector.broadcast %cst_22 : f32 to vector<32x128xf32>
    %33 = arith.addf %32, %31 : vector<32x128xf32>
    %34 = arith.divf %32, %33 : vector<32x128xf32>
    %35 = arith.mulf %28, %34 : vector<32x128xf32>
    %36 = arith.truncf %35 : vector<32x128xf32> to vector<32x128xbf16>
    %c0_23 = arith.constant 0 : index
    %c0_24 = arith.constant 0 : index
    %c0_25 = arith.constant 0 : index
    %37 = vector.load %arg8[%c0_23, %c0_24, %c0_25] : memref<1x32x32xbf16, #tpu.memory_space<vmem>>, vector<1x32x32xbf16>
    %38 = vector.shape_cast %37 : vector<1x32x32xbf16> to vector<32x32xbf16>
    %cst_26 = arith.constant dense<0.000000e+00> : vector<32x128xf32>
    %39 = tpu.matmul %38, %36, %cst_26 {dimension_numbers = #tpu.dot_dimension_numbers<[1], [0], [0], [1], [0, 0, 1, 1], [], []>} : vector<32x32xbf16>, vector<32x128xbf16>, vector<32x128xf32> -> vector<32x128xf32>
    %c0_27 = arith.constant 0 : index
    %c0_28 = arith.constant 0 : index
    %c0_29 = arith.constant 0 : index
    %40 = vector.load %arg9[%c0_27, %c0_28, %c0_29] : memref<1x32x1xf32, #tpu.memory_space<vmem>>, vector<1x32x1xf32>
    %41 = vector.shape_cast %40 : vector<1x32x1xf32> to vector<32x1xf32>
    %42 = vector.broadcast %41 : vector<32x1xf32> to vector<32x128xf32>
    %43 = arith.addf %39, %42 : vector<32x128xf32>
    %44 = arith.addf %43, %9 : vector<32x128xf32>
    %c0_30 = arith.constant 0 : index
    %c0_31 = arith.constant 0 : index
    %c0_32 = arith.constant 0 : index
    %45 = vector.load %arg10[%c0_30, %c0_31, %c0_32] : memref<2x32x32xbf16, #tpu.memory_space<vmem>>, vector<1x32x32xbf16>
    %46 = vector.shape_cast %45 : vector<1x32x32xbf16> to vector<32x32xbf16>
    %cst_33 = arith.constant dense<0.000000e+00> : vector<32x128xf32>
    %47 = tpu.matmul %46, %36, %cst_33 {dimension_numbers = #tpu.dot_dimension_numbers<[1], [0], [0], [1], [0, 0, 1, 1], [], []>} : vector<32x32xbf16>, vector<32x128xbf16>, vector<32x128xf32> -> vector<32x128xf32>
    %c0_34 = arith.constant 0 : index
    %c0_35 = arith.constant 0 : index
    %c0_36 = arith.constant 0 : index
    %48 = vector.load %arg11[%c0_34, %c0_35, %c0_36] : memref<2x32x1xf32, #tpu.memory_space<vmem>>, vector<1x32x1xf32>
    %49 = vector.shape_cast %48 : vector<1x32x1xf32> to vector<32x1xf32>
    %50 = vector.broadcast %49 : vector<32x1xf32> to vector<32x128xf32>
    %51 = arith.addf %47, %50 : vector<32x128xf32>
    %c0_37 = arith.constant 0 : index
    %c2_38 = arith.constant 2 : index
    %52 = vector.load %arg15[%c0_37, %c2_38] : memref<32x132xf32, #tpu.memory_space<vmem>>, vector<32x128xf32>
    tpu.vector_store %arg15[%c0_37, %c2_38], %44 {strides = array<i32>} : memref<32x132xf32, #tpu.memory_space<vmem>>, vector<32x128xf32>,
    %c0_39 = arith.constant 0 : index
    %c0_40 = arith.constant 0 : index
    %53 = vector.load %arg15[%c0_39, %c0_40] : memref<32x132xf32, #tpu.memory_space<vmem>>, vector<32x128xf32>
    %c0_41 = arith.constant 0 : index
    %c4 = arith.constant 4 : index
    %54 = vector.load %arg15[%c0_41, %c4] : memref<32x132xf32, #tpu.memory_space<vmem>>, vector<32x128xf32>
    %55 = tpu.concatenate %53, %44, %54 in 0 : vector<32x128xf32>, vector<32x128xf32>, vector<32x128xf32> -> vector<96x128xf32>
    %56 = arith.truncf %55 : vector<96x128xf32> to vector<96x128xbf16>
    %c1_42 = arith.constant 1 : index
    %c0_43 = arith.constant 0 : index
    %c0_44 = arith.constant 0 : index
    %57 = vector.load %arg6[%c1_42, %c0_43, %c0_44] : memref<2x64x96xbf16, #tpu.memory_space<vmem>>, vector<1x64x96xbf16>
    %58 = vector.shape_cast %57 : vector<1x64x96xbf16> to vector<64x96xbf16>
    %cst_45 = arith.constant dense<0.000000e+00> : vector<64x128xf32>
    %59 = tpu.matmul %58, %56, %cst_45 {dimension_numbers = #tpu.dot_dimension_numbers<[1], [0], [0], [1], [0, 0, 1, 1], [], []>} : vector<64x96xbf16>, vector<96x128xbf16>, vector<64x128xf32> -> vector<64x128xf32>
    %c1_46 = arith.constant 1 : index
    %c0_47 = arith.constant 0 : index
    %c0_48 = arith.constant 0 : index
    %60 = vector.load %arg7[%c1_46, %c0_47, %c0_48] : memref<2x64x1xf32, #tpu.memory_space<vmem>>, vector<1x64x1xf32>
    %61 = vector.shape_cast %60 : vector<1x64x1xf32> to vector<64x1xf32>
    %62 = vector.broadcast %61 : vector<64x1xf32> to vector<64x128xf32>
    %63 = arith.addf %59, %62 : vector<64x128xf32>
    %c0_49 = arith.constant 0 : index
    %c64 = arith.constant 64 : index
    %c0_50 = arith.constant 0 : index
    %64 = vector.load %arg2[%c0_49, %c64, %c0_50] : memref<1x128x128xf32, #tpu.memory_space<vmem>>, vector<1x64x128xf32>
    %65 = vector.shape_cast %64 : vector<1x64x128xf32> to vector<64x128xf32>
    %66 = arith.addf %63, %65 : vector<64x128xf32>
    %67 = vector.extract_strided_slice %66 {offsets = [0, 0], sizes = [32, 128], strides = [1, 1]} : vector<64x128xf32> to vector<32x128xf32>
    %68 = math.tanh %67 : vector<32x128xf32>
    %69 = vector.extract_strided_slice %66 {offsets = [32, 0], sizes = [32, 128], strides = [1, 1]} : vector<64x128xf32> to vector<32x128xf32>
    %70 = arith.negf %69 : vector<32x128xf32>
    %71 = math.exp %70 : vector<32x128xf32>
    %cst_51 = arith.constant 1.000000e+00 : f32
    %72 = vector.broadcast %cst_51 : f32 to vector<32x128xf32>
    %73 = arith.addf %72, %71 : vector<32x128xf32>
    %74 = arith.divf %72, %73 : vector<32x128xf32>
    %75 = arith.mulf %68, %74 : vector<32x128xf32>
    %76 = arith.truncf %75 : vector<32x128xf32> to vector<32x128xbf16>
    %c1_52 = arith.constant 1 : index
    %c0_53 = arith.constant 0 : index
    %c0_54 = arith.constant 0 : index
    %77 = vector.load %arg10[%c1_52, %c0_53, %c0_54] : memref<2x32x32xbf16, #tpu.memory_space<vmem>>, vector<1x32x32xbf16>
    %78 = vector.shape_cast %77 : vector<1x32x32xbf16> to vector<32x32xbf16>
    %cst_55 = arith.constant dense<0.000000e+00> : vector<32x128xf32>
    %79 = tpu.matmul %78, %76, %cst_55 {dimension_numbers = #tpu.dot_dimension_numbers<[1], [0], [0], [1], [0, 0, 1, 1], [], []>} : vector<32x32xbf16>, vector<32x128xbf16>, vector<32x128xf32> -> vector<32x128xf32>
    %c1_56 = arith.constant 1 : index
    %c0_57 = arith.constant 0 : index
    %c0_58 = arith.constant 0 : index
    %80 = vector.load %arg11[%c1_56, %c0_57, %c0_58] : memref<2x32x1xf32, #tpu.memory_space<vmem>>, vector<1x32x1xf32>
    %81 = vector.shape_cast %80 : vector<1x32x1xf32> to vector<32x1xf32>
    %82 = vector.broadcast %81 : vector<32x1xf32> to vector<32x128xf32>
    %83 = arith.addf %79, %82 : vector<32x128xf32>
    %84 = arith.addf %51, %83 : vector<32x128xf32>
    %c0_59 = arith.constant 0 : index
    %c0_60 = arith.constant 0 : index
    %85 = vector.load %arg12[%c0_59, %c0_60] : memref<8x32xbf16, #tpu.memory_space<vmem>>, vector<8x32xbf16>
    %86 = arith.truncf %84 : vector<32x128xf32> to vector<32x128xbf16>
    %cst_61 = arith.constant dense<0.000000e+00> : vector<8x128xf32>
    %87 = tpu.matmul %85, %86, %cst_61 {dimension_numbers = #tpu.dot_dimension_numbers<[1], [0], [0], [1], [0, 0, 1, 1], [], []>} : vector<8x32xbf16>, vector<32x128xbf16>, vector<8x128xf32> -> vector<8x128xf32>
    %c0_62 = arith.constant 0 : index
    %c0_63 = arith.constant 0 : index
    %88 = vector.load %arg13[%c0_62, %c0_63] : memref<8x1xf32, #tpu.memory_space<vmem>>, vector<8x1xf32>
    %89 = vector.broadcast %88 : vector<8x1xf32> to vector<8x128xf32>
    %90 = arith.addf %87, %89 : vector<8x128xf32>
    %91 = vector.extract_strided_slice %90 {offsets = [0, 0], sizes = [4, 128], strides = [1, 1]} : vector<8x128xf32> to vector<4x128xf32>
    %92 = vector.extract_strided_slice %90 {offsets = [4, 0], sizes = [4, 128], strides = [1, 1]} : vector<8x128xf32> to vector<4x128xf32>
    %93 = arith.subf %3, %91 : vector<4x128xf32>
    %cst_64 = arith.constant 0.000000e+00 : f32
    %94 = vector.broadcast %cst_64 : f32 to vector<4x128xf32>
    %95 = arith.subf %94, %92 : vector<4x128xf32>
    %96 = math.exp %95 : vector<4x128xf32>
    %97 = arith.mulf %93, %96 : vector<4x128xf32>
    %98 = tpu.concatenate %2, %97 in 0 : vector<4x128xf32>, vector<4x128xf32> -> vector<8x128xf32>
    %c0_65 = arith.constant 0 : index
    %c0_66 = arith.constant 0 : index
    %99 = vector.load %arg3[%c0_65, %c0_66] : memref<8x8xbf16, #tpu.memory_space<vmem>>, vector<8x8xbf16>
    %100 = arith.truncf %98 : vector<8x128xf32> to vector<8x128xbf16>
    %cst_67 = arith.constant dense<0.000000e+00> : vector<8x128xf32>
    %101 = tpu.matmul %99, %100, %cst_67 {dimension_numbers = #tpu.dot_dimension_numbers<[1], [0], [0], [1], [0, 0, 1, 1], [], []>} : vector<8x8xbf16>, vector<8x128xbf16>, vector<8x128xf32> -> vector<8x128xf32>
    %c0_68 = arith.constant 0 : index
    %c0_69 = arith.constant 0 : index
    %c0_70 = arith.constant 0 : index
    %102 = vector.load %arg14[%c0_68, %c0_69, %c0_70] : memref<1x8x128xf32, #tpu.memory_space<vmem>>, vector<1x8x128xf32>
    %103 = vector.shape_cast %102 : vector<1x8x128xf32> to vector<8x128xf32>
    %104 = vector.shape_cast %101 : vector<8x128xf32> to vector<1x8x128xf32>
    tpu.vector_store %arg14[%c0_68, %c0_69, %c0_70], %104 {strides = array<i32>} : memref<1x8x128xf32, #tpu.memory_space<vmem>>, vector<1x8x128xf32>,
    return
  }
  func.func @transform_0(%arg0: i32) -> (i32, i32, i32) {
    %c0_i32 = arith.constant 0 : i32
    %c0_i32_0 = arith.constant 0 : i32
    %c0_i32_1 = arith.constant 0 : i32
    return %arg0, %c0_i32, %c0_i32_0 : i32, i32, i32
  }
  func.func @transform_1(%arg0: i32) -> (i32, i32, i32) {
    %c2_i32 = arith.constant 2 : i32
    %c0_i32 = arith.constant 0 : i32
    %c0_i32_0 = arith.constant 0 : i32
    return %arg0, %c2_i32, %c0_i32 : i32, i32, i32
  }
  func.func @transform_2(%arg0: i32) -> (i32, i32) {
    %c0_i32 = arith.constant 0 : i32
    %c0_i32_0 = arith.constant 0 : i32
    %c0_i32_1 = arith.constant 0 : i32
    return %c0_i32, %c0_i32_0 : i32, i32
  }
  func.func @transform_3(%arg0: i32) -> (i32, i32) {
    %c0_i32 = arith.constant 0 : i32
    %c0_i32_0 = arith.constant 0 : i32
    %c0_i32_1 = arith.constant 0 : i32
    return %c0_i32, %c0_i32_0 : i32, i32
  }
  func.func @transform_4(%arg0: i32) -> (i32, i32) {
    %c0_i32 = arith.constant 0 : i32
    %c0_i32_0 = arith.constant 0 : i32
    %c0_i32_1 = arith.constant 0 : i32
    return %c0_i32, %c0_i32_0 : i32, i32
  }
  func.func @transform_5(%arg0: i32) -> (i32, i32, i32) {
    %c0_i32 = arith.constant 0 : i32
    %c0_i32_0 = arith.constant 0 : i32
    %c0_i32_1 = arith.constant 0 : i32
    %c0_i32_2 = arith.constant 0 : i32
    return %c0_i32, %c0_i32_0, %c0_i32_1 : i32, i32, i32
  }
  func.func @transform_6(%arg0: i32) -> (i32, i32, i32) {
    %c0_i32 = arith.constant 0 : i32
    %c0_i32_0 = arith.constant 0 : i32
    %c0_i32_1 = arith.constant 0 : i32
    %c0_i32_2 = arith.constant 0 : i32
    return %c0_i32, %c0_i32_0, %c0_i32_1 : i32, i32, i32
  }
  func.func @transform_7(%arg0: i32) -> (i32, i32, i32) {
    %c0_i32 = arith.constant 0 : i32
    %c0_i32_0 = arith.constant 0 : i32
    %c0_i32_1 = arith.constant 0 : i32
    %c0_i32_2 = arith.constant 0 : i32
    return %c0_i32, %c0_i32_0, %c0_i32_1 : i32, i32, i32
  }
  func.func @transform_8(%arg0: i32) -> (i32, i32, i32) {
    %c0_i32 = arith.constant 0 : i32
    %c0_i32_0 = arith.constant 0 : i32
    %c0_i32_1 = arith.constant 0 : i32
    %c0_i32_2 = arith.constant 0 : i32
    return %c0_i32, %c0_i32_0, %c0_i32_1 : i32, i32, i32
  }
  func.func @transform_9(%arg0: i32) -> (i32, i32, i32) {
    %c0_i32 = arith.constant 0 : i32
    %c0_i32_0 = arith.constant 0 : i32
    %c0_i32_1 = arith.constant 0 : i32
    %c0_i32_2 = arith.constant 0 : i32
    return %c0_i32, %c0_i32_0, %c0_i32_1 : i32, i32, i32
  }
  func.func @transform_10(%arg0: i32) -> (i32, i32, i32) {
    %c0_i32 = arith.constant 0 : i32
    %c0_i32_0 = arith.constant 0 : i32
    %c0_i32_1 = arith.constant 0 : i32
    %c0_i32_2 = arith.constant 0 : i32
    return %c0_i32, %c0_i32_0, %c0_i32_1 : i32, i32, i32
  }
  func.func @transform_11(%arg0: i32) -> (i32, i32) {
    %c0_i32 = arith.constant 0 : i32
    %c0_i32_0 = arith.constant 0 : i32
    %c0_i32_1 = arith.constant 0 : i32
    return %c0_i32, %c0_i32_0 : i32, i32
  }
  func.func @transform_12(%arg0: i32) -> (i32, i32) {
    %c0_i32 = arith.constant 0 : i32
    %c0_i32_0 = arith.constant 0 : i32
    %c0_i32_1 = arith.constant 0 : i32
    return %c0_i32, %c0_i32_0 : i32, i32
  }
  func.func @transform_13(%arg0: i32) -> (i32, i32, i32) {
    %c0_i32 = arith.constant 0 : i32
    %c0_i32_0 = arith.constant 0 : i32
    %c0_i32_1 = arith.constant 0 : i32
    return %arg0, %c0_i32, %c0_i32_0 : i32, i32, i32
  }
}

module attributes {stable_mosaic.version = 11 : i64} {
  func.func @kernel(%arg0: i32, %arg1: memref<1x8x128xf32, #tpu.memory_space<vmem>>, %arg2: memref<1x128x128xf32, #tpu.memory_space<vmem>>, %arg3: memref<8x8xbf16, #tpu.memory_space<vmem>>, %arg4: memref<32x4xbf16, #tpu.memory_space<vmem>>, %arg5: memref<32x1xf32, #tpu.memory_space<vmem>>, %arg6: memref<2x64x96xbf16, #tpu.memory_space<vmem>>, %arg7: memref<2x64x1xf32, #tpu.memory_space<vmem>>, %arg8: memref<1x32x32xbf16, #tpu.memory_space<vmem>>, %arg9: memref<1x32x1xf32, #tpu.memory_space<vmem>>, %arg10: memref<2x32x32xbf16, #tpu.memory_space<vmem>>, %arg11: memref<2x32x1xf32, #tpu.memory_space<vmem>>, %arg12: memref<8x32xbf16, #tpu.memory_space<vmem>>, %arg13: memref<8x1xf32, #tpu.memory_space<vmem>>, %arg14: memref<1x8x128xf32, #tpu.memory_space<vmem>>, %arg15: memref<32x132xf32, #tpu.memory_space<vmem>>) attributes {dimension_semantics = [#tpu.dimension_semantics<parallel>], iteration_bounds = array<i64: 2>, scalar_prefetch = 0 : i64, scratch_operands = 1 : i64, tpu.core_type = #tpu.core_type<tc>, window_params = [{transform_indices = @transform_0, window_bounds = array<i64: 1, 8, 128>}, {transform_indices = @transform_1, window_bounds = array<i64: 1, 128, 128>}, {pipeline_mode = #tpu.pipeline_mode<synchronous>, transform_indices = @transform_2, window_bounds = array<i64: 8, 8>}, {pipeline_mode = #tpu.pipeline_mode<synchronous>, transform_indices = @transform_3, window_bounds = array<i64: 32, 4>}, {pipeline_mode = #tpu.pipeline_mode<synchronous>, transform_indices = @transform_4, window_bounds = array<i64: 32, 1>}, {pipeline_mode = #tpu.pipeline_mode<synchronous>, transform_indices = @transform_5, window_bounds = array<i64: 2, 64, 96>}, {pipeline_mode = #tpu.pipeline_mode<synchronous>, transform_indices = @transform_6, window_bounds = array<i64: 2, 64, 1>}, {pipeline_mode = #tpu.pipeline_mode<synchronous>, transform_indices = @transform_7, window_bounds = array<i64: 1, 32, 32>}, {pipeline_mode = #tpu.pipeline_mode<synchronous>, transform_indices = @transform_8, window_bounds = array<i64: 1, 32, 1>}, {pipeline_mode = #tpu.pipeline_mode<synchronous>, transform_indices = @transform_9, window_bounds = array<i64: 2, 32, 32>}, {pipeline_mode = #tpu.pipeline_mode<synchronous>, transform_indices = @transform_10, window_bounds = array<i64: 2, 32, 1>}, {pipeline_mode = #tpu.pipeline_mode<synchronous>, transform_indices = @transform_11, window_bounds = array<i64: 8, 32>}, {pipeline_mode = #tpu.pipeline_mode<synchronous>, transform_indices = @transform_12, window_bounds = array<i64: 8, 1>}, {transform_indices = @transform_13, window_bounds = array<i64: 1, 8, 128>}]} {
    %c0 = arith.constant 0 : index
    %c0_0 = arith.constant 0 : index
    %c0_1 = arith.constant 0 : index
    %0 = vector.load %arg1[%c0, %c0_0, %c0_1] : memref<1x8x128xf32, #tpu.memory_space<vmem>>, vector<1x8x128xf32>
    %1 = vector.shape_cast %0 : vector<1x8x128xf32> to vector<8x128xf32>
    %2 = vector.extract_strided_slice %1 {offsets = [0, 0], sizes = [4, 128], strides = [1, 1]} : vector<8x128xf32> to vector<4x128xf32>
    %3 = vector.extract_strided_slice %1 {offsets = [4, 0], sizes = [4, 128], strides = [1, 1]} : vector<8x128xf32> to vector<4x128xf32>
    %c0_2 = arith.constant 0 : index
    %c0_3 = arith.constant 0 : index
    %4 = vector.load %arg4[%c0_2, %c0_3] : memref<32x4xbf16, #tpu.memory_space<vmem>>, vector<32x4xbf16>
    %5 = arith.truncf %2 : vector<4x128xf32> to vector<4x128xbf16>
    %cst = arith.constant dense<0.000000e+00> : vector<32x128xf32>
    %6 = tpu.matmul %4, %5, %cst {dimension_numbers = #tpu.dot_dimension_numbers<[1], [0], [0], [1], [0, 0, 1, 1], [], []>} : vector<32x4xbf16>, vector<4x128xbf16>, vector<32x128xf32> -> vector<32x128xf32>
    %c0_4 = arith.constant 0 : index
    %c0_5 = arith.constant 0 : index
    %7 = vector.load %arg5[%c0_4, %c0_5] : memref<32x1xf32, #tpu.memory_space<vmem>>, vector<32x1xf32>
    %8 = vector.broadcast %7 : vector<32x1xf32> to vector<32x128xf32>
    %9 = arith.addf %6, %8 : vector<32x128xf32>
    %cst_6 = arith.constant 0.000000e+00 : f32
    %10 = vector.broadcast %cst_6 : f32 to vector<32x132xf32>
    %c0_7 = arith.constant 0 : index
    %c0_8 = arith.constant 0 : index
    %11 = vector.load %arg15[%c0_7, %c0_8] : memref<32x132xf32, #tpu.memory_space<vmem>>, vector<32x132xf32>
    tpu.vector_store %arg15[%c0_7, %c0_8], %10 {strides = array<i32>} : memref<32x132xf32, #tpu.memory_space<vmem>>, vector<32x132xf32>,
    %c0_9 = arith.constant 0 : index
    %c2 = arith.constant 2 : index
    %12 = vector.load %arg15[%c0_9, %c2] : memref<32x132xf32, #tpu.memory_space<vmem>>, vector<32x128xf32>
    tpu.vector_store %arg15[%c0_9, %c2], %9 {strides = array<i32>} : memref<32x132xf32, #tpu.memory_space<vmem>>, vector<32x128xf32>,
    %c0_10 = arith.constant 0 : index
    %c1 = arith.constant 1 : index
    %13 = vector.load %arg15[%c0_10, %c1] : memref<32x132xf32, #tpu.memory_space<vmem>>, vector<32x128xf32>
    %c0_11 = arith.constant 0 : index
    %c3 = arith.constant 3 : index
    %14 = vector.load %arg15[%c0_11, %c3] : memref<32x132xf32, #tpu.memory_space<vmem>>, vector<32x128xf32>
    %15 = tpu.concatenate %13, %9, %14 in 0 : vector<32x128xf32>, vector<32x128xf32>, vector<32x128xf32> -> vector<96x128xf32>
    %16 = arith.truncf %15 : vector<96x128xf32> to vector<96x128xbf16>
    %c0_12 = arith.constant 0 : index
    %c0_13 = arith.constant 0 : index
    %c0_14 = arith.constant 0 : index
    %17 = vector.load %arg6[%c0_12, %c0_13, %c0_14] : memref<2x64x96xbf16, #tpu.memory_space<vmem>>, vector<1x64x96xbf16>
    %18 = vector.shape_cast %17 : vector<1x64x96xbf16> to vector<64x96xbf16>
    %cst_15 = arith.constant dense<0.000000e+00> : vector<64x128xf32>
    %19 = tpu.matmul %18, %16, %cst_15 {dimension_numbers = #tpu.dot_dimension_numbers<[1], [0], [0], [1], [0, 0, 1, 1], [], []>} : vector<64x96xbf16>, vector<96x128xbf16>, vector<64x128xf32> -> vector<64x128xf32>
    %c0_16 = arith.constant 0 : index
    %c0_17 = arith.constant 0 : index
    %c0_18 = arith.constant 0 : index
    %20 = vector.load %arg7[%c0_16, %c0_17, %c0_18] : memref<2x64x1xf32, #tpu.memory_space<vmem>>, vector<1x64x1xf32>
    %21 = vector.shape_cast %20 : vector<1x64x1xf32> to vector<64x1xf32>
    %22 = vector.broadcast %21 : vector<64x1xf32> to vector<64x128xf32>
    %23 = arith.addf %19, %22 : vector<64x128xf32>
    %c0_19 = arith.constant 0 : index
    %c0_20 = arith.constant 0 : index
    %c0_21 = arith.constant 0 : index
    %24 = vector.load %arg2[%c0_19, %c0_20, %c0_21] : memref<1x128x128xf32, #tpu.memory_space<vmem>>, vector<1x64x128xf32>
    %25 = vector.shape_cast %24 : vector<1x64x128xf32> to vector<64x128xf32>
    %26 = arith.addf %23, %25 : vector<64x128xf32>
    %27 = vector.extract_strided_slice %26 {offsets = [0, 0], sizes = [32, 128], strides = [1, 1]} : vector<64x128xf32> to vector<32x128xf32>
    %28 = math.tanh %27 : vector<32x128xf32>
    %29 = vector.extract_strided_slice %26 {offsets = [32, 0], sizes = [32, 128], strides = [1, 1]} : vector<64x128xf32> to vector<32x128xf32>
    %30 = arith.negf %29 : vector<32x128xf32>
    %31 = math.exp %30 : vector<32x128xf32>
    %cst_22 = arith.constant 1.000000e+00 : f32
    %32 = vector.broadcast %cst_22 : f32 to vector<32x128xf32>
    %33 = arith.addf %32, %31 : vector<32x128xf32>
    %34 = arith.divf %32, %33 : vector<32x128xf32>
    %35 = arith.mulf %28, %34 : vector<32x128xf32>
    %36 = arith.truncf %35 : vector<32x128xf32> to vector<32x128xbf16>
    %c0_23 = arith.constant 0 : index
    %c0_24 = arith.constant 0 : index
    %c0_25 = arith.constant 0 : index
    %37 = vector.load %arg8[%c0_23, %c0_24, %c0_25] : memref<1x32x32xbf16, #tpu.memory_space<vmem>>, vector<1x32x32xbf16>
    %38 = vector.shape_cast %37 : vector<1x32x32xbf16> to vector<32x32xbf16>
    %cst_26 = arith.constant dense<0.000000e+00> : vector<32x128xf32>
    %39 = tpu.matmul %38, %36, %cst_26 {dimension_numbers = #tpu.dot_dimension_numbers<[1], [0], [0], [1], [0, 0, 1, 1], [], []>} : vector<32x32xbf16>, vector<32x128xbf16>, vector<32x128xf32> -> vector<32x128xf32>
    %c0_27 = arith.constant 0 : index
    %c0_28 = arith.constant 0 : index
    %c0_29 = arith.constant 0 : index
    %40 = vector.load %arg9[%c0_27, %c0_28, %c0_29] : memref<1x32x1xf32, #tpu.memory_space<vmem>>, vector<1x32x1xf32>
    %41 = vector.shape_cast %40 : vector<1x32x1xf32> to vector<32x1xf32>
    %42 = vector.broadcast %41 : vector<32x1xf32> to vector<32x128xf32>
    %43 = arith.addf %39, %42 : vector<32x128xf32>
    %44 = arith.addf %43, %9 : vector<32x128xf32>
    %c0_30 = arith.constant 0 : index
    %c0_31 = arith.constant 0 : index
    %c0_32 = arith.constant 0 : index
    %45 = vector.load %arg10[%c0_30, %c0_31, %c0_32] : memref<2x32x32xbf16, #tpu.memory_space<vmem>>, vector<1x32x32xbf16>
    %46 = vector.shape_cast %45 : vector<1x32x32xbf16> to vector<32x32xbf16>
    %cst_33 = arith.constant dense<0.000000e+00> : vector<32x128xf32>
    %47 = tpu.matmul %46, %36, %cst_33 {dimension_numbers = #tpu.dot_dimension_numbers<[1], [0], [0], [1], [0, 0, 1, 1], [], []>} : vector<32x32xbf16>, vector<32x128xbf16>, vector<32x128xf32> -> vector<32x128xf32>
    %c0_34 = arith.constant 0 : index
    %c0_35 = arith.constant 0 : index
    %c0_36 = arith.constant 0 : index
    %48 = vector.load %arg11[%c0_34, %c0_35, %c0_36] : memref<2x32x1xf32, #tpu.memory_space<vmem>>, vector<1x32x1xf32>
    %49 = vector.shape_cast %48 : vector<1x32x1xf32> to vector<32x1xf32>
    %50 = vector.broadcast %49 : vector<32x1xf32> to vector<32x128xf32>
    %51 = arith.addf %47, %50 : vector<32x128xf32>
    %c0_37 = arith.constant 0 : index
    %c2_38 = arith.constant 2 : index
    %52 = vector.load %arg15[%c0_37, %c2_38] : memref<32x132xf32, #tpu.memory_space<vmem>>, vector<32x128xf32>
    tpu.vector_store %arg15[%c0_37, %c2_38], %44 {strides = array<i32>} : memref<32x132xf32, #tpu.memory_space<vmem>>, vector<32x128xf32>,
    %c0_39 = arith.constant 0 : index
    %c0_40 = arith.constant 0 : index
    %53 = vector.load %arg15[%c0_39, %c0_40] : memref<32x132xf32, #tpu.memory_space<vmem>>, vector<32x128xf32>
    %c0_41 = arith.constant 0 : index
    %c4 = arith.constant 4 : index
    %54 = vector.load %arg15[%c0_41, %c4] : memref<32x132xf32, #tpu.memory_space<vmem>>, vector<32x128xf32>
    %55 = tpu.concatenate %53, %44, %54 in 0 : vector<32x128xf32>, vector<32x128xf32>, vector<32x128xf32> -> vector<96x128xf32>
    %56 = arith.truncf %55 : vector<96x128xf32> to vector<96x128xbf16>
    %c1_42 = arith.constant 1 : index
    %c0_43 = arith.constant 0 : index
    %c0_44 = arith.constant 0 : index
    %57 = vector.load %arg6[%c1_42, %c0_43, %c0_44] : memref<2x64x96xbf16, #tpu.memory_space<vmem>>, vector<1x64x96xbf16>
    %58 = vector.shape_cast %57 : vector<1x64x96xbf16> to vector<64x96xbf16>
    %cst_45 = arith.constant dense<0.000000e+00> : vector<64x128xf32>
    %59 = tpu.matmul %58, %56, %cst_45 {dimension_numbers = #tpu.dot_dimension_numbers<[1], [0], [0], [1], [0, 0, 1, 1], [], []>} : vector<64x96xbf16>, vector<96x128xbf16>, vector<64x128xf32> -> vector<64x128xf32>
    %c1_46 = arith.constant 1 : index
    %c0_47 = arith.constant 0 : index
    %c0_48 = arith.constant 0 : index
    %60 = vector.load %arg7[%c1_46, %c0_47, %c0_48] : memref<2x64x1xf32, #tpu.memory_space<vmem>>, vector<1x64x1xf32>
    %61 = vector.shape_cast %60 : vector<1x64x1xf32> to vector<64x1xf32>
    %62 = vector.broadcast %61 : vector<64x1xf32> to vector<64x128xf32>
    %63 = arith.addf %59, %62 : vector<64x128xf32>
    %c0_49 = arith.constant 0 : index
    %c64 = arith.constant 64 : index
    %c0_50 = arith.constant 0 : index
    %64 = vector.load %arg2[%c0_49, %c64, %c0_50] : memref<1x128x128xf32, #tpu.memory_space<vmem>>, vector<1x64x128xf32>
    %65 = vector.shape_cast %64 : vector<1x64x128xf32> to vector<64x128xf32>
    %66 = arith.addf %63, %65 : vector<64x128xf32>
    %67 = vector.extract_strided_slice %66 {offsets = [0, 0], sizes = [32, 128], strides = [1, 1]} : vector<64x128xf32> to vector<32x128xf32>
    %68 = math.tanh %67 : vector<32x128xf32>
    %69 = vector.extract_strided_slice %66 {offsets = [32, 0], sizes = [32, 128], strides = [1, 1]} : vector<64x128xf32> to vector<32x128xf32>
    %70 = arith.negf %69 : vector<32x128xf32>
    %71 = math.exp %70 : vector<32x128xf32>
    %cst_51 = arith.constant 1.000000e+00 : f32
    %72 = vector.broadcast %cst_51 : f32 to vector<32x128xf32>
    %73 = arith.addf %72, %71 : vector<32x128xf32>
    %74 = arith.divf %72, %73 : vector<32x128xf32>
    %75 = arith.mulf %68, %74 : vector<32x128xf32>
    %76 = arith.truncf %75 : vector<32x128xf32> to vector<32x128xbf16>
    %c1_52 = arith.constant 1 : index
    %c0_53 = arith.constant 0 : index
    %c0_54 = arith.constant 0 : index
    %77 = vector.load %arg10[%c1_52, %c0_53, %c0_54] : memref<2x32x32xbf16, #tpu.memory_space<vmem>>, vector<1x32x32xbf16>
    %78 = vector.shape_cast %77 : vector<1x32x32xbf16> to vector<32x32xbf16>
    %cst_55 = arith.constant dense<0.000000e+00> : vector<32x128xf32>
    %79 = tpu.matmul %78, %76, %cst_55 {dimension_numbers = #tpu.dot_dimension_numbers<[1], [0], [0], [1], [0, 0, 1, 1], [], []>} : vector<32x32xbf16>, vector<32x128xbf16>, vector<32x128xf32> -> vector<32x128xf32>
    %c1_56 = arith.constant 1 : index
    %c0_57 = arith.constant 0 : index
    %c0_58 = arith.constant 0 : index
    %80 = vector.load %arg11[%c1_56, %c0_57, %c0_58] : memref<2x32x1xf32, #tpu.memory_space<vmem>>, vector<1x32x1xf32>
    %81 = vector.shape_cast %80 : vector<1x32x1xf32> to vector<32x1xf32>
    %82 = vector.broadcast %81 : vector<32x1xf32> to vector<32x128xf32>
    %83 = arith.addf %79, %82 : vector<32x128xf32>
    %84 = arith.addf %51, %83 : vector<32x128xf32>
    %c0_59 = arith.constant 0 : index
    %c0_60 = arith.constant 0 : index
    %85 = vector.load %arg12[%c0_59, %c0_60] : memref<8x32xbf16, #tpu.memory_space<vmem>>, vector<8x32xbf16>
    %86 = arith.truncf %84 : vector<32x128xf32> to vector<32x128xbf16>
    %cst_61 = arith.constant dense<0.000000e+00> : vector<8x128xf32>
    %87 = tpu.matmul %85, %86, %cst_61 {dimension_numbers = #tpu.dot_dimension_numbers<[1], [0], [0], [1], [0, 0, 1, 1], [], []>} : vector<8x32xbf16>, vector<32x128xbf16>, vector<8x128xf32> -> vector<8x128xf32>
    %c0_62 = arith.constant 0 : index
    %c0_63 = arith.constant 0 : index
    %88 = vector.load %arg13[%c0_62, %c0_63] : memref<8x1xf32, #tpu.memory_space<vmem>>, vector<8x1xf32>
    %89 = vector.broadcast %88 : vector<8x1xf32> to vector<8x128xf32>
    %90 = arith.addf %87, %89 : vector<8x128xf32>
    %91 = vector.extract_strided_slice %90 {offsets = [0, 0], sizes = [4, 128], strides = [1, 1]} : vector<8x128xf32> to vector<4x128xf32>
    %92 = vector.extract_strided_slice %90 {offsets = [4, 0], sizes = [4, 128], strides = [1, 1]} : vector<8x128xf32> to vector<4x128xf32>
    %93 = arith.subf %3, %91 : vector<4x128xf32>
    %cst_64 = arith.constant 0.000000e+00 : f32
    %94 = vector.broadcast %cst_64 : f32 to vector<4x128xf32>
    %95 = arith.subf %94, %92 : vector<4x128xf32>
    %96 = math.exp %95 : vector<4x128xf32>
    %97 = arith.mulf %93, %96 : vector<4x128xf32>
    %98 = tpu.concatenate %2, %97 in 0 : vector<4x128xf32>, vector<4x128xf32> -> vector<8x128xf32>
    %c0_65 = arith.constant 0 : index
    %c0_66 = arith.constant 0 : index
    %99 = vector.load %arg3[%c0_65, %c0_66] : memref<8x8xbf16, #tpu.memory_space<vmem>>, vector<8x8xbf16>
    %100 = arith.truncf %98 : vector<8x128xf32> to vector<8x128xbf16>
    %cst_67 = arith.constant dense<0.000000e+00> : vector<8x128xf32>
    %101 = tpu.matmul %99, %100, %cst_67 {dimension_numbers = #tpu.dot_dimension_numbers<[1], [0], [0], [1], [0, 0, 1, 1], [], []>} : vector<8x8xbf16>, vector<8x128xbf16>, vector<8x128xf32> -> vector<8x128xf32>
    %c0_68 = arith.constant 0 : index
    %c0_69 = arith.constant 0 : index
    %c0_70 = arith.constant 0 : index
    %102 = vector.load %arg14[%c0_68, %c0_69, %c0_70] : memref<1x8x128xf32, #tpu.memory_space<vmem>>, vector<1x8x128xf32>
    %103 = vector.shape_cast %102 : vector<1x8x128xf32> to vector<8x128xf32>
    %104 = vector.shape_cast %101 : vector<8x128xf32> to vector<1x8x128xf32>
    tpu.vector_store %arg14[%c0_68, %c0_69, %c0_70], %104 {strides = array<i32>} : memref<1x8x128xf32, #tpu.memory_space<vmem>>, vector<1x8x128xf32>,
    return
  }
  func.func @transform_0(%arg0: i32) -> (i32, i32, i32) {
    %c0_i32 = arith.constant 0 : i32
    %c0_i32_0 = arith.constant 0 : i32
    %c0_i32_1 = arith.constant 0 : i32
    return %arg0, %c0_i32, %c0_i32_0 : i32, i32, i32
  }
  func.func @transform_1(%arg0: i32) -> (i32, i32, i32) {
    %c0_i32 = arith.constant 0 : i32
    %c0_i32_0 = arith.constant 0 : i32
    %c0_i32_1 = arith.constant 0 : i32
    return %arg0, %c0_i32, %c0_i32_0 : i32, i32, i32
  }
  func.func @transform_2(%arg0: i32) -> (i32, i32) {
    %c0_i32 = arith.constant 0 : i32
    %c0_i32_0 = arith.constant 0 : i32
    %c0_i32_1 = arith.constant 0 : i32
    return %c0_i32, %c0_i32_0 : i32, i32
  }
  func.func @transform_3(%arg0: i32) -> (i32, i32) {
    %c0_i32 = arith.constant 0 : i32
    %c0_i32_0 = arith.constant 0 : i32
    %c0_i32_1 = arith.constant 0 : i32
    return %c0_i32, %c0_i32_0 : i32, i32
  }
  func.func @transform_4(%arg0: i32) -> (i32, i32) {
    %c0_i32 = arith.constant 0 : i32
    %c0_i32_0 = arith.constant 0 : i32
    %c0_i32_1 = arith.constant 0 : i32
    return %c0_i32, %c0_i32_0 : i32, i32
  }
  func.func @transform_5(%arg0: i32) -> (i32, i32, i32) {
    %c0_i32 = arith.constant 0 : i32
    %c0_i32_0 = arith.constant 0 : i32
    %c0_i32_1 = arith.constant 0 : i32
    %c0_i32_2 = arith.constant 0 : i32
    return %c0_i32, %c0_i32_0, %c0_i32_1 : i32, i32, i32
  }
  func.func @transform_6(%arg0: i32) -> (i32, i32, i32) {
    %c0_i32 = arith.constant 0 : i32
    %c0_i32_0 = arith.constant 0 : i32
    %c0_i32_1 = arith.constant 0 : i32
    %c0_i32_2 = arith.constant 0 : i32
    return %c0_i32, %c0_i32_0, %c0_i32_1 : i32, i32, i32
  }
  func.func @transform_7(%arg0: i32) -> (i32, i32, i32) {
    %c0_i32 = arith.constant 0 : i32
    %c0_i32_0 = arith.constant 0 : i32
    %c0_i32_1 = arith.constant 0 : i32
    %c0_i32_2 = arith.constant 0 : i32
    return %c0_i32, %c0_i32_0, %c0_i32_1 : i32, i32, i32
  }
  func.func @transform_8(%arg0: i32) -> (i32, i32, i32) {
    %c0_i32 = arith.constant 0 : i32
    %c0_i32_0 = arith.constant 0 : i32
    %c0_i32_1 = arith.constant 0 : i32
    %c0_i32_2 = arith.constant 0 : i32
    return %c0_i32, %c0_i32_0, %c0_i32_1 : i32, i32, i32
  }
  func.func @transform_9(%arg0: i32) -> (i32, i32, i32) {
    %c0_i32 = arith.constant 0 : i32
    %c0_i32_0 = arith.constant 0 : i32
    %c0_i32_1 = arith.constant 0 : i32
    %c0_i32_2 = arith.constant 0 : i32
    return %c0_i32, %c0_i32_0, %c0_i32_1 : i32, i32, i32
  }
  func.func @transform_10(%arg0: i32) -> (i32, i32, i32) {
    %c0_i32 = arith.constant 0 : i32
    %c0_i32_0 = arith.constant 0 : i32
    %c0_i32_1 = arith.constant 0 : i32
    %c0_i32_2 = arith.constant 0 : i32
    return %c0_i32, %c0_i32_0, %c0_i32_1 : i32, i32, i32
  }
  func.func @transform_11(%arg0: i32) -> (i32, i32) {
    %c0_i32 = arith.constant 0 : i32
    %c0_i32_0 = arith.constant 0 : i32
    %c0_i32_1 = arith.constant 0 : i32
    return %c0_i32, %c0_i32_0 : i32, i32
  }
  func.func @transform_12(%arg0: i32) -> (i32, i32) {
    %c0_i32 = arith.constant 0 : i32
    %c0_i32_0 = arith.constant 0 : i32
    %c0_i32_1 = arith.constant 0 : i32
    return %c0_i32, %c0_i32_0 : i32, i32
  }
  func.func @transform_13(%arg0: i32) -> (i32, i32, i32) {
    %c0_i32 = arith.constant 0 : i32
    %c0_i32_0 = arith.constant 0 : i32
    %c0_i32_1 = arith.constant 0 : i32
    return %arg0, %c0_i32, %c0_i32_0 : i32, i32, i32
  }
}

module attributes {stable_mosaic.version = 11 : i64} {
  func.func @kernel(%arg0: i32, %arg1: memref<1x8x128xf32, #tpu.memory_space<vmem>>, %arg2: memref<1x128x128xf32, #tpu.memory_space<vmem>>, %arg3: memref<8x8xbf16, #tpu.memory_space<vmem>>, %arg4: memref<32x4xbf16, #tpu.memory_space<vmem>>, %arg5: memref<32x1xf32, #tpu.memory_space<vmem>>, %arg6: memref<2x64x96xbf16, #tpu.memory_space<vmem>>, %arg7: memref<2x64x1xf32, #tpu.memory_space<vmem>>, %arg8: memref<1x32x32xbf16, #tpu.memory_space<vmem>>, %arg9: memref<1x32x1xf32, #tpu.memory_space<vmem>>, %arg10: memref<2x32x32xbf16, #tpu.memory_space<vmem>>, %arg11: memref<2x32x1xf32, #tpu.memory_space<vmem>>, %arg12: memref<8x32xbf16, #tpu.memory_space<vmem>>, %arg13: memref<8x1xf32, #tpu.memory_space<vmem>>, %arg14: memref<1x8x128xf32, #tpu.memory_space<vmem>>, %arg15: memref<32x132xf32, #tpu.memory_space<vmem>>) attributes {dimension_semantics = [#tpu.dimension_semantics<parallel>], iteration_bounds = array<i64: 2>, scalar_prefetch = 0 : i64, scratch_operands = 1 : i64, tpu.core_type = #tpu.core_type<tc>, window_params = [{transform_indices = @transform_0, window_bounds = array<i64: 1, 8, 128>}, {transform_indices = @transform_1, window_bounds = array<i64: 1, 128, 128>}, {pipeline_mode = #tpu.pipeline_mode<synchronous>, transform_indices = @transform_2, window_bounds = array<i64: 8, 8>}, {pipeline_mode = #tpu.pipeline_mode<synchronous>, transform_indices = @transform_3, window_bounds = array<i64: 32, 4>}, {pipeline_mode = #tpu.pipeline_mode<synchronous>, transform_indices = @transform_4, window_bounds = array<i64: 32, 1>}, {pipeline_mode = #tpu.pipeline_mode<synchronous>, transform_indices = @transform_5, window_bounds = array<i64: 2, 64, 96>}, {pipeline_mode = #tpu.pipeline_mode<synchronous>, transform_indices = @transform_6, window_bounds = array<i64: 2, 64, 1>}, {pipeline_mode = #tpu.pipeline_mode<synchronous>, transform_indices = @transform_7, window_bounds = array<i64: 1, 32, 32>}, {pipeline_mode = #tpu.pipeline_mode<synchronous>, transform_indices = @transform_8, window_bounds = array<i64: 1, 32, 1>}, {pipeline_mode = #tpu.pipeline_mode<synchronous>, transform_indices = @transform_9, window_bounds = array<i64: 2, 32, 32>}, {pipeline_mode = #tpu.pipeline_mode<synchronous>, transform_indices = @transform_10, window_bounds = array<i64: 2, 32, 1>}, {pipeline_mode = #tpu.pipeline_mode<synchronous>, transform_indices = @transform_11, window_bounds = array<i64: 8, 32>}, {pipeline_mode = #tpu.pipeline_mode<synchronous>, transform_indices = @transform_12, window_bounds = array<i64: 8, 1>}, {transform_indices = @transform_13, window_bounds = array<i64: 1, 8, 128>}]} {
    %c0 = arith.constant 0 : index
    %c0_0 = arith.constant 0 : index
    %c0_1 = arith.constant 0 : index
    %0 = vector.load %arg1[%c0, %c0_0, %c0_1] : memref<1x8x128xf32, #tpu.memory_space<vmem>>, vector<1x8x128xf32>
    %1 = vector.shape_cast %0 : vector<1x8x128xf32> to vector<8x128xf32>
    %2 = vector.extract_strided_slice %1 {offsets = [0, 0], sizes = [4, 128], strides = [1, 1]} : vector<8x128xf32> to vector<4x128xf32>
    %3 = vector.extract_strided_slice %1 {offsets = [4, 0], sizes = [4, 128], strides = [1, 1]} : vector<8x128xf32> to vector<4x128xf32>
    %c0_2 = arith.constant 0 : index
    %c0_3 = arith.constant 0 : index
    %4 = vector.load %arg4[%c0_2, %c0_3] : memref<32x4xbf16, #tpu.memory_space<vmem>>, vector<32x4xbf16>
    %5 = arith.truncf %3 : vector<4x128xf32> to vector<4x128xbf16>
    %cst = arith.constant dense<0.000000e+00> : vector<32x128xf32>
    %6 = tpu.matmul %4, %5, %cst {dimension_numbers = #tpu.dot_dimension_numbers<[1], [0], [0], [1], [0, 0, 1, 1], [], []>} : vector<32x4xbf16>, vector<4x128xbf16>, vector<32x128xf32> -> vector<32x128xf32>
    %c0_4 = arith.constant 0 : index
    %c0_5 = arith.constant 0 : index
    %7 = vector.load %arg5[%c0_4, %c0_5] : memref<32x1xf32, #tpu.memory_space<vmem>>, vector<32x1xf32>
    %8 = vector.broadcast %7 : vector<32x1xf32> to vector<32x128xf32>
    %9 = arith.addf %6, %8 : vector<32x128xf32>
    %cst_6 = arith.constant 0.000000e+00 : f32
    %10 = vector.broadcast %cst_6 : f32 to vector<32x132xf32>
    %c0_7 = arith.constant 0 : index
    %c0_8 = arith.constant 0 : index
    %11 = vector.load %arg15[%c0_7, %c0_8] : memref<32x132xf32, #tpu.memory_space<vmem>>, vector<32x132xf32>
    tpu.vector_store %arg15[%c0_7, %c0_8], %10 {strides = array<i32>} : memref<32x132xf32, #tpu.memory_space<vmem>>, vector<32x132xf32>,
    %c0_9 = arith.constant 0 : index
    %c2 = arith.constant 2 : index
    %12 = vector.load %arg15[%c0_9, %c2] : memref<32x132xf32, #tpu.memory_space<vmem>>, vector<32x128xf32>
    tpu.vector_store %arg15[%c0_9, %c2], %9 {strides = array<i32>} : memref<32x132xf32, #tpu.memory_space<vmem>>, vector<32x128xf32>,
    %c0_10 = arith.constant 0 : index
    %c1 = arith.constant 1 : index
    %13 = vector.load %arg15[%c0_10, %c1] : memref<32x132xf32, #tpu.memory_space<vmem>>, vector<32x128xf32>
    %c0_11 = arith.constant 0 : index
    %c3 = arith.constant 3 : index
    %14 = vector.load %arg15[%c0_11, %c3] : memref<32x132xf32, #tpu.memory_space<vmem>>, vector<32x128xf32>
    %15 = tpu.concatenate %13, %9, %14 in 0 : vector<32x128xf32>, vector<32x128xf32>, vector<32x128xf32> -> vector<96x128xf32>
    %16 = arith.truncf %15 : vector<96x128xf32> to vector<96x128xbf16>
    %c0_12 = arith.constant 0 : index
    %c0_13 = arith.constant 0 : index
    %c0_14 = arith.constant 0 : index
    %17 = vector.load %arg6[%c0_12, %c0_13, %c0_14] : memref<2x64x96xbf16, #tpu.memory_space<vmem>>, vector<1x64x96xbf16>
    %18 = vector.shape_cast %17 : vector<1x64x96xbf16> to vector<64x96xbf16>
    %cst_15 = arith.constant dense<0.000000e+00> : vector<64x128xf32>
    %19 = tpu.matmul %18, %16, %cst_15 {dimension_numbers = #tpu.dot_dimension_numbers<[1], [0], [0], [1], [0, 0, 1, 1], [], []>} : vector<64x96xbf16>, vector<96x128xbf16>, vector<64x128xf32> -> vector<64x128xf32>
    %c0_16 = arith.constant 0 : index
    %c0_17 = arith.constant 0 : index
    %c0_18 = arith.constant 0 : index
    %20 = vector.load %arg7[%c0_16, %c0_17, %c0_18] : memref<2x64x1xf32, #tpu.memory_space<vmem>>, vector<1x64x1xf32>
    %21 = vector.shape_cast %20 : vector<1x64x1xf32> to vector<64x1xf32>
    %22 = vector.broadcast %21 : vector<64x1xf32> to vector<64x128xf32>
    %23 = arith.addf %19, %22 : vector<64x128xf32>
    %c0_19 = arith.constant 0 : index
    %c0_20 = arith.constant 0 : index
    %c0_21 = arith.constant 0 : index
    %24 = vector.load %arg2[%c0_19, %c0_20, %c0_21] : memref<1x128x128xf32, #tpu.memory_space<vmem>>, vector<1x64x128xf32>
    %25 = vector.shape_cast %24 : vector<1x64x128xf32> to vector<64x128xf32>
    %26 = arith.addf %23, %25 : vector<64x128xf32>
    %27 = vector.extract_strided_slice %26 {offsets = [0, 0], sizes = [32, 128], strides = [1, 1]} : vector<64x128xf32> to vector<32x128xf32>
    %28 = math.tanh %27 : vector<32x128xf32>
    %29 = vector.extract_strided_slice %26 {offsets = [32, 0], sizes = [32, 128], strides = [1, 1]} : vector<64x128xf32> to vector<32x128xf32>
    %30 = arith.negf %29 : vector<32x128xf32>
    %31 = math.exp %30 : vector<32x128xf32>
    %cst_22 = arith.constant 1.000000e+00 : f32
    %32 = vector.broadcast %cst_22 : f32 to vector<32x128xf32>
    %33 = arith.addf %32, %31 : vector<32x128xf32>
    %34 = arith.divf %32, %33 : vector<32x128xf32>
    %35 = arith.mulf %28, %34 : vector<32x128xf32>
    %36 = arith.truncf %35 : vector<32x128xf32> to vector<32x128xbf16>
    %c0_23 = arith.constant 0 : index
    %c0_24 = arith.constant 0 : index
    %c0_25 = arith.constant 0 : index
    %37 = vector.load %arg8[%c0_23, %c0_24, %c0_25] : memref<1x32x32xbf16, #tpu.memory_space<vmem>>, vector<1x32x32xbf16>
    %38 = vector.shape_cast %37 : vector<1x32x32xbf16> to vector<32x32xbf16>
    %cst_26 = arith.constant dense<0.000000e+00> : vector<32x128xf32>
    %39 = tpu.matmul %38, %36, %cst_26 {dimension_numbers = #tpu.dot_dimension_numbers<[1], [0], [0], [1], [0, 0, 1, 1], [], []>} : vector<32x32xbf16>, vector<32x128xbf16>, vector<32x128xf32> -> vector<32x128xf32>
    %c0_27 = arith.constant 0 : index
    %c0_28 = arith.constant 0 : index
    %c0_29 = arith.constant 0 : index
    %40 = vector.load %arg9[%c0_27, %c0_28, %c0_29] : memref<1x32x1xf32, #tpu.memory_space<vmem>>, vector<1x32x1xf32>
    %41 = vector.shape_cast %40 : vector<1x32x1xf32> to vector<32x1xf32>
    %42 = vector.broadcast %41 : vector<32x1xf32> to vector<32x128xf32>
    %43 = arith.addf %39, %42 : vector<32x128xf32>
    %44 = arith.addf %43, %9 : vector<32x128xf32>
    %c0_30 = arith.constant 0 : index
    %c0_31 = arith.constant 0 : index
    %c0_32 = arith.constant 0 : index
    %45 = vector.load %arg10[%c0_30, %c0_31, %c0_32] : memref<2x32x32xbf16, #tpu.memory_space<vmem>>, vector<1x32x32xbf16>
    %46 = vector.shape_cast %45 : vector<1x32x32xbf16> to vector<32x32xbf16>
    %cst_33 = arith.constant dense<0.000000e+00> : vector<32x128xf32>
    %47 = tpu.matmul %46, %36, %cst_33 {dimension_numbers = #tpu.dot_dimension_numbers<[1], [0], [0], [1], [0, 0, 1, 1], [], []>} : vector<32x32xbf16>, vector<32x128xbf16>, vector<32x128xf32> -> vector<32x128xf32>
    %c0_34 = arith.constant 0 : index
    %c0_35 = arith.constant 0 : index
    %c0_36 = arith.constant 0 : index
    %48 = vector.load %arg11[%c0_34, %c0_35, %c0_36] : memref<2x32x1xf32, #tpu.memory_space<vmem>>, vector<1x32x1xf32>
    %49 = vector.shape_cast %48 : vector<1x32x1xf32> to vector<32x1xf32>
    %50 = vector.broadcast %49 : vector<32x1xf32> to vector<32x128xf32>
    %51 = arith.addf %47, %50 : vector<32x128xf32>
    %c0_37 = arith.constant 0 : index
    %c2_38 = arith.constant 2 : index
    %52 = vector.load %arg15[%c0_37, %c2_38] : memref<32x132xf32, #tpu.memory_space<vmem>>, vector<32x128xf32>
    tpu.vector_store %arg15[%c0_37, %c2_38], %44 {strides = array<i32>} : memref<32x132xf32, #tpu.memory_space<vmem>>, vector<32x128xf32>,
    %c0_39 = arith.constant 0 : index
    %c0_40 = arith.constant 0 : index
    %53 = vector.load %arg15[%c0_39, %c0_40] : memref<32x132xf32, #tpu.memory_space<vmem>>, vector<32x128xf32>
    %c0_41 = arith.constant 0 : index
    %c4 = arith.constant 4 : index
    %54 = vector.load %arg15[%c0_41, %c4] : memref<32x132xf32, #tpu.memory_space<vmem>>, vector<32x128xf32>
    %55 = tpu.concatenate %53, %44, %54 in 0 : vector<32x128xf32>, vector<32x128xf32>, vector<32x128xf32> -> vector<96x128xf32>
    %56 = arith.truncf %55 : vector<96x128xf32> to vector<96x128xbf16>
    %c1_42 = arith.constant 1 : index
    %c0_43 = arith.constant 0 : index
    %c0_44 = arith.constant 0 : index
    %57 = vector.load %arg6[%c1_42, %c0_43, %c0_44] : memref<2x64x96xbf16, #tpu.memory_space<vmem>>, vector<1x64x96xbf16>
    %58 = vector.shape_cast %57 : vector<1x64x96xbf16> to vector<64x96xbf16>
    %cst_45 = arith.constant dense<0.000000e+00> : vector<64x128xf32>
    %59 = tpu.matmul %58, %56, %cst_45 {dimension_numbers = #tpu.dot_dimension_numbers<[1], [0], [0], [1], [0, 0, 1, 1], [], []>} : vector<64x96xbf16>, vector<96x128xbf16>, vector<64x128xf32> -> vector<64x128xf32>
    %c1_46 = arith.constant 1 : index
    %c0_47 = arith.constant 0 : index
    %c0_48 = arith.constant 0 : index
    %60 = vector.load %arg7[%c1_46, %c0_47, %c0_48] : memref<2x64x1xf32, #tpu.memory_space<vmem>>, vector<1x64x1xf32>
    %61 = vector.shape_cast %60 : vector<1x64x1xf32> to vector<64x1xf32>
    %62 = vector.broadcast %61 : vector<64x1xf32> to vector<64x128xf32>
    %63 = arith.addf %59, %62 : vector<64x128xf32>
    %c0_49 = arith.constant 0 : index
    %c64 = arith.constant 64 : index
    %c0_50 = arith.constant 0 : index
    %64 = vector.load %arg2[%c0_49, %c64, %c0_50] : memref<1x128x128xf32, #tpu.memory_space<vmem>>, vector<1x64x128xf32>
    %65 = vector.shape_cast %64 : vector<1x64x128xf32> to vector<64x128xf32>
    %66 = arith.addf %63, %65 : vector<64x128xf32>
    %67 = vector.extract_strided_slice %66 {offsets = [0, 0], sizes = [32, 128], strides = [1, 1]} : vector<64x128xf32> to vector<32x128xf32>
    %68 = math.tanh %67 : vector<32x128xf32>
    %69 = vector.extract_strided_slice %66 {offsets = [32, 0], sizes = [32, 128], strides = [1, 1]} : vector<64x128xf32> to vector<32x128xf32>
    %70 = arith.negf %69 : vector<32x128xf32>
    %71 = math.exp %70 : vector<32x128xf32>
    %cst_51 = arith.constant 1.000000e+00 : f32
    %72 = vector.broadcast %cst_51 : f32 to vector<32x128xf32>
    %73 = arith.addf %72, %71 : vector<32x128xf32>
    %74 = arith.divf %72, %73 : vector<32x128xf32>
    %75 = arith.mulf %68, %74 : vector<32x128xf32>
    %76 = arith.truncf %75 : vector<32x128xf32> to vector<32x128xbf16>
    %c1_52 = arith.constant 1 : index
    %c0_53 = arith.constant 0 : index
    %c0_54 = arith.constant 0 : index
    %77 = vector.load %arg10[%c1_52, %c0_53, %c0_54] : memref<2x32x32xbf16, #tpu.memory_space<vmem>>, vector<1x32x32xbf16>
    %78 = vector.shape_cast %77 : vector<1x32x32xbf16> to vector<32x32xbf16>
    %cst_55 = arith.constant dense<0.000000e+00> : vector<32x128xf32>
    %79 = tpu.matmul %78, %76, %cst_55 {dimension_numbers = #tpu.dot_dimension_numbers<[1], [0], [0], [1], [0, 0, 1, 1], [], []>} : vector<32x32xbf16>, vector<32x128xbf16>, vector<32x128xf32> -> vector<32x128xf32>
    %c1_56 = arith.constant 1 : index
    %c0_57 = arith.constant 0 : index
    %c0_58 = arith.constant 0 : index
    %80 = vector.load %arg11[%c1_56, %c0_57, %c0_58] : memref<2x32x1xf32, #tpu.memory_space<vmem>>, vector<1x32x1xf32>
    %81 = vector.shape_cast %80 : vector<1x32x1xf32> to vector<32x1xf32>
    %82 = vector.broadcast %81 : vector<32x1xf32> to vector<32x128xf32>
    %83 = arith.addf %79, %82 : vector<32x128xf32>
    %84 = arith.addf %51, %83 : vector<32x128xf32>
    %c0_59 = arith.constant 0 : index
    %c0_60 = arith.constant 0 : index
    %85 = vector.load %arg12[%c0_59, %c0_60] : memref<8x32xbf16, #tpu.memory_space<vmem>>, vector<8x32xbf16>
    %86 = arith.truncf %84 : vector<32x128xf32> to vector<32x128xbf16>
    %cst_61 = arith.constant dense<0.000000e+00> : vector<8x128xf32>
    %87 = tpu.matmul %85, %86, %cst_61 {dimension_numbers = #tpu.dot_dimension_numbers<[1], [0], [0], [1], [0, 0, 1, 1], [], []>} : vector<8x32xbf16>, vector<32x128xbf16>, vector<8x128xf32> -> vector<8x128xf32>
    %c0_62 = arith.constant 0 : index
    %c0_63 = arith.constant 0 : index
    %88 = vector.load %arg13[%c0_62, %c0_63] : memref<8x1xf32, #tpu.memory_space<vmem>>, vector<8x1xf32>
    %89 = vector.broadcast %88 : vector<8x1xf32> to vector<8x128xf32>
    %90 = arith.addf %87, %89 : vector<8x128xf32>
    %91 = vector.extract_strided_slice %90 {offsets = [0, 0], sizes = [4, 128], strides = [1, 1]} : vector<8x128xf32> to vector<4x128xf32>
    %92 = vector.extract_strided_slice %90 {offsets = [4, 0], sizes = [4, 128], strides = [1, 1]} : vector<8x128xf32> to vector<4x128xf32>
    %93 = arith.subf %2, %91 : vector<4x128xf32>
    %cst_64 = arith.constant 0.000000e+00 : f32
    %94 = vector.broadcast %cst_64 : f32 to vector<4x128xf32>
    %95 = arith.subf %94, %92 : vector<4x128xf32>
    %96 = math.exp %95 : vector<4x128xf32>
    %97 = arith.mulf %93, %96 : vector<4x128xf32>
    %98 = tpu.concatenate %97, %3 in 0 : vector<4x128xf32>, vector<4x128xf32> -> vector<8x128xf32>
    %c0_65 = arith.constant 0 : index
    %c0_66 = arith.constant 0 : index
    %99 = vector.load %arg3[%c0_65, %c0_66] : memref<8x8xbf16, #tpu.memory_space<vmem>>, vector<8x8xbf16>
    %100 = arith.truncf %98 : vector<8x128xf32> to vector<8x128xbf16>
    %cst_67 = arith.constant dense<0.000000e+00> : vector<8x128xf32>
    %101 = tpu.matmul %99, %100, %cst_67 {dimension_numbers = #tpu.dot_dimension_numbers<[1], [0], [0], [1], [0, 0, 1, 1], [], []>} : vector<8x8xbf16>, vector<8x128xbf16>, vector<8x128xf32> -> vector<8x128xf32>
    %c0_68 = arith.constant 0 : index
    %c0_69 = arith.constant 0 : index
    %c0_70 = arith.constant 0 : index
    %102 = vector.load %arg14[%c0_68, %c0_69, %c0_70] : memref<1x8x128xf32, #tpu.memory_space<vmem>>, vector<1x8x128xf32>
    %103 = vector.shape_cast %102 : vector<1x8x128xf32> to vector<8x128xf32>
    %104 = vector.shape_cast %101 : vector<8x128xf32> to vector<1x8x128xf32>
    tpu.vector_store %arg14[%c0_68, %c0_69, %c0_70], %104 {strides = array<i32>} : memref<1x8x128xf32, #tpu.memory_space<vmem>>, vector<1x8x128xf32>,
    return
  }
  func.func @transform_0(%arg0: i32) -> (i32, i32, i32) {
    %c0_i32 = arith.constant 0 : i32
    %c0_i32_0 = arith.constant 0 : i32
    %c0_i32_1 = arith.constant 0 : i32
    return %arg0, %c0_i32, %c0_i32_0 : i32, i32, i32
  }
  func.func @transform_1(%arg0: i32) -> (i32, i32, i32) {
    %c1_i32 = arith.constant 1 : i32
    %c0_i32 = arith.constant 0 : i32
    %c0_i32_0 = arith.constant 0 : i32
    return %arg0, %c1_i32, %c0_i32 : i32, i32, i32
  }
  func.func @transform_2(%arg0: i32) -> (i32, i32) {
    %c0_i32 = arith.constant 0 : i32
    %c0_i32_0 = arith.constant 0 : i32
    %c0_i32_1 = arith.constant 0 : i32
    return %c0_i32, %c0_i32_0 : i32, i32
  }
  func.func @transform_3(%arg0: i32) -> (i32, i32) {
    %c0_i32 = arith.constant 0 : i32
    %c0_i32_0 = arith.constant 0 : i32
    %c0_i32_1 = arith.constant 0 : i32
    return %c0_i32, %c0_i32_0 : i32, i32
  }
  func.func @transform_4(%arg0: i32) -> (i32, i32) {
    %c0_i32 = arith.constant 0 : i32
    %c0_i32_0 = arith.constant 0 : i32
    %c0_i32_1 = arith.constant 0 : i32
    return %c0_i32, %c0_i32_0 : i32, i32
  }
  func.func @transform_5(%arg0: i32) -> (i32, i32, i32) {
    %c0_i32 = arith.constant 0 : i32
    %c0_i32_0 = arith.constant 0 : i32
    %c0_i32_1 = arith.constant 0 : i32
    %c0_i32_2 = arith.constant 0 : i32
    return %c0_i32, %c0_i32_0, %c0_i32_1 : i32, i32, i32
  }
  func.func @transform_6(%arg0: i32) -> (i32, i32, i32) {
    %c0_i32 = arith.constant 0 : i32
    %c0_i32_0 = arith.constant 0 : i32
    %c0_i32_1 = arith.constant 0 : i32
    %c0_i32_2 = arith.constant 0 : i32
    return %c0_i32, %c0_i32_0, %c0_i32_1 : i32, i32, i32
  }
  func.func @transform_7(%arg0: i32) -> (i32, i32, i32) {
    %c0_i32 = arith.constant 0 : i32
    %c0_i32_0 = arith.constant 0 : i32
    %c0_i32_1 = arith.constant 0 : i32
    %c0_i32_2 = arith.constant 0 : i32
    return %c0_i32, %c0_i32_0, %c0_i32_1 : i32, i32, i32
  }
  func.func @transform_8(%arg0: i32) -> (i32, i32, i32) {
    %c0_i32 = arith.constant 0 : i32
    %c0_i32_0 = arith.constant 0 : i32
    %c0_i32_1 = arith.constant 0 : i32
    %c0_i32_2 = arith.constant 0 : i32
    return %c0_i32, %c0_i32_0, %c0_i32_1 : i32, i32, i32
  }
  func.func @transform_9(%arg0: i32) -> (i32, i32, i32) {
    %c0_i32 = arith.constant 0 : i32
    %c0_i32_0 = arith.constant 0 : i32
    %c0_i32_1 = arith.constant 0 : i32
    %c0_i32_2 = arith.constant 0 : i32
    return %c0_i32, %c0_i32_0, %c0_i32_1 : i32, i32, i32
  }
  func.func @transform_10(%arg0: i32) -> (i32, i32, i32) {
    %c0_i32 = arith.constant 0 : i32
    %c0_i32_0 = arith.constant 0 : i32
    %c0_i32_1 = arith.constant 0 : i32
    %c0_i32_2 = arith.constant 0 : i32
    return %c0_i32, %c0_i32_0, %c0_i32_1 : i32, i32, i32
  }
  func.func @transform_11(%arg0: i32) -> (i32, i32) {
    %c0_i32 = arith.constant 0 : i32
    %c0_i32_0 = arith.constant 0 : i32
    %c0_i32_1 = arith.constant 0 : i32
    return %c0_i32, %c0_i32_0 : i32, i32
  }
  func.func @transform_12(%arg0: i32) -> (i32, i32) {
    %c0_i32 = arith.constant 0 : i32
    %c0_i32_0 = arith.constant 0 : i32
    %c0_i32_1 = arith.constant 0 : i32
    return %c0_i32, %c0_i32_0 : i32, i32
  }
  func.func @transform_13(%arg0: i32) -> (i32, i32, i32) {
    %c0_i32 = arith.constant 0 : i32
    %c0_i32_0 = arith.constant 0 : i32
    %c0_i32_1 = arith.constant 0 : i32
    return %arg0, %c0_i32, %c0_i32_0 : i32, i32, i32
  }
}

</mosaic_0001>

<bundles_post_ra>
// kernel: tile.5
= control target key start
LH: loop header
LB: loop body
LE: loop exit
PB: predicated region body
PF: predicated region fallthrough
CT: control target
= control target key end

     0   :  { %s69_s10 = smov 56   ;;  %s70_s11 = smov 40   ;;  %vm3_vm0 = vcmask 64512   ;;  %vm9_vm1 = vcmask 523712   ;;  %vm15_vm2 = vcmask 458112   ;;  %vm21_vm3 = vcmask 392512   ;;  %s113_s0 = inlined_call_operand.vmem [shape: f32[8,8], index: 0, kind: input, shape index: {}]   ;;  %s114_s1 = inlined_call_operand.vmem [shape: f32[64], index: 1, kind: output, shape index: {}]  }
   0x1   :  { %v55_v0 = vld [vmem:[%s113_s0 + $0x7] sm:$0x1]   ;;  %v57_v1 = vld [vmem:[%s113_s0 + $0x5] sm:$0x1]   ;;  %v56_v2 = vld [vmem:[%s113_s0 + $0x6] sm:$0x1]  }
   0x2   :  { %7 = vrot.lane.b32.xlu0 %v55_v0, %s69_s10  ;;  %19 = vrot.lane.b32.xlu1 %v57_v1, %s70_s11  ;;  %v58_v3 = vld [vmem:[%s113_s0 + $0x4] sm:$0x1]   ;;  %v2_v4 = vld [vmem:[%s113_s0] sm:$0x1]   ;;  %s71_s18 = smov 48   ;;  %s72_s19 = smov 32  }
   0x3   :  { %4 = vst.msk [vmem:[#allocation0] sm:$0x1] %vm3_vm0, %v2_v4   ;;  %v59_v5 = vld [vmem:[%s113_s0 + $0x3] sm:$0x1]   ;;  %v60_v6 = vld [vmem:[%s113_s0 + $0x2] sm:$0x1]  }
   0x4   :  { %s73_s24 = smov 24   ;;  %s74_s25 = smov 16   ;;  %v61_v7 = vld [vmem:[%s113_s0 + $0x1] sm:$0x1]   ;;  %vm27_vm4 = vcmask 326912   ;;  %vm33_vm5 = vcmask 261312  }
   0x5   :  { %s75_s0 = smov 8   ;;  %vm39_vm6 = vcmask 195712   ;;  %vm45_vm7 = vcmask 130112  }
   0x6   :  { %13 = vrot.lane.b32.xlu0 %v56_v2, %s71_s18  ;;  %25 = vrot.lane.b32.xlu1 %v58_v3, %s72_s19 }
   0xa   :  { %31 = vrot.lane.b32.xlu0 %v59_v5, %s73_s24  ;;  %37 = vrot.lane.b32.xlu1 %v60_v6, %s74_s25 }
   0xe   :  { %43 = vrot.lane.b32.xlu0 %v61_v7, %s75_s0 }
  0x74   :  { %v8_v8 = vpop.permute.xlu0 %7   ;;  %v20_v9 = vpop.permute.xlu1 %19  }
  0x75   :  { %10 = vst.msk [vmem:[#allocation0] sm:$0x1] %vm9_vm1, %v8_v8  }
  0x78   :  { %v14_v10 = vpop.permute.xlu0 %13   ;;  %v26_v11 = vpop.permute.xlu1 %25  }
  0x79   :  { %16 = vst.msk [vmem:[#allocation0] sm:$0x1] %vm15_vm2, %v14_v10  }
  0x7a   :  { %22 = vst.msk [vmem:[#allocation0] sm:$0x1] %vm21_vm3, %v20_v9  }
  0x7b   :  { %28 = vst.msk [vmem:[#allocation0] sm:$0x1] %vm27_vm4, %v26_v11  }
  0x7c   :  { %v32_v12 = vpop.permute.xlu0 %31   ;;  %v38_v13 = vpop.permute.xlu1 %37  }
  0x7d   :  { %34 = vst.msk [vmem:[#allocation0] sm:$0x1] %vm33_vm5, %v32_v12  }
  0x7e   :  { %40 = vst.msk [vmem:[#allocation0] sm:$0x1] %vm39_vm6, %v38_v13  }
  0x80   :  { %v44_v14 = vpop.permute.xlu0 %43  }
  0x81   :  { %46 = vst.msk [vmem:[#allocation0] sm:$0x1] %vm45_vm7, %v44_v14  }
  0x88   :  { %v51_v15 = vld [vmem:[#allocation0] sm:$0x1] }
  0x89   :  { %54 = vst [vmem:[%s114_s1] sm:$0x1] %v51_v15 }

// kernel: tile.6
= control target key start
LH: loop header
LB: loop body
LE: loop exit
PB: predicated region body
PF: predicated region fallthrough
CT: control target
= control target key end

     0   :  { %s40_s0 = inlined_call_operand.vmem [shape: f32[64], index: 0, kind: input, shape index: {}]   ;;  %s41_s1 = inlined_call_operand.vmem [shape: f32[32,64], index: 1, kind: output, shape index: {}]  }
   0x1   :  { %v4_v0 = vld [vmem:[%s40_s0] ss:$0 sm:$0xff] }
   0x2   :  { %5 = vst [vmem:[%s41_s1] sm:$0xff] %v4_v0  ;;  %12 = vst [vmem:[%s41_s1 + $0x8] sm:$0xff] %v4_v0 }
   0x3   :  { %13 = vst [vmem:[%s41_s1 + $0x10] sm:$0xff] %v4_v0  ;;  %14 = vst [vmem:[%s41_s1 + $0x18] sm:$0xff] %v4_v0 }

// kernel: tile.7
= control target key start
LH: loop header
LB: loop body
LE: loop exit
PB: predicated region body
PF: predicated region fallthrough
CT: control target
= control target key end

     0   :  { %s174_s8 = smov 64   ;;  %vm3_vm0 = vcmask 523264   ;;  %vm17_vm1 = vcmask 1048064   ;;  %s245_s0 = inlined_call_operand.vmem [shape: f32[32,64], index: 0, kind: input, shape index: {}]   ;;  %s246_s1 = inlined_call_operand.vmem [shape: f32[1,2048], index: 1, kind: output, shape index: {}]  }
   0x1   :  { %v156_v0 = vld [vmem:[%s245_s0 + $0x1] ss:$2 sm:$0xff]   ;;  %v2_v1 = vld [vmem:[%s245_s0] ss:$2 sm:$0xff]   ;;  %v155_v2 = vld [vmem:[%s245_s0 + $0x10] ss:$2 sm:$0xff]  }
   0x2   :  { %15 = vrot.lane.b32.xlu0 %v156_v0, %s174_s8  ;;  %v157_v3 = vld [vmem:[%s245_s0 + $0x11] ss:$2 sm:$0xff]   ;;  %4 = vst.msk [vmem:[#allocation0] ss:$8 sm:$0xf] %vm3_vm0, %v2_v1  }
   0x3   :  { %5 = vst.msk [vmem:[#allocation0] ss:$8 sm:$0xf0] %vm3_vm0, %v2_v1   ;;  %10 = vst.msk [vmem:[#allocation0 + $0x40] ss:$8 sm:$0xf] %vm3_vm0, %v155_v2  }
   0x4   :  { %12 = vst.msk [vmem:[#allocation0 + $0x40] ss:$8 sm:$0xf0] %vm3_vm0, %v155_v2  }
   0x6   :  { %22 = vrot.lane.b32.xlu0 %v157_v3, %s174_s8 }
  0x74   :  { %v16_v4 = vpop.permute.xlu0 %15  }
  0x75   :  { %18 = vst.msk [vmem:[#allocation0] ss:$8 sm:$0xf] %vm17_vm1, %v16_v4   ;;  %19 = vst.msk [vmem:[#allocation0] ss:$8 sm:$0xf0] %vm17_vm1, %v16_v4  }
  0x78   :  { %v23_v5 = vpop.permute.xlu0 %22  }
  0x79   :  { %26 = vst.msk [vmem:[#allocation0 + $0x40] ss:$8 sm:$0xf] %vm17_vm1, %v23_v5   ;;  %28 = vst.msk [vmem:[#allocation0 + $0x40] ss:$8 sm:$0xf0] %vm17_vm1, %v23_v5  }
  0x7c   :  { %v33_v6 = vld [vmem:[#allocation0] sm:$0x1]  ;;  %v38_v7 = vld [vmem:[#allocation0 + $0x8] sm:$0x1]  ;;  %v44_v8 = vld [vmem:[#allocation0 + $0x10] sm:$0x1] }
  0x7d   :  { %36 = vst [vmem:[%s246_s1] sm:$0x1] %v33_v6  ;;  %158 = vst [vmem:[%s246_s1 + $0x1] sm:$0x1] %v38_v7  ;;  %v51_v9 = vld [vmem:[#allocation0 + $0x18] sm:$0x1] }
  0x7e   :  { %159 = vst [vmem:[%s246_s1 + $0x2] sm:$0x1] %v44_v8  ;;  %v58_v10 = vld [vmem:[#allocation0 + $0x20] sm:$0x1]  ;;  %v65_v11 = vld [vmem:[#allocation0 + $0x28] sm:$0x1] }
  0x7f   :  { %160 = vst [vmem:[%s246_s1 + $0x3] sm:$0x1] %v51_v9  ;;  %161 = vst [vmem:[%s246_s1 + $0x4] sm:$0x1] %v58_v10  ;;  %v72_v12 = vld [vmem:[#allocation0 + $0x30] sm:$0x1] }
  0x80   :  { %162 = vst [vmem:[%s246_s1 + $0x5] sm:$0x1] %v65_v11  ;;  %v79_v13 = vld [vmem:[#allocation0 + $0x38] sm:$0x1]  ;;  %163 = vst [vmem:[%s246_s1 + $0x6] sm:$0x1] %v72_v12 }
  0x81   :  { %164 = vst [vmem:[%s246_s1 + $0x7] sm:$0x1] %v79_v13  ;;  %v86_v14 = vld [vmem:[#allocation0 + $0x40] sm:$0x1]  ;;  %v93_v15 = vld [vmem:[#allocation0 + $0x48] sm:$0x1] }
  0x82   :  { %v100_v16 = vld [vmem:[#allocation0 + $0x50] sm:$0x1]  ;;  %165 = vst [vmem:[%s246_s1 + $0x8] sm:$0x1] %v86_v14  ;;  %166 = vst [vmem:[%s246_s1 + $0x9] sm:$0x1] %v93_v15 }
  0x83   :  { %167 = vst [vmem:[%s246_s1 + $0xa] sm:$0x1] %v100_v16  ;;  %v107_v17 = vld [vmem:[#allocation0 + $0x58] sm:$0x1]  ;;  %v114_v18 = vld [vmem:[#allocation0 + $0x60] sm:$0x1] }
  0x84   :  { %v121_v19 = vld [vmem:[#allocation0 + $0x68] sm:$0x1]  ;;  %168 = vst [vmem:[%s246_s1 + $0xb] sm:$0x1] %v107_v17  ;;  %169 = vst [vmem:[%s246_s1 + $0xc] sm:$0x1] %v114_v18 }
  0x85   :  { %170 = vst [vmem:[%s246_s1 + $0xd] sm:$0x1] %v121_v19  ;;  %v128_v20 = vld [vmem:[#allocation0 + $0x70] sm:$0x1]  ;;  %v135_v21 = vld [vmem:[#allocation0 + $0x78] sm:$0x1] }
  0x86   :  { %171 = vst [vmem:[%s246_s1 + $0xe] sm:$0x1] %v128_v20  ;;  %172 = vst [vmem:[%s246_s1 + $0xf] sm:$0x1] %v135_v21 }

// kernel: _lambda_.6
= control target key start
LH: loop header
LB: loop body
LE: loop exit
PB: predicated region body
PF: predicated region fallthrough
CT: control target
= control target key end

     0   :  { %v686_v3 = vmov 0   ;;  %vm293_vm0 = vcmask 261120   ;;  %s896_s1 = inlined_call_operand.vmem [shape: bf16[32,2048], index: 1, kind: input, shape index: {}]   ;;  %s897_s0 = inlined_call_operand.vmem [shape: f32[8,32], index: 0, kind: input, shape index: {}]   ;;  %s898_s2 = inlined_call_operand.vmem [shape: f32[1,2048], index: 2, kind: input, shape index: {}]   ;;  %s899_s3 = inlined_call_operand.vmem [shape: f32[8,2048], index: 3, kind: output, shape index: {}]  }
   0x1   :  { %v33_v0 = vld [vmem:[%s896_s1 + $0x80] sm:$0xff]  ;;  %v34_v2 = vld [vmem:[%s896_s1 + $0x88] sm:$0xff]  ;;  %329 = vmatprep.mubr.bf16.mxu0 %v686_v3  ;;  %370 = vmatprep.mubr.bf16.mxu1 %v686_v3  ;;  %v35_v15 = vld [vmem:[%s896_s1 + $0x90] sm:$0xff] }
   0x2   :  { %v41_v1 = vld [vmem:[%s896_s1 + $0xc0] sm:$0xff]  ;;  %v42_v5 = vld [vmem:[%s896_s1 + $0xc8] sm:$0xff]  ;;  %v43_v16 = vld [vmem:[%s896_s1 + $0xd0] sm:$0xff] }
   0x3   :  { %v662_v4 = vcombine.high %v33_v0, %v41_v1  ;;  %v661_v6 = vcombine.low %v33_v0, %v41_v1  ;;  %v17_v7 = vld [vmem:[%s896_s1] sm:$0xff]  ;;  %v664_v9 = vcombine.high %v34_v2, %v42_v5  ;;  %v663_v10 = vcombine.low %v34_v2, %v42_v5  ;;  %v18_v12 = vld [vmem:[%s896_s1 + $0x8] sm:$0xff]  ;;  %v36_v17 = vld [vmem:[%s896_s1 + $0x98] sm:$0xff] }
   0x4   :  { %v25_v8 = vld [vmem:[%s896_s1 + $0x40] sm:$0xff]  ;;  %v26_v13 = vld [vmem:[%s896_s1 + $0x48] sm:$0xff]  ;;  %v44_v20 = vld [vmem:[%s896_s1 + $0xd8] sm:$0xff]  ;;  %v666_v22 = vcombine.high %v35_v15, %v43_v16  ;;  %v665_v29 = vcombine.low %v35_v15, %v43_v16 }
   0x5   :  { %v646_v11 = vcombine.high %v17_v7, %v25_v8  ;;  %309 = vmatprep.subr.bf16.mxu0 %v662_v4  ;;  %v648_v14 = vcombine.high %v18_v12, %v26_v13  ;;  %350 = vmatprep.subr.bf16.mxu1 %v664_v9  ;;  %v645_v18 = vcombine.low %v17_v7, %v25_v8  ;;  %v15_v19 = vld [vmem:[%s897_s0] sm:$0xff]  ;;  %v19_v24 = vld [vmem:[%s896_s1 + $0x10] sm:$0xff]  ;;  %v20_v27 = vld [vmem:[%s896_s1 + $0x18] sm:$0xff]  ;;  %v53_v4 = vlaneseq }
   0x6   :  { %310 = vmatpush1.bf16.msra.mxu0 %v661_v6  ;;  %351 = vmatpush1.bf16.msra.mxu1 %v663_v10  ;;  %v647_v21 = vcombine.low %v18_v12, %v26_v13  ;;  %v668_v23 = vcombine.high %v36_v17, %v44_v20  ;;  %v27_v25 = vld [vmem:[%s896_s1 + $0x50] sm:$0xff]  ;;  %v754_v26 = vpack.c.bf16 %v15_v19, %v15_v19  ;;  %v28_v28 = vld [vmem:[%s896_s1 + $0x58] sm:$0xff]  ;;  %v37_v33 = vld [vmem:[%s896_s1 + $0xa0] sm:$0xff] }
   0x7   :  { %311 = vmatprep.subr.bf16.mxu0 %v646_v11  ;;  %352 = vmatprep.subr.bf16.mxu1 %v648_v14  ;;  %v667_v30 = vcombine.low %v36_v17, %v44_v20  ;;  %v650_v31 = vcombine.high %v19_v24, %v27_v25  ;;  %v652_v32 = vcombine.high %v20_v27, %v28_v28  ;;  %v45_v34 = vld [vmem:[%s896_s1 + $0xe0] sm:$0xff]  ;;  %v38_v35 = vld [vmem:[%s896_s1 + $0xa8] sm:$0xff]  ;;  %v39_v49 = vld [vmem:[%s896_s1 + $0xb0] sm:$0xff]  ;;  %v832_v5 = vshrl.u32 %v53_v4, 7 }
   0x8   :  { %v46_v36 = vld [vmem:[%s896_s1 + $0xe8] sm:$0xff]  ;;  %v649_v37 = vcombine.low %v19_v24, %v27_v25  ;;  %v651_v38 = vcombine.low %v20_v27, %v28_v28  ;;  %v670_v39 = vcombine.high %v37_v33, %v45_v34  ;;  %v21_v41 = vld [vmem:[%s896_s1 + $0x20] sm:$0xff]  ;;  %v669_v45 = vcombine.low %v37_v33, %v45_v34  ;;  %v47_v50 = vld [vmem:[%s896_s1 + $0xf0] sm:$0xff] }
   0x9   :  { %v672_v40 = vcombine.high %v38_v35, %v46_v36  ;;  %v29_v42 = vld [vmem:[%s896_s1 + $0x60] sm:$0xff]  ;;  %v22_v43 = vld [vmem:[%s896_s1 + $0x28] sm:$0xff]  ;;  %v671_v46 = vcombine.low %v38_v35, %v46_v36  ;;  %v40_v51 = vld [vmem:[%s896_s1 + $0xb8] sm:$0xff]  ;;  %v674_v55 = vcombine.high %v39_v49, %v47_v50  ;;  %v673_v61 = vcombine.low %v39_v49, %v47_v50 }
   0xa   :  { %312 = vmatpush1.bf16.msra.mxu0 %v645_v18  ;;  %353 = vmatpush1.bf16.msra.mxu1 %v647_v21  ;;  %v30_v44 = vld [vmem:[%s896_s1 + $0x68] sm:$0xff]  ;;  %v654_v47 = vcombine.high %v21_v41, %v29_v42  ;;  %v48_v52 = vld [vmem:[%s896_s1 + $0xf8] sm:$0xff]  ;;  %v653_v53 = vcombine.low %v21_v41, %v29_v42  ;;  %v23_v57 = vld [vmem:[%s896_s1 + $0x30] sm:$0xff]  ;;  %v55_v6 = vsub.s32 0, %v832_v5  ;;  %v63_v8 = vsub.s32 2, %v832_v5 }
   0xb   :  { %391 = vmatprep.subr.bf16.mxu0 %v666_v22  ;;  %432 = vmatprep.subr.bf16.mxu1 %v668_v23  ;;  %v656_v48 = vcombine.high %v22_v43, %v30_v44  ;;  %v655_v54 = vcombine.low %v22_v43, %v30_v44  ;;  %v676_v56 = vcombine.high %v40_v51, %v48_v52  ;;  %v31_v58 = vld [vmem:[%s896_s1 + $0x70] sm:$0xff]  ;;  %v24_v59 = vld [vmem:[%s896_s1 + $0x38] sm:$0xff]  ;;  %v49_v7 = vld [vmem:[%s898_s2] sm:$0xff]  ;;  %v67_v9 = vsub.s32 3, %v832_v5 }
   0xc   :  { %v32_v60 = vld [vmem:[%s896_s1 + $0x78] sm:$0xff]  ;;  %v675_v62 = vcombine.low %v40_v51, %v48_v52  ;;  %v658_v63 = vcombine.high %v23_v57, %v31_v58  ;;  %v657_v1 = vcombine.low %v23_v57, %v31_v58  ;;  %v56_v10 = vrot.slane %v49_v7, %v55_v6 }
   0xd   :  { %677 = vmatmul.mubr.msk.bf16.vlgmr.msra.gmra.mxu0 %vm293_vm0, %v754_v26  ;;  %678 = vmatmul.mubr.msk.bf16.vlgmr.msra.gmra.mxu1 %vm293_vm0, %v754_v26  ;;  %v660_v0 = vcombine.high %v24_v59, %v32_v60  ;;  %v659_v2 = vcombine.low %v24_v59, %v32_v60  ;;  %v64_v11 = vrot.slane %v49_v7, %v63_v8  ;;  %v71_v17 = vsub.s32 4, %v832_v5 }
   0xe   :  { %392 = vmatpush1.bf16.msra.mxu0 %v665_v29  ;;  %433 = vmatpush1.bf16.msra.mxu1 %v667_v30  ;;  %v68_v14 = vrot.slane %v49_v7, %v67_v9  ;;  %v79_v20 = vsub.s32 6, %v832_v5  ;;  %v75_v23 = vsub.s32 5, %v832_v5 }
   0xf   :  { %393 = vmatprep.subr.bf16.mxu0 %v650_v31  ;;  %434 = vmatprep.subr.bf16.mxu1 %v652_v32  ;;  %v72_v28 = vrot.slane %v49_v7, %v71_v17 }
  0x10   :  { %411 = vmatprep.mubr.bf16.mxu0 %v686_v3  ;;  %452 = vmatprep.mubr.bf16.mxu1 %v686_v3  ;;  %v80_v30 = vrot.slane %v49_v7, %v79_v20  ;;  %v76_v32 = vrot.slane %v49_v7, %v75_v23 }
  0x12   :  { %394 = vmatpush1.bf16.msra.mxu0 %v649_v37  ;;  %435 = vmatpush1.bf16.msra.mxu1 %v651_v38 }
  0x13   :  { %473 = vmatprep.subr.bf16.mxu0 %v670_v39  ;;  %514 = vmatprep.subr.bf16.mxu1 %v672_v40  ;;  %v50_v39 = vld [vmem:[%s898_s2 + $0x8] sm:$0xff] }
  0x14   :  { %v100_v51 = vrot.slane %v50_v39, %v67_v9 }
  0x15   :  { %679 = vmatmul.mubr.msk.bf16.vlgmr.msra.gmra.mxu0 %vm293_vm0, %v754_v26  ;;  %680 = vmatmul.mubr.msk.bf16.vlgmr.msra.gmra.mxu1 %vm293_vm0, %v754_v26 }
  0x16   :  { %474 = vmatpush1.bf16.msra.mxu0 %v669_v45  ;;  %515 = vmatpush1.bf16.msra.mxu1 %v671_v46  ;;  %v88_v45 = vrot.slane %v50_v39, %v55_v6 }
  0x17   :  { %475 = vmatprep.subr.bf16.mxu0 %v654_v47  ;;  %516 = vmatprep.subr.bf16.mxu1 %v656_v48  ;;  %v96_v47 = vrot.slane %v50_v39, %v63_v8 }
  0x18   :  { %493 = vmatprep.mubr.bf16.mxu0 %v686_v3  ;;  %534 = vmatprep.mubr.bf16.mxu1 %v686_v3 }
  0x1a   :  { %476 = vmatpush1.bf16.msra.mxu0 %v653_v53  ;;  %517 = vmatpush1.bf16.msra.mxu1 %v655_v54 }
  0x1b   :  { %555 = vmatprep.subr.bf16.mxu0 %v674_v55  ;;  %596 = vmatprep.subr.bf16.mxu1 %v676_v56 }
  0x1d   :  { %681 = vmatmul.mubr.msk.bf16.vlgmr.msra.gmra.mxu0 %vm293_vm0, %v754_v26  ;;  %682 = vmatmul.mubr.msk.bf16.vlgmr.msra.gmra.mxu1 %vm293_vm0, %v754_v26 }
  0x1e   :  { %556 = vmatpush1.bf16.msra.mxu0 %v673_v61  ;;  %597 = vmatpush1.bf16.msra.mxu1 %v675_v62  ;;  %v104_v61 = vrot.slane %v50_v39, %v71_v17 }
  0x1f   :  { %557 = vmatprep.subr.bf16.mxu0 %v658_v63  ;;  %598 = vmatprep.subr.bf16.mxu1 %v660_v0  ;;  %v112_v63 = vrot.slane %v50_v39, %v79_v20 }
  0x20   :  { %575 = vmatprep.mubr.bf16.mxu0 %v686_v3  ;;  %616 = vmatprep.mubr.bf16.mxu1 %v686_v3  ;;  %v59_v3 = vsub.s32 1, %v832_v5 }
  0x22   :  { %558 = vmatpush1.bf16.msra.mxu0 %v657_v1  ;;  %599 = vmatpush1.bf16.msra.mxu1 %v659_v2  ;;  %v60_v12 = vrot.slane %v49_v7, %v59_v3  ;;  %v92_v49 = vrot.slane %v50_v39, %v59_v3  ;;  %v108_v1 = vrot.slane %v50_v39, %v75_v23 }
  0x25   :  { %683 = vmatmul.mubr.msk.bf16.vlgmr.msra.gmra.mxu0 %vm293_vm0, %v754_v26  ;;  %684 = vmatmul.mubr.msk.bf16.vlgmr.msra.gmra.mxu1 %vm293_vm0, %v754_v26  ;;  %v83_v26 = vsub.s32 7, %v832_v5 }
  0x27   :  { %v84_v34 = vrot.slane %v49_v7, %v83_v26  ;;  %v116_v4 = vrot.slane %v50_v39, %v83_v26 }
  0xcd   :  { %v331_v13 = vpop.f32.mrf.mxu0  ;;  %v372_v16 = vpop.f32.mrf.mxu1 }
  0xce   :  { %v332_v15 = vadd.f32 %v331_v13, %v56_v10  ;;  %v373_v18 = vadd.f32 %v372_v16, %v64_v11 }
  0xcf   :  { %v333_v19 = vpop.f32.mrf.mxu0  ;;  %v374_v22 = vpop.f32.mrf.mxu1 }
  0xd0   :  { %625 = vst [vmem:[%s899_s3] sm:$0xff] %v332_v15  ;;  %v334_v21 = vadd.f32 %v333_v19, %v60_v12  ;;  %627 = vst [vmem:[%s899_s3 + $0x10] sm:$0xff] %v373_v18  ;;  %v375_v24 = vadd.f32 %v374_v22, %v68_v14 }
  0xd1   :  { %v335_v25 = vpop.f32.mrf.mxu0  ;;  %v376_v27 = vpop.f32.mrf.mxu1 }
  0xd2   :  { %626 = vst [vmem:[%s899_s3 + $0x8] sm:$0xff] %v334_v21  ;;  %628 = vst [vmem:[%s899_s3 + $0x18] sm:$0xff] %v375_v24 }
  0xd3   :  { %v336_v29 = vpop.f32.mrf.mxu0  ;;  %v377_v31 = vpop.f32.mrf.mxu1 }
  0xd5   :  { %v413_v33 = vpop.f32.mrf.mxu0  ;;  %v454_v36 = vpop.f32.mrf.mxu1 }
  0xd6   :  { %v414_v35 = vadd.f32 %v413_v33, %v72_v28  ;;  %v455_v37 = vadd.f32 %v454_v36, %v80_v30 }
  0xd7   :  { %v415_v38 = vpop.f32.mrf.mxu0  ;;  %v456_v41 = vpop.f32.mrf.mxu1 }
  0xd8   :  { %629 = vst [vmem:[%s899_s3 + $0x20] sm:$0xff] %v414_v35  ;;  %v416_v40 = vadd.f32 %v415_v38, %v76_v32  ;;  %631 = vst [vmem:[%s899_s3 + $0x30] sm:$0xff] %v455_v37  ;;  %v457_v42 = vadd.f32 %v456_v41, %v84_v34 }
  0xd9   :  { %v417_v43 = vpop.f32.mrf.mxu0  ;;  %v458_v44 = vpop.f32.mrf.mxu1 }
  0xda   :  { %630 = vst [vmem:[%s899_s3 + $0x28] sm:$0xff] %v416_v40  ;;  %632 = vst [vmem:[%s899_s3 + $0x38] sm:$0xff] %v457_v42 }
  0xdb   :  { %v418_v46 = vpop.f32.mrf.mxu0  ;;  %v459_v48 = vpop.f32.mrf.mxu1 }
  0xdd   :  { %v495_v50 = vpop.f32.mrf.mxu0  ;;  %v536_v53 = vpop.f32.mrf.mxu1 }
  0xde   :  { %v496_v52 = vadd.f32 %v495_v50, %v88_v45  ;;  %v537_v54 = vadd.f32 %v536_v53, %v96_v47 }
  0xdf   :  { %v497_v55 = vpop.f32.mrf.mxu0  ;;  %v538_v57 = vpop.f32.mrf.mxu1 }
  0xe0   :  { %633 = vst [vmem:[%s899_s3 + $0x40] sm:$0xff] %v496_v52  ;;  %v498_v56 = vadd.f32 %v497_v55, %v92_v49  ;;  %635 = vst [vmem:[%s899_s3 + $0x50] sm:$0xff] %v537_v54  ;;  %v539_v58 = vadd.f32 %v538_v57, %v100_v51 }
  0xe1   :  { %v499_v59 = vpop.f32.mrf.mxu0  ;;  %v540_v60 = vpop.f32.mrf.mxu1 }
  0xe2   :  { %634 = vst [vmem:[%s899_s3 + $0x48] sm:$0xff] %v498_v56  ;;  %636 = vst [vmem:[%s899_s3 + $0x58] sm:$0xff] %v539_v58 }
  0xe3   :  { %v500_v62 = vpop.f32.mrf.mxu0  ;;  %v541_v0 = vpop.f32.mrf.mxu1 }
  0xe5   :  { %v577_v2 = vpop.f32.mrf.mxu0  ;;  %v618_v6 = vpop.f32.mrf.mxu1 }
  0xe6   :  { %v578_v5 = vadd.f32 %v577_v2, %v104_v61  ;;  %v619_v7 = vadd.f32 %v618_v6, %v112_v63 }
  0xe7   :  { %v579_v8 = vpop.f32.mrf.mxu0  ;;  %v620_v9 = vpop.f32.mrf.mxu1 }
  0xe8   :  { %637 = vst [vmem:[%s899_s3 + $0x60] sm:$0xff] %v578_v5  ;;  %v580_v3 = vadd.f32 %v579_v8, %v108_v1  ;;  %639 = vst [vmem:[%s899_s3 + $0x70] sm:$0xff] %v619_v7  ;;  %v621_v10 = vadd.f32 %v620_v9, %v116_v4 }
  0xe9   :  { %v581_v11 = vpop.f32.mrf.mxu0  ;;  %v622_v12 = vpop.f32.mrf.mxu1 }
  0xea   :  { %638 = vst [vmem:[%s899_s3 + $0x68] sm:$0xff] %v580_v3  ;;  %640 = vst [vmem:[%s899_s3 + $0x78] sm:$0xff] %v621_v10 }
  0xeb   :  { %v582_v13 = vpop.f32.mrf.mxu0  ;;  %v623_v14 = vpop.f32.mrf.mxu1 }

// kernel: _lambda_.7
= control target key start
LH: loop header
LB: loop body
LE: loop exit
PB: predicated region body
PF: predicated region fallthrough
CT: control target
= control target key end

     0   :  { %s1730_s12 = smov 0   ;;  %s1732_s13 = smov 0   ;;  %s2315_s0 = inlined_call_operand.vmem [shape: f32[2,128,64], index: 0, kind: input, shape index: {}]   ;;  %s2316_s1 = inlined_call_operand.vmem [shape: bf16[512,64], index: 1, kind: input, shape index: {}]   ;;  %s2317_s2 = inlined_call_operand.vmem [shape: f32[512,1], index: 2, kind: input, shape index: {}]   ;;  %s2318_s3 = inlined_call_operand.vmem [shape: f32[2,512,128], index: 3, kind: output, shape index: {}]  }
   0x1   :  { %s1734_s14 = smov 0  }
   0x2 LB: > { %s25_s15 = sadd.s32 1, %s1703_s13  ;;  %p1401_p0 = scmp.ge.s32.totalorder %s1707_s14, 1  ;;  %s1707_s14 = sphi %s1734_s14, %s13_s14   ;;  %s1703_s13 = sphi %s1732_s13, %s2320_s13   ;;  %s1699_s12 = sphi %s1730_s12, %s2319_s12  }
   0x3   : > { %p27_p1 = scmp.ge.s32.totalorder %s25_s15, 2  ;;  %p158_p2 = scmp.lt.s32.totalorder %s1707_s14, 3 }
   0x5   : > { %s2322_s15 = smov (%p27_p1, %s25_s15), 0  ;;  %p159_p3 = pnand %p1401_p0, %p158_p2 }
   0x6   : > { %p190_p4 = scmp.lt.s32.totalorder (!%p159_p3), %s1699_s12, 1 }
   0x7   : > { %162 = sbr.rel (%p159_p3) target bundleno = 341 (0x155), region = 32 }
   0xc   : > { %v298_v0 = vld [vmem:[%s2317_s2 + $0x10] sm:$0xff]  ;;  %v296_v1 = vld [vmem:[%s2317_s2] sm:$0xff]  ;;  %v1709_v2 = vmov 0   ;;  %s2324_s12 = smov (!%p190_p4, %s1699_s12), 1  ;;  %v299_v3 = vld [vmem:[%s2317_s2 + $0x18] sm:$0xff]  ;;  %vm840_vm0 = vcmask 523264  }
   0xd   : > { %1652 = vset.pattern.permute.xlu1 %v1709_v2  ;;  %1651 = vset.pattern.permute.xlu0 %v1709_v2  ;;  %v297_v4 = vld [vmem:[%s2317_s2 + $0x8] sm:$0xff]  ;;  %s1472_s24 = sshll.u32 %s2324_s12, 7  ;;  %v300_v10 = vld [vmem:[%s2317_s2 + $0x20] sm:$0xff]  ;;  %v303_v14 = vld [vmem:[%s2317_s2 + $0x38] sm:$0xff]  ;;  %s1473_s30 = sshll.u32 %s2324_s12, 9 }
   0xe   : > { %372 = vperm.xlu1 %1652, %v298_v0   ;;  %362 = vperm.xlu0 %1651, %v296_v1   ;;  %s1766_s27 = scalar_lea.vmem %s2315_s0, %s1472_s24  ;;  %v301_v9 = vld [vmem:[%s2317_s2 + $0x28] sm:$0xff]  ;;  %v302_v15 = vld [vmem:[%s2317_s2 + $0x30] sm:$0xff]  ;;  %v304_v19 = vld [vmem:[%s2317_s2 + $0x40] sm:$0xff]  ;;  %s2184_s6 = scalar_lea.vmem %s2318_s3, %s1473_s30 }
   0xf   : > { %v222_v5 = vld [vmem:[%s1766_s27 + $0x70] sm:$0xff]  ;;  %v223_v6 = vld [vmem:[%s1766_s27 + $0x78] sm:$0xff]  ;;  %v220_v7 = vld [vmem:[%s1766_s27 + $0x60] sm:$0xff] }
  0x10   : > { %v231_v8 = vpack.c.bf16 %v223_v6, %v222_v5  ;;  %v221_v11 = vld [vmem:[%s1766_s27 + $0x68] sm:$0xff]  ;;  %v218_v16 = vld [vmem:[%s1766_s27 + $0x50] sm:$0xff]  ;;  %v219_v17 = vld [vmem:[%s1766_s27 + $0x58] sm:$0xff] }
  0x11   : > { %v230_v12 = vpack.c.bf16 %v221_v11, %v220_v7  ;;  %v305_v18 = vld [vmem:[%s2317_s2 + $0x48] sm:$0xff]  ;;  %v229_v21 = vpack.c.bf16 %v219_v17, %v218_v16  ;;  %v307_v22 = vld [vmem:[%s2317_s2 + $0x58] sm:$0xff]  ;;  %v306_v23 = vld [vmem:[%s2317_s2 + $0x50] sm:$0xff] }
  0x12   : > { %377 = vperm.xlu1 %1652, %v299_v3   ;;  %367 = vperm.xlu0 %1651, %v297_v4   ;;  %v959_v13 = vsel %vm840_vm0, %v231_v8, 0  ;;  %v1653_v24 = vld [vmem:[%s2316_s1] sm:$0xff]   ;;  %v217_v27 = vld [vmem:[%s1766_s27 + $0x48] sm:$0xff]  ;;  %v311_v32 = vld [vmem:[%s2317_s2 + $0x78] sm:$0xff] }
  0x13   : > { %1610 = vmatprep.subr.msk.bf16.mxu0 %vm840_vm0, %v231_v8  ;;  %1611 = vmatprep.subr.msk.bf16.mxu1 %vm840_vm0, %v231_v8  ;;  %v956_v20 = vsel %vm840_vm0, %v230_v12, 0  ;;  %v1654_v25 = vld [vmem:[%s2316_s1 + $0x80] sm:$0xff]   ;;  %v309_v28 = vld [vmem:[%s2317_s2 + $0x68] sm:$0xff]  ;;  %v953_v30 = vsel %vm840_vm0, %v229_v21, 0  ;;  %v310_v33 = vld [vmem:[%s2317_s2 + $0x70] sm:$0xff] }
  0x14   : > { %1515 = vmatpush3.bf16.xpose.msra.mxu0 %v959_v13  ;;  %1602 = vmatpush3.bf16.xpose.msra.mxu1 %v959_v13  ;;  %v216_v26 = vld [vmem:[%s1766_s27 + $0x40] sm:$0xff]  ;;  %v214_v34 = vld [vmem:[%s1766_s27 + $0x30] sm:$0xff]  ;;  %v215_v35 = vld [vmem:[%s1766_s27 + $0x38] sm:$0xff] }
  0x15   : > { %1612 = vmatprep.subr.msk.bf16.mxu0 %vm840_vm0, %v230_v12  ;;  %1613 = vmatprep.subr.msk.bf16.mxu1 %vm840_vm0, %v230_v12  ;;  %v308_v29 = vld [vmem:[%s2317_s2 + $0x60] sm:$0xff]  ;;  %v228_v31 = vpack.c.bf16 %v217_v27, %v216_v26  ;;  %v313_v36 = vld [vmem:[%s2317_s2 + $0x88] sm:$0xff]  ;;  %v227_v39 = vpack.c.bf16 %v215_v35, %v214_v34  ;;  %v315_v40 = vld [vmem:[%s2317_s2 + $0x98] sm:$0xff] }
  0x16   : > { %387 = vperm.xlu1 %1652, %v301_v9   ;;  %382 = vperm.xlu0 %1651, %v300_v10   ;;  %v312_v37 = vld [vmem:[%s2317_s2 + $0x80] sm:$0xff]  ;;  %v314_v41 = vld [vmem:[%s2317_s2 + $0x90] sm:$0xff]  ;;  %v213_v43 = vld [vmem:[%s1766_s27 + $0x28] sm:$0xff] }
  0x17   : > { %1530 = vmatprep.mubr.msk.bf16.mxu0 %vm840_vm0, %v1653_v24  ;;  %1562 = vmatprep.mubr.msk.bf16.mxu1 %vm840_vm0, %v1654_v25  ;;  %v950_v38 = vsel %vm840_vm0, %v228_v31, 0  ;;  %v212_v42 = vld [vmem:[%s1766_s27 + $0x20] sm:$0xff]  ;;  %v317_v44 = vld [vmem:[%s2317_s2 + $0xa8] sm:$0xff]  ;;  %v947_v46 = vsel %vm840_vm0, %v227_v39, 0  ;;  %v319_v48 = vld [vmem:[%s2317_s2 + $0xb8] sm:$0xff] }
  0x18   : > { %v316_v45 = vld [vmem:[%s2317_s2 + $0xa0] sm:$0xff]  ;;  %v226_v47 = vpack.c.bf16 %v213_v43, %v212_v42  ;;  %v318_v49 = vld [vmem:[%s2317_s2 + $0xb0] sm:$0xff]  ;;  %v211_v51 = vld [vmem:[%s1766_s27 + $0x18] sm:$0xff] }
  0x19   : > { %v210_v50 = vld [vmem:[%s1766_s27 + $0x10] sm:$0xff]  ;;  %v321_v52 = vld [vmem:[%s2317_s2 + $0xc8] sm:$0xff]  ;;  %v320_v53 = vld [vmem:[%s2317_s2 + $0xc0] sm:$0xff] }
  0x1a   : > { %397 = vperm.xlu1 %1652, %v303_v14   ;;  %392 = vperm.xlu0 %1651, %v302_v15   ;;  %v944_v54 = vsel %vm840_vm0, %v226_v47, 0  ;;  %v225_v55 = vpack.c.bf16 %v211_v51, %v210_v50  ;;  %v323_v56 = vld [vmem:[%s2317_s2 + $0xd8] sm:$0xff]  ;;  %v322_v57 = vld [vmem:[%s2317_s2 + $0xd0] sm:$0xff]  ;;  %v208_v58 = vld [vmem:[%s1766_s27] sm:$0xff] }
  0x1b   : > { %v209_v59 = vld [vmem:[%s1766_s27 + $0x8] sm:$0xff]  ;;  %v324_v61 = vld [vmem:[%s2317_s2 + $0xe0] sm:$0xff]  ;;  %v327_v0 = vld [vmem:[%s2317_s2 + $0xf8] sm:$0xff] }
  0x1c   : > { %1517 = vmatpush3.bf16.xpose.msra.mxu0 %v956_v20  ;;  %1603 = vmatpush3.bf16.xpose.msra.mxu1 %v956_v20  ;;  %v325_v60 = vld [vmem:[%s2317_s2 + $0xe8] sm:$0xff]  ;;  %v941_v62 = vsel %vm840_vm0, %v225_v55, 0  ;;  %v224_v63 = vpack.c.bf16 %v209_v59, %v208_v58  ;;  %v326_v1 = vld [vmem:[%s2317_s2 + $0xf0] sm:$0xff]  ;;  %v328_v3 = vld [vmem:[%s2317_s2 + $0x100] sm:$0xff] }
  0x1d   : > { %1614 = vmatprep.subr.msk.bf16.mxu0 %vm840_vm0, %v229_v21  ;;  %1615 = vmatprep.subr.msk.bf16.mxu1 %vm840_vm0, %v229_v21  ;;  %v329_v2 = vld [vmem:[%s2317_s2 + $0x108] sm:$0xff]  ;;  %v331_v5 = vld [vmem:[%s2317_s2 + $0x118] sm:$0xff]  ;;  %v330_v6 = vld [vmem:[%s2317_s2 + $0x110] sm:$0xff] }
  0x1e   : > { %407 = vperm.xlu1 %1652, %v305_v18   ;;  %402 = vperm.xlu0 %1651, %v304_v19   ;;  %v938_v4 = vsel %vm840_vm0, %v224_v63, 0  ;;  %v1655_v7 = vld [vmem:[%s2316_s1 + $0x8] sm:$0xff]   ;;  %v332_v10 = vld [vmem:[%s2317_s2 + $0x120] sm:$0xff]  ;;  %v1657_v11 = vld [vmem:[%s2316_s1 + $0x10] sm:$0xff]  }
  0x1f   : > { %v1656_v8 = vld [vmem:[%s2316_s1 + $0x88] sm:$0xff]   ;;  %v1658_v12 = vld [vmem:[%s2316_s1 + $0x90] sm:$0xff]   ;;  %v335_v13 = vld [vmem:[%s2317_s2 + $0x138] sm:$0xff] }
  0x20   : > { %v333_v9 = vld [vmem:[%s2317_s2 + $0x128] sm:$0xff]  ;;  %v334_v14 = vld [vmem:[%s2317_s2 + $0x130] sm:$0xff]  ;;  %v1659_v15 = vld [vmem:[%s2316_s1 + $0x18] sm:$0xff]  }
  0x21   : > { %v1660_v16 = vld [vmem:[%s2316_s1 + $0x98] sm:$0xff]   ;;  %v337_v17 = vld [vmem:[%s2317_s2 + $0x148] sm:$0xff]  ;;  %v336_v18 = vld [vmem:[%s2317_s2 + $0x140] sm:$0xff] }
  0x22   : > { %417 = vperm.xlu1 %1652, %v307_v22   ;;  %412 = vperm.xlu0 %1651, %v306_v23   ;;  %v1661_v19 = vld [vmem:[%s2316_s1 + $0x20] sm:$0xff]   ;;  %v339_v21 = vld [vmem:[%s2317_s2 + $0x158] sm:$0xff]  ;;  %v338_v22 = vld [vmem:[%s2317_s2 + $0x150] sm:$0xff] }
  0x23   : > { %v1662_v20 = vld [vmem:[%s2316_s1 + $0xa0] sm:$0xff]   ;;  %v1663_v23 = vld [vmem:[%s2316_s1 + $0x28] sm:$0xff]   ;;  %v1665_v27 = vld [vmem:[%s2316_s1 + $0x30] sm:$0xff]  }
  0x24   : > { %1519 = vmatpush3.bf16.xpose.msra.mxu0 %v953_v30  ;;  %1604 = vmatpush3.bf16.xpose.msra.mxu1 %v953_v30  ;;  %v1664_v24 = vld [vmem:[%s2316_s1 + $0xa8] sm:$0xff]   ;;  %v340_v26 = vld [vmem:[%s2317_s2 + $0x160] sm:$0xff]  ;;  %v342_v30 = vld [vmem:[%s2317_s2 + $0x170] sm:$0xff] }
  0x25   : > { %1616 = vmatprep.subr.msk.bf16.mxu0 %vm840_vm0, %v228_v31  ;;  %1617 = vmatprep.subr.msk.bf16.mxu1 %vm840_vm0, %v228_v31  ;;  %v341_v25 = vld [vmem:[%s2317_s2 + $0x168] sm:$0xff]  ;;  %v1667_v31 = vld [vmem:[%s2316_s1 + $0x38] sm:$0xff]   ;;  %v344_v34 = vld [vmem:[%s2317_s2 + $0x180] sm:$0xff] }
  0x26   : > { %427 = vperm.xlu1 %1652, %v309_v28   ;;  %422 = vperm.xlu0 %1651, %v308_v29   ;;  %v1666_v28 = vld [vmem:[%s2316_s1 + $0xb0] sm:$0xff]   ;;  %v343_v29 = vld [vmem:[%s2317_s2 + $0x178] sm:$0xff]  ;;  %v1669_v35 = vld [vmem:[%s2316_s1 + $0x40] sm:$0xff]  }
  0x27   : > { %v348_v42 = vld [vmem:[%s2317_s2 + $0x1a0] sm:$0xff]  ;;  %v1673_v43 = vld [vmem:[%s2316_s1 + $0x50] sm:$0xff]  }
  0x28   : > { %v352_v50 = vld [vmem:[%s2317_s2 + $0x1c0] sm:$0xff]  ;;  %v1681_v59 = vld [vmem:[%s2316_s1 + $0x70] sm:$0xff]  }
  0x29   : > { %v1677_v51 = vld [vmem:[%s2316_s1 + $0x60] sm:$0xff]  }
  0x2a   : > { %437 = vperm.xlu1 %1652, %v311_v32   ;;  %432 = vperm.xlu0 %1651, %v310_v33   ;;  %v1668_v32 = vld [vmem:[%s2316_s1 + $0xb8] sm:$0xff]   ;;  %v345_v33 = vld [vmem:[%s2317_s2 + $0x188] sm:$0xff]  ;;  %v356_v58 = vld [vmem:[%s2317_s2 + $0x1e0] sm:$0xff] }
  0x2c   : > { %1521 = vmatpush3.bf16.xpose.msra.mxu0 %v950_v38  ;;  %1605 = vmatpush3.bf16.xpose.msra.mxu1 %v950_v38  ;;  %v346_v38 = vld [vmem:[%s2317_s2 + $0x190] sm:$0xff] }
  0x2d   : > { %1618 = vmatprep.subr.msk.bf16.mxu0 %vm840_vm0, %v227_v39  ;;  %1619 = vmatprep.subr.msk.bf16.mxu1 %vm840_vm0, %v227_v39  ;;  %v1671_v39 = vld [vmem:[%s2316_s1 + $0x48] sm:$0xff]  }
  0x2e   : > { %447 = vperm.xlu1 %1652, %v313_v36   ;;  %442 = vperm.xlu0 %1651, %v312_v37   ;;  %v1670_v36 = vld [vmem:[%s2316_s1 + $0xc0] sm:$0xff]   ;;  %v347_v37 = vld [vmem:[%s2317_s2 + $0x198] sm:$0xff] }
  0x32   : > { %457 = vperm.xlu1 %1652, %v315_v40   ;;  %452 = vperm.xlu0 %1651, %v314_v41   ;;  %v1672_v40 = vld [vmem:[%s2316_s1 + $0xc8] sm:$0xff]  }
  0x33   : > { %v349_v41 = vld [vmem:[%s2317_s2 + $0x1a8] sm:$0xff] }
  0x34   : > { %1523 = vmatpush3.bf16.xpose.msra.mxu0 %v947_v46  ;;  %1606 = vmatpush3.bf16.xpose.msra.mxu1 %v947_v46  ;;  %v350_v46 = vld [vmem:[%s2317_s2 + $0x1b0] sm:$0xff] }
  0x35   : > { %1620 = vmatprep.subr.msk.bf16.mxu0 %vm840_vm0, %v226_v47  ;;  %1621 = vmatprep.subr.msk.bf16.mxu1 %vm840_vm0, %v226_v47  ;;  %v1675_v47 = vld [vmem:[%s2316_s1 + $0x58] sm:$0xff]  }
  0x36   : > { %467 = vperm.xlu1 %1652, %v317_v44   ;;  %462 = vperm.xlu0 %1651, %v316_v45   ;;  %v1674_v44 = vld [vmem:[%s2316_s1 + $0xd0] sm:$0xff]   ;;  %v351_v45 = vld [vmem:[%s2317_s2 + $0x1b8] sm:$0xff] }
  0x3a   : > { %477 = vperm.xlu1 %1652, %v319_v48   ;;  %472 = vperm.xlu0 %1651, %v318_v49   ;;  %v1676_v48 = vld [vmem:[%s2316_s1 + $0xd8] sm:$0xff]   ;;  %v353_v49 = vld [vmem:[%s2317_s2 + $0x1c8] sm:$0xff] }
  0x3c   : > { %1525 = vmatpush3.bf16.xpose.msra.mxu0 %v944_v54  ;;  %1607 = vmatpush3.bf16.xpose.msra.mxu1 %v944_v54  ;;  %v354_v54 = vld [vmem:[%s2317_s2 + $0x1d0] sm:$0xff] }
  0x3d   : > { %1622 = vmatprep.subr.msk.bf16.mxu0 %vm840_vm0, %v225_v55  ;;  %1623 = vmatprep.subr.msk.bf16.mxu1 %vm840_vm0, %v225_v55  ;;  %v1679_v55 = vld [vmem:[%s2316_s1 + $0x68] sm:$0xff]  }
  0x3e   : > { %487 = vperm.xlu1 %1652, %v321_v52   ;;  %482 = vperm.xlu0 %1651, %v320_v53   ;;  %v1678_v52 = vld [vmem:[%s2316_s1 + $0xe0] sm:$0xff]   ;;  %v355_v53 = vld [vmem:[%s2317_s2 + $0x1d8] sm:$0xff] }
  0x42   : > { %497 = vperm.xlu1 %1652, %v323_v56   ;;  %492 = vperm.xlu0 %1651, %v322_v57   ;;  %v1680_v56 = vld [vmem:[%s2316_s1 + $0xe8] sm:$0xff]  }
  0x43   : > { %v357_v57 = vld [vmem:[%s2317_s2 + $0x1e8] sm:$0xff] }
  0x44   : > { %1527 = vmatpush3.bf16.xpose.msra.mxu0 %v941_v62  ;;  %1608 = vmatpush3.bf16.xpose.msra.mxu1 %v941_v62  ;;  %v358_v62 = vld [vmem:[%s2317_s2 + $0x1f0] sm:$0xff] }
  0x45   : > { %1624 = vmatprep.subr.msk.bf16.mxu0 %vm840_vm0, %v224_v63  ;;  %1625 = vmatprep.subr.msk.bf16.mxu1 %vm840_vm0, %v224_v63  ;;  %v1683_v63 = vld [vmem:[%s2316_s1 + $0x78] sm:$0xff]  }
  0x46   : > { %507 = vperm.xlu1 %1652, %v325_v60   ;;  %502 = vperm.xlu0 %1651, %v324_v61   ;;  %v1682_v60 = vld [vmem:[%s2316_s1 + $0xf0] sm:$0xff]   ;;  %v359_v61 = vld [vmem:[%s2317_s2 + $0x1f8] sm:$0xff] }
  0x4a   : > { %517 = vperm.xlu1 %1652, %v327_v0   ;;  %512 = vperm.xlu0 %1651, %v326_v1   ;;  %v1684_v0 = vld [vmem:[%s2316_s1 + $0xf8] sm:$0xff]  }
  0x4c   : > { %1529 = vmatpush3.bf16.xpose.msra.mxu0 %v938_v4  ;;  %1609 = vmatpush3.bf16.xpose.msra.mxu1 %v938_v4 }
  0x4e   : > { %527 = vperm.xlu1 %1652, %v329_v2   ;;  %522 = vperm.xlu0 %1651, %v328_v3  }
  0x52   : > { %537 = vperm.xlu1 %1652, %v331_v5   ;;  %532 = vperm.xlu0 %1651, %v330_v6  }
  0x53   : > { %1531 = vmatmul.mubr.msk.bf16.vlgmr.msra.gmra.mxu0 %vm840_vm0, %v1655_v7  ;;  %1563 = vmatmul.mubr.msk.bf16.vlgmr.msra.gmra.mxu1 %vm840_vm0, %v1656_v8 }
  0x54   : > { %1534 = vmatprep.mubr.msk.bf16.mxu0 %vm840_vm0, %v1657_v11  ;;  %1566 = vmatprep.mubr.msk.bf16.mxu1 %vm840_vm0, %v1658_v12 }
  0x56   : > { %547 = vperm.xlu1 %1652, %v333_v9   ;;  %542 = vperm.xlu0 %1651, %v332_v10  }
  0x5a   : > { %557 = vperm.xlu1 %1652, %v335_v13   ;;  %552 = vperm.xlu0 %1651, %v334_v14  }
  0x5b   : > { %1535 = vmatmul.mubr.msk.bf16.gmra.mxu0 %vm840_vm0, %v1659_v15  ;;  %1567 = vmatmul.mubr.msk.bf16.gmra.mxu1 %vm840_vm0, %v1660_v16 }
  0x5c   : > { %1538 = vmatprep.mubr.msk.bf16.mxu0 %vm840_vm0, %v1661_v19  ;;  %1570 = vmatprep.mubr.msk.bf16.mxu1 %vm840_vm0, %v1662_v20 }
  0x5e   : > { %567 = vperm.xlu1 %1652, %v337_v17   ;;  %562 = vperm.xlu0 %1651, %v336_v18  }
  0x62   : > { %577 = vperm.xlu1 %1652, %v339_v21   ;;  %572 = vperm.xlu0 %1651, %v338_v22  }
  0x63   : > { %1539 = vmatmul.mubr.msk.bf16.gmra.mxu0 %vm840_vm0, %v1663_v23  ;;  %1571 = vmatmul.mubr.msk.bf16.gmra.mxu1 %vm840_vm0, %v1664_v24 }
  0x64   : > { %1542 = vmatprep.mubr.msk.bf16.mxu0 %vm840_vm0, %v1665_v27  ;;  %1574 = vmatprep.mubr.msk.bf16.mxu1 %vm840_vm0, %v1666_v28 }
  0x66   : > { %587 = vperm.xlu1 %1652, %v341_v25   ;;  %582 = vperm.xlu0 %1651, %v340_v26  }
  0x6a   : > { %597 = vperm.xlu1 %1652, %v343_v29   ;;  %592 = vperm.xlu0 %1651, %v342_v30  }
  0x6b   : > { %1543 = vmatmul.mubr.msk.bf16.gmra.mxu0 %vm840_vm0, %v1667_v31  ;;  %1575 = vmatmul.mubr.msk.bf16.gmra.mxu1 %vm840_vm0, %v1668_v32 }
  0x6c   : > { %1546 = vmatprep.mubr.msk.bf16.mxu0 %vm840_vm0, %v1669_v35  ;;  %1578 = vmatprep.mubr.msk.bf16.mxu1 %vm840_vm0, %v1670_v36 }
  0x6e   : > { %607 = vperm.xlu1 %1652, %v345_v33   ;;  %602 = vperm.xlu0 %1651, %v344_v34  }
  0x72   : > { %617 = vperm.xlu1 %1652, %v347_v37   ;;  %612 = vperm.xlu0 %1651, %v346_v38  }
  0x73   : > { %1547 = vmatmul.mubr.msk.bf16.gmra.mxu0 %vm840_vm0, %v1671_v39  ;;  %1579 = vmatmul.mubr.msk.bf16.gmra.mxu1 %vm840_vm0, %v1672_v40 }
  0x74   : > { %1550 = vmatprep.mubr.msk.bf16.mxu0 %vm840_vm0, %v1673_v43  ;;  %1582 = vmatprep.mubr.msk.bf16.mxu1 %vm840_vm0, %v1674_v44 }
  0x76   : > { %627 = vperm.xlu1 %1652, %v349_v41   ;;  %622 = vperm.xlu0 %1651, %v348_v42  }
  0x7a   : > { %637 = vperm.xlu1 %1652, %v351_v45   ;;  %632 = vperm.xlu0 %1651, %v350_v46  }
  0x7b   : > { %1551 = vmatmul.mubr.msk.bf16.gmra.mxu0 %vm840_vm0, %v1675_v47  ;;  %1583 = vmatmul.mubr.msk.bf16.gmra.mxu1 %vm840_vm0, %v1676_v48 }
  0x7c   : > { %1554 = vmatprep.mubr.msk.bf16.mxu0 %vm840_vm0, %v1677_v51  ;;  %1586 = vmatprep.mubr.msk.bf16.mxu1 %vm840_vm0, %v1678_v52 }
  0x7e   : > { %647 = vperm.xlu1 %1652, %v353_v49   ;;  %642 = vperm.xlu0 %1651, %v352_v50  }
  0x82   : > { %657 = vperm.xlu1 %1652, %v355_v53   ;;  %652 = vperm.xlu0 %1651, %v354_v54  }
  0x83   : > { %1555 = vmatmul.mubr.msk.bf16.gmra.mxu0 %vm840_vm0, %v1679_v55  ;;  %1587 = vmatmul.mubr.msk.bf16.gmra.mxu1 %vm840_vm0, %v1680_v56 }
  0x84   : > { %1558 = vmatprep.mubr.msk.bf16.mxu0 %vm840_vm0, %v1681_v59  ;;  %1590 = vmatprep.mubr.msk.bf16.mxu1 %vm840_vm0, %v1682_v60 }
  0x86   : > { %667 = vperm.xlu1 %1652, %v357_v57   ;;  %662 = vperm.xlu0 %1651, %v356_v58  }
  0x89   : > { %v363_v1 = vpop.permute.xlu0 %362  ;;  %v373_v2 = vpop.permute.xlu1 %372 }
  0x8a   : > { %677 = vperm.xlu1 %1652, %v359_v61   ;;  %672 = vperm.xlu0 %1651, %v358_v62  }
  0x8b   : > { %1559 = vmatmul.mubr.msk.bf16.gmra.mxu0 %vm840_vm0, %v1683_v63  ;;  %1591 = vmatmul.mubr.msk.bf16.gmra.mxu1 %vm840_vm0, %v1684_v0 }
  0x8d   : > { %v2116_v3 = vpop.permute.xlu0 %367  ;;  %v378_v4 = vpop.permute.xlu1 %377 }
  0x91   : > { %v2118_v5 = vpop.permute.xlu0 %382  ;;  %v2120_v6 = vpop.permute.xlu1 %387 }
  0x95   : > { %v2122_v7 = vpop.permute.xlu0 %392  ;;  %v2124_v8 = vpop.permute.xlu1 %397 }
  0x99   : > { %v2126_v9 = vpop.permute.xlu0 %402  ;;  %v2128_v10 = vpop.permute.xlu1 %407 }
  0x9d   : > { %v2130_v11 = vpop.permute.xlu0 %412  ;;  %v2132_v12 = vpop.permute.xlu1 %417 }
  0xa1   : > { %v2134_v13 = vpop.permute.xlu0 %422  ;;  %v2136_v14 = vpop.permute.xlu1 %427 }
  0xa5   : > { %v2138_v15 = vpop.permute.xlu0 %432  ;;  %v2140_v16 = vpop.permute.xlu1 %437 }
  0xa9   : > { %v2142_v17 = vpop.permute.xlu0 %442  ;;  %v2144_v18 = vpop.permute.xlu1 %447 }
  0xad   : > { %v2146_v19 = vpop.permute.xlu0 %452  ;;  %v2148_v20 = vpop.permute.xlu1 %457 }
  0xb1   : > { %v2150_v21 = vpop.permute.xlu0 %462  ;;  %v2152_v22 = vpop.permute.xlu1 %467 }
  0xb5   : > { %v2154_v23 = vpop.permute.xlu0 %472  ;;  %v2156_v24 = vpop.permute.xlu1 %477 }
  0xb9   : > { %v2158_v25 = vpop.permute.xlu0 %482  ;;  %v2160_v26 = vpop.permute.xlu1 %487 }
  0xbd   : > { %v2162_v27 = vpop.permute.xlu0 %492  ;;  %v2164_v28 = vpop.permute.xlu1 %497 }
  0xc1   : > { %v2166_v29 = vpop.permute.xlu0 %502  ;;  %v2168_v30 = vpop.permute.xlu1 %507 }
  0xc5   : > { %v2170_v31 = vpop.permute.xlu0 %512  ;;  %v2172_v32 = vpop.permute.xlu1 %517 }
  0xc9   : > { %v523_v33 = vpop.permute.xlu0 %522  ;;  %v528_v34 = vpop.permute.xlu1 %527 }
  0xcd   : > { %v533_v35 = vpop.permute.xlu0 %532  ;;  %v538_v36 = vpop.permute.xlu1 %537 }
  0xd1   : > { %v543_v37 = vpop.permute.xlu0 %542  ;;  %v548_v38 = vpop.permute.xlu1 %547 }
  0xd5   : > { %v553_v39 = vpop.permute.xlu0 %552  ;;  %v558_v40 = vpop.permute.xlu1 %557 }
  0xd9   : > { %v2174_v41 = vpop.permute.xlu0 %562  ;;  %v2176_v42 = vpop.permute.xlu1 %567 }
  0xdd   : > { %v573_v43 = vpop.permute.xlu0 %572  ;;  %v2179_v44 = vpop.permute.xlu1 %577 }
  0xe1   : > { %v2186_v47 = vpop.permute.xlu0 %582  ;;  %v2190_v56 = vpop.permute.xlu1 %587 }
  0xe5   : > { %v2194_v61 = vpop.permute.xlu0 %592 }
 0x113   : > { %v1532_v45 = vpop.f32.mrf.mxu0  ;;  %v1564_v46 = vpop.f32.mrf.mxu1 }
 0x114   : > { %v1004_v48 = vadd.f32 %v1532_v45, %v373_v2  ;;  %v1132_v49 = vadd.f32 %v1564_v46, %v533_v35 }
 0x115   : > { %v995_v50 = vpop.f32.mrf.mxu0  ;;  %v1123_v51 = vpop.f32.mrf.mxu1 }
 0x116   : > { %1252 = vst [vmem:[%s2184_s6 + $0x10] sm:$0xff] %v1004_v48  ;;  %1284 = vst [vmem:[%s2184_s6 + $0x110] sm:$0xff] %v1132_v49  ;;  %v996_v52 = vadd.f32 %v995_v50, %v363_v1  ;;  %v1124_v53 = vadd.f32 %v1123_v51, %v523_v33  ;;  %v2207_v48 = vpop.permute.xlu0 %602 }
 0x117   : > { %v1533_v54 = vpop.f32.mrf.mxu0  ;;  %v1565_v55 = vpop.f32.mrf.mxu1 }
 0x118   : > { %1250 = vst [vmem:[%s2184_s6] sm:$0xff] %v996_v52  ;;  %1282 = vst [vmem:[%s2184_s6 + $0x100] sm:$0xff] %v1124_v53  ;;  %v1007_v57 = vadd.f32 %v1533_v54, %v378_v4  ;;  %v1135_v58 = vadd.f32 %v1565_v55, %v538_v36  ;;  %v2202_v36 = vpop.permute.xlu1 %597 }
 0x119   : > { %v998_v59 = vpop.f32.mrf.mxu0  ;;  %v1126_v60 = vpop.f32.mrf.mxu1 }
 0x11a   : > { %1253 = vst [vmem:[%s2184_s6 + $0x18] sm:$0xff] %v1007_v57  ;;  %1285 = vst [vmem:[%s2184_s6 + $0x118] sm:$0xff] %v1135_v58  ;;  %v999_v62 = vadd.f32 %v998_v59, %v2116_v3  ;;  %v1127_v63 = vadd.f32 %v1126_v60, %v528_v34  ;;  %v613_v57 = vpop.permute.xlu0 %612 }
 0x11b   : > { %v1536_v0 = vpop.f32.mrf.mxu0  ;;  %v1568_v1 = vpop.f32.mrf.mxu1 }
 0x11c   : > { %1251 = vst [vmem:[%s2184_s6 + $0x8] sm:$0xff] %v999_v62  ;;  %1283 = vst [vmem:[%s2184_s6 + $0x108] sm:$0xff] %v1127_v63  ;;  %v1020_v2 = vadd.f32 %v1536_v0, %v2122_v7  ;;  %v1148_v4 = vadd.f32 %v1568_v1, %v553_v39  ;;  %v2215_v53 = vpop.permute.xlu1 %607 }
 0x11d   : > { %v1011_v33 = vpop.f32.mrf.mxu0  ;;  %v1139_v35 = vpop.f32.mrf.mxu1 }
 0x11e   : > { %1256 = vst [vmem:[%s2184_s6 + $0x30] sm:$0xff] %v1020_v2  ;;  %1288 = vst [vmem:[%s2184_s6 + $0x130] sm:$0xff] %v1148_v4  ;;  %v1012_v3 = vadd.f32 %v1011_v33, %v2118_v5  ;;  %v1140_v34 = vadd.f32 %v1139_v35, %v543_v37  ;;  %v2232_v2 = vpop.permute.xlu0 %622 }
 0x11f   : > { %v1537_v45 = vpop.f32.mrf.mxu0  ;;  %v1569_v46 = vpop.f32.mrf.mxu1 }
 0x120   : > { %1254 = vst [vmem:[%s2184_s6 + $0x20] sm:$0xff] %v1012_v3  ;;  %1286 = vst [vmem:[%s2184_s6 + $0x120] sm:$0xff] %v1140_v34  ;;  %v1023_v7 = vadd.f32 %v1537_v45, %v2124_v8  ;;  %v1151_v39 = vadd.f32 %v1569_v46, %v558_v40  ;;  %v618_v63 = vpop.permute.xlu1 %617 }
 0x121   : > { %v1014_v49 = vpop.f32.mrf.mxu0  ;;  %v1142_v50 = vpop.f32.mrf.mxu1 }
 0x122   : > { %1257 = vst [vmem:[%s2184_s6 + $0x38] sm:$0xff] %v1023_v7  ;;  %1289 = vst [vmem:[%s2184_s6 + $0x138] sm:$0xff] %v1151_v39  ;;  %v1015_v5 = vadd.f32 %v1014_v49, %v2120_v6  ;;  %v1143_v37 = vadd.f32 %v1142_v50, %v548_v38  ;;  %v633_v7 = vpop.permute.xlu0 %632 }
 0x123   : > { %v1540_v51 = vpop.f32.mrf.mxu0  ;;  %v1572_v52 = vpop.f32.mrf.mxu1 }
 0x124   : > { %1255 = vst [vmem:[%s2184_s6 + $0x28] sm:$0xff] %v1015_v5  ;;  %1287 = vst [vmem:[%s2184_s6 + $0x128] sm:$0xff] %v1143_v37  ;;  %v1036_v8 = vadd.f32 %v1540_v51, %v2130_v11  ;;  %v1164_v40 = vadd.f32 %v1572_v52, %v573_v43  ;;  %v2242_v34 = vpop.permute.xlu1 %627 }
 0x125   : > { %v1027_v54 = vpop.f32.mrf.mxu0  ;;  %v1155_v55 = vpop.f32.mrf.mxu1 }
 0x126   : > { %1260 = vst [vmem:[%s2184_s6 + $0x50] sm:$0xff] %v1036_v8  ;;  %1292 = vst [vmem:[%s2184_s6 + $0x150] sm:$0xff] %v1164_v40  ;;  %v1028_v6 = vadd.f32 %v1027_v54, %v2126_v9  ;;  %v1156_v38 = vadd.f32 %v1155_v55, %v2174_v41  ;;  %v643_v8 = vpop.permute.xlu0 %642 }
 0x127   : > { %v1541_v58 = vpop.f32.mrf.mxu0  ;;  %v1573_v59 = vpop.f32.mrf.mxu1 }
 0x128   : > { %1258 = vst [vmem:[%s2184_s6 + $0x40] sm:$0xff] %v1028_v6  ;;  %1290 = vst [vmem:[%s2184_s6 + $0x140] sm:$0xff] %v1156_v38  ;;  %v1039_v11 = vadd.f32 %v1541_v58, %v2132_v12  ;;  %v1167_v43 = vadd.f32 %v1573_v59, %v2179_v44  ;;  %v638_v37 = vpop.permute.xlu1 %637 }
 0x129   : > { %v1030_v60 = vpop.f32.mrf.mxu0  ;;  %v1158_v62 = vpop.f32.mrf.mxu1 }
 0x12a   : > { %1261 = vst [vmem:[%s2184_s6 + $0x58] sm:$0xff] %v1039_v11  ;;  %1293 = vst [vmem:[%s2184_s6 + $0x158] sm:$0xff] %v1167_v43  ;;  %v1031_v9 = vadd.f32 %v1030_v60, %v2128_v10  ;;  %v1159_v41 = vadd.f32 %v1158_v62, %v2176_v42  ;;  %v653_v43 = vpop.permute.xlu0 %652 }
 0x12b   : > { %v1544_v0 = vpop.f32.mrf.mxu0  ;;  %v1576_v1 = vpop.f32.mrf.mxu1 }
 0x12c   : > { %1259 = vst [vmem:[%s2184_s6 + $0x48] sm:$0xff] %v1031_v9  ;;  %1291 = vst [vmem:[%s2184_s6 + $0x148] sm:$0xff] %v1159_v41  ;;  %v1052_v12 = vadd.f32 %v1544_v0, %v2138_v15  ;;  %v1180_v44 = vadd.f32 %v1576_v1, %v2194_v61  ;;  %v648_v38 = vpop.permute.xlu1 %647 }
 0x12d   : > { %v1043_v4 = vpop.f32.mrf.mxu0  ;;  %v1171_v33 = vpop.f32.mrf.mxu1 }
 0x12e   : > { %1264 = vst [vmem:[%s2184_s6 + $0x70] sm:$0xff] %v1052_v12  ;;  %1296 = vst [vmem:[%s2184_s6 + $0x170] sm:$0xff] %v1180_v44  ;;  %v1044_v10 = vadd.f32 %v1043_v4, %v2134_v13  ;;  %v1172_v42 = vadd.f32 %v1171_v33, %v2186_v47  ;;  %v663_v44 = vpop.permute.xlu0 %662 }
 0x12f   : > { %v1545_v35 = vpop.f32.mrf.mxu0  ;;  %v1577_v3 = vpop.f32.mrf.mxu1 }
 0x130   : > { %1262 = vst [vmem:[%s2184_s6 + $0x60] sm:$0xff] %v1044_v10  ;;  %1294 = vst [vmem:[%s2184_s6 + $0x160] sm:$0xff] %v1172_v42  ;;  %v1055_v15 = vadd.f32 %v1545_v35, %v2140_v16  ;;  %v1183_v61 = vadd.f32 %v1577_v3, %v2202_v36  ;;  %v658_v0 = vpop.permute.xlu1 %657 }
 0x131   : > { %v1046_v45 = vpop.f32.mrf.mxu0  ;;  %v1174_v46 = vpop.f32.mrf.mxu1 }
 0x132   : > { %1265 = vst [vmem:[%s2184_s6 + $0x78] sm:$0xff] %v1055_v15  ;;  %1297 = vst [vmem:[%s2184_s6 + $0x178] sm:$0xff] %v1183_v61  ;;  %v1047_v13 = vadd.f32 %v1046_v45, %v2136_v14  ;;  %v1175_v47 = vadd.f32 %v1174_v46, %v2190_v56  ;;  %v673_v46 = vpop.permute.xlu0 %672 }
 0x133   : > { %v1548_v39 = vpop.f32.mrf.mxu0  ;;  %v1580_v49 = vpop.f32.mrf.mxu1 }
 0x134   : > { %1263 = vst [vmem:[%s2184_s6 + $0x68] sm:$0xff] %v1047_v13  ;;  %1295 = vst [vmem:[%s2184_s6 + $0x168] sm:$0xff] %v1175_v47  ;;  %v1068_v16 = vadd.f32 %v1548_v39, %v2146_v19  ;;  %v1196_v36 = vadd.f32 %v1580_v49, %v613_v57 }
 0x135   : > { %v1059_v50 = vpop.f32.mrf.mxu0  ;;  %v1187_v5 = vpop.f32.mrf.mxu1 }
 0x136   : > { %1268 = vst [vmem:[%s2184_s6 + $0x90] sm:$0xff] %v1068_v16  ;;  %1300 = vst [vmem:[%s2184_s6 + $0x190] sm:$0xff] %v1196_v36  ;;  %v1060_v14 = vadd.f32 %v1059_v50, %v2142_v17  ;;  %v1188_v56 = vadd.f32 %v1187_v5, %v2207_v48 }
 0x137   : > { %v1549_v51 = vpop.f32.mrf.mxu0  ;;  %v1581_v52 = vpop.f32.mrf.mxu1 }
 0x138   : > { %1266 = vst [vmem:[%s2184_s6 + $0x80] sm:$0xff] %v1060_v14  ;;  %1298 = vst [vmem:[%s2184_s6 + $0x180] sm:$0xff] %v1188_v56  ;;  %v1071_v19 = vadd.f32 %v1549_v51, %v2148_v20  ;;  %v1199_v40 = vadd.f32 %v1581_v52, %v618_v63 }
 0x139   : > { %v1062_v54 = vpop.f32.mrf.mxu0  ;;  %v1190_v55 = vpop.f32.mrf.mxu1 }
 0x13a   : > { %1269 = vst [vmem:[%s2184_s6 + $0x98] sm:$0xff] %v1071_v19  ;;  %1301 = vst [vmem:[%s2184_s6 + $0x198] sm:$0xff] %v1199_v40  ;;  %v1063_v17 = vadd.f32 %v1062_v54, %v2144_v18  ;;  %v1191_v48 = vadd.f32 %v1190_v55, %v2215_v53 }
 0x13b   : > { %v1552_v57 = vpop.f32.mrf.mxu0  ;;  %v1584_v6 = vpop.f32.mrf.mxu1 }
 0x13c   : > { %1267 = vst [vmem:[%s2184_s6 + $0x88] sm:$0xff] %v1063_v17  ;;  %1299 = vst [vmem:[%s2184_s6 + $0x188] sm:$0xff] %v1191_v48  ;;  %v1084_v20 = vadd.f32 %v1552_v57, %v2154_v23  ;;  %v1212_v58 = vadd.f32 %v1584_v6, %v633_v7 }
 0x13d   : > { %v1075_v59 = vpop.f32.mrf.mxu0  ;;  %v1203_v11 = vpop.f32.mrf.mxu1 }
 0x13e   : > { %1272 = vst [vmem:[%s2184_s6 + $0xb0] sm:$0xff] %v1084_v20  ;;  %1304 = vst [vmem:[%s2184_s6 + $0x1b0] sm:$0xff] %v1212_v58  ;;  %v1076_v18 = vadd.f32 %v1075_v59, %v2150_v21  ;;  %v1204_v53 = vadd.f32 %v1203_v11, %v2232_v2 }
 0x13f   : > { %v1553_v60 = vpop.f32.mrf.mxu0  ;;  %v1585_v62 = vpop.f32.mrf.mxu1 }
 0x140   : > { %1270 = vst [vmem:[%s2184_s6 + $0xa0] sm:$0xff] %v1076_v18  ;;  %1302 = vst [vmem:[%s2184_s6 + $0x1a0] sm:$0xff] %v1204_v53  ;;  %v1087_v23 = vadd.f32 %v1553_v60, %v2156_v24  ;;  %v1215_v63 = vadd.f32 %v1585_v62, %v638_v37 }
 0x141   : > { %v1078_v9 = vpop.f32.mrf.mxu0  ;;  %v1206_v41 = vpop.f32.mrf.mxu1 }
 0x142   : > { %1273 = vst [vmem:[%s2184_s6 + $0xb8] sm:$0xff] %v1087_v23  ;;  %1305 = vst [vmem:[%s2184_s6 + $0x1b8] sm:$0xff] %v1215_v63  ;;  %v1079_v21 = vadd.f32 %v1078_v9, %v2152_v22  ;;  %v1207_v1 = vadd.f32 %v1206_v41, %v2242_v34  ;;  %v668_v34 = vpop.permute.xlu1 %667 }
 0x143   : > { %v1556_v2 = vpop.f32.mrf.mxu0  ;;  %v1588_v12 = vpop.f32.mrf.mxu1 }
 0x144   : > { %1271 = vst [vmem:[%s2184_s6 + $0xa8] sm:$0xff] %v1079_v21  ;;  %1303 = vst [vmem:[%s2184_s6 + $0x1a8] sm:$0xff] %v1207_v1  ;;  %v1100_v24 = vadd.f32 %v1556_v2, %v2162_v27  ;;  %v1228_v4 = vadd.f32 %v1588_v12, %v653_v43 }
 0x145   : > { %v1091_v33 = vpop.f32.mrf.mxu0  ;;  %v1219_v10 = vpop.f32.mrf.mxu1 }
 0x146   : > { %1276 = vst [vmem:[%s2184_s6 + $0xd0] sm:$0xff] %v1100_v24  ;;  %1308 = vst [vmem:[%s2184_s6 + $0x1d0] sm:$0xff] %v1228_v4  ;;  %v1092_v22 = vadd.f32 %v1091_v33, %v2158_v25  ;;  %v1220_v42 = vadd.f32 %v1219_v10, %v643_v8  ;;  %v678_v36 = vpop.permute.xlu1 %677 }
 0x147   : > { %v1557_v35 = vpop.f32.mrf.mxu0  ;;  %v1589_v3 = vpop.f32.mrf.mxu1 }
 0x148   : > { %1274 = vst [vmem:[%s2184_s6 + $0xc0] sm:$0xff] %v1092_v22  ;;  %1306 = vst [vmem:[%s2184_s6 + $0x1c0] sm:$0xff] %v1220_v42  ;;  %v1103_v15 = vadd.f32 %v1557_v35, %v2164_v28  ;;  %v1231_v27 = vadd.f32 %v1589_v3, %v658_v0 }
 0x149   : > { %v1094_v61 = vpop.f32.mrf.mxu0  ;;  %v1222_v45 = vpop.f32.mrf.mxu1 }
 0x14a   : > { %1277 = vst [vmem:[%s2184_s6 + $0xd8] sm:$0xff] %v1103_v15  ;;  %1309 = vst [vmem:[%s2184_s6 + $0x1d8] sm:$0xff] %v1231_v27  ;;  %v1095_v25 = vadd.f32 %v1094_v61, %v2160_v26  ;;  %v1223_v7 = vadd.f32 %v1222_v45, %v648_v38 }
 0x14b   : > { %v1560_v13 = vpop.f32.mrf.mxu0  ;;  %v1592_v47 = vpop.f32.mrf.mxu1 }
 0x14c   : > { %1275 = vst [vmem:[%s2184_s6 + $0xc8] sm:$0xff] %v1095_v25  ;;  %1307 = vst [vmem:[%s2184_s6 + $0x1c8] sm:$0xff] %v1223_v7  ;;  %v1116_v39 = vadd.f32 %v1560_v13, %v2170_v31  ;;  %v1244_v28 = vadd.f32 %v1592_v47, %v673_v46 }
 0x14d   : > { %v1107_v49 = vpop.f32.mrf.mxu0  ;;  %v1235_v16 = vpop.f32.mrf.mxu1 }
 0x14e   : > { %1280 = vst [vmem:[%s2184_s6 + $0xf0] sm:$0xff] %v1116_v39  ;;  %1312 = vst [vmem:[%s2184_s6 + $0x1f0] sm:$0xff] %v1244_v28  ;;  %v1108_v26 = vadd.f32 %v1107_v49, %v2166_v29  ;;  %v1236_v50 = vadd.f32 %v1235_v16, %v663_v44 }
 0x14f   : > { %v1561_v5 = vpop.f32.mrf.mxu0  ;;  %v1593_v37 = vpop.f32.mrf.mxu1 }
 0x150   : > { %1278 = vst [vmem:[%s2184_s6 + $0xe0] sm:$0xff] %v1108_v26  ;;  %1310 = vst [vmem:[%s2184_s6 + $0x1e0] sm:$0xff] %v1236_v50  ;;  %v1119_v14 = vadd.f32 %v1561_v5, %v2172_v32  ;;  %v1247_v31 = vadd.f32 %v1593_v37, %v678_v36 }
 0x151   : > { %v1110_v56 = vpop.f32.mrf.mxu0  ;;  %v1238_v51 = vpop.f32.mrf.mxu1 }
 0x152   : > { %1281 = vst [vmem:[%s2184_s6 + $0xf8] sm:$0xff] %v1119_v14  ;;  %1313 = vst [vmem:[%s2184_s6 + $0x1f8] sm:$0xff] %v1247_v31  ;;  %v1111_v52 = vadd.f32 %v1110_v56, %v2168_v30  ;;  %v1239_v8 = vadd.f32 %v1238_v51, %v668_v34 }
 0x154   : > { %1279 = vst [vmem:[%s2184_s6 + $0xe8] sm:$0xff] %v1111_v52  ;;  %1311 = vst [vmem:[%s2184_s6 + $0x1e8] sm:$0xff] %v1239_v8 }
 0x155 PF: > { %s13_s14 = sadd.s32 1, %s1707_s14   ;;  %s2319_s12 = smov %s1703_s13 }
 0x156   : > { %p10_p5 = scmp.ge.s32.totalorder %s13_s14, 4   ;;  %s2320_s13 = smov %s2322_s15 }
 0x158   :  { %12 = sbr.rel (!%p10_p5) target bundleno = 2 (0x2), region = 62 }

// kernel: _lambda_.8
= control target key start
LH: loop header
LB: loop body
LE: loop exit
PB: predicated region body
PF: predicated region fallthrough
CT: control target
= control target key end

     0   :  { %s2097_s25 = smov 0   ;;  %s2424_s0 = inlined_call_operand.vmem [shape: f32[2,8,128], index: 0, kind: input, shape index: {}]   ;;  %s2425_s1 = inlined_call_operand.vmem [shape: f32[2,512,128], index: 1, kind: input, shape index: {}]   ;;  %s2426_s2 = inlined_call_operand.vmem [shape: bf16[8,8], index: 2, kind: input, shape index: {}]   ;;  %s2427_s3 = inlined_call_operand.vmem [shape: bf16[32,4], index: 3, kind: input, shape index: {}]   ;;  %s2428_s4 = inlined_call_operand.vmem [shape: f32[32,1], index: 4, kind: input, shape index: {}]   ;;  %s2429_s5 = inlined_call_operand.vmem [shape: bf16[2,64,96], index: 5, kind: input, shape index: {}]   ;;  %s2430_s6 = inlined_call_operand.vmem [shape: f32[2,64,1], index: 6, kind: input, shape index: {}]   ;;  %s2431_s7 = inlined_call_operand.vmem [shape: bf16[1,32,32], index: 7, kind: input, shape index: {}]   ;;  %s2432_s8 = inlined_call_operand.vmem [shape: f32[1,32,1], index: 8, kind: input, shape index: {}]   ;;  %s2433_s9 = inlined_call_operand.vmem [shape: bf16[2,32,32], index: 9, kind: input, shape index: {}]   ;;  %s2434_s10 = inlined_call_operand.vmem [shape: f32[2,32,1], index: 10, kind: input, shape index: {}]   ;;  %s2435_s11 = inlined_call_operand.vmem [shape: bf16[8,32], index: 11, kind: input, shape index: {}]   ;;  %s2436_s12 = inlined_call_operand.vmem [shape: f32[8,1], index: 12, kind: input, shape index: {}]   ;;  %s2437_s13 = inlined_call_operand.vmem [shape: f32[2,8,128], index: 13, kind: output, shape index: {}]  }
   0x1 LB: > { %s1657_s26 = sadd.s32 4294967295, %s2017_s25   ;;  %p1661_p0 = scmp.ge.s32.totalorder %s2017_s25, 1  ;;  %s2017_s25 = sphi %s2097_s25, %s23_s25  }
   0x2   : > { %p397_p1 = scmp.lt.s32.totalorder %s2017_s25, 3 }
   0x4   : > { %p398_p2 = pnand %p1661_p0, %p397_p1 }
   0x5   : > { %p445_p3 = scmp.lt.s32.totalorder (!%p398_p2), %s1657_s26, 1  ;;  %s2021_s28 = smov (!%p398_p2), 2  }
   0x6   : > { %401 = sbr.rel (%p398_p2) target bundleno = 2218 (0x8aa), region = 72  ;;  %s2022_s29 = smov (!%p398_p2), 126  }
   0x7   : > { %s2023_s30 = smov (!%p398_p2), 1   ;;  %s2024_s14 = smov (!%p398_p2), 127  }
   0xb   : > { %v1944_v0 = vld [vmem:[%s2427_s3] sm:$0xff]   ;;  %vm502_vm0 = vcmask 31744   ;;  %s2439_s26 = smov (!%p445_p3, %s1657_s26), 1  ;;  %v468_v1 = vld [vmem:[%s2428_s4 + $0x10] sm:$0xff]  ;;  %v2019_v2 = vmov 0   ;;  %v469_v3 = vld [vmem:[%s2428_s4 + $0x18] sm:$0xff] }
   0xc   : > { %1793 = vmatprep.mubr.msk.bf16.mxu0 %vm502_vm0, %v1944_v0  ;;  %1892 = vset.pattern.permute.xlu0 %v2019_v2  ;;  %v466_v4 = vld [vmem:[%s2428_s4] sm:$0xff]  ;;  %s1662_s18 = sshll.u32 %s2439_s26, 3  ;;  %v467_v5 = vld [vmem:[%s2428_s4 + $0x8] sm:$0xff]  ;;  %vm509_vm1 = vcmask 1041408   ;;  %v2020_v11 = vmov 0.0   ;;  %vm586_vm2 = vcmask 1047568  }
   0xd   : > { %482 = vperm.xlu0 %1892, %v468_v1   ;;  %1893 = vset.pattern.permute.xlu1 %v2019_v2  ;;  %s2129_s23 = scalar_lea.vmem %s2424_s0, %s1662_s18  ;;  %v1945_v10 = vld [vmem:[%s2427_s3 + $0x8] sm:$0xff]   ;;  %566 = vst [vmem:[#allocation2 + $0x20] sm:$0xff] %v2020_v11  ;;  %567 = vst.msk [vmem:[#allocation2 + $0x28] sm:$0xff] %vm502_vm0, %v2020_v11  ;;  %vm588_vm3 = vcmask 15360   ;;  %vm640_vm4 = vcmask 1031168   ;;  %vm780_vm5 = vcmask 785408  }
   0xe   : > { %472 = vperm.xlu1 %1893, %v466_v4   ;;  %v460_v6 = vld [vmem:[%s2129_s23] sm:$0xff]  ;;  %562 = vst [vmem:[#allocation2] sm:$0xff] %v2020_v11  ;;  %563 = vst.msk [vmem:[#allocation2 + $0x8] sm:$0xff] %vm502_vm0, %v2020_v11  ;;  %vm769_vm6 = vcmask 1039360   ;;  %vm946_vm7 = vcmask 261120   ;;  %vm1155_vm8 = vcmask 1014784  }
   0xf   : > { %v465_v7 = vpack.c.bf16 %v460_v6, %v460_v6  ;;  %564 = vst [vmem:[#allocation2 + $0x10] sm:$0xff] %v2020_v11  ;;  %565 = vst.msk [vmem:[#allocation2 + $0x18] sm:$0xff] %vm502_vm0, %v2020_v11  ;;  %vm2026_vm9 = vmmov 0   ;;  %vm1534_vm10 = vcmask 1043456   ;;  %vm1538_vm11 = vcmask 64512  }
  0x10   : > { %568 = vst [vmem:[#allocation2 + $0x30] sm:$0xff] %v2020_v11  ;;  %569 = vst.msk [vmem:[#allocation2 + $0x38] sm:$0xff] %vm502_vm0, %v2020_v11 }
  0x11   : > { %487 = vperm.xlu0 %1892, %v469_v3   ;;  %v501_v8 = vrot.slane %v465_v7, 2  ;;  %v1946_v7 = vld [vmem:[%s2429_s5] sm:$0xff]  }
  0x12   : > { %477 = vperm.xlu1 %1893, %v467_v5   ;;  %1809 = vmatprep.mubr.msk.bf16.mxu1 %vm780_vm5, %v1946_v7 }
  0x13   : > { %1875 = vmatprep.subr.msk.bf16.mxu0 %vm509_vm1, %v501_v8  ;;  %v511_v9 = vsel %vm509_vm1, %v501_v8, 0 }
  0x14   : > { %1792 = vmatpush3.bf16.msra.mxu0 %v511_v9 }
  0x17   : > { %1794 = vmatmul.mubr.msk.bf16.vlgmr.msra.gmra.mxu0 %vm502_vm0, %v1945_v10 }
  0x88   : > { %v483_v12 = vpop.permute.xlu0 %482 }
  0x89   : > { %v473_v15 = vpop.permute.xlu1 %472 }
  0x8c   : > { %v488_v17 = vpop.permute.xlu0 %487 }
  0x8d   : > { %v478_v22 = vpop.permute.xlu1 %477 }
  0xd7   : > { %v1795_v13 = vpop.f32.mrf.mxu0 }
  0xd8   : > { %v2148_v14 = vadd.f32 %v1795_v13, %v483_v12  ;;  %v678_v12 = vld [vmem:[%s2430_s6 + $0x38] sm:$0xff]  ;;  %v677_v13 = vld [vmem:[%s2430_s6 + $0x30] sm:$0xff] }
  0xd9   : > { %v547_v16 = vpop.f32.mrf.mxu0 }
  0xda   : > { %578 = vrot.lane.b32.xlu0 %v2148_v14, %s2021_s28  ;;  %v2152_v19 = vadd.f32 %v547_v16, %v473_v15  ;;  %v676_v15 = vld [vmem:[%s2430_s6 + $0x28] sm:$0xff]  ;;  %v675_v16 = vld [vmem:[%s2430_s6 + $0x20] sm:$0xff] }
  0xdb   : > { %v1796_v18 = vpop.f32.mrf.mxu0 }
  0xdc   : > { %v2154_v20 = vadd.f32 %v1796_v18, %v488_v17  ;;  %v674_v17 = vld [vmem:[%s2430_s6 + $0x18] sm:$0xff]  ;;  %v673_v18 = vld [vmem:[%s2430_s6 + $0x10] sm:$0xff] }
  0xdd   : > { %v550_v21 = vpop.f32.mrf.mxu0 }
  0xde   : > { %580 = vrot.lane.b32.xlu1 %v2154_v20, %s2021_s28  ;;  %574 = vrot.lane.b32.xlu0 %v2152_v19, %s2021_s28  ;;  %v2160_v23 = vadd.f32 %v550_v21, %v478_v22  ;;  %v1914_v40 = vpack.i.bf16 %v2154_v20, %v2148_v14  ;;  %v672_v21 = vld [vmem:[%s2430_s6 + $0x8] sm:$0xff]  ;;  %v671_v22 = vld [vmem:[%s2430_s6] sm:$0xff] }
  0xe0   : > { %v1919_v41 = vpack.i.bf16 %v2160_v23, %v2152_v19 }
  0xe2   : > { %576 = vrot.lane.b32.xlu1 %v2160_v23, %s2021_s28 }
 0x14c   : > { %v579_v24 = vpop.permute.xlu0 %578 }
 0x14d   : > { %592 = vst.msk [vmem:[#allocation2 + $0x20] sm:$0xff] %vm586_vm2, %v579_v24 }
 0x14e   : > { %593 = vst.msk [vmem:[#allocation2 + $0x28] sm:$0xff] %vm588_vm3, %v579_v24  ;;  %v915_v24 = vld [vmem:[%s2432_s8 + $0x18] sm:$0xff] }
 0x150   : > { %v581_v25 = vpop.permute.xlu1 %580  ;;  %v575_v26 = vpop.permute.xlu0 %574 }
 0x151   : > { %594 = vst.msk [vmem:[#allocation2 + $0x30] sm:$0xff] %vm586_vm2, %v581_v25  ;;  %587 = vst.msk [vmem:[#allocation2] sm:$0xff] %vm586_vm2, %v575_v26 }
 0x152   : > { %595 = vst.msk [vmem:[#allocation2 + $0x38] sm:$0xff] %vm588_vm3, %v581_v25  ;;  %589 = vst.msk [vmem:[#allocation2 + $0x8] sm:$0xff] %vm588_vm3, %v575_v26  ;;  %v914_v25 = vld [vmem:[%s2432_s8 + $0x10] sm:$0xff]  ;;  %v913_v26 = vld [vmem:[%s2432_s8 + $0x8] sm:$0xff] }
 0x154   : > { %v577_v27 = vpop.permute.xlu1 %576  ;;  %v2170_v28 = vld [vmem:[#allocation2 + $0x20] sm:$0xff] }
 0x155   : > { %v2172_v29 = vld [vmem:[#allocation2 + $0x28] sm:$0xff]  ;;  %590 = vst.msk [vmem:[#allocation2 + $0x10] sm:$0xff] %vm586_vm2, %v577_v27 }
 0x156   : > { %591 = vst.msk [vmem:[#allocation2 + $0x18] sm:$0xff] %vm588_vm3, %v577_v27  ;;  %v1894_v30 = vpack.i.bf16 %v2172_v29, %v2170_v28  ;;  %v912_v27 = vld [vmem:[%s2432_s8] sm:$0xff] }
 0x158   : > { %1895 = vrot.lane.b32.xlu0 %v1894_v30, %s2022_s29  ;;  %v602_v31 = vld [vmem:[#allocation2 + $0x30] sm:$0xff]  ;;  %v596_v33 = vld [vmem:[#allocation2] sm:$0xff] }
 0x159   : > { %v603_v32 = vld [vmem:[#allocation2 + $0x38] sm:$0xff]  ;;  %v597_v35 = vld [vmem:[#allocation2 + $0x8] sm:$0xff]  ;;  %v655_v8 = vpack.c.bf16 %v602_v31, %v2170_v28 }
 0x15a   : > { %v1904_v34 = vpack.i.bf16 %v603_v32, %v602_v31  ;;  %v1899_v36 = vpack.i.bf16 %v597_v35, %v596_v33  ;;  %v656_v6 = vpack.c.bf16 %v603_v32, %v2172_v29 }
 0x15c   : > { %1905 = vrot.lane.b32.xlu1 %v1904_v34, %s2022_s29  ;;  %1900 = vrot.lane.b32.xlu0 %v1899_v36, %s2022_s29  ;;  %v598_v37 = vld [vmem:[#allocation2 + $0x10] sm:$0xff] }
 0x15d   : > { %v599_v38 = vld [vmem:[#allocation2 + $0x18] sm:$0xff]  ;;  %v653_v10 = vpack.c.bf16 %v598_v37, %v596_v33 }
 0x15e   : > { %v1909_v39 = vpack.i.bf16 %v599_v38, %v598_v37  ;;  %v654_v9 = vpack.c.bf16 %v599_v38, %v597_v35 }
 0x160   : > { %1910 = vrot.lane.b32.xlu1 %v1909_v39, %s2022_s29  ;;  %1915 = vrot.lane.b32.xlu0 %v1914_v40, %s2023_s30 }
 0x164   : > { %1920 = vrot.lane.b32.xlu1 %v1919_v41, %s2023_s30  ;;  %s1750_s30 = sshll.u32 %s2439_s26, 9 }
 0x165   : > { %s2252_s16 = scalar_lea.vmem %s2425_s1, %s1750_s30 }
 0x1ca   : > { %v1896_v42 = vpop.permute.xlu0 %1895 }
 0x1cb   : > { %v1898_v43 = vunpack.i.h.bf16 %v1896_v42  ;;  %v1897_v44 = vunpack.i.l.bf16 %v1896_v42  ;;  %v1947_v42 = vld [vmem:[%s2429_s5 + $0x8] sm:$0xff]  }
 0x1cd   : > { %v643_v49 = vsel %vm640_vm4, %v1897_v44, %v1898_v43  ;;  %v1949_v44 = vld [vmem:[%s2429_s5 + $0x18] sm:$0xff]  }
 0x1ce   : > { %v1906_v45 = vpop.permute.xlu1 %1905  ;;  %v1901_v48 = vpop.permute.xlu0 %1900 }
 0x1cf   : > { %v1908_v46 = vunpack.i.h.bf16 %v1906_v45  ;;  %v1907_v47 = vunpack.i.l.bf16 %v1906_v45  ;;  %v1903_v51 = vunpack.i.h.bf16 %v1901_v48  ;;  %v1902_v52 = vunpack.i.l.bf16 %v1901_v48  ;;  %v1950_v45 = vld [vmem:[%s2431_s7] sm:$0xff]  }
 0x1d0   : > { %1821 = vmatprep.mubr.msk.bf16.mxu0 %vm946_vm7, %v1950_v45 }
 0x1d1   : > { %v662_v50 = vpack.c.bf16 %v1908_v46, %v1898_v43  ;;  %v644_v53 = vsel %vm640_vm4, %v1907_v47, %v1908_v46  ;;  %v641_v60 = vsel %vm640_vm4, %v1902_v52, %v1903_v51  ;;  %v1948_v43 = vld [vmem:[%s2429_s5 + $0x10] sm:$0xff]  }
 0x1d2   : > { %v1911_v54 = vpop.permute.xlu1 %1910  ;;  %v661_v55 = vpack.c.bf16 %v644_v53, %v643_v49  ;;  %v1916_v58 = vpop.permute.xlu0 %1915  ;;  %v1684_v53 = vld [vmem:[%s2252_s16 + $0x1b0] sm:$0xff] }
 0x1d3   : > { %v1913_v56 = vunpack.i.h.bf16 %v1911_v54  ;;  %v1912_v57 = vunpack.i.l.bf16 %v1911_v54  ;;  %767 = vrot.lane.b32.xlu1 %v662_v50, %s2024_s14  ;;  %v1918_v62 = vunpack.i.h.bf16 %v1916_v58  ;;  %v1917_v63 = vunpack.i.l.bf16 %v1916_v58 }
 0x1d4   : > { %765 = vrot.lane.b32.xlu0 %v661_v55, %s2024_s14 }
 0x1d5   : > { %v660_v59 = vpack.c.bf16 %v1913_v56, %v1903_v51  ;;  %v642_v61 = vsel %vm640_vm4, %v1912_v57, %v1913_v56  ;;  %v658_v5 = vpack.c.bf16 %v1918_v62, %v1917_v63  ;;  %v1682_v57 = vld [vmem:[%s2252_s16 + $0x1a0] sm:$0xff] }
 0x1d6   : > { %v1921_v0 = vpop.permute.xlu1 %1920  ;;  %v659_v1 = vpack.c.bf16 %v642_v61, %v641_v60  ;;  %v1685_v61 = vld [vmem:[%s2252_s16 + $0x1b8] sm:$0xff] }
 0x1d7   : > { %v1923_v2 = vunpack.i.h.bf16 %v1921_v0  ;;  %v1922_v3 = vunpack.i.l.bf16 %v1921_v0  ;;  %763 = vrot.lane.b32.xlu1 %v660_v59, %s2024_s14 }
 0x1d8   : > { %761 = vrot.lane.b32.xlu0 %v659_v1, %s2024_s14 }
 0x1d9   : > { %v657_v4 = vpack.c.bf16 %v1923_v2, %v1922_v3  ;;  %v1683_v3 = vld [vmem:[%s2252_s16 + $0x1a8] sm:$0xff] }
 0x1db   : > { %757 = vrot.lane.b32.xlu1 %v657_v4, %s2024_s14 }
 0x1dc   : > { %759 = vrot.lane.b32.xlu0 %v658_v5, %s2024_s14 }
 0x1df   : > { %755 = vrot.lane.b32.xlu1 %v656_v6, %s2024_s14 }
 0x1e0   : > { %753 = vrot.lane.b32.xlu0 %v655_v8, %s2024_s14 }
 0x1e3   : > { %751 = vrot.lane.b32.xlu1 %v654_v9, %s2024_s14 }
 0x1e4   : > { %749 = vrot.lane.b32.xlu0 %v653_v10, %s2024_s14  ;;  %s458_s14 = scalar_lea.vmem %s2437_s13, %s1662_s18 }
 0x1e7   : > { %716 = vperm.xlu1 %1893, %v678_v12  }
 0x1e8   : > { %711 = vperm.xlu0 %1892, %v677_v13  }
 0x1eb   : > { %706 = vperm.xlu1 %1893, %v676_v15  }
 0x1ec   : > { %701 = vperm.xlu0 %1892, %v675_v16   ;;  %v1680_v16 = vld [vmem:[%s2252_s16 + $0x190] sm:$0xff] }
 0x1ef   : > { %696 = vperm.xlu1 %1893, %v674_v17  }
 0x1f0   : > { %691 = vperm.xlu0 %1892, %v673_v18   ;;  %v1678_v18 = vld [vmem:[%s2252_s16 + $0x180] sm:$0xff] }
 0x1f3   : > { %686 = vperm.xlu1 %1893, %v672_v21  }
 0x1f4   : > { %681 = vperm.xlu0 %1892, %v671_v22   ;;  %v1681_v22 = vld [vmem:[%s2252_s16 + $0x198] sm:$0xff] }
 0x1f7   : > { %933 = vperm.xlu1 %1893, %v915_v24  }
 0x1f8   : > { %928 = vperm.xlu0 %1892, %v914_v25  }
 0x1fb   : > { %923 = vperm.xlu1 %1893, %v913_v26  }
 0x1fc   : > { %918 = vperm.xlu0 %1892, %v912_v27  }
 0x245   : > { %v768_v28 = vpop.permute.xlu1 %767 }
 0x246   : > { %v766_v29 = vpop.permute.xlu0 %765 }
 0x247   : > { %v773_v30 = vsel %vm769_vm6, %v766_v29, %v768_v28 }
 0x248   : > { %1797 = vmatprep.subr.bf16.mxu1 %v773_v30 }
 0x249   : > { %v764_v31 = vpop.permute.xlu1 %763  ;;  %1798 = vmatpush3.bf16.msra.mxu1 %v773_v30  ;;  %v1679_v30 = vld [vmem:[%s2252_s16 + $0x188] sm:$0xff] }
 0x24a   : > { %v762_v32 = vpop.permute.xlu0 %761 }
 0x24b   : > { %v772_v33 = vsel %vm769_vm6, %v762_v32, %v764_v31 }
 0x24c   : > { %1799 = vmatprep.subr.bf16.mxu1 %v772_v33 }
 0x24d   : > { %v758_v34 = vpop.permute.xlu1 %757  ;;  %1800 = vmatpush3.bf16.msra.mxu1 %v772_v33 }
 0x24e   : > { %v760_v35 = vpop.permute.xlu0 %759 }
 0x24f   : > { %1801 = vmatprep.subr.bf16.mxu1 %v760_v35 }
 0x251   : > { %v756_v36 = vpop.permute.xlu1 %755  ;;  %1802 = vmatpush3.bf16.msra.mxu1 %v760_v35 }
 0x252   : > { %1803 = vmatprep.subr.bf16.mxu1 %v758_v34  ;;  %v754_v37 = vpop.permute.xlu0 %753 }
 0x253   : > { %v771_v38 = vsel %vm769_vm6, %v754_v37, %v756_v36 }
 0x255   : > { %1804 = vmatpush3.bf16.msra.mxu1 %v758_v34  ;;  %v752_v39 = vpop.permute.xlu1 %751 }
 0x256   : > { %1805 = vmatprep.subr.bf16.mxu1 %v771_v38  ;;  %v750_v40 = vpop.permute.xlu0 %749 }
 0x257   : > { %v770_v41 = vsel %vm769_vm6, %v750_v40, %v752_v39 }
 0x259   : > { %1806 = vmatpush3.bf16.msra.mxu1 %v771_v38 }
 0x25a   : > { %1807 = vmatprep.subr.bf16.mxu1 %v770_v41 }
 0x25d   : > { %1808 = vmatpush3.bf16.msra.mxu1 %v770_v41 }
 0x260   : > { %1810 = vmatmul.mubr.msk.bf16.vlgmr.msra.gmra.mxu1 %vm780_vm5, %v1947_v42 }
 0x261   : > { %1813 = vmatprep.mubr.msk.bf16.mxu1 %vm780_vm5, %v1948_v43 }
 0x262   : > { %v717_v51 = vpop.permute.xlu1 %716 }
 0x263   : > { %v712_v48 = vpop.permute.xlu0 %711 }
 0x266   : > { %v707_v1 = vpop.permute.xlu1 %706 }
 0x267   : > { %v702_v55 = vpop.permute.xlu0 %701 }
 0x268   : > { %1814 = vmatmul.mubr.msk.bf16.gmra.mxu1 %vm780_vm5, %v1949_v44 }
 0x26a   : > { %v697_v12 = vpop.permute.xlu1 %696 }
 0x26b   : > { %v692_v7 = vpop.permute.xlu0 %691 }
 0x26e   : > { %v687_v25 = vpop.permute.xlu1 %686 }
 0x26f   : > { %v682_v13 = vpop.permute.xlu0 %681 }
 0x320   : > { %v1811_v46 = vpop.f32.mrf.mxu1 }
 0x321   : > { %v836_v15 = vadd.f32 %v1811_v46, %v692_v7 }
 0x322   : > { %v827_v47 = vpop.f32.mrf.mxu1 }
 0x323   : > { %v828_v17 = vadd.f32 %v827_v47, %v682_v13  ;;  %v868_v24 = vadd.f32 %v1680_v16, %v836_v15 }
 0x324   : > { %v1812_v49 = vpop.f32.mrf.mxu1 }
 0x325   : > { %v839_v21 = vadd.f32 %v1812_v49, %v697_v12  ;;  %v866_v26 = vadd.f32 %v1678_v18, %v828_v17 }
 0x326   : > { %v830_v50 = vpop.f32.mrf.mxu1 }
 0x327   : > { %v869_v28 = vadd.f32 %v1681_v22, %v839_v21  ;;  %v831_v29 = vadd.f32 %v830_v50, %v687_v25 }
 0x328   : > { %v1815_v52 = vpop.f32.mrf.mxu1 }
 0x329   : > { %v852_v54 = vadd.f32 %v1815_v52, %v712_v48  ;;  %v867_v35 = vadd.f32 %v1679_v30, %v831_v29  ;;  %v1713_v30 = vld [vmem:[%s2430_s6 + $0x78] sm:$0xff] }
 0x32a   : > { %v843_v56 = vpop.f32.mrf.mxu1 }
 0x32b   : > { %v872_v58 = vadd.f32 %v1684_v53, %v852_v54  ;;  %v844_v59 = vadd.f32 %v843_v56, %v702_v55  ;;  %v1951_v53 = vld [vmem:[%s2431_s7 + $0x8] sm:$0xff]   ;;  %v1952_v54 = vld [vmem:[%s2433_s9] sm:$0xff]   ;;  %v929_v56 = vpop.permute.xlu0 %928 }
 0x32c   : > { %v1816_v60 = vpop.f32.mrf.mxu1  ;;  %v1953_v55 = vld [vmem:[%s2433_s9 + $0x8] sm:$0xff]  }
 0x32d   : > { %v1688_v62 = vmul.f32 -1.442695, %v872_v58  ;;  %v870_v63 = vadd.f32 %v1682_v57, %v844_v59  ;;  %v855_v0 = vadd.f32 %v1816_v60, %v717_v51  ;;  %v934_v57 = vpop.permute.xlu1 %933 }
 0x32e   : > { %v846_v2 = vpop.f32.mrf.mxu1 }
 0x32f   : > { %1960 = vpow2.f32 %v1688_v62  ;;  %v1686_v4 = vmul.f32 -1.442695, %v870_v63  ;;  %v873_v5 = vadd.f32 %v1685_v61, %v855_v0  ;;  %v847_v6 = vadd.f32 %v846_v2, %v707_v1  ;;  %v919_v60 = vpop.permute.xlu0 %918 }
 0x331   : > { %1962 = vpow2.f32 %v1686_v4  ;;  %v1689_v8 = vmul.f32 -1.442695, %v873_v5  ;;  %v871_v9 = vadd.f32 %v1683_v3, %v847_v6  ;;  %v924_v2 = vpop.permute.xlu1 %923 }
 0x333   : > { %1964 = vpow2.f32 %v1689_v8  ;;  %v1687_v10 = vmul.f32 -1.442695, %v871_v9 }
 0x335   : > { %1966 = vpow2.f32 %v1687_v10 }
 0x336   : > { %1968 = vtanh.f32 %v868_v24 }
 0x337   : > { %1970 = vtanh.f32 %v866_v26 }
 0x338   : > { %1972 = vtanh.f32 %v869_v28  ;;  %v1712_v28 = vld [vmem:[%s2430_s6 + $0x70] sm:$0xff] }
 0x33c   : > { %v1961_v27 = vpop.eup %1960 }
 0x33d   : > { %v892_v31 = vadd.f32 1.0, %v1961_v27 }
 0x33e   : > { %v1963_v32 = vpop.eup %1962 }
 0x33f   : > { %v890_v33 = vadd.f32 1.0, %v1963_v32  ;;  %1974 = vrcp.f32 %v892_v31  ;;  %v1710_v31 = vld [vmem:[%s2430_s6 + $0x60] sm:$0xff]  ;;  %v1711_v32 = vld [vmem:[%s2430_s6 + $0x68] sm:$0xff] }
 0x340   : > { %v1965_v34 = vpop.eup %1964 }
 0x341   : > { %v893_v36 = vadd.f32 1.0, %v1965_v34  ;;  %1976 = vrcp.f32 %v890_v33  ;;  %v1708_v33 = vld [vmem:[%s2430_s6 + $0x50] sm:$0xff]  ;;  %v1709_v34 = vld [vmem:[%s2430_s6 + $0x58] sm:$0xff] }
 0x342   : > { %v1967_v37 = vpop.eup %1966 }
 0x343   : > { %1978 = vrcp.f32 %v893_v36  ;;  %v891_v38 = vadd.f32 1.0, %v1967_v37  ;;  %v1969_v39 = vpop.eup %1968  ;;  %v1706_v36 = vld [vmem:[%s2430_s6 + $0x40] sm:$0xff]  ;;  %v1707_v37 = vld [vmem:[%s2430_s6 + $0x48] sm:$0xff] }
 0x344   : > { %1980 = vtanh.f32 %v867_v35  ;;  %v1971_v40 = vpop.eup %1970  ;;  %v1954_v35 = vld [vmem:[%s2429_s5 + $0x20] sm:$0xff]  }
 0x345   : > { %1982 = vrcp.f32 %v891_v38  ;;  %v1973_v41 = vpop.eup %1972  ;;  %v1012_v38 = vld [vmem:[%s2434_s10 + $0x10] sm:$0xff] }
 0x34c   : > { %v1975_v42 = vpop.eup %1974 }
 0x34d   : > { %v904_v46 = vmul.f32 %v1975_v42, %v1969_v39  ;;  %v1013_v39 = vld [vmem:[%s2434_s10 + $0x18] sm:$0xff]  ;;  %v1010_v42 = vld [vmem:[%s2434_s10] sm:$0xff] }
 0x34e   : > { %v1977_v43 = vpop.eup %1976 }
 0x34f   : > { %v902_v50 = vmul.f32 %v1977_v43, %v1971_v40  ;;  %v1740_v40 = vld [vmem:[%s2434_s10 + $0x30] sm:$0xff]  ;;  %v1011_v43 = vld [vmem:[%s2434_s10 + $0x8] sm:$0xff] }
 0x350   : > { %v1979_v44 = vpop.eup %1978 }
 0x351   : > { %v1981_v45 = vpop.eup %1980  ;;  %v905_v47 = vmul.f32 %v1979_v44, %v1973_v41  ;;  %v1741_v41 = vld [vmem:[%s2434_s10 + $0x38] sm:$0xff]  ;;  %v1738_v44 = vld [vmem:[%s2434_s10 + $0x20] sm:$0xff] }
 0x352   : > { %v1983_v48 = vpop.eup %1982 }
 0x353   : > { %v907_v49 = vpack.c.bf16 %v905_v47, %v904_v46  ;;  %v903_v51 = vmul.f32 %v1983_v48, %v1981_v45  ;;  %v1739_v45 = vld [vmem:[%s2434_s10 + $0x28] sm:$0xff]  ;;  %v1477_v46 = vld [vmem:[%s2436_s12] sm:$0xff] }
 0x355   : > { %1817 = vmatprep.subr.bf16.mxu0 %v907_v49  ;;  %v906_v52 = vpack.c.bf16 %v903_v51, %v902_v50 }
 0x356   : > { %1818 = vmatpush3.bf16.msra.mxu0 %v907_v49 }
 0x357   : > { %1819 = vmatprep.subr.bf16.mxu0 %v906_v52 }
 0x35a   : > { %1820 = vmatpush3.bf16.msra.mxu0 %v906_v52 }
 0x35b   : > { %1825 = vmatprep.subr.bf16.mxu0 %v907_v49 }
 0x35d   : > { %1822 = vmatmul.mubr.msk.bf16.vlgmr.msra.gmra.mxu0 %vm946_vm7, %v1951_v53 }
 0x35e   : > { %1826 = vmatpush3.bf16.msra.mxu0 %v907_v49  ;;  %1829 = vmatprep.mubr.msk.bf16.mxu0 %vm946_vm7, %v1952_v54 }
 0x35f   : > { %1827 = vmatprep.subr.bf16.mxu0 %v906_v52 }
 0x362   : > { %1828 = vmatpush3.bf16.msra.mxu0 %v906_v52 }
 0x365   : > { %1830 = vmatmul.mubr.msk.bf16.vlgmr.msra.gmra.mxu0 %vm946_vm7, %v1953_v55 }
 0x366   : > { %1845 = vmatprep.mubr.msk.bf16.mxu0 %vm780_vm5, %v1954_v35 }
 0x41d   : > { %v1823_v58 = vpop.f32.mrf.mxu0 }
 0x41e   : > { %v996_v59 = vadd.f32 %v1823_v58, %v929_v56 }
 0x41f   : > { %v987_v61 = vpop.f32.mrf.mxu0 }
 0x420   : > { %v1004_v62 = vadd.f32 %v996_v59, %v2148_v14  ;;  %v988_v63 = vadd.f32 %v987_v61, %v919_v60 }
 0x421   : > { %v1824_v0 = vpop.f32.mrf.mxu0 }
 0x422   : > { %v999_v1 = vadd.f32 %v1824_v0, %v934_v57  ;;  %1107 = vrot.lane.b32.xlu0 %v1004_v62, %s2021_s28  ;;  %v1002_v4 = vadd.f32 %v988_v63, %v2152_v19 }
 0x423   : > { %v990_v3 = vpop.f32.mrf.mxu0 }
 0x424   : > { %v1005_v5 = vadd.f32 %v999_v1, %v2154_v20  ;;  %v991_v6 = vadd.f32 %v990_v3, %v924_v2  ;;  %v1955_v1 = vld [vmem:[%s2429_s5 + $0x28] sm:$0xff]   ;;  %v1956_v2 = vld [vmem:[%s2429_s5 + $0x30] sm:$0xff]   ;;  %v1957_v3 = vld [vmem:[%s2429_s5 + $0x38] sm:$0xff]  }
 0x426   : > { %v1003_v7 = vadd.f32 %v991_v6, %v2160_v23  ;;  %1109 = vrot.lane.b32.xlu1 %v1005_v5, %s2021_s28  ;;  %1103 = vrot.lane.b32.xlu0 %v1002_v4, %s2021_s28  ;;  %v2281_v8 = vpack.c.bf16 %v1005_v5, %v1004_v62  ;;  %v2377_v5 = vpop.f32.mrf.mxu0 }
 0x428   : > { %v2283_v14 = vpack.c.bf16 %v1003_v7, %v1002_v4  ;;  %v1958_v4 = vld [vmem:[%s2433_s9 + $0x10] sm:$0xff]   ;;  %v2379_v6 = vpop.f32.mrf.mxu0 }
 0x429   : > { %1857 = vmatprep.mubr.msk.bf16.mxu1 %vm946_vm7, %v1958_v4 }
 0x42a   : > { %1105 = vrot.lane.b32.xlu1 %v1003_v7, %s2021_s28  ;;  %s2025_s28 = smov 124   ;;  %v2381_v7 = vpop.f32.mrf.mxu0 }
 0x494   : > { %v1108_v9 = vpop.permute.xlu0 %1107 }
 0x495   : > { %1119 = vst.msk [vmem:[#allocation2 + $0x20] sm:$0xff] %vm586_vm2, %v1108_v9 }
 0x496   : > { %1120 = vst.msk [vmem:[#allocation2 + $0x28] sm:$0xff] %vm588_vm3, %v1108_v9 }
 0x498   : > { %v1110_v19 = vpop.permute.xlu1 %1109  ;;  %v1104_v20 = vpop.permute.xlu0 %1103 }
 0x499   : > { %1121 = vst.msk [vmem:[#allocation2 + $0x30] sm:$0xff] %vm586_vm2, %v1110_v19  ;;  %1115 = vst.msk [vmem:[#allocation2] sm:$0xff] %vm586_vm2, %v1104_v20 }
 0x49a   : > { %1122 = vst.msk [vmem:[#allocation2 + $0x38] sm:$0xff] %vm588_vm3, %v1110_v19  ;;  %1116 = vst.msk [vmem:[#allocation2 + $0x8] sm:$0xff] %vm588_vm3, %v1104_v20 }
 0x49c   : > { %v1106_v23 = vpop.permute.xlu1 %1105  ;;  %v1125_v10 = vld [vmem:[#allocation2 + $0x20] sm:$0xff] }
 0x49d   : > { %v1129_v12 = vld [vmem:[#allocation2 + $0x28] sm:$0xff]  ;;  %1117 = vst.msk [vmem:[#allocation2 + $0x10] sm:$0xff] %vm586_vm2, %v1106_v23 }
 0x49e   : > { %1118 = vst.msk [vmem:[#allocation2 + $0x18] sm:$0xff] %vm588_vm3, %v1106_v23  ;;  %v1924_v13 = vpack.i.bf16 %v1129_v12, %v1125_v10 }
 0x4a0   : > { %1925 = vrot.lane.b32.xlu0 %v1924_v13, %s2025_s28  ;;  %v1126_v15 = vld [vmem:[#allocation2 + $0x30] sm:$0xff]  ;;  %v1123_v17 = vld [vmem:[#allocation2] sm:$0xff] }
 0x4a1   : > { %v1130_v16 = vld [vmem:[#allocation2 + $0x38] sm:$0xff]  ;;  %v1127_v21 = vld [vmem:[#allocation2 + $0x8] sm:$0xff]  ;;  %v2294_v22 = vpack.c.bf16 %v1126_v15, %v1125_v10  ;;  %v1728_v13 = vld [vmem:[%s2252_s16 + $0x1f0] sm:$0xff] }
 0x4a2   : > { %v1934_v18 = vpack.i.bf16 %v1130_v16, %v1126_v15  ;;  %v1929_v24 = vpack.i.bf16 %v1127_v21, %v1123_v17 }
 0x4a4   : > { %1935 = vrot.lane.b32.xlu1 %v1934_v18, %s2025_s28  ;;  %1930 = vrot.lane.b32.xlu0 %v1929_v24, %s2025_s28  ;;  %v1124_v25 = vld [vmem:[#allocation2 + $0x10] sm:$0xff]  ;;  %v1726_v18 = vld [vmem:[%s2252_s16 + $0x1e0] sm:$0xff] }
 0x4a5   : > { %v1128_v26 = vld [vmem:[#allocation2 + $0x18] sm:$0xff]  ;;  %v2299_v29 = vpack.c.bf16 %v1124_v25, %v1123_v17 }
 0x4a6   : > { %v1939_v27 = vpack.i.bf16 %v1128_v26, %v1124_v25  ;;  %v1729_v25 = vld [vmem:[%s2252_s16 + $0x1f8] sm:$0xff] }
 0x4a8   : > { %1940 = vrot.lane.b32.xlu1 %v1939_v27, %s2025_s28  ;;  %1220 = vperm.xlu0 %1892, %v1712_v28  }
 0x4ac   : > { %1225 = vperm.xlu1 %1893, %v1713_v30   ;;  %1210 = vperm.xlu0 %1892, %v1710_v31   ;;  %v1727_v31 = vld [vmem:[%s2252_s16 + $0x1e8] sm:$0xff] }
 0x4b0   : > { %1215 = vperm.xlu1 %1893, %v1711_v32   ;;  %1200 = vperm.xlu0 %1892, %v1708_v33  }
 0x4b4   : > { %1205 = vperm.xlu1 %1893, %v1709_v34   ;;  %1190 = vperm.xlu0 %1892, %v1706_v36  }
 0x4b8   : > { %1195 = vperm.xlu1 %1893, %v1707_v37   ;;  %1026 = vperm.xlu0 %1892, %v1012_v38  }
 0x4bc   : > { %1031 = vperm.xlu1 %1893, %v1013_v39   ;;  %1397 = vperm.xlu0 %1892, %v1740_v40  }
 0x4c0   : > { %1402 = vperm.xlu1 %1893, %v1741_v41   ;;  %1016 = vperm.xlu0 %1892, %v1010_v42   ;;  %v1724_v42 = vld [vmem:[%s2252_s16 + $0x1d0] sm:$0xff] }
 0x4c4   : > { %1021 = vperm.xlu1 %1893, %v1011_v43   ;;  %1387 = vperm.xlu0 %1892, %v1738_v44   ;;  %v1722_v44 = vld [vmem:[%s2252_s16 + $0x1c0] sm:$0xff] }
 0x4c8   : > { %1392 = vperm.xlu1 %1893, %v1739_v45   ;;  %1480 = vperm.xlu0 %1892, %v1477_v46   ;;  %v1725_v46 = vld [vmem:[%s2252_s16 + $0x1d8] sm:$0xff] }
 0x512   : > { %v1926_v47 = vpop.permute.xlu0 %1925 }
 0x513   : > { %v1928_v48 = vunpack.i.h.bf16 %v1926_v47  ;;  %v1927_v49 = vunpack.i.l.bf16 %v1926_v47 }
 0x515   : > { %v1158_v56 = vsel %vm1155_vm8, %v1927_v49, %v1928_v48 }
 0x516   : > { %v1936_v50 = vpop.permute.xlu1 %1935  ;;  %v1931_v53 = vpop.permute.xlu0 %1930 }
 0x517   : > { %v1938_v51 = vunpack.i.h.bf16 %v1936_v50  ;;  %v1937_v52 = vunpack.i.l.bf16 %v1936_v50  ;;  %v1933_v54 = vunpack.i.h.bf16 %v1931_v53  ;;  %v1932_v55 = vunpack.i.l.bf16 %v1931_v53  ;;  %v1723_v53 = vld [vmem:[%s2252_s16 + $0x1c8] sm:$0xff] }
 0x519   : > { %v1159_v57 = vsel %vm1155_vm8, %v1937_v52, %v1938_v51  ;;  %v1156_v62 = vsel %vm1155_vm8, %v1932_v55, %v1933_v54 }
 0x51a   : > { %v1941_v58 = vpop.permute.xlu1 %1940  ;;  %v1169_v59 = vpack.c.bf16 %v1159_v57, %v1158_v56 }
 0x51b   : > { %v1943_v60 = vunpack.i.h.bf16 %v1941_v58  ;;  %v1942_v61 = vunpack.i.l.bf16 %v1941_v58 }
 0x51c   : > { %1833 = vmatprep.subr.bf16.mxu0 %v1169_v59 }
 0x51d   : > { %1834 = vmatpush3.bf16.msra.mxu0 %v1169_v59  ;;  %v1157_v63 = vsel %vm1155_vm8, %v1942_v61, %v1943_v60 }
 0x51e   : > { %v1168_v0 = vpack.c.bf16 %v1157_v63, %v1156_v62 }
 0x520   : > { %1835 = vmatprep.subr.bf16.mxu0 %v1168_v0 }
 0x521   : > { %1836 = vmatpush3.bf16.msra.mxu0 %v1168_v0 }
 0x522   : > { %1837 = vmatprep.subr.bf16.mxu0 %v2281_v8 }
 0x523   : > { %v1221_v19 = vpop.permute.xlu0 %1220 }
 0x525   : > { %1838 = vmatpush3.bf16.msra.mxu0 %v2281_v8  ;;  %v2383_v8 = vpop.f32.mrf.mxu0 }
 0x526   : > { %1839 = vmatprep.subr.bf16.mxu0 %v2283_v14 }
 0x527   : > { %v1226_v10 = vpop.permute.xlu1 %1225  ;;  %v1211_v16 = vpop.permute.xlu0 %1210 }
 0x529   : > { %1840 = vmatpush3.bf16.msra.mxu0 %v2283_v14 }
 0x52a   : > { %1841 = vmatprep.subr.bf16.mxu0 %v2294_v22 }
 0x52b   : > { %v1201_v35 = vpop.permute.xlu0 %1200 }
 0x52d   : > { %1842 = vmatpush3.bf16.msra.mxu0 %v2294_v22 }
 0x52e   : > { %1843 = vmatprep.subr.bf16.mxu0 %v2299_v29 }
 0x52f   : > { %v1191_v40 = vpop.permute.xlu0 %1190 }
 0x531   : > { %1844 = vmatpush3.bf16.msra.mxu0 %v2299_v29  ;;  %v1216_v29 = vpop.permute.xlu1 %1215 }
 0x534   : > { %1846 = vmatmul.mubr.msk.bf16.vlgmr.msra.gmra.mxu0 %vm780_vm5, %v1955_v1 }
 0x535   : > { %1849 = vmatprep.mubr.msk.bf16.mxu0 %vm780_vm5, %v1956_v2  ;;  %v1206_v39 = vpop.permute.xlu1 %1205 }
 0x539   : > { %v1196_v48 = vpop.permute.xlu1 %1195 }
 0x53c   : > { %1850 = vmatmul.mubr.msk.bf16.gmra.mxu0 %vm780_vm5, %v1957_v3 }
 0x5f4   : > { %v1847_v14 = vpop.f32.mrf.mxu0 }
 0x5f5   : > { %v1303_v41 = vadd.f32 %v1847_v14, %v1201_v35 }
 0x5f6   : > { %v1294_v9 = vpop.f32.mrf.mxu0 }
 0x5f7   : > { %v1295_v43 = vadd.f32 %v1294_v9, %v1191_v40  ;;  %v1335_v47 = vadd.f32 %v1724_v42, %v1303_v41 }
 0x5f8   : > { %v1848_v20 = vpop.f32.mrf.mxu0 }
 0x5f9   : > { %v1306_v45 = vadd.f32 %v1848_v20, %v1206_v39  ;;  %v1333_v49 = vadd.f32 %v1722_v44, %v1295_v43 }
 0x5fa   : > { %v1297_v23 = vpop.f32.mrf.mxu0 }
 0x5fb   : > { %v1336_v51 = vadd.f32 %v1725_v46, %v1306_v45  ;;  %v1298_v52 = vadd.f32 %v1297_v23, %v1196_v48 }
 0x5fc   : > { %v1851_v12 = vpop.f32.mrf.mxu0 }
 0x5fd   : > { %v1319_v15 = vadd.f32 %v1851_v12, %v1221_v19  ;;  %v1334_v58 = vadd.f32 %v1723_v53, %v1298_v52 }
 0x5fe   : > { %v1310_v17 = vpop.f32.mrf.mxu0 }
 0x5ff   : > { %v1339_v21 = vadd.f32 %v1728_v13, %v1319_v15  ;;  %v1311_v22 = vadd.f32 %v1310_v17, %v1211_v16  ;;  %v1959_v13 = vld [vmem:[%s2433_s9 + $0x18] sm:$0xff]   ;;  %v1027_v15 = vpop.permute.xlu0 %1026  ;;  %v1032_v16 = vpop.permute.xlu1 %1031 }
 0x600   : > { %v1852_v24 = vpop.f32.mrf.mxu0 }
 0x601   : > { %v1732_v26 = vmul.f32 -1.442695, %v1339_v21  ;;  %v1337_v27 = vadd.f32 %v1726_v18, %v1311_v22  ;;  %v1322_v28 = vadd.f32 %v1852_v24, %v1226_v10 }
 0x602   : > { %v1313_v30 = vpop.f32.mrf.mxu0 }
 0x603   : > { %1984 = vpow2.f32 %v1732_v26  ;;  %v1730_v32 = vmul.f32 -1.442695, %v1337_v27  ;;  %v1340_v33 = vadd.f32 %v1729_v25, %v1322_v28  ;;  %v1314_v34 = vadd.f32 %v1313_v30, %v1216_v29  ;;  %v1398_v17 = vpop.permute.xlu0 %1397  ;;  %v1403_v18 = vpop.permute.xlu1 %1402 }
 0x604   : > { %v1093_v28 = vadd.f32 %v2377_v5, %v1027_v15  ;;  %v1096_v29 = vadd.f32 %v2381_v7, %v1032_v16  ;;  %v1474_v7 = vld [vmem:[%s2435_s11] sm:$0xf] }
 0x605   : > { %1986 = vpow2.f32 %v1730_v32  ;;  %v1733_v36 = vmul.f32 -1.442695, %v1340_v33  ;;  %v1338_v37 = vadd.f32 %v1727_v31, %v1314_v34 }
 0x607   : > { %1988 = vpow2.f32 %v1733_v36  ;;  %v1731_v38 = vmul.f32 -1.442695, %v1338_v37  ;;  %v1017_v21 = vpop.permute.xlu0 %1016  ;;  %v1022_v22 = vpop.permute.xlu1 %1021 }
 0x608   : > { %v1088_v32 = vadd.f32 %v2383_v8, %v1022_v22  ;;  %v1085_v39 = vadd.f32 %v2379_v6, %v1017_v21 }
 0x609   : > { %1990 = vpow2.f32 %v1731_v38 }
 0x60a   : > { %1992 = vtanh.f32 %v1335_v47 }
 0x60b   : > { %1994 = vtanh.f32 %v1333_v49  ;;  %v1388_v30 = vpop.permute.xlu0 %1387  ;;  %v1393_v33 = vpop.permute.xlu1 %1392 }
 0x60c   : > { %1996 = vtanh.f32 %v1336_v51 }
 0x60f   : > { %v1481_v6 = vpop.permute.xlu0 %1480 }
 0x610   : > { %v1985_v50 = vpop.eup %1984 }
 0x611   : > { %v1359_v54 = vadd.f32 1.0, %v1985_v50  ;;  %v2010_v50 = vld [vmem:[%s2129_s23] sm:$0xff] }
 0x612   : > { %v1987_v55 = vpop.eup %1986 }
 0x613   : > { %v1357_v56 = vadd.f32 1.0, %v1987_v55  ;;  %1998 = vrcp.f32 %v1359_v54 }
 0x614   : > { %v1989_v57 = vpop.eup %1988 }
 0x615   : > { %v1360_v59 = vadd.f32 1.0, %v1989_v57  ;;  %2000 = vrcp.f32 %v1357_v56 }
 0x616   : > { %v1991_v60 = vpop.eup %1990 }
 0x617   : > { %2002 = vrcp.f32 %v1360_v59  ;;  %v1358_v61 = vadd.f32 1.0, %v1991_v60  ;;  %v1993_v62 = vpop.eup %1992 }
 0x618   : > { %2004 = vtanh.f32 %v1334_v58  ;;  %v1995_v63 = vpop.eup %1994 }
 0x619   : > { %2006 = vrcp.f32 %v1358_v61  ;;  %v1997_v0 = vpop.eup %1996 }
 0x620   : > { %v1999_v1 = vpop.eup %1998 }
 0x621   : > { %v1371_v14 = vmul.f32 %v1999_v1, %v1993_v62 }
 0x622   : > { %v2001_v2 = vpop.eup %2000 }
 0x623   : > { %v1369_v23 = vmul.f32 %v2001_v2, %v1995_v63 }
 0x624   : > { %v2003_v3 = vpop.eup %2002 }
 0x625   : > { %v2005_v4 = vpop.eup %2004  ;;  %v1372_v9 = vmul.f32 %v2003_v3, %v1997_v0 }
 0x626   : > { %v2007_v19 = vpop.eup %2006 }
 0x627   : > { %v1374_v20 = vpack.c.bf16 %v1372_v9, %v1371_v14  ;;  %v1370_v10 = vmul.f32 %v2007_v19, %v2005_v4 }
 0x629   : > { %1853 = vmatprep.subr.bf16.mxu1 %v1374_v20  ;;  %v1373_v12 = vpack.c.bf16 %v1370_v10, %v1369_v23 }
 0x62a   : > { %1854 = vmatpush3.bf16.msra.mxu1 %v1374_v20 }
 0x62b   : > { %1855 = vmatprep.subr.bf16.mxu1 %v1373_v12 }
 0x62e   : > { %1856 = vmatpush3.bf16.msra.mxu1 %v1373_v12 }
 0x62f   : > { %1861 = vmatprep.subr.bf16.mxu1 %v2020_v11 }
 0x631   : > { %1858 = vmatmul.mubr.msk.bf16.vlgmr.msra.gmra.mxu1 %vm946_vm7, %v1959_v13 }
 0x632   : > { %1865 = vmatprep.mubr.msk.bf16.mxu1 %vm2026_vm9, %v2020_v11 }
 0x6f1   : > { %v1859_v24 = vpop.f32.mrf.mxu1 }
 0x6f2   : > { %v1464_v26 = vadd.f32 %v1859_v24, %v1398_v17 }
 0x6f3   : > { %v1455_v25 = vpop.f32.mrf.mxu1 }
 0x6f4   : > { %v1472_v35 = vadd.f32 %v1464_v26, %v1093_v28  ;;  %v1456_v36 = vadd.f32 %v1455_v25, %v1388_v30 }
 0x6f5   : > { %v1860_v27 = vpop.f32.mrf.mxu1 }
 0x6f6   : > { %v1467_v31 = vadd.f32 %v1860_v27, %v1403_v18  ;;  %v1470_v42 = vadd.f32 %v1456_v36, %v1085_v39 }
 0x6f7   : > { %v1458_v34 = vpop.f32.mrf.mxu1 }
 0x6f8   : > { %v1473_v37 = vadd.f32 %v1467_v31, %v1096_v29  ;;  %v1459_v38 = vadd.f32 %v1458_v34, %v1393_v33 }
 0x6fa   : > { %v1476_v40 = vpack.c.bf16 %v1473_v37, %v1472_v35  ;;  %v1471_v41 = vadd.f32 %v1459_v38, %v1088_v32 }
 0x6fc   : > { %1862 = vmatpush3.bf16.msra.mxu1 %v1476_v40  ;;  %v1475_v5 = vpack.c.bf16 %v1471_v41, %v1470_v42 }
 0x6fd   : > { %1863 = vmatprep.subr.bf16.mxu1 %v2020_v11 }
 0x700   : > { %1864 = vmatpush3.bf16.msra.mxu1 %v1475_v5 }
 0x701   : > { %1869 = vmatprep.subr.bf16.mxu1 %v2020_v11 }
 0x703   : > { %1866 = vmatmul.mubr.msk.bf16.vlgmr.msra.gmra.mxu1 %vm946_vm7, %v1474_v7 }
 0x704   : > { %1871 = vmatprep.mubr.msk.bf16.mxu1 %vm2026_vm9, %v2020_v11  ;;  %v1536_v11 = vld [vmem:[%s2426_s2] sm:$0xf] }
 0x7c3   : > { %v1520_v8 = vpop.f32.mrf.mxu1 }
 0x7c4   : > { %v1521_v43 = vadd.f32 %v1520_v8, %v1481_v6 }
 0x7c5   : > { %v1867_v44 = vpop.f32.mrf.mxu1 }
 0x7c6   : > { %v1527_v45 = vsub.f32 0.0, %v1521_v43  ;;  %v1526_v51 = vsub.f32 %v2010_v50, %v1521_v43 }
 0x7c7   : > { %v1523_v46 = vpop.f32.mrf.mxu1 }
 0x7c8   : > { %v1528_v47 = vmul.f32 1.442695, %v1527_v45 }
 0x7c9   : > { %v1868_v48 = vpop.f32.mrf.mxu1 }
 0x7ca   : > { %2008 = vpow2.f32 %v1528_v47 }
 0x7d7   : > { %v2009_v49 = vpop.eup %2008 }
 0x7d8   : > { %v1531_v52 = vrot.slane %v2009_v49, 4 }
 0x7da   : > { %v1533_v53 = vmul.f32 %v1531_v52, %v1526_v51 }
 0x7dc   : > { %v1535_v54 = vsel %vm1534_vm10, %v1533_v53, %v2010_v50 }
 0x7dd   : > { %v1537_v55 = vpack.c.bf16 %v1535_v54, %v1535_v54 }
 0x7df   : > { %v1543_v56 = vsel %vm1534_vm10, %v1537_v55, 0 }
 0x7e0   : > { %1870 = vmatpush3.bf16.msra.mxu1 %v1543_v56 }
 0x7e3   : > { %1872 = vmatmul.mubr.msk.bf16.vlgmr.msra.gmra.mxu1 %vm1538_vm11, %v1536_v11 }
 0x8a3   : > { %v1579_v57 = vpop.f32.mrf.mxu1 }
 0x8a4   : > { %1585 = vst [vmem:[%s458_s14] sm:$0xff] %v1579_v57 }
 0x8a5   : > { %v1873_v58 = vpop.f32.mrf.mxu1 }
 0x8a7   : > { %v1582_v59 = vpop.f32.mrf.mxu1 }
 0x8a9   : > { %v1874_v60 = vpop.f32.mrf.mxu1 }
 0x8aa PF: > { %s23_s25 = sadd.s32 1, %s2017_s25  }
 0x8ab   : > { %p20_p4 = scmp.ge.s32.totalorder %s23_s25, 4  }
 0x8ad   :  { %22 = sbr.rel (!%p20_p4) target bundleno = 1 (0x1), region = 109 }

// kernel: _lambda_.9
= control target key start
LH: loop header
LB: loop body
LE: loop exit
PB: predicated region body
PF: predicated region fallthrough
CT: control target
= control target key end

     0   :  { %s2095_s25 = smov 0   ;;  %s2422_s0 = inlined_call_operand.vmem [shape: f32[2,8,128], index: 0, kind: input, shape index: {}]   ;;  %s2423_s1 = inlined_call_operand.vmem [shape: f32[2,512,128], index: 1, kind: input, shape index: {}]   ;;  %s2424_s2 = inlined_call_operand.vmem [shape: bf16[8,8], index: 2, kind: input, shape index: {}]   ;;  %s2425_s3 = inlined_call_operand.vmem [shape: bf16[32,4], index: 3, kind: input, shape index: {}]   ;;  %s2426_s4 = inlined_call_operand.vmem [shape: f32[32,1], index: 4, kind: input, shape index: {}]   ;;  %s2427_s5 = inlined_call_operand.vmem [shape: bf16[2,64,96], index: 5, kind: input, shape index: {}]   ;;  %s2428_s6 = inlined_call_operand.vmem [shape: f32[2,64,1], index: 6, kind: input, shape index: {}]   ;;  %s2429_s7 = inlined_call_operand.vmem [shape: bf16[1,32,32], index: 7, kind: input, shape index: {}]   ;;  %s2430_s8 = inlined_call_operand.vmem [shape: f32[1,32,1], index: 8, kind: input, shape index: {}]   ;;  %s2431_s9 = inlined_call_operand.vmem [shape: bf16[2,32,32], index: 9, kind: input, shape index: {}]   ;;  %s2432_s10 = inlined_call_operand.vmem [shape: f32[2,32,1], index: 10, kind: input, shape index: {}]   ;;  %s2433_s11 = inlined_call_operand.vmem [shape: bf16[8,32], index: 11, kind: input, shape index: {}]   ;;  %s2434_s12 = inlined_call_operand.vmem [shape: f32[8,1], index: 12, kind: input, shape index: {}]   ;;  %s2435_s13 = inlined_call_operand.vmem [shape: f32[2,8,128], index: 13, kind: output, shape index: {}]  }
   0x1 LB: > { %s1655_s26 = sadd.s32 4294967295, %s2015_s25   ;;  %p1659_p0 = scmp.ge.s32.totalorder %s2015_s25, 1  ;;  %s2015_s25 = sphi %s2095_s25, %s23_s25  }
   0x2   : > { %p397_p1 = scmp.lt.s32.totalorder %s2015_s25, 3 }
   0x4   : > { %p398_p2 = pnand %p1659_p0, %p397_p1 }
   0x5   : > { %p445_p3 = scmp.lt.s32.totalorder (!%p398_p2), %s1655_s26, 1  ;;  %s2019_s28 = smov (!%p398_p2), 2  }
   0x6   : > { %401 = sbr.rel (%p398_p2) target bundleno = 2214 (0x8a6), region = 72  ;;  %s2020_s29 = smov (!%p398_p2), 126  }
   0x7   : > { %s2021_s30 = smov (!%p398_p2), 1   ;;  %s2022_s14 = smov (!%p398_p2), 127  }
   0xb   : > { %v1942_v0 = vld [vmem:[%s2425_s3] sm:$0xff]   ;;  %vm500_vm0 = vcmask 31744   ;;  %s2437_s26 = smov (!%p445_p3, %s1655_s26), 1  ;;  %v468_v1 = vld [vmem:[%s2426_s4 + $0x10] sm:$0xff]  ;;  %v2017_v2 = vmov 0   ;;  %v469_v3 = vld [vmem:[%s2426_s4 + $0x18] sm:$0xff] }
   0xc   : > { %1791 = vmatprep.mubr.msk.bf16.mxu0 %vm500_vm0, %v1942_v0  ;;  %1890 = vset.pattern.permute.xlu0 %v2017_v2  ;;  %v466_v4 = vld [vmem:[%s2426_s4] sm:$0xff]  ;;  %s1660_s18 = sshll.u32 %s2437_s26, 3  ;;  %v467_v5 = vld [vmem:[%s2426_s4 + $0x8] sm:$0xff]  ;;  %vm507_vm1 = vcmask 1041408   ;;  %v2018_v10 = vmov 0.0   ;;  %vm584_vm2 = vcmask 1047568  }
   0xd   : > { %482 = vperm.xlu0 %1890, %v468_v1   ;;  %1891 = vset.pattern.permute.xlu1 %v2017_v2  ;;  %s2127_s23 = scalar_lea.vmem %s2422_s0, %s1660_s18  ;;  %v1943_v9 = vld [vmem:[%s2425_s3 + $0x8] sm:$0xff]   ;;  %564 = vst [vmem:[#allocation2 + $0x20] sm:$0xff] %v2018_v10  ;;  %565 = vst.msk [vmem:[#allocation2 + $0x28] sm:$0xff] %vm500_vm0, %v2018_v10  ;;  %vm586_vm3 = vcmask 15360   ;;  %vm638_vm4 = vcmask 1031168   ;;  %vm778_vm5 = vcmask 785408  }
   0xe   : > { %472 = vperm.xlu1 %1891, %v466_v4   ;;  %v460_v6 = vld [vmem:[%s2127_s23] sm:$0xff]  ;;  %560 = vst [vmem:[#allocation2] sm:$0xff] %v2018_v10  ;;  %561 = vst.msk [vmem:[#allocation2 + $0x8] sm:$0xff] %vm500_vm0, %v2018_v10  ;;  %vm767_vm6 = vcmask 1039360   ;;  %vm944_vm7 = vcmask 261120   ;;  %vm1153_vm8 = vcmask 1014784  }
   0xf   : > { %v465_v7 = vpack.c.bf16 %v460_v6, %v460_v6  ;;  %562 = vst [vmem:[#allocation2 + $0x10] sm:$0xff] %v2018_v10  ;;  %563 = vst.msk [vmem:[#allocation2 + $0x18] sm:$0xff] %vm500_vm0, %v2018_v10  ;;  %v1944_v6 = vld [vmem:[%s2427_s5] sm:$0xff]   ;;  %vm2024_vm9 = vmmov 0   ;;  %vm1532_vm10 = vcmask 1043456   ;;  %vm1536_vm11 = vcmask 64512  }
  0x10   : > { %566 = vst [vmem:[#allocation2 + $0x30] sm:$0xff] %v2018_v10  ;;  %567 = vst.msk [vmem:[#allocation2 + $0x38] sm:$0xff] %vm500_vm0, %v2018_v10  ;;  %1807 = vmatprep.mubr.msk.bf16.mxu1 %vm778_vm5, %v1944_v6 }
  0x11   : > { %487 = vperm.xlu0 %1890, %v469_v3   ;;  %1873 = vmatprep.subr.msk.bf16.mxu0 %vm507_vm1, %v465_v7  ;;  %v509_v8 = vsel %vm507_vm1, %v465_v7, 0 }
  0x12   : > { %477 = vperm.xlu1 %1891, %v467_v5   ;;  %1790 = vmatpush3.bf16.msra.mxu0 %v509_v8 }
  0x15   : > { %1792 = vmatmul.mubr.msk.bf16.vlgmr.msra.gmra.mxu0 %vm500_vm0, %v1943_v9 }
  0x88   : > { %v483_v11 = vpop.permute.xlu0 %482 }
  0x89   : > { %v473_v14 = vpop.permute.xlu1 %472 }
  0x8c   : > { %v488_v16 = vpop.permute.xlu0 %487 }
  0x8d   : > { %v478_v21 = vpop.permute.xlu1 %477 }
  0xd5   : > { %v1793_v12 = vpop.f32.mrf.mxu0 }
  0xd6   : > { %v2146_v13 = vadd.f32 %v1793_v12, %v483_v11  ;;  %v676_v11 = vld [vmem:[%s2428_s6 + $0x38] sm:$0xff]  ;;  %v675_v12 = vld [vmem:[%s2428_s6 + $0x30] sm:$0xff] }
  0xd7   : > { %v545_v15 = vpop.f32.mrf.mxu0 }
  0xd8   : > { %576 = vrot.lane.b32.xlu0 %v2146_v13, %s2019_s28  ;;  %v2150_v18 = vadd.f32 %v545_v15, %v473_v14  ;;  %v674_v14 = vld [vmem:[%s2428_s6 + $0x28] sm:$0xff]  ;;  %v673_v15 = vld [vmem:[%s2428_s6 + $0x20] sm:$0xff] }
  0xd9   : > { %v1794_v17 = vpop.f32.mrf.mxu0 }
  0xda   : > { %v2152_v19 = vadd.f32 %v1794_v17, %v488_v16  ;;  %v672_v16 = vld [vmem:[%s2428_s6 + $0x18] sm:$0xff]  ;;  %v671_v17 = vld [vmem:[%s2428_s6 + $0x10] sm:$0xff] }
  0xdb   : > { %v548_v20 = vpop.f32.mrf.mxu0 }
  0xdc   : > { %578 = vrot.lane.b32.xlu1 %v2152_v19, %s2019_s28  ;;  %572 = vrot.lane.b32.xlu0 %v2150_v18, %s2019_s28  ;;  %v2158_v22 = vadd.f32 %v548_v20, %v478_v21  ;;  %v1912_v39 = vpack.i.bf16 %v2152_v19, %v2146_v13  ;;  %v670_v20 = vld [vmem:[%s2428_s6 + $0x8] sm:$0xff]  ;;  %v669_v21 = vld [vmem:[%s2428_s6] sm:$0xff] }
  0xde   : > { %v1917_v40 = vpack.i.bf16 %v2158_v22, %v2150_v18 }
  0xe0   : > { %574 = vrot.lane.b32.xlu1 %v2158_v22, %s2019_s28 }
 0x14a   : > { %v577_v23 = vpop.permute.xlu0 %576 }
 0x14b   : > { %590 = vst.msk [vmem:[#allocation2 + $0x20] sm:$0xff] %vm584_vm2, %v577_v23 }
 0x14c   : > { %591 = vst.msk [vmem:[#allocation2 + $0x28] sm:$0xff] %vm586_vm3, %v577_v23  ;;  %v913_v23 = vld [vmem:[%s2430_s8 + $0x18] sm:$0xff] }
 0x14e   : > { %v579_v24 = vpop.permute.xlu1 %578  ;;  %v573_v25 = vpop.permute.xlu0 %572 }
 0x14f   : > { %592 = vst.msk [vmem:[#allocation2 + $0x30] sm:$0xff] %vm584_vm2, %v579_v24  ;;  %585 = vst.msk [vmem:[#allocation2] sm:$0xff] %vm584_vm2, %v573_v25 }
 0x150   : > { %593 = vst.msk [vmem:[#allocation2 + $0x38] sm:$0xff] %vm586_vm3, %v579_v24  ;;  %587 = vst.msk [vmem:[#allocation2 + $0x8] sm:$0xff] %vm586_vm3, %v573_v25  ;;  %v912_v24 = vld [vmem:[%s2430_s8 + $0x10] sm:$0xff]  ;;  %v911_v25 = vld [vmem:[%s2430_s8 + $0x8] sm:$0xff] }
 0x152   : > { %v575_v26 = vpop.permute.xlu1 %574  ;;  %v2168_v27 = vld [vmem:[#allocation2 + $0x20] sm:$0xff] }
 0x153   : > { %v2170_v28 = vld [vmem:[#allocation2 + $0x28] sm:$0xff]  ;;  %588 = vst.msk [vmem:[#allocation2 + $0x10] sm:$0xff] %vm584_vm2, %v575_v26 }
 0x154   : > { %589 = vst.msk [vmem:[#allocation2 + $0x18] sm:$0xff] %vm586_vm3, %v575_v26  ;;  %v1892_v29 = vpack.i.bf16 %v2170_v28, %v2168_v27  ;;  %v910_v26 = vld [vmem:[%s2430_s8] sm:$0xff] }
 0x156   : > { %1893 = vrot.lane.b32.xlu0 %v1892_v29, %s2020_s29  ;;  %v600_v30 = vld [vmem:[#allocation2 + $0x30] sm:$0xff]  ;;  %v594_v32 = vld [vmem:[#allocation2] sm:$0xff] }
 0x157   : > { %v601_v31 = vld [vmem:[#allocation2 + $0x38] sm:$0xff]  ;;  %v595_v34 = vld [vmem:[#allocation2 + $0x8] sm:$0xff]  ;;  %v653_v7 = vpack.c.bf16 %v600_v30, %v2168_v27 }
 0x158   : > { %v1902_v33 = vpack.i.bf16 %v601_v31, %v600_v30  ;;  %v1897_v35 = vpack.i.bf16 %v595_v34, %v594_v32  ;;  %v654_v5 = vpack.c.bf16 %v601_v31, %v2170_v28 }
 0x15a   : > { %1903 = vrot.lane.b32.xlu1 %v1902_v33, %s2020_s29  ;;  %1898 = vrot.lane.b32.xlu0 %v1897_v35, %s2020_s29  ;;  %v596_v36 = vld [vmem:[#allocation2 + $0x10] sm:$0xff] }
 0x15b   : > { %v597_v37 = vld [vmem:[#allocation2 + $0x18] sm:$0xff]  ;;  %v651_v9 = vpack.c.bf16 %v596_v36, %v594_v32 }
 0x15c   : > { %v1907_v38 = vpack.i.bf16 %v597_v37, %v596_v36  ;;  %v652_v8 = vpack.c.bf16 %v597_v37, %v595_v34 }
 0x15e   : > { %1908 = vrot.lane.b32.xlu1 %v1907_v38, %s2020_s29  ;;  %1913 = vrot.lane.b32.xlu0 %v1912_v39, %s2021_s30 }
 0x162   : > { %1918 = vrot.lane.b32.xlu1 %v1917_v40, %s2021_s30  ;;  %s1748_s30 = sshll.u32 %s2437_s26, 9 }
 0x163   : > { %s2250_s16 = scalar_lea.vmem %s2423_s1, %s1748_s30 }
 0x1c8   : > { %v1894_v41 = vpop.permute.xlu0 %1893 }
 0x1c9   : > { %v1896_v42 = vunpack.i.h.bf16 %v1894_v41  ;;  %v1895_v43 = vunpack.i.l.bf16 %v1894_v41  ;;  %v1945_v41 = vld [vmem:[%s2427_s5 + $0x8] sm:$0xff]  }
 0x1cb   : > { %v641_v48 = vsel %vm638_vm4, %v1895_v43, %v1896_v42  ;;  %v1947_v43 = vld [vmem:[%s2427_s5 + $0x18] sm:$0xff]  }
 0x1cc   : > { %v1904_v44 = vpop.permute.xlu1 %1903  ;;  %v1899_v47 = vpop.permute.xlu0 %1898 }
 0x1cd   : > { %v1906_v45 = vunpack.i.h.bf16 %v1904_v44  ;;  %v1905_v46 = vunpack.i.l.bf16 %v1904_v44  ;;  %v1901_v50 = vunpack.i.h.bf16 %v1899_v47  ;;  %v1900_v51 = vunpack.i.l.bf16 %v1899_v47  ;;  %v1948_v44 = vld [vmem:[%s2429_s7] sm:$0xff]  }
 0x1ce   : > { %1819 = vmatprep.mubr.msk.bf16.mxu0 %vm944_vm7, %v1948_v44 }
 0x1cf   : > { %v660_v49 = vpack.c.bf16 %v1906_v45, %v1896_v42  ;;  %v642_v52 = vsel %vm638_vm4, %v1905_v46, %v1906_v45  ;;  %v639_v59 = vsel %vm638_vm4, %v1900_v51, %v1901_v50  ;;  %v1946_v42 = vld [vmem:[%s2427_s5 + $0x10] sm:$0xff]  }
 0x1d0   : > { %v1909_v53 = vpop.permute.xlu1 %1908  ;;  %v659_v54 = vpack.c.bf16 %v642_v52, %v641_v48  ;;  %v1914_v57 = vpop.permute.xlu0 %1913  ;;  %v1682_v52 = vld [vmem:[%s2250_s16 + $0x130] sm:$0xff] }
 0x1d1   : > { %v1911_v55 = vunpack.i.h.bf16 %v1909_v53  ;;  %v1910_v56 = vunpack.i.l.bf16 %v1909_v53  ;;  %765 = vrot.lane.b32.xlu1 %v660_v49, %s2022_s14  ;;  %v1916_v61 = vunpack.i.h.bf16 %v1914_v57  ;;  %v1915_v62 = vunpack.i.l.bf16 %v1914_v57 }
 0x1d2   : > { %763 = vrot.lane.b32.xlu0 %v659_v54, %s2022_s14 }
 0x1d3   : > { %v658_v58 = vpack.c.bf16 %v1911_v55, %v1901_v50  ;;  %v640_v60 = vsel %vm638_vm4, %v1910_v56, %v1911_v55  ;;  %v656_v4 = vpack.c.bf16 %v1916_v61, %v1915_v62  ;;  %v1680_v56 = vld [vmem:[%s2250_s16 + $0x120] sm:$0xff] }
 0x1d4   : > { %v1919_v63 = vpop.permute.xlu1 %1918  ;;  %v657_v0 = vpack.c.bf16 %v640_v60, %v639_v59  ;;  %v1683_v60 = vld [vmem:[%s2250_s16 + $0x138] sm:$0xff] }
 0x1d5   : > { %v1921_v1 = vunpack.i.h.bf16 %v1919_v63  ;;  %v1920_v2 = vunpack.i.l.bf16 %v1919_v63  ;;  %761 = vrot.lane.b32.xlu1 %v658_v58, %s2022_s14 }
 0x1d6   : > { %759 = vrot.lane.b32.xlu0 %v657_v0, %s2022_s14 }
 0x1d7   : > { %v655_v3 = vpack.c.bf16 %v1921_v1, %v1920_v2  ;;  %v1681_v2 = vld [vmem:[%s2250_s16 + $0x128] sm:$0xff] }
 0x1d9   : > { %755 = vrot.lane.b32.xlu1 %v655_v3, %s2022_s14 }
 0x1da   : > { %757 = vrot.lane.b32.xlu0 %v656_v4, %s2022_s14 }
 0x1dd   : > { %753 = vrot.lane.b32.xlu1 %v654_v5, %s2022_s14 }
 0x1de   : > { %751 = vrot.lane.b32.xlu0 %v653_v7, %s2022_s14 }
 0x1e1   : > { %749 = vrot.lane.b32.xlu1 %v652_v8, %s2022_s14 }
 0x1e2   : > { %747 = vrot.lane.b32.xlu0 %v651_v9, %s2022_s14  ;;  %s458_s14 = scalar_lea.vmem %s2435_s13, %s1660_s18 }
 0x1e5   : > { %714 = vperm.xlu1 %1891, %v676_v11  }
 0x1e6   : > { %709 = vperm.xlu0 %1890, %v675_v12  }
 0x1e9   : > { %704 = vperm.xlu1 %1891, %v674_v14  }
 0x1ea   : > { %699 = vperm.xlu0 %1890, %v673_v15   ;;  %v1678_v15 = vld [vmem:[%s2250_s16 + $0x110] sm:$0xff] }
 0x1ed   : > { %694 = vperm.xlu1 %1891, %v672_v16  }
 0x1ee   : > { %689 = vperm.xlu0 %1890, %v671_v17   ;;  %v1676_v17 = vld [vmem:[%s2250_s16 + $0x100] sm:$0xff] }
 0x1f1   : > { %684 = vperm.xlu1 %1891, %v670_v20  }
 0x1f2   : > { %679 = vperm.xlu0 %1890, %v669_v21   ;;  %v1679_v21 = vld [vmem:[%s2250_s16 + $0x118] sm:$0xff] }
 0x1f5   : > { %931 = vperm.xlu1 %1891, %v913_v23  }
 0x1f6   : > { %926 = vperm.xlu0 %1890, %v912_v24  }
 0x1f9   : > { %921 = vperm.xlu1 %1891, %v911_v25  }
 0x1fa   : > { %916 = vperm.xlu0 %1890, %v910_v26  }
 0x243   : > { %v766_v27 = vpop.permute.xlu1 %765 }
 0x244   : > { %v764_v28 = vpop.permute.xlu0 %763 }
 0x245   : > { %v771_v29 = vsel %vm767_vm6, %v764_v28, %v766_v27 }
 0x246   : > { %1795 = vmatprep.subr.bf16.mxu1 %v771_v29 }
 0x247   : > { %v762_v30 = vpop.permute.xlu1 %761  ;;  %1796 = vmatpush3.bf16.msra.mxu1 %v771_v29  ;;  %v1677_v29 = vld [vmem:[%s2250_s16 + $0x108] sm:$0xff] }
 0x248   : > { %v760_v31 = vpop.permute.xlu0 %759 }
 0x249   : > { %v770_v32 = vsel %vm767_vm6, %v760_v31, %v762_v30 }
 0x24a   : > { %1797 = vmatprep.subr.bf16.mxu1 %v770_v32 }
 0x24b   : > { %v756_v33 = vpop.permute.xlu1 %755  ;;  %1798 = vmatpush3.bf16.msra.mxu1 %v770_v32 }
 0x24c   : > { %v758_v34 = vpop.permute.xlu0 %757 }
 0x24d   : > { %1799 = vmatprep.subr.bf16.mxu1 %v758_v34 }
 0x24f   : > { %v754_v35 = vpop.permute.xlu1 %753  ;;  %1800 = vmatpush3.bf16.msra.mxu1 %v758_v34 }
 0x250   : > { %1801 = vmatprep.subr.bf16.mxu1 %v756_v33  ;;  %v752_v36 = vpop.permute.xlu0 %751 }
 0x251   : > { %v769_v37 = vsel %vm767_vm6, %v752_v36, %v754_v35 }
 0x253   : > { %1802 = vmatpush3.bf16.msra.mxu1 %v756_v33  ;;  %v750_v38 = vpop.permute.xlu1 %749 }
 0x254   : > { %1803 = vmatprep.subr.bf16.mxu1 %v769_v37  ;;  %v748_v39 = vpop.permute.xlu0 %747 }
 0x255   : > { %v768_v40 = vsel %vm767_vm6, %v748_v39, %v750_v38 }
 0x257   : > { %1804 = vmatpush3.bf16.msra.mxu1 %v769_v37 }
 0x258   : > { %1805 = vmatprep.subr.bf16.mxu1 %v768_v40 }
 0x25b   : > { %1806 = vmatpush3.bf16.msra.mxu1 %v768_v40 }
 0x25e   : > { %1808 = vmatmul.mubr.msk.bf16.vlgmr.msra.gmra.mxu1 %vm778_vm5, %v1945_v41 }
 0x25f   : > { %1811 = vmatprep.mubr.msk.bf16.mxu1 %vm778_vm5, %v1946_v42 }
 0x260   : > { %v715_v50 = vpop.permute.xlu1 %714 }
 0x261   : > { %v710_v47 = vpop.permute.xlu0 %709 }
 0x264   : > { %v705_v0 = vpop.permute.xlu1 %704 }
 0x265   : > { %v700_v54 = vpop.permute.xlu0 %699 }
 0x266   : > { %1812 = vmatmul.mubr.msk.bf16.gmra.mxu1 %vm778_vm5, %v1947_v43 }
 0x268   : > { %v695_v11 = vpop.permute.xlu1 %694 }
 0x269   : > { %v690_v6 = vpop.permute.xlu0 %689 }
 0x26c   : > { %v685_v24 = vpop.permute.xlu1 %684 }
 0x26d   : > { %v680_v12 = vpop.permute.xlu0 %679 }
 0x31e   : > { %v1809_v45 = vpop.f32.mrf.mxu1 }
 0x31f   : > { %v834_v14 = vadd.f32 %v1809_v45, %v690_v6 }
 0x320   : > { %v825_v46 = vpop.f32.mrf.mxu1 }
 0x321   : > { %v826_v16 = vadd.f32 %v825_v46, %v680_v12  ;;  %v866_v23 = vadd.f32 %v1678_v15, %v834_v14 }
 0x322   : > { %v1810_v48 = vpop.f32.mrf.mxu1 }
 0x323   : > { %v837_v20 = vadd.f32 %v1810_v48, %v695_v11  ;;  %v864_v25 = vadd.f32 %v1676_v17, %v826_v16 }
 0x324   : > { %v828_v49 = vpop.f32.mrf.mxu1 }
 0x325   : > { %v867_v27 = vadd.f32 %v1679_v21, %v837_v20  ;;  %v829_v28 = vadd.f32 %v828_v49, %v685_v24 }
 0x326   : > { %v1813_v51 = vpop.f32.mrf.mxu1 }
 0x327   : > { %v850_v53 = vadd.f32 %v1813_v51, %v710_v47  ;;  %v865_v34 = vadd.f32 %v1677_v29, %v829_v28  ;;  %v1711_v29 = vld [vmem:[%s2428_s6 + $0x78] sm:$0xff] }
 0x328   : > { %v841_v55 = vpop.f32.mrf.mxu1 }
 0x329   : > { %v870_v57 = vadd.f32 %v1682_v52, %v850_v53  ;;  %v842_v58 = vadd.f32 %v841_v55, %v700_v54  ;;  %v1949_v52 = vld [vmem:[%s2429_s7 + $0x8] sm:$0xff]   ;;  %v1950_v53 = vld [vmem:[%s2431_s9] sm:$0xff]   ;;  %v927_v55 = vpop.permute.xlu0 %926 }
 0x32a   : > { %v1814_v59 = vpop.f32.mrf.mxu1  ;;  %v1951_v54 = vld [vmem:[%s2431_s9 + $0x8] sm:$0xff]  }
 0x32b   : > { %v1686_v61 = vmul.f32 -1.442695, %v870_v57  ;;  %v868_v62 = vadd.f32 %v1680_v56, %v842_v58  ;;  %v853_v63 = vadd.f32 %v1814_v59, %v715_v50  ;;  %v932_v56 = vpop.permute.xlu1 %931 }
 0x32c   : > { %v844_v1 = vpop.f32.mrf.mxu1 }
 0x32d   : > { %1958 = vpow2.f32 %v1686_v61  ;;  %v1684_v3 = vmul.f32 -1.442695, %v868_v62  ;;  %v871_v4 = vadd.f32 %v1683_v60, %v853_v63  ;;  %v845_v5 = vadd.f32 %v844_v1, %v705_v0  ;;  %v917_v59 = vpop.permute.xlu0 %916 }
 0x32f   : > { %1960 = vpow2.f32 %v1684_v3  ;;  %v1687_v7 = vmul.f32 -1.442695, %v871_v4  ;;  %v869_v8 = vadd.f32 %v1681_v2, %v845_v5  ;;  %v922_v1 = vpop.permute.xlu1 %921 }
 0x331   : > { %1962 = vpow2.f32 %v1687_v7  ;;  %v1685_v9 = vmul.f32 -1.442695, %v869_v8 }
 0x333   : > { %1964 = vpow2.f32 %v1685_v9 }
 0x334   : > { %1966 = vtanh.f32 %v866_v23 }
 0x335   : > { %1968 = vtanh.f32 %v864_v25 }
 0x336   : > { %1970 = vtanh.f32 %v867_v27  ;;  %v1710_v27 = vld [vmem:[%s2428_s6 + $0x70] sm:$0xff] }
 0x33a   : > { %v1959_v26 = vpop.eup %1958 }
 0x33b   : > { %v890_v30 = vadd.f32 1.0, %v1959_v26 }
 0x33c   : > { %v1961_v31 = vpop.eup %1960 }
 0x33d   : > { %v888_v32 = vadd.f32 1.0, %v1961_v31  ;;  %1972 = vrcp.f32 %v890_v30  ;;  %v1708_v30 = vld [vmem:[%s2428_s6 + $0x60] sm:$0xff]  ;;  %v1709_v31 = vld [vmem:[%s2428_s6 + $0x68] sm:$0xff] }
 0x33e   : > { %v1963_v33 = vpop.eup %1962 }
 0x33f   : > { %v891_v35 = vadd.f32 1.0, %v1963_v33  ;;  %1974 = vrcp.f32 %v888_v32  ;;  %v1706_v32 = vld [vmem:[%s2428_s6 + $0x50] sm:$0xff]  ;;  %v1707_v33 = vld [vmem:[%s2428_s6 + $0x58] sm:$0xff] }
 0x340   : > { %v1965_v36 = vpop.eup %1964 }
 0x341   : > { %1976 = vrcp.f32 %v891_v35  ;;  %v889_v37 = vadd.f32 1.0, %v1965_v36  ;;  %v1967_v38 = vpop.eup %1966  ;;  %v1704_v35 = vld [vmem:[%s2428_s6 + $0x40] sm:$0xff]  ;;  %v1705_v36 = vld [vmem:[%s2428_s6 + $0x48] sm:$0xff] }
 0x342   : > { %1978 = vtanh.f32 %v865_v34  ;;  %v1969_v39 = vpop.eup %1968  ;;  %v1952_v34 = vld [vmem:[%s2427_s5 + $0x20] sm:$0xff]  }
 0x343   : > { %1980 = vrcp.f32 %v889_v37  ;;  %v1971_v40 = vpop.eup %1970  ;;  %v1010_v37 = vld [vmem:[%s2432_s10 + $0x10] sm:$0xff] }
 0x34a   : > { %v1973_v41 = vpop.eup %1972 }
 0x34b   : > { %v902_v45 = vmul.f32 %v1973_v41, %v1967_v38  ;;  %v1011_v38 = vld [vmem:[%s2432_s10 + $0x18] sm:$0xff]  ;;  %v1008_v41 = vld [vmem:[%s2432_s10] sm:$0xff] }
 0x34c   : > { %v1975_v42 = vpop.eup %1974 }
 0x34d   : > { %v900_v49 = vmul.f32 %v1975_v42, %v1969_v39  ;;  %v1738_v39 = vld [vmem:[%s2432_s10 + $0x30] sm:$0xff]  ;;  %v1009_v42 = vld [vmem:[%s2432_s10 + $0x8] sm:$0xff] }
 0x34e   : > { %v1977_v43 = vpop.eup %1976 }
 0x34f   : > { %v1979_v44 = vpop.eup %1978  ;;  %v903_v46 = vmul.f32 %v1977_v43, %v1971_v40  ;;  %v1739_v40 = vld [vmem:[%s2432_s10 + $0x38] sm:$0xff]  ;;  %v1736_v43 = vld [vmem:[%s2432_s10 + $0x20] sm:$0xff] }
 0x350   : > { %v1981_v47 = vpop.eup %1980 }
 0x351   : > { %v905_v48 = vpack.c.bf16 %v903_v46, %v902_v45  ;;  %v901_v50 = vmul.f32 %v1981_v47, %v1979_v44  ;;  %v1737_v44 = vld [vmem:[%s2432_s10 + $0x28] sm:$0xff]  ;;  %v1475_v45 = vld [vmem:[%s2434_s12] sm:$0xff] }
 0x353   : > { %1815 = vmatprep.subr.bf16.mxu0 %v905_v48  ;;  %v904_v51 = vpack.c.bf16 %v901_v50, %v900_v49 }
 0x354   : > { %1816 = vmatpush3.bf16.msra.mxu0 %v905_v48 }
 0x355   : > { %1817 = vmatprep.subr.bf16.mxu0 %v904_v51 }
 0x358   : > { %1818 = vmatpush3.bf16.msra.mxu0 %v904_v51 }
 0x359   : > { %1823 = vmatprep.subr.bf16.mxu0 %v905_v48 }
 0x35b   : > { %1820 = vmatmul.mubr.msk.bf16.vlgmr.msra.gmra.mxu0 %vm944_vm7, %v1949_v52 }
 0x35c   : > { %1824 = vmatpush3.bf16.msra.mxu0 %v905_v48  ;;  %1827 = vmatprep.mubr.msk.bf16.mxu0 %vm944_vm7, %v1950_v53 }
 0x35d   : > { %1825 = vmatprep.subr.bf16.mxu0 %v904_v51 }
 0x360   : > { %1826 = vmatpush3.bf16.msra.mxu0 %v904_v51 }
 0x363   : > { %1828 = vmatmul.mubr.msk.bf16.vlgmr.msra.gmra.mxu0 %vm944_vm7, %v1951_v54 }
 0x364   : > { %1843 = vmatprep.mubr.msk.bf16.mxu0 %vm778_vm5, %v1952_v34 }
 0x41b   : > { %v1821_v57 = vpop.f32.mrf.mxu0 }
 0x41c   : > { %v994_v58 = vadd.f32 %v1821_v57, %v927_v55 }
 0x41d   : > { %v985_v60 = vpop.f32.mrf.mxu0 }
 0x41e   : > { %v1002_v61 = vadd.f32 %v994_v58, %v2146_v13  ;;  %v986_v62 = vadd.f32 %v985_v60, %v917_v59 }
 0x41f   : > { %v1822_v63 = vpop.f32.mrf.mxu0 }
 0x420   : > { %v997_v0 = vadd.f32 %v1822_v63, %v932_v56  ;;  %1105 = vrot.lane.b32.xlu0 %v1002_v61, %s2019_s28  ;;  %v1000_v3 = vadd.f32 %v986_v62, %v2150_v18 }
 0x421   : > { %v988_v2 = vpop.f32.mrf.mxu0 }
 0x422   : > { %v1003_v4 = vadd.f32 %v997_v0, %v2152_v19  ;;  %v989_v5 = vadd.f32 %v988_v2, %v922_v1  ;;  %v1953_v0 = vld [vmem:[%s2427_s5 + $0x28] sm:$0xff]   ;;  %v1954_v1 = vld [vmem:[%s2427_s5 + $0x30] sm:$0xff]   ;;  %v1955_v2 = vld [vmem:[%s2427_s5 + $0x38] sm:$0xff]  }
 0x424   : > { %v1001_v6 = vadd.f32 %v989_v5, %v2158_v22  ;;  %1107 = vrot.lane.b32.xlu1 %v1003_v4, %s2019_s28  ;;  %1101 = vrot.lane.b32.xlu0 %v1000_v3, %s2019_s28  ;;  %v2279_v7 = vpack.c.bf16 %v1003_v4, %v1002_v61  ;;  %v2375_v4 = vpop.f32.mrf.mxu0 }
 0x426   : > { %v2281_v13 = vpack.c.bf16 %v1001_v6, %v1000_v3  ;;  %v1956_v3 = vld [vmem:[%s2431_s9 + $0x10] sm:$0xff]   ;;  %v2377_v5 = vpop.f32.mrf.mxu0 }
 0x427   : > { %1855 = vmatprep.mubr.msk.bf16.mxu1 %vm944_vm7, %v1956_v3 }
 0x428   : > { %1103 = vrot.lane.b32.xlu1 %v1001_v6, %s2019_s28  ;;  %s2023_s28 = smov 124   ;;  %v2379_v6 = vpop.f32.mrf.mxu0 }
 0x492   : > { %v1106_v8 = vpop.permute.xlu0 %1105 }
 0x493   : > { %1117 = vst.msk [vmem:[#allocation2 + $0x20] sm:$0xff] %vm584_vm2, %v1106_v8 }
 0x494   : > { %1118 = vst.msk [vmem:[#allocation2 + $0x28] sm:$0xff] %vm586_vm3, %v1106_v8 }
 0x496   : > { %v1108_v18 = vpop.permute.xlu1 %1107  ;;  %v1102_v19 = vpop.permute.xlu0 %1101 }
 0x497   : > { %1119 = vst.msk [vmem:[#allocation2 + $0x30] sm:$0xff] %vm584_vm2, %v1108_v18  ;;  %1113 = vst.msk [vmem:[#allocation2] sm:$0xff] %vm584_vm2, %v1102_v19 }
 0x498   : > { %1120 = vst.msk [vmem:[#allocation2 + $0x38] sm:$0xff] %vm586_vm3, %v1108_v18  ;;  %1114 = vst.msk [vmem:[#allocation2 + $0x8] sm:$0xff] %vm586_vm3, %v1102_v19 }
 0x49a   : > { %v1104_v22 = vpop.permute.xlu1 %1103  ;;  %v1123_v9 = vld [vmem:[#allocation2 + $0x20] sm:$0xff] }
 0x49b   : > { %v1127_v11 = vld [vmem:[#allocation2 + $0x28] sm:$0xff]  ;;  %1115 = vst.msk [vmem:[#allocation2 + $0x10] sm:$0xff] %vm584_vm2, %v1104_v22 }
 0x49c   : > { %1116 = vst.msk [vmem:[#allocation2 + $0x18] sm:$0xff] %vm586_vm3, %v1104_v22  ;;  %v1922_v12 = vpack.i.bf16 %v1127_v11, %v1123_v9 }
 0x49e   : > { %1923 = vrot.lane.b32.xlu0 %v1922_v12, %s2023_s28  ;;  %v1124_v14 = vld [vmem:[#allocation2 + $0x30] sm:$0xff]  ;;  %v1121_v16 = vld [vmem:[#allocation2] sm:$0xff] }
 0x49f   : > { %v1128_v15 = vld [vmem:[#allocation2 + $0x38] sm:$0xff]  ;;  %v1125_v20 = vld [vmem:[#allocation2 + $0x8] sm:$0xff]  ;;  %v2292_v21 = vpack.c.bf16 %v1124_v14, %v1123_v9  ;;  %v1726_v12 = vld [vmem:[%s2250_s16 + $0x170] sm:$0xff] }
 0x4a0   : > { %v1932_v17 = vpack.i.bf16 %v1128_v15, %v1124_v14  ;;  %v1927_v23 = vpack.i.bf16 %v1125_v20, %v1121_v16 }
 0x4a2   : > { %1933 = vrot.lane.b32.xlu1 %v1932_v17, %s2023_s28  ;;  %1928 = vrot.lane.b32.xlu0 %v1927_v23, %s2023_s28  ;;  %v1122_v24 = vld [vmem:[#allocation2 + $0x10] sm:$0xff]  ;;  %v1724_v17 = vld [vmem:[%s2250_s16 + $0x160] sm:$0xff] }
 0x4a3   : > { %v1126_v25 = vld [vmem:[#allocation2 + $0x18] sm:$0xff]  ;;  %v2297_v28 = vpack.c.bf16 %v1122_v24, %v1121_v16 }
 0x4a4   : > { %v1937_v26 = vpack.i.bf16 %v1126_v25, %v1122_v24  ;;  %v1727_v24 = vld [vmem:[%s2250_s16 + $0x178] sm:$0xff] }
 0x4a6   : > { %1938 = vrot.lane.b32.xlu1 %v1937_v26, %s2023_s28  ;;  %1218 = vperm.xlu0 %1890, %v1710_v27  }
 0x4aa   : > { %1223 = vperm.xlu1 %1891, %v1711_v29   ;;  %1208 = vperm.xlu0 %1890, %v1708_v30   ;;  %v1725_v30 = vld [vmem:[%s2250_s16 + $0x168] sm:$0xff] }
 0x4ae   : > { %1213 = vperm.xlu1 %1891, %v1709_v31   ;;  %1198 = vperm.xlu0 %1890, %v1706_v32  }
 0x4b2   : > { %1203 = vperm.xlu1 %1891, %v1707_v33   ;;  %1188 = vperm.xlu0 %1890, %v1704_v35  }
 0x4b6   : > { %1193 = vperm.xlu1 %1891, %v1705_v36   ;;  %1024 = vperm.xlu0 %1890, %v1010_v37  }
 0x4ba   : > { %1029 = vperm.xlu1 %1891, %v1011_v38   ;;  %1395 = vperm.xlu0 %1890, %v1738_v39  }
 0x4be   : > { %1400 = vperm.xlu1 %1891, %v1739_v40   ;;  %1014 = vperm.xlu0 %1890, %v1008_v41   ;;  %v1722_v41 = vld [vmem:[%s2250_s16 + $0x150] sm:$0xff] }
 0x4c2   : > { %1019 = vperm.xlu1 %1891, %v1009_v42   ;;  %1385 = vperm.xlu0 %1890, %v1736_v43   ;;  %v1720_v43 = vld [vmem:[%s2250_s16 + $0x140] sm:$0xff] }
 0x4c6   : > { %1390 = vperm.xlu1 %1891, %v1737_v44   ;;  %1478 = vperm.xlu0 %1890, %v1475_v45   ;;  %v1723_v45 = vld [vmem:[%s2250_s16 + $0x158] sm:$0xff] }
 0x510   : > { %v1924_v46 = vpop.permute.xlu0 %1923 }
 0x511   : > { %v1926_v47 = vunpack.i.h.bf16 %v1924_v46  ;;  %v1925_v48 = vunpack.i.l.bf16 %v1924_v46 }
 0x513   : > { %v1156_v55 = vsel %vm1153_vm8, %v1925_v48, %v1926_v47 }
 0x514   : > { %v1934_v49 = vpop.permute.xlu1 %1933  ;;  %v1929_v52 = vpop.permute.xlu0 %1928 }
 0x515   : > { %v1936_v50 = vunpack.i.h.bf16 %v1934_v49  ;;  %v1935_v51 = vunpack.i.l.bf16 %v1934_v49  ;;  %v1931_v53 = vunpack.i.h.bf16 %v1929_v52  ;;  %v1930_v54 = vunpack.i.l.bf16 %v1929_v52  ;;  %v1721_v52 = vld [vmem:[%s2250_s16 + $0x148] sm:$0xff] }
 0x517   : > { %v1157_v56 = vsel %vm1153_vm8, %v1935_v51, %v1936_v50  ;;  %v1154_v61 = vsel %vm1153_vm8, %v1930_v54, %v1931_v53 }
 0x518   : > { %v1939_v57 = vpop.permute.xlu1 %1938  ;;  %v1167_v58 = vpack.c.bf16 %v1157_v56, %v1156_v55 }
 0x519   : > { %v1941_v59 = vunpack.i.h.bf16 %v1939_v57  ;;  %v1940_v60 = vunpack.i.l.bf16 %v1939_v57 }
 0x51a   : > { %1831 = vmatprep.subr.bf16.mxu0 %v1167_v58 }
 0x51b   : > { %1832 = vmatpush3.bf16.msra.mxu0 %v1167_v58  ;;  %v1155_v62 = vsel %vm1153_vm8, %v1940_v60, %v1941_v59 }
 0x51c   : > { %v1166_v63 = vpack.c.bf16 %v1155_v62, %v1154_v61 }
 0x51e   : > { %1833 = vmatprep.subr.bf16.mxu0 %v1166_v63 }
 0x51f   : > { %1834 = vmatpush3.bf16.msra.mxu0 %v1166_v63 }
 0x520   : > { %1835 = vmatprep.subr.bf16.mxu0 %v2279_v7 }
 0x521   : > { %v1219_v18 = vpop.permute.xlu0 %1218 }
 0x523   : > { %1836 = vmatpush3.bf16.msra.mxu0 %v2279_v7  ;;  %v2381_v7 = vpop.f32.mrf.mxu0 }
 0x524   : > { %1837 = vmatprep.subr.bf16.mxu0 %v2281_v13 }
 0x525   : > { %v1224_v9 = vpop.permute.xlu1 %1223  ;;  %v1209_v15 = vpop.permute.xlu0 %1208 }
 0x527   : > { %1838 = vmatpush3.bf16.msra.mxu0 %v2281_v13 }
 0x528   : > { %1839 = vmatprep.subr.bf16.mxu0 %v2292_v21 }
 0x529   : > { %v1199_v34 = vpop.permute.xlu0 %1198 }
 0x52b   : > { %1840 = vmatpush3.bf16.msra.mxu0 %v2292_v21 }
 0x52c   : > { %1841 = vmatprep.subr.bf16.mxu0 %v2297_v28 }
 0x52d   : > { %v1189_v39 = vpop.permute.xlu0 %1188 }
 0x52f   : > { %1842 = vmatpush3.bf16.msra.mxu0 %v2297_v28  ;;  %v1214_v28 = vpop.permute.xlu1 %1213 }
 0x532   : > { %1844 = vmatmul.mubr.msk.bf16.vlgmr.msra.gmra.mxu0 %vm778_vm5, %v1953_v0 }
 0x533   : > { %1847 = vmatprep.mubr.msk.bf16.mxu0 %vm778_vm5, %v1954_v1  ;;  %v1204_v38 = vpop.permute.xlu1 %1203 }
 0x537   : > { %v1194_v47 = vpop.permute.xlu1 %1193 }
 0x53a   : > { %1848 = vmatmul.mubr.msk.bf16.gmra.mxu0 %vm778_vm5, %v1955_v2 }
 0x5f2   : > { %v1845_v13 = vpop.f32.mrf.mxu0 }
 0x5f3   : > { %v1301_v40 = vadd.f32 %v1845_v13, %v1199_v34 }
 0x5f4   : > { %v1292_v8 = vpop.f32.mrf.mxu0 }
 0x5f5   : > { %v1293_v42 = vadd.f32 %v1292_v8, %v1189_v39  ;;  %v1333_v46 = vadd.f32 %v1722_v41, %v1301_v40 }
 0x5f6   : > { %v1846_v19 = vpop.f32.mrf.mxu0 }
 0x5f7   : > { %v1304_v44 = vadd.f32 %v1846_v19, %v1204_v38  ;;  %v1331_v48 = vadd.f32 %v1720_v43, %v1293_v42 }
 0x5f8   : > { %v1295_v22 = vpop.f32.mrf.mxu0 }
 0x5f9   : > { %v1334_v50 = vadd.f32 %v1723_v45, %v1304_v44  ;;  %v1296_v51 = vadd.f32 %v1295_v22, %v1194_v47 }
 0x5fa   : > { %v1849_v11 = vpop.f32.mrf.mxu0 }
 0x5fb   : > { %v1317_v14 = vadd.f32 %v1849_v11, %v1219_v18  ;;  %v1332_v57 = vadd.f32 %v1721_v52, %v1296_v51 }
 0x5fc   : > { %v1308_v16 = vpop.f32.mrf.mxu0 }
 0x5fd   : > { %v1337_v20 = vadd.f32 %v1726_v12, %v1317_v14  ;;  %v1309_v21 = vadd.f32 %v1308_v16, %v1209_v15  ;;  %v1957_v12 = vld [vmem:[%s2431_s9 + $0x18] sm:$0xff]   ;;  %v1025_v14 = vpop.permute.xlu0 %1024  ;;  %v1030_v15 = vpop.permute.xlu1 %1029 }
 0x5fe   : > { %v1850_v23 = vpop.f32.mrf.mxu0 }
 0x5ff   : > { %v1730_v25 = vmul.f32 -1.442695, %v1337_v20  ;;  %v1335_v26 = vadd.f32 %v1724_v17, %v1309_v21  ;;  %v1320_v27 = vadd.f32 %v1850_v23, %v1224_v9 }
 0x600   : > { %v1311_v29 = vpop.f32.mrf.mxu0 }
 0x601   : > { %1982 = vpow2.f32 %v1730_v25  ;;  %v1728_v31 = vmul.f32 -1.442695, %v1335_v26  ;;  %v1338_v32 = vadd.f32 %v1727_v24, %v1320_v27  ;;  %v1312_v33 = vadd.f32 %v1311_v29, %v1214_v28  ;;  %v1396_v16 = vpop.permute.xlu0 %1395  ;;  %v1401_v17 = vpop.permute.xlu1 %1400 }
 0x602   : > { %v1091_v27 = vadd.f32 %v2375_v4, %v1025_v14  ;;  %v1094_v28 = vadd.f32 %v2379_v6, %v1030_v15  ;;  %v1472_v6 = vld [vmem:[%s2433_s11] sm:$0xf] }
 0x603   : > { %1984 = vpow2.f32 %v1728_v31  ;;  %v1731_v35 = vmul.f32 -1.442695, %v1338_v32  ;;  %v1336_v36 = vadd.f32 %v1725_v30, %v1312_v33 }
 0x605   : > { %1986 = vpow2.f32 %v1731_v35  ;;  %v1729_v37 = vmul.f32 -1.442695, %v1336_v36  ;;  %v1015_v20 = vpop.permute.xlu0 %1014  ;;  %v1020_v21 = vpop.permute.xlu1 %1019 }
 0x606   : > { %v1086_v31 = vadd.f32 %v2381_v7, %v1020_v21  ;;  %v1083_v38 = vadd.f32 %v2377_v5, %v1015_v20 }
 0x607   : > { %1988 = vpow2.f32 %v1729_v37 }
 0x608   : > { %1990 = vtanh.f32 %v1333_v46 }
 0x609   : > { %1992 = vtanh.f32 %v1331_v48  ;;  %v1386_v29 = vpop.permute.xlu0 %1385  ;;  %v1391_v32 = vpop.permute.xlu1 %1390 }
 0x60a   : > { %1994 = vtanh.f32 %v1334_v50 }
 0x60d   : > { %v1479_v5 = vpop.permute.xlu0 %1478 }
 0x60e   : > { %v1983_v49 = vpop.eup %1982 }
 0x60f   : > { %v1357_v53 = vadd.f32 1.0, %v1983_v49  ;;  %v2008_v49 = vld [vmem:[%s2127_s23] sm:$0xff] }
 0x610   : > { %v1985_v54 = vpop.eup %1984 }
 0x611   : > { %v1355_v55 = vadd.f32 1.0, %v1985_v54  ;;  %1996 = vrcp.f32 %v1357_v53 }
 0x612   : > { %v1987_v56 = vpop.eup %1986 }
 0x613   : > { %v1358_v58 = vadd.f32 1.0, %v1987_v56  ;;  %1998 = vrcp.f32 %v1355_v55 }
 0x614   : > { %v1989_v59 = vpop.eup %1988 }
 0x615   : > { %2000 = vrcp.f32 %v1358_v58  ;;  %v1356_v60 = vadd.f32 1.0, %v1989_v59  ;;  %v1991_v61 = vpop.eup %1990 }
 0x616   : > { %2002 = vtanh.f32 %v1332_v57  ;;  %v1993_v62 = vpop.eup %1992 }
 0x617   : > { %2004 = vrcp.f32 %v1356_v60  ;;  %v1995_v63 = vpop.eup %1994 }
 0x61e   : > { %v1997_v0 = vpop.eup %1996 }
 0x61f   : > { %v1369_v13 = vmul.f32 %v1997_v0, %v1991_v61 }
 0x620   : > { %v1999_v1 = vpop.eup %1998 }
 0x621   : > { %v1367_v22 = vmul.f32 %v1999_v1, %v1993_v62 }
 0x622   : > { %v2001_v2 = vpop.eup %2000 }
 0x623   : > { %v2003_v3 = vpop.eup %2002  ;;  %v1370_v8 = vmul.f32 %v2001_v2, %v1995_v63 }
 0x624   : > { %v2005_v18 = vpop.eup %2004 }
 0x625   : > { %v1372_v19 = vpack.c.bf16 %v1370_v8, %v1369_v13  ;;  %v1368_v9 = vmul.f32 %v2005_v18, %v2003_v3 }
 0x627   : > { %1851 = vmatprep.subr.bf16.mxu1 %v1372_v19  ;;  %v1371_v11 = vpack.c.bf16 %v1368_v9, %v1367_v22 }
 0x628   : > { %1852 = vmatpush3.bf16.msra.mxu1 %v1372_v19 }
 0x629   : > { %1853 = vmatprep.subr.bf16.mxu1 %v1371_v11 }
 0x62c   : > { %1854 = vmatpush3.bf16.msra.mxu1 %v1371_v11 }
 0x62d   : > { %1859 = vmatprep.subr.bf16.mxu1 %v2018_v10 }
 0x62f   : > { %1856 = vmatmul.mubr.msk.bf16.vlgmr.msra.gmra.mxu1 %vm944_vm7, %v1957_v12 }
 0x630   : > { %1863 = vmatprep.mubr.msk.bf16.mxu1 %vm2024_vm9, %v2018_v10 }
 0x6ef   : > { %v1857_v23 = vpop.f32.mrf.mxu1 }
 0x6f0   : > { %v1462_v25 = vadd.f32 %v1857_v23, %v1396_v16 }
 0x6f1   : > { %v1453_v24 = vpop.f32.mrf.mxu1 }
 0x6f2   : > { %v1470_v34 = vadd.f32 %v1462_v25, %v1091_v27  ;;  %v1454_v35 = vadd.f32 %v1453_v24, %v1386_v29 }
 0x6f3   : > { %v1858_v26 = vpop.f32.mrf.mxu1 }
 0x6f4   : > { %v1465_v30 = vadd.f32 %v1858_v26, %v1401_v17  ;;  %v1468_v41 = vadd.f32 %v1454_v35, %v1083_v38 }
 0x6f5   : > { %v1456_v33 = vpop.f32.mrf.mxu1 }
 0x6f6   : > { %v1471_v36 = vadd.f32 %v1465_v30, %v1094_v28  ;;  %v1457_v37 = vadd.f32 %v1456_v33, %v1391_v32 }
 0x6f8   : > { %v1474_v39 = vpack.c.bf16 %v1471_v36, %v1470_v34  ;;  %v1469_v40 = vadd.f32 %v1457_v37, %v1086_v31 }
 0x6fa   : > { %1860 = vmatpush3.bf16.msra.mxu1 %v1474_v39  ;;  %v1473_v4 = vpack.c.bf16 %v1469_v40, %v1468_v41 }
 0x6fb   : > { %1861 = vmatprep.subr.bf16.mxu1 %v2018_v10 }
 0x6fe   : > { %1862 = vmatpush3.bf16.msra.mxu1 %v1473_v4 }
 0x6ff   : > { %1867 = vmatprep.subr.bf16.mxu1 %v2018_v10 }
 0x701   : > { %1864 = vmatmul.mubr.msk.bf16.vlgmr.msra.gmra.mxu1 %vm944_vm7, %v1472_v6 }
 0x702   : > { %1869 = vmatprep.mubr.msk.bf16.mxu1 %vm2024_vm9, %v2018_v10  ;;  %v1534_v10 = vld [vmem:[%s2424_s2] sm:$0xf] }
 0x7c1   : > { %v1518_v7 = vpop.f32.mrf.mxu1 }
 0x7c2   : > { %v1519_v42 = vadd.f32 %v1518_v7, %v1479_v5 }
 0x7c3   : > { %v1865_v43 = vpop.f32.mrf.mxu1 }
 0x7c4   : > { %v1528_v44 = vsub.f32 0.0, %v1519_v42  ;;  %v1525_v48 = vrot.slane %v1519_v42, 4 }
 0x7c5   : > { %v1521_v45 = vpop.f32.mrf.mxu1 }
 0x7c6   : > { %v1529_v46 = vmul.f32 1.442695, %v1528_v44  ;;  %v1527_v50 = vsub.f32 %v2008_v49, %v1525_v48 }
 0x7c7   : > { %v1866_v47 = vpop.f32.mrf.mxu1 }
 0x7c8   : > { %2006 = vpow2.f32 %v1529_v46 }
 0x7d5   : > { %v2007_v51 = vpop.eup %2006 }
 0x7d6   : > { %v1531_v52 = vmul.f32 %v2007_v51, %v1527_v50 }
 0x7d8   : > { %v1533_v53 = vsel %vm1532_vm10, %v2008_v49, %v1531_v52 }
 0x7d9   : > { %v1535_v54 = vpack.c.bf16 %v1533_v53, %v1533_v53 }
 0x7db   : > { %v1541_v55 = vsel %vm1532_vm10, %v1535_v54, 0 }
 0x7dc   : > { %1868 = vmatpush3.bf16.msra.mxu1 %v1541_v55 }
 0x7df   : > { %1870 = vmatmul.mubr.msk.bf16.vlgmr.msra.gmra.mxu1 %vm1536_vm11, %v1534_v10 }
 0x89f   : > { %v1577_v56 = vpop.f32.mrf.mxu1 }
 0x8a0   : > { %1583 = vst [vmem:[%s458_s14] sm:$0xff] %v1577_v56 }
 0x8a1   : > { %v1871_v57 = vpop.f32.mrf.mxu1 }
 0x8a3   : > { %v1580_v58 = vpop.f32.mrf.mxu1 }
 0x8a5   : > { %v1872_v59 = vpop.f32.mrf.mxu1 }
 0x8a6 PF: > { %s23_s25 = sadd.s32 1, %s2015_s25  }
 0x8a7   : > { %p20_p4 = scmp.ge.s32.totalorder %s23_s25, 4  }
 0x8a9   :  { %22 = sbr.rel (!%p20_p4) target bundleno = 1 (0x1), region = 109 }

// kernel: _lambda_.11
= control target key start
LH: loop header
LB: loop body
LE: loop exit
PB: predicated region body
PF: predicated region fallthrough
CT: control target
= control target key end

     0   :  { %s2070_s25 = smov 0   ;;  %s2397_s0 = inlined_call_operand.vmem [shape: f32[2,8,128], index: 0, kind: input, shape index: {}]   ;;  %s2398_s1 = inlined_call_operand.vmem [shape: f32[2,512,128], index: 1, kind: input, shape index: {}]   ;;  %s2399_s2 = inlined_call_operand.vmem [shape: bf16[8,8], index: 2, kind: input, shape index: {}]   ;;  %s2400_s3 = inlined_call_operand.vmem [shape: bf16[32,4], index: 3, kind: input, shape index: {}]   ;;  %s2401_s4 = inlined_call_operand.vmem [shape: f32[32,1], index: 4, kind: input, shape index: {}]   ;;  %s2402_s5 = inlined_call_operand.vmem [shape: bf16[2,64,96], index: 5, kind: input, shape index: {}]   ;;  %s2403_s6 = inlined_call_operand.vmem [shape: f32[2,64,1], index: 6, kind: input, shape index: {}]   ;;  %s2404_s7 = inlined_call_operand.vmem [shape: bf16[1,32,32], index: 7, kind: input, shape index: {}]   ;;  %s2405_s8 = inlined_call_operand.vmem [shape: f32[1,32,1], index: 8, kind: input, shape index: {}]   ;;  %s2406_s9 = inlined_call_operand.vmem [shape: bf16[2,32,32], index: 9, kind: input, shape index: {}]   ;;  %s2407_s10 = inlined_call_operand.vmem [shape: f32[2,32,1], index: 10, kind: input, shape index: {}]   ;;  %s2408_s11 = inlined_call_operand.vmem [shape: bf16[8,32], index: 11, kind: input, shape index: {}]   ;;  %s2409_s12 = inlined_call_operand.vmem [shape: f32[8,1], index: 12, kind: input, shape index: {}]   ;;  %s2410_s13 = inlined_call_operand.vmem [shape: f32[2,8,128], index: 13, kind: output, shape index: {}]  }
   0x1 LB: > { %s1646_s26 = sadd.s32 4294967295, %s1990_s25   ;;  %p1650_p0 = scmp.ge.s32.totalorder %s1990_s25, 1  ;;  %s1990_s25 = sphi %s2070_s25, %s23_s25  }
   0x2   : > { %p396_p1 = scmp.lt.s32.totalorder %s1990_s25, 3 }
   0x4   : > { %p397_p2 = pnand %p1650_p0, %p396_p1 }
   0x5   : > { %p443_p3 = scmp.lt.s32.totalorder (!%p397_p2), %s1646_s26, 1  ;;  %s1994_s28 = smov (!%p397_p2), 2  }
   0x6   : > { %400 = sbr.rel (%p397_p2) target bundleno = 2214 (0x8a6), region = 72  ;;  %s1995_s29 = smov (!%p397_p2), 126  }
   0x7   : > { %s1996_s30 = smov (!%p397_p2), 1   ;;  %s1997_s14 = smov (!%p397_p2), 127  }
   0xb   : > { %v1917_v0 = vld [vmem:[%s2400_s3] sm:$0xff]   ;;  %vm497_vm0 = vcmask 31744   ;;  %s2412_s26 = smov (!%p443_p3, %s1646_s26), 1  ;;  %v465_v1 = vld [vmem:[%s2401_s4 + $0x10] sm:$0xff]  ;;  %v1992_v2 = vmov 0   ;;  %v466_v3 = vld [vmem:[%s2401_s4 + $0x18] sm:$0xff] }
   0xc   : > { %1766 = vmatprep.mubr.msk.bf16.mxu0 %vm497_vm0, %v1917_v0  ;;  %1865 = vset.pattern.permute.xlu0 %v1992_v2  ;;  %v463_v4 = vld [vmem:[%s2401_s4] sm:$0xff]  ;;  %s1651_s18 = sshll.u32 %s2412_s26, 3  ;;  %v464_v5 = vld [vmem:[%s2401_s4 + $0x8] sm:$0xff]  ;;  %vm504_vm1 = vcmask 1041408   ;;  %v1993_v10 = vmov 0.0   ;;  %vm581_vm2 = vcmask 1047568  }
   0xd   : > { %479 = vperm.xlu0 %1865, %v465_v1   ;;  %1866 = vset.pattern.permute.xlu1 %v1992_v2  ;;  %s2102_s23 = scalar_lea.vmem %s2397_s0, %s1651_s18  ;;  %v1918_v9 = vld [vmem:[%s2400_s3 + $0x8] sm:$0xff]   ;;  %561 = vst [vmem:[#allocation2 + $0x20] sm:$0xff] %v1993_v10  ;;  %562 = vst.msk [vmem:[#allocation2 + $0x28] sm:$0xff] %vm497_vm0, %v1993_v10  ;;  %vm583_vm3 = vcmask 15360   ;;  %vm635_vm4 = vcmask 1031168   ;;  %vm775_vm5 = vcmask 785408  }
   0xe   : > { %469 = vperm.xlu1 %1866, %v463_v4   ;;  %v457_v6 = vld [vmem:[%s2102_s23] sm:$0xff]  ;;  %557 = vst [vmem:[#allocation2] sm:$0xff] %v1993_v10  ;;  %558 = vst.msk [vmem:[#allocation2 + $0x8] sm:$0xff] %vm497_vm0, %v1993_v10  ;;  %vm764_vm6 = vcmask 1039360   ;;  %vm941_vm7 = vcmask 261120   ;;  %vm1150_vm8 = vcmask 1014784  }
   0xf   : > { %v462_v7 = vpack.c.bf16 %v457_v6, %v457_v6  ;;  %559 = vst [vmem:[#allocation2 + $0x10] sm:$0xff] %v1993_v10  ;;  %560 = vst.msk [vmem:[#allocation2 + $0x18] sm:$0xff] %vm497_vm0, %v1993_v10  ;;  %v1919_v6 = vld [vmem:[%s2402_s5] sm:$0xff]   ;;  %vm1999_vm9 = vmmov 0   ;;  %vm1529_vm10 = vcmask 1043456   ;;  %vm1533_vm11 = vcmask 64512  }
  0x10   : > { %563 = vst [vmem:[#allocation2 + $0x30] sm:$0xff] %v1993_v10  ;;  %564 = vst.msk [vmem:[#allocation2 + $0x38] sm:$0xff] %vm497_vm0, %v1993_v10  ;;  %1782 = vmatprep.mubr.msk.bf16.mxu1 %vm775_vm5, %v1919_v6 }
  0x11   : > { %484 = vperm.xlu0 %1865, %v466_v3   ;;  %1848 = vmatprep.subr.msk.bf16.mxu0 %vm504_vm1, %v462_v7  ;;  %v506_v8 = vsel %vm504_vm1, %v462_v7, 0 }
  0x12   : > { %474 = vperm.xlu1 %1866, %v464_v5   ;;  %1765 = vmatpush3.bf16.msra.mxu0 %v506_v8 }
  0x15   : > { %1767 = vmatmul.mubr.msk.bf16.vlgmr.msra.gmra.mxu0 %vm497_vm0, %v1918_v9 }
  0x88   : > { %v480_v11 = vpop.permute.xlu0 %479 }
  0x89   : > { %v470_v14 = vpop.permute.xlu1 %469 }
  0x8c   : > { %v485_v16 = vpop.permute.xlu0 %484 }
  0x8d   : > { %v475_v21 = vpop.permute.xlu1 %474 }
  0xd5   : > { %v1768_v12 = vpop.f32.mrf.mxu0 }
  0xd6   : > { %v2121_v13 = vadd.f32 %v1768_v12, %v480_v11  ;;  %v673_v11 = vld [vmem:[%s2403_s6 + $0x38] sm:$0xff]  ;;  %v672_v12 = vld [vmem:[%s2403_s6 + $0x30] sm:$0xff] }
  0xd7   : > { %v542_v15 = vpop.f32.mrf.mxu0 }
  0xd8   : > { %573 = vrot.lane.b32.xlu0 %v2121_v13, %s1994_s28  ;;  %v2125_v18 = vadd.f32 %v542_v15, %v470_v14  ;;  %v671_v14 = vld [vmem:[%s2403_s6 + $0x28] sm:$0xff]  ;;  %v670_v15 = vld [vmem:[%s2403_s6 + $0x20] sm:$0xff] }
  0xd9   : > { %v1769_v17 = vpop.f32.mrf.mxu0 }
  0xda   : > { %v2127_v19 = vadd.f32 %v1769_v17, %v485_v16  ;;  %v669_v16 = vld [vmem:[%s2403_s6 + $0x18] sm:$0xff]  ;;  %v668_v17 = vld [vmem:[%s2403_s6 + $0x10] sm:$0xff] }
  0xdb   : > { %v545_v20 = vpop.f32.mrf.mxu0 }
  0xdc   : > { %575 = vrot.lane.b32.xlu1 %v2127_v19, %s1994_s28  ;;  %569 = vrot.lane.b32.xlu0 %v2125_v18, %s1994_s28  ;;  %v2133_v22 = vadd.f32 %v545_v20, %v475_v21  ;;  %v1887_v39 = vpack.i.bf16 %v2127_v19, %v2121_v13  ;;  %v667_v20 = vld [vmem:[%s2403_s6 + $0x8] sm:$0xff]  ;;  %v666_v21 = vld [vmem:[%s2403_s6] sm:$0xff] }
  0xde   : > { %v1892_v40 = vpack.i.bf16 %v2133_v22, %v2125_v18 }
  0xe0   : > { %571 = vrot.lane.b32.xlu1 %v2133_v22, %s1994_s28 }
 0x14a   : > { %v574_v23 = vpop.permute.xlu0 %573 }
 0x14b   : > { %587 = vst.msk [vmem:[#allocation2 + $0x20] sm:$0xff] %vm581_vm2, %v574_v23 }
 0x14c   : > { %588 = vst.msk [vmem:[#allocation2 + $0x28] sm:$0xff] %vm583_vm3, %v574_v23  ;;  %v910_v23 = vld [vmem:[%s2405_s8 + $0x18] sm:$0xff] }
 0x14e   : > { %v576_v24 = vpop.permute.xlu1 %575  ;;  %v570_v25 = vpop.permute.xlu0 %569 }
 0x14f   : > { %589 = vst.msk [vmem:[#allocation2 + $0x30] sm:$0xff] %vm581_vm2, %v576_v24  ;;  %582 = vst.msk [vmem:[#allocation2] sm:$0xff] %vm581_vm2, %v570_v25 }
 0x150   : > { %590 = vst.msk [vmem:[#allocation2 + $0x38] sm:$0xff] %vm583_vm3, %v576_v24  ;;  %584 = vst.msk [vmem:[#allocation2 + $0x8] sm:$0xff] %vm583_vm3, %v570_v25  ;;  %v909_v24 = vld [vmem:[%s2405_s8 + $0x10] sm:$0xff]  ;;  %v908_v25 = vld [vmem:[%s2405_s8 + $0x8] sm:$0xff] }
 0x152   : > { %v572_v26 = vpop.permute.xlu1 %571  ;;  %v2143_v27 = vld [vmem:[#allocation2 + $0x20] sm:$0xff] }
 0x153   : > { %v2145_v28 = vld [vmem:[#allocation2 + $0x28] sm:$0xff]  ;;  %585 = vst.msk [vmem:[#allocation2 + $0x10] sm:$0xff] %vm581_vm2, %v572_v26 }
 0x154   : > { %586 = vst.msk [vmem:[#allocation2 + $0x18] sm:$0xff] %vm583_vm3, %v572_v26  ;;  %v1867_v29 = vpack.i.bf16 %v2145_v28, %v2143_v27  ;;  %v907_v26 = vld [vmem:[%s2405_s8] sm:$0xff] }
 0x156   : > { %1868 = vrot.lane.b32.xlu0 %v1867_v29, %s1995_s29  ;;  %v597_v30 = vld [vmem:[#allocation2 + $0x30] sm:$0xff]  ;;  %v591_v32 = vld [vmem:[#allocation2] sm:$0xff] }
 0x157   : > { %v598_v31 = vld [vmem:[#allocation2 + $0x38] sm:$0xff]  ;;  %v592_v34 = vld [vmem:[#allocation2 + $0x8] sm:$0xff]  ;;  %v650_v7 = vpack.c.bf16 %v597_v30, %v2143_v27 }
 0x158   : > { %v1877_v33 = vpack.i.bf16 %v598_v31, %v597_v30  ;;  %v1872_v35 = vpack.i.bf16 %v592_v34, %v591_v32  ;;  %v651_v5 = vpack.c.bf16 %v598_v31, %v2145_v28 }
 0x15a   : > { %1878 = vrot.lane.b32.xlu1 %v1877_v33, %s1995_s29  ;;  %1873 = vrot.lane.b32.xlu0 %v1872_v35, %s1995_s29  ;;  %v593_v36 = vld [vmem:[#allocation2 + $0x10] sm:$0xff] }
 0x15b   : > { %v594_v37 = vld [vmem:[#allocation2 + $0x18] sm:$0xff]  ;;  %v648_v9 = vpack.c.bf16 %v593_v36, %v591_v32 }
 0x15c   : > { %v1882_v38 = vpack.i.bf16 %v594_v37, %v593_v36  ;;  %v649_v8 = vpack.c.bf16 %v594_v37, %v592_v34 }
 0x15e   : > { %1883 = vrot.lane.b32.xlu1 %v1882_v38, %s1995_s29  ;;  %1888 = vrot.lane.b32.xlu0 %v1887_v39, %s1996_s30 }
 0x162   : > { %1893 = vrot.lane.b32.xlu1 %v1892_v40, %s1996_s30  ;;  %s1723_s30 = sshll.u32 %s2412_s26, 9 }
 0x163   : > { %s2225_s16 = scalar_lea.vmem %s2398_s1, %s1723_s30 }
 0x1c8   : > { %v1869_v41 = vpop.permute.xlu0 %1868 }
 0x1c9   : > { %v1871_v42 = vunpack.i.h.bf16 %v1869_v41  ;;  %v1870_v43 = vunpack.i.l.bf16 %v1869_v41  ;;  %v1920_v41 = vld [vmem:[%s2402_s5 + $0x8] sm:$0xff]  }
 0x1cb   : > { %v638_v48 = vsel %vm635_vm4, %v1870_v43, %v1871_v42  ;;  %v1922_v43 = vld [vmem:[%s2402_s5 + $0x18] sm:$0xff]  }
 0x1cc   : > { %v1879_v44 = vpop.permute.xlu1 %1878  ;;  %v1874_v47 = vpop.permute.xlu0 %1873 }
 0x1cd   : > { %v1881_v45 = vunpack.i.h.bf16 %v1879_v44  ;;  %v1880_v46 = vunpack.i.l.bf16 %v1879_v44  ;;  %v1876_v50 = vunpack.i.h.bf16 %v1874_v47  ;;  %v1875_v51 = vunpack.i.l.bf16 %v1874_v47  ;;  %v1923_v44 = vld [vmem:[%s2404_s7] sm:$0xff]  }
 0x1ce   : > { %1794 = vmatprep.mubr.msk.bf16.mxu0 %vm941_vm7, %v1923_v44 }
 0x1cf   : > { %v657_v49 = vpack.c.bf16 %v1881_v45, %v1871_v42  ;;  %v639_v52 = vsel %vm635_vm4, %v1880_v46, %v1881_v45  ;;  %v636_v59 = vsel %vm635_vm4, %v1875_v51, %v1876_v50  ;;  %v1921_v42 = vld [vmem:[%s2402_s5 + $0x10] sm:$0xff]  }
 0x1d0   : > { %v1884_v53 = vpop.permute.xlu1 %1883  ;;  %v656_v54 = vpack.c.bf16 %v639_v52, %v638_v48  ;;  %v1889_v57 = vpop.permute.xlu0 %1888  ;;  %v859_v52 = vld [vmem:[%s2225_s16 + $0x30] sm:$0xff] }
 0x1d1   : > { %v1886_v55 = vunpack.i.h.bf16 %v1884_v53  ;;  %v1885_v56 = vunpack.i.l.bf16 %v1884_v53  ;;  %762 = vrot.lane.b32.xlu1 %v657_v49, %s1997_s14  ;;  %v1891_v61 = vunpack.i.h.bf16 %v1889_v57  ;;  %v1890_v62 = vunpack.i.l.bf16 %v1889_v57 }
 0x1d2   : > { %760 = vrot.lane.b32.xlu0 %v656_v54, %s1997_s14 }
 0x1d3   : > { %v655_v58 = vpack.c.bf16 %v1886_v55, %v1876_v50  ;;  %v637_v60 = vsel %vm635_vm4, %v1885_v56, %v1886_v55  ;;  %v653_v4 = vpack.c.bf16 %v1891_v61, %v1890_v62  ;;  %v857_v56 = vld [vmem:[%s2225_s16 + $0x20] sm:$0xff] }
 0x1d4   : > { %v1894_v63 = vpop.permute.xlu1 %1893  ;;  %v654_v0 = vpack.c.bf16 %v637_v60, %v636_v59  ;;  %v860_v60 = vld [vmem:[%s2225_s16 + $0x38] sm:$0xff] }
 0x1d5   : > { %v1896_v1 = vunpack.i.h.bf16 %v1894_v63  ;;  %v1895_v2 = vunpack.i.l.bf16 %v1894_v63  ;;  %758 = vrot.lane.b32.xlu1 %v655_v58, %s1997_s14 }
 0x1d6   : > { %756 = vrot.lane.b32.xlu0 %v654_v0, %s1997_s14 }
 0x1d7   : > { %v652_v3 = vpack.c.bf16 %v1896_v1, %v1895_v2  ;;  %v858_v2 = vld [vmem:[%s2225_s16 + $0x28] sm:$0xff] }
 0x1d9   : > { %752 = vrot.lane.b32.xlu1 %v652_v3, %s1997_s14 }
 0x1da   : > { %754 = vrot.lane.b32.xlu0 %v653_v4, %s1997_s14 }
 0x1dd   : > { %750 = vrot.lane.b32.xlu1 %v651_v5, %s1997_s14 }
 0x1de   : > { %748 = vrot.lane.b32.xlu0 %v650_v7, %s1997_s14 }
 0x1e1   : > { %746 = vrot.lane.b32.xlu1 %v649_v8, %s1997_s14 }
 0x1e2   : > { %744 = vrot.lane.b32.xlu0 %v648_v9, %s1997_s14  ;;  %s455_s14 = scalar_lea.vmem %s2410_s13, %s1651_s18 }
 0x1e5   : > { %711 = vperm.xlu1 %1866, %v673_v11  }
 0x1e6   : > { %706 = vperm.xlu0 %1865, %v672_v12  }
 0x1e9   : > { %701 = vperm.xlu1 %1866, %v671_v14  }
 0x1ea   : > { %696 = vperm.xlu0 %1865, %v670_v15   ;;  %v855_v15 = vld [vmem:[%s2225_s16 + $0x10] sm:$0xff] }
 0x1ed   : > { %691 = vperm.xlu1 %1866, %v669_v16  }
 0x1ee   : > { %686 = vperm.xlu0 %1865, %v668_v17   ;;  %v853_v17 = vld [vmem:[%s2225_s16] sm:$0xff] }
 0x1f1   : > { %681 = vperm.xlu1 %1866, %v667_v20  }
 0x1f2   : > { %676 = vperm.xlu0 %1865, %v666_v21   ;;  %v856_v21 = vld [vmem:[%s2225_s16 + $0x18] sm:$0xff] }
 0x1f5   : > { %928 = vperm.xlu1 %1866, %v910_v23  }
 0x1f6   : > { %923 = vperm.xlu0 %1865, %v909_v24  }
 0x1f9   : > { %918 = vperm.xlu1 %1866, %v908_v25  }
 0x1fa   : > { %913 = vperm.xlu0 %1865, %v907_v26  }
 0x243   : > { %v763_v27 = vpop.permute.xlu1 %762 }
 0x244   : > { %v761_v28 = vpop.permute.xlu0 %760 }
 0x245   : > { %v768_v29 = vsel %vm764_vm6, %v761_v28, %v763_v27 }
 0x246   : > { %1770 = vmatprep.subr.bf16.mxu1 %v768_v29 }
 0x247   : > { %v759_v30 = vpop.permute.xlu1 %758  ;;  %1771 = vmatpush3.bf16.msra.mxu1 %v768_v29  ;;  %v854_v29 = vld [vmem:[%s2225_s16 + $0x8] sm:$0xff] }
 0x248   : > { %v757_v31 = vpop.permute.xlu0 %756 }
 0x249   : > { %v767_v32 = vsel %vm764_vm6, %v757_v31, %v759_v30 }
 0x24a   : > { %1772 = vmatprep.subr.bf16.mxu1 %v767_v32 }
 0x24b   : > { %v753_v33 = vpop.permute.xlu1 %752  ;;  %1773 = vmatpush3.bf16.msra.mxu1 %v767_v32 }
 0x24c   : > { %v755_v34 = vpop.permute.xlu0 %754 }
 0x24d   : > { %1774 = vmatprep.subr.bf16.mxu1 %v755_v34 }
 0x24f   : > { %v751_v35 = vpop.permute.xlu1 %750  ;;  %1775 = vmatpush3.bf16.msra.mxu1 %v755_v34 }
 0x250   : > { %1776 = vmatprep.subr.bf16.mxu1 %v753_v33  ;;  %v749_v36 = vpop.permute.xlu0 %748 }
 0x251   : > { %v766_v37 = vsel %vm764_vm6, %v749_v36, %v751_v35 }
 0x253   : > { %1777 = vmatpush3.bf16.msra.mxu1 %v753_v33  ;;  %v747_v38 = vpop.permute.xlu1 %746 }
 0x254   : > { %1778 = vmatprep.subr.bf16.mxu1 %v766_v37  ;;  %v745_v39 = vpop.permute.xlu0 %744 }
 0x255   : > { %v765_v40 = vsel %vm764_vm6, %v745_v39, %v747_v38 }
 0x257   : > { %1779 = vmatpush3.bf16.msra.mxu1 %v766_v37 }
 0x258   : > { %1780 = vmatprep.subr.bf16.mxu1 %v765_v40 }
 0x25b   : > { %1781 = vmatpush3.bf16.msra.mxu1 %v765_v40 }
 0x25e   : > { %1783 = vmatmul.mubr.msk.bf16.vlgmr.msra.gmra.mxu1 %vm775_vm5, %v1920_v41 }
 0x25f   : > { %1786 = vmatprep.mubr.msk.bf16.mxu1 %vm775_vm5, %v1921_v42 }
 0x260   : > { %v712_v50 = vpop.permute.xlu1 %711 }
 0x261   : > { %v707_v47 = vpop.permute.xlu0 %706 }
 0x264   : > { %v702_v0 = vpop.permute.xlu1 %701 }
 0x265   : > { %v697_v54 = vpop.permute.xlu0 %696 }
 0x266   : > { %1787 = vmatmul.mubr.msk.bf16.gmra.mxu1 %vm775_vm5, %v1922_v43 }
 0x268   : > { %v692_v11 = vpop.permute.xlu1 %691 }
 0x269   : > { %v687_v6 = vpop.permute.xlu0 %686 }
 0x26c   : > { %v682_v24 = vpop.permute.xlu1 %681 }
 0x26d   : > { %v677_v12 = vpop.permute.xlu0 %676 }
 0x31e   : > { %v1784_v45 = vpop.f32.mrf.mxu1 }
 0x31f   : > { %v831_v14 = vadd.f32 %v1784_v45, %v687_v6 }
 0x320   : > { %v822_v46 = vpop.f32.mrf.mxu1 }
 0x321   : > { %v823_v16 = vadd.f32 %v822_v46, %v677_v12  ;;  %v863_v23 = vadd.f32 %v855_v15, %v831_v14 }
 0x322   : > { %v1785_v48 = vpop.f32.mrf.mxu1 }
 0x323   : > { %v834_v20 = vadd.f32 %v1785_v48, %v692_v11  ;;  %v861_v25 = vadd.f32 %v853_v17, %v823_v16 }
 0x324   : > { %v825_v49 = vpop.f32.mrf.mxu1 }
 0x325   : > { %v864_v27 = vadd.f32 %v856_v21, %v834_v20  ;;  %v826_v28 = vadd.f32 %v825_v49, %v682_v24 }
 0x326   : > { %v1788_v51 = vpop.f32.mrf.mxu1 }
 0x327   : > { %v847_v53 = vadd.f32 %v1788_v51, %v707_v47  ;;  %v862_v34 = vadd.f32 %v854_v29, %v826_v28  ;;  %v1694_v29 = vld [vmem:[%s2403_s6 + $0x78] sm:$0xff] }
 0x328   : > { %v838_v55 = vpop.f32.mrf.mxu1 }
 0x329   : > { %v867_v57 = vadd.f32 %v859_v52, %v847_v53  ;;  %v839_v58 = vadd.f32 %v838_v55, %v697_v54  ;;  %v1924_v52 = vld [vmem:[%s2404_s7 + $0x8] sm:$0xff]   ;;  %v1925_v53 = vld [vmem:[%s2406_s9] sm:$0xff]   ;;  %v924_v55 = vpop.permute.xlu0 %923 }
 0x32a   : > { %v1789_v59 = vpop.f32.mrf.mxu1  ;;  %v1926_v54 = vld [vmem:[%s2406_s9 + $0x8] sm:$0xff]  }
 0x32b   : > { %v1669_v61 = vmul.f32 -1.442695, %v867_v57  ;;  %v865_v62 = vadd.f32 %v857_v56, %v839_v58  ;;  %v850_v63 = vadd.f32 %v1789_v59, %v712_v50  ;;  %v929_v56 = vpop.permute.xlu1 %928 }
 0x32c   : > { %v841_v1 = vpop.f32.mrf.mxu1 }
 0x32d   : > { %1933 = vpow2.f32 %v1669_v61  ;;  %v1667_v3 = vmul.f32 -1.442695, %v865_v62  ;;  %v868_v4 = vadd.f32 %v860_v60, %v850_v63  ;;  %v842_v5 = vadd.f32 %v841_v1, %v702_v0  ;;  %v914_v59 = vpop.permute.xlu0 %913 }
 0x32f   : > { %1935 = vpow2.f32 %v1667_v3  ;;  %v1670_v7 = vmul.f32 -1.442695, %v868_v4  ;;  %v866_v8 = vadd.f32 %v858_v2, %v842_v5  ;;  %v919_v1 = vpop.permute.xlu1 %918 }
 0x331   : > { %1937 = vpow2.f32 %v1670_v7  ;;  %v1668_v9 = vmul.f32 -1.442695, %v866_v8 }
 0x333   : > { %1939 = vpow2.f32 %v1668_v9 }
 0x334   : > { %1941 = vtanh.f32 %v863_v23 }
 0x335   : > { %1943 = vtanh.f32 %v861_v25 }
 0x336   : > { %1945 = vtanh.f32 %v864_v27  ;;  %v1693_v27 = vld [vmem:[%s2403_s6 + $0x70] sm:$0xff] }
 0x33a   : > { %v1934_v26 = vpop.eup %1933 }
 0x33b   : > { %v887_v30 = vadd.f32 1.0, %v1934_v26 }
 0x33c   : > { %v1936_v31 = vpop.eup %1935 }
 0x33d   : > { %v885_v32 = vadd.f32 1.0, %v1936_v31  ;;  %1947 = vrcp.f32 %v887_v30  ;;  %v1691_v30 = vld [vmem:[%s2403_s6 + $0x60] sm:$0xff]  ;;  %v1692_v31 = vld [vmem:[%s2403_s6 + $0x68] sm:$0xff] }
 0x33e   : > { %v1938_v33 = vpop.eup %1937 }
 0x33f   : > { %v888_v35 = vadd.f32 1.0, %v1938_v33  ;;  %1949 = vrcp.f32 %v885_v32  ;;  %v1689_v32 = vld [vmem:[%s2403_s6 + $0x50] sm:$0xff]  ;;  %v1690_v33 = vld [vmem:[%s2403_s6 + $0x58] sm:$0xff] }
 0x340   : > { %v1940_v36 = vpop.eup %1939 }
 0x341   : > { %1951 = vrcp.f32 %v888_v35  ;;  %v886_v37 = vadd.f32 1.0, %v1940_v36  ;;  %v1942_v38 = vpop.eup %1941  ;;  %v1687_v35 = vld [vmem:[%s2403_s6 + $0x40] sm:$0xff]  ;;  %v1688_v36 = vld [vmem:[%s2403_s6 + $0x48] sm:$0xff] }
 0x342   : > { %1953 = vtanh.f32 %v862_v34  ;;  %v1944_v39 = vpop.eup %1943  ;;  %v1927_v34 = vld [vmem:[%s2402_s5 + $0x20] sm:$0xff]  }
 0x343   : > { %1955 = vrcp.f32 %v886_v37  ;;  %v1946_v40 = vpop.eup %1945  ;;  %v1007_v37 = vld [vmem:[%s2407_s10 + $0x10] sm:$0xff] }
 0x34a   : > { %v1948_v41 = vpop.eup %1947 }
 0x34b   : > { %v899_v45 = vmul.f32 %v1948_v41, %v1942_v38  ;;  %v1008_v38 = vld [vmem:[%s2407_s10 + $0x18] sm:$0xff]  ;;  %v1005_v41 = vld [vmem:[%s2407_s10] sm:$0xff] }
 0x34c   : > { %v1950_v42 = vpop.eup %1949 }
 0x34d   : > { %v897_v49 = vmul.f32 %v1950_v42, %v1944_v39  ;;  %v1713_v39 = vld [vmem:[%s2407_s10 + $0x30] sm:$0xff]  ;;  %v1006_v42 = vld [vmem:[%s2407_s10 + $0x8] sm:$0xff] }
 0x34e   : > { %v1952_v43 = vpop.eup %1951 }
 0x34f   : > { %v1954_v44 = vpop.eup %1953  ;;  %v900_v46 = vmul.f32 %v1952_v43, %v1946_v40  ;;  %v1714_v40 = vld [vmem:[%s2407_s10 + $0x38] sm:$0xff]  ;;  %v1711_v43 = vld [vmem:[%s2407_s10 + $0x20] sm:$0xff] }
 0x350   : > { %v1956_v47 = vpop.eup %1955 }
 0x351   : > { %v902_v48 = vpack.c.bf16 %v900_v46, %v899_v45  ;;  %v898_v50 = vmul.f32 %v1956_v47, %v1954_v44  ;;  %v1712_v44 = vld [vmem:[%s2407_s10 + $0x28] sm:$0xff]  ;;  %v1472_v45 = vld [vmem:[%s2409_s12] sm:$0xff] }
 0x353   : > { %1790 = vmatprep.subr.bf16.mxu0 %v902_v48  ;;  %v901_v51 = vpack.c.bf16 %v898_v50, %v897_v49 }
 0x354   : > { %1791 = vmatpush3.bf16.msra.mxu0 %v902_v48 }
 0x355   : > { %1792 = vmatprep.subr.bf16.mxu0 %v901_v51 }
 0x358   : > { %1793 = vmatpush3.bf16.msra.mxu0 %v901_v51 }
 0x359   : > { %1798 = vmatprep.subr.bf16.mxu0 %v902_v48 }
 0x35b   : > { %1795 = vmatmul.mubr.msk.bf16.vlgmr.msra.gmra.mxu0 %vm941_vm7, %v1924_v52 }
 0x35c   : > { %1799 = vmatpush3.bf16.msra.mxu0 %v902_v48  ;;  %1802 = vmatprep.mubr.msk.bf16.mxu0 %vm941_vm7, %v1925_v53 }
 0x35d   : > { %1800 = vmatprep.subr.bf16.mxu0 %v901_v51 }
 0x360   : > { %1801 = vmatpush3.bf16.msra.mxu0 %v901_v51 }
 0x363   : > { %1803 = vmatmul.mubr.msk.bf16.vlgmr.msra.gmra.mxu0 %vm941_vm7, %v1926_v54 }
 0x364   : > { %1818 = vmatprep.mubr.msk.bf16.mxu0 %vm775_vm5, %v1927_v34 }
 0x41b   : > { %v1796_v57 = vpop.f32.mrf.mxu0 }
 0x41c   : > { %v991_v58 = vadd.f32 %v1796_v57, %v924_v55 }
 0x41d   : > { %v982_v60 = vpop.f32.mrf.mxu0 }
 0x41e   : > { %v999_v61 = vadd.f32 %v991_v58, %v2121_v13  ;;  %v983_v62 = vadd.f32 %v982_v60, %v914_v59 }
 0x41f   : > { %v1797_v63 = vpop.f32.mrf.mxu0 }
 0x420   : > { %v994_v0 = vadd.f32 %v1797_v63, %v929_v56  ;;  %1102 = vrot.lane.b32.xlu0 %v999_v61, %s1994_s28  ;;  %v997_v3 = vadd.f32 %v983_v62, %v2125_v18 }
 0x421   : > { %v985_v2 = vpop.f32.mrf.mxu0 }
 0x422   : > { %v1000_v4 = vadd.f32 %v994_v0, %v2127_v19  ;;  %v986_v5 = vadd.f32 %v985_v2, %v919_v1  ;;  %v1928_v0 = vld [vmem:[%s2402_s5 + $0x28] sm:$0xff]   ;;  %v1929_v1 = vld [vmem:[%s2402_s5 + $0x30] sm:$0xff]   ;;  %v1930_v2 = vld [vmem:[%s2402_s5 + $0x38] sm:$0xff]  }
 0x424   : > { %v998_v6 = vadd.f32 %v986_v5, %v2133_v22  ;;  %1104 = vrot.lane.b32.xlu1 %v1000_v4, %s1994_s28  ;;  %1098 = vrot.lane.b32.xlu0 %v997_v3, %s1994_s28  ;;  %v2254_v7 = vpack.c.bf16 %v1000_v4, %v999_v61  ;;  %v2350_v4 = vpop.f32.mrf.mxu0 }
 0x426   : > { %v2256_v13 = vpack.c.bf16 %v998_v6, %v997_v3  ;;  %v1931_v3 = vld [vmem:[%s2406_s9 + $0x10] sm:$0xff]   ;;  %v2352_v5 = vpop.f32.mrf.mxu0 }
 0x427   : > { %1830 = vmatprep.mubr.msk.bf16.mxu1 %vm941_vm7, %v1931_v3 }
 0x428   : > { %1100 = vrot.lane.b32.xlu1 %v998_v6, %s1994_s28  ;;  %s1998_s28 = smov 124   ;;  %v2354_v6 = vpop.f32.mrf.mxu0 }
 0x492   : > { %v1103_v8 = vpop.permute.xlu0 %1102 }
 0x493   : > { %1114 = vst.msk [vmem:[#allocation2 + $0x20] sm:$0xff] %vm581_vm2, %v1103_v8 }
 0x494   : > { %1115 = vst.msk [vmem:[#allocation2 + $0x28] sm:$0xff] %vm583_vm3, %v1103_v8 }
 0x496   : > { %v1105_v18 = vpop.permute.xlu1 %1104  ;;  %v1099_v19 = vpop.permute.xlu0 %1098 }
 0x497   : > { %1116 = vst.msk [vmem:[#allocation2 + $0x30] sm:$0xff] %vm581_vm2, %v1105_v18  ;;  %1110 = vst.msk [vmem:[#allocation2] sm:$0xff] %vm581_vm2, %v1099_v19 }
 0x498   : > { %1117 = vst.msk [vmem:[#allocation2 + $0x38] sm:$0xff] %vm583_vm3, %v1105_v18  ;;  %1111 = vst.msk [vmem:[#allocation2 + $0x8] sm:$0xff] %vm583_vm3, %v1099_v19 }
 0x49a   : > { %v1101_v22 = vpop.permute.xlu1 %1100  ;;  %v1120_v9 = vld [vmem:[#allocation2 + $0x20] sm:$0xff] }
 0x49b   : > { %v1124_v11 = vld [vmem:[#allocation2 + $0x28] sm:$0xff]  ;;  %1112 = vst.msk [vmem:[#allocation2 + $0x10] sm:$0xff] %vm581_vm2, %v1101_v22 }
 0x49c   : > { %1113 = vst.msk [vmem:[#allocation2 + $0x18] sm:$0xff] %vm583_vm3, %v1101_v22  ;;  %v1897_v12 = vpack.i.bf16 %v1124_v11, %v1120_v9 }
 0x49e   : > { %1898 = vrot.lane.b32.xlu0 %v1897_v12, %s1998_s28  ;;  %v1121_v14 = vld [vmem:[#allocation2 + $0x30] sm:$0xff]  ;;  %v1118_v16 = vld [vmem:[#allocation2] sm:$0xff] }
 0x49f   : > { %v1125_v15 = vld [vmem:[#allocation2 + $0x38] sm:$0xff]  ;;  %v1122_v20 = vld [vmem:[#allocation2 + $0x8] sm:$0xff]  ;;  %v2267_v21 = vpack.c.bf16 %v1121_v14, %v1120_v9  ;;  %v1326_v12 = vld [vmem:[%s2225_s16 + $0x70] sm:$0xff] }
 0x4a0   : > { %v1907_v17 = vpack.i.bf16 %v1125_v15, %v1121_v14  ;;  %v1902_v23 = vpack.i.bf16 %v1122_v20, %v1118_v16 }
 0x4a2   : > { %1908 = vrot.lane.b32.xlu1 %v1907_v17, %s1998_s28  ;;  %1903 = vrot.lane.b32.xlu0 %v1902_v23, %s1998_s28  ;;  %v1119_v24 = vld [vmem:[#allocation2 + $0x10] sm:$0xff]  ;;  %v1324_v17 = vld [vmem:[%s2225_s16 + $0x60] sm:$0xff] }
 0x4a3   : > { %v1123_v25 = vld [vmem:[#allocation2 + $0x18] sm:$0xff]  ;;  %v2272_v28 = vpack.c.bf16 %v1119_v24, %v1118_v16 }
 0x4a4   : > { %v1912_v26 = vpack.i.bf16 %v1123_v25, %v1119_v24  ;;  %v1327_v24 = vld [vmem:[%s2225_s16 + $0x78] sm:$0xff] }
 0x4a6   : > { %1913 = vrot.lane.b32.xlu1 %v1912_v26, %s1998_s28  ;;  %1215 = vperm.xlu0 %1865, %v1693_v27  }
 0x4aa   : > { %1220 = vperm.xlu1 %1866, %v1694_v29   ;;  %1205 = vperm.xlu0 %1865, %v1691_v30   ;;  %v1325_v30 = vld [vmem:[%s2225_s16 + $0x68] sm:$0xff] }
 0x4ae   : > { %1210 = vperm.xlu1 %1866, %v1692_v31   ;;  %1195 = vperm.xlu0 %1865, %v1689_v32  }
 0x4b2   : > { %1200 = vperm.xlu1 %1866, %v1690_v33   ;;  %1185 = vperm.xlu0 %1865, %v1687_v35  }
 0x4b6   : > { %1190 = vperm.xlu1 %1866, %v1688_v36   ;;  %1021 = vperm.xlu0 %1865, %v1007_v37  }
 0x4ba   : > { %1026 = vperm.xlu1 %1866, %v1008_v38   ;;  %1392 = vperm.xlu0 %1865, %v1713_v39  }
 0x4be   : > { %1397 = vperm.xlu1 %1866, %v1714_v40   ;;  %1011 = vperm.xlu0 %1865, %v1005_v41   ;;  %v1322_v41 = vld [vmem:[%s2225_s16 + $0x50] sm:$0xff] }
 0x4c2   : > { %1016 = vperm.xlu1 %1866, %v1006_v42   ;;  %1382 = vperm.xlu0 %1865, %v1711_v43   ;;  %v1320_v43 = vld [vmem:[%s2225_s16 + $0x40] sm:$0xff] }
 0x4c6   : > { %1387 = vperm.xlu1 %1866, %v1712_v44   ;;  %1475 = vperm.xlu0 %1865, %v1472_v45   ;;  %v1323_v45 = vld [vmem:[%s2225_s16 + $0x58] sm:$0xff] }
 0x510   : > { %v1899_v46 = vpop.permute.xlu0 %1898 }
 0x511   : > { %v1901_v47 = vunpack.i.h.bf16 %v1899_v46  ;;  %v1900_v48 = vunpack.i.l.bf16 %v1899_v46 }
 0x513   : > { %v1153_v55 = vsel %vm1150_vm8, %v1900_v48, %v1901_v47 }
 0x514   : > { %v1909_v49 = vpop.permute.xlu1 %1908  ;;  %v1904_v52 = vpop.permute.xlu0 %1903 }
 0x515   : > { %v1911_v50 = vunpack.i.h.bf16 %v1909_v49  ;;  %v1910_v51 = vunpack.i.l.bf16 %v1909_v49  ;;  %v1906_v53 = vunpack.i.h.bf16 %v1904_v52  ;;  %v1905_v54 = vunpack.i.l.bf16 %v1904_v52  ;;  %v1321_v52 = vld [vmem:[%s2225_s16 + $0x48] sm:$0xff] }
 0x517   : > { %v1154_v56 = vsel %vm1150_vm8, %v1910_v51, %v1911_v50  ;;  %v1151_v61 = vsel %vm1150_vm8, %v1905_v54, %v1906_v53 }
 0x518   : > { %v1914_v57 = vpop.permute.xlu1 %1913  ;;  %v1164_v58 = vpack.c.bf16 %v1154_v56, %v1153_v55 }
 0x519   : > { %v1916_v59 = vunpack.i.h.bf16 %v1914_v57  ;;  %v1915_v60 = vunpack.i.l.bf16 %v1914_v57 }
 0x51a   : > { %1806 = vmatprep.subr.bf16.mxu0 %v1164_v58 }
 0x51b   : > { %1807 = vmatpush3.bf16.msra.mxu0 %v1164_v58  ;;  %v1152_v62 = vsel %vm1150_vm8, %v1915_v60, %v1916_v59 }
 0x51c   : > { %v1163_v63 = vpack.c.bf16 %v1152_v62, %v1151_v61 }
 0x51e   : > { %1808 = vmatprep.subr.bf16.mxu0 %v1163_v63 }
 0x51f   : > { %1809 = vmatpush3.bf16.msra.mxu0 %v1163_v63 }
 0x520   : > { %1810 = vmatprep.subr.bf16.mxu0 %v2254_v7 }
 0x521   : > { %v1216_v18 = vpop.permute.xlu0 %1215 }
 0x523   : > { %1811 = vmatpush3.bf16.msra.mxu0 %v2254_v7  ;;  %v2356_v7 = vpop.f32.mrf.mxu0 }
 0x524   : > { %1812 = vmatprep.subr.bf16.mxu0 %v2256_v13 }
 0x525   : > { %v1221_v9 = vpop.permute.xlu1 %1220  ;;  %v1206_v15 = vpop.permute.xlu0 %1205 }
 0x527   : > { %1813 = vmatpush3.bf16.msra.mxu0 %v2256_v13 }
 0x528   : > { %1814 = vmatprep.subr.bf16.mxu0 %v2267_v21 }
 0x529   : > { %v1196_v34 = vpop.permute.xlu0 %1195 }
 0x52b   : > { %1815 = vmatpush3.bf16.msra.mxu0 %v2267_v21 }
 0x52c   : > { %1816 = vmatprep.subr.bf16.mxu0 %v2272_v28 }
 0x52d   : > { %v1186_v39 = vpop.permute.xlu0 %1185 }
 0x52f   : > { %1817 = vmatpush3.bf16.msra.mxu0 %v2272_v28  ;;  %v1211_v28 = vpop.permute.xlu1 %1210 }
 0x532   : > { %1819 = vmatmul.mubr.msk.bf16.vlgmr.msra.gmra.mxu0 %vm775_vm5, %v1928_v0 }
 0x533   : > { %1822 = vmatprep.mubr.msk.bf16.mxu0 %vm775_vm5, %v1929_v1  ;;  %v1201_v38 = vpop.permute.xlu1 %1200 }
 0x537   : > { %v1191_v47 = vpop.permute.xlu1 %1190 }
 0x53a   : > { %1823 = vmatmul.mubr.msk.bf16.gmra.mxu0 %vm775_vm5, %v1930_v2 }
 0x5f2   : > { %v1820_v13 = vpop.f32.mrf.mxu0 }
 0x5f3   : > { %v1298_v40 = vadd.f32 %v1820_v13, %v1196_v34 }
 0x5f4   : > { %v1289_v8 = vpop.f32.mrf.mxu0 }
 0x5f5   : > { %v1290_v42 = vadd.f32 %v1289_v8, %v1186_v39  ;;  %v1330_v46 = vadd.f32 %v1322_v41, %v1298_v40 }
 0x5f6   : > { %v1821_v19 = vpop.f32.mrf.mxu0 }
 0x5f7   : > { %v1301_v44 = vadd.f32 %v1821_v19, %v1201_v38  ;;  %v1328_v48 = vadd.f32 %v1320_v43, %v1290_v42 }
 0x5f8   : > { %v1292_v22 = vpop.f32.mrf.mxu0 }
 0x5f9   : > { %v1331_v50 = vadd.f32 %v1323_v45, %v1301_v44  ;;  %v1293_v51 = vadd.f32 %v1292_v22, %v1191_v47 }
 0x5fa   : > { %v1824_v11 = vpop.f32.mrf.mxu0 }
 0x5fb   : > { %v1314_v14 = vadd.f32 %v1824_v11, %v1216_v18  ;;  %v1329_v57 = vadd.f32 %v1321_v52, %v1293_v51 }
 0x5fc   : > { %v1305_v16 = vpop.f32.mrf.mxu0 }
 0x5fd   : > { %v1334_v20 = vadd.f32 %v1326_v12, %v1314_v14  ;;  %v1306_v21 = vadd.f32 %v1305_v16, %v1206_v15  ;;  %v1932_v12 = vld [vmem:[%s2406_s9 + $0x18] sm:$0xff]   ;;  %v1022_v14 = vpop.permute.xlu0 %1021  ;;  %v1027_v15 = vpop.permute.xlu1 %1026 }
 0x5fe   : > { %v1825_v23 = vpop.f32.mrf.mxu0 }
 0x5ff   : > { %v1705_v25 = vmul.f32 -1.442695, %v1334_v20  ;;  %v1332_v26 = vadd.f32 %v1324_v17, %v1306_v21  ;;  %v1317_v27 = vadd.f32 %v1825_v23, %v1221_v9 }
 0x600   : > { %v1308_v29 = vpop.f32.mrf.mxu0 }
 0x601   : > { %1957 = vpow2.f32 %v1705_v25  ;;  %v1703_v31 = vmul.f32 -1.442695, %v1332_v26  ;;  %v1335_v32 = vadd.f32 %v1327_v24, %v1317_v27  ;;  %v1309_v33 = vadd.f32 %v1308_v29, %v1211_v28  ;;  %v1393_v16 = vpop.permute.xlu0 %1392  ;;  %v1398_v17 = vpop.permute.xlu1 %1397 }
 0x602   : > { %v1088_v27 = vadd.f32 %v2350_v4, %v1022_v14  ;;  %v1091_v28 = vadd.f32 %v2354_v6, %v1027_v15  ;;  %v1469_v6 = vld [vmem:[%s2408_s11] sm:$0xf] }
 0x603   : > { %1959 = vpow2.f32 %v1703_v31  ;;  %v1706_v35 = vmul.f32 -1.442695, %v1335_v32  ;;  %v1333_v36 = vadd.f32 %v1325_v30, %v1309_v33 }
 0x605   : > { %1961 = vpow2.f32 %v1706_v35  ;;  %v1704_v37 = vmul.f32 -1.442695, %v1333_v36  ;;  %v1012_v20 = vpop.permute.xlu0 %1011  ;;  %v1017_v21 = vpop.permute.xlu1 %1016 }
 0x606   : > { %v1083_v31 = vadd.f32 %v2356_v7, %v1017_v21  ;;  %v1080_v38 = vadd.f32 %v2352_v5, %v1012_v20 }
 0x607   : > { %1963 = vpow2.f32 %v1704_v37 }
 0x608   : > { %1965 = vtanh.f32 %v1330_v46 }
 0x609   : > { %1967 = vtanh.f32 %v1328_v48  ;;  %v1383_v29 = vpop.permute.xlu0 %1382  ;;  %v1388_v32 = vpop.permute.xlu1 %1387 }
 0x60a   : > { %1969 = vtanh.f32 %v1331_v50 }
 0x60d   : > { %v1476_v5 = vpop.permute.xlu0 %1475 }
 0x60e   : > { %v1958_v49 = vpop.eup %1957 }
 0x60f   : > { %v1354_v53 = vadd.f32 1.0, %v1958_v49  ;;  %v1983_v49 = vld [vmem:[%s2102_s23] sm:$0xff] }
 0x610   : > { %v1960_v54 = vpop.eup %1959 }
 0x611   : > { %v1352_v55 = vadd.f32 1.0, %v1960_v54  ;;  %1971 = vrcp.f32 %v1354_v53 }
 0x612   : > { %v1962_v56 = vpop.eup %1961 }
 0x613   : > { %v1355_v58 = vadd.f32 1.0, %v1962_v56  ;;  %1973 = vrcp.f32 %v1352_v55 }
 0x614   : > { %v1964_v59 = vpop.eup %1963 }
 0x615   : > { %1975 = vrcp.f32 %v1355_v58  ;;  %v1353_v60 = vadd.f32 1.0, %v1964_v59  ;;  %v1966_v61 = vpop.eup %1965 }
 0x616   : > { %1977 = vtanh.f32 %v1329_v57  ;;  %v1968_v62 = vpop.eup %1967 }
 0x617   : > { %1979 = vrcp.f32 %v1353_v60  ;;  %v1970_v63 = vpop.eup %1969 }
 0x61e   : > { %v1972_v0 = vpop.eup %1971 }
 0x61f   : > { %v1366_v13 = vmul.f32 %v1972_v0, %v1966_v61 }
 0x620   : > { %v1974_v1 = vpop.eup %1973 }
 0x621   : > { %v1364_v22 = vmul.f32 %v1974_v1, %v1968_v62 }
 0x622   : > { %v1976_v2 = vpop.eup %1975 }
 0x623   : > { %v1978_v3 = vpop.eup %1977  ;;  %v1367_v8 = vmul.f32 %v1976_v2, %v1970_v63 }
 0x624   : > { %v1980_v18 = vpop.eup %1979 }
 0x625   : > { %v1369_v19 = vpack.c.bf16 %v1367_v8, %v1366_v13  ;;  %v1365_v9 = vmul.f32 %v1980_v18, %v1978_v3 }
 0x627   : > { %1826 = vmatprep.subr.bf16.mxu1 %v1369_v19  ;;  %v1368_v11 = vpack.c.bf16 %v1365_v9, %v1364_v22 }
 0x628   : > { %1827 = vmatpush3.bf16.msra.mxu1 %v1369_v19 }
 0x629   : > { %1828 = vmatprep.subr.bf16.mxu1 %v1368_v11 }
 0x62c   : > { %1829 = vmatpush3.bf16.msra.mxu1 %v1368_v11 }
 0x62d   : > { %1834 = vmatprep.subr.bf16.mxu1 %v1993_v10 }
 0x62f   : > { %1831 = vmatmul.mubr.msk.bf16.vlgmr.msra.gmra.mxu1 %vm941_vm7, %v1932_v12 }
 0x630   : > { %1838 = vmatprep.mubr.msk.bf16.mxu1 %vm1999_vm9, %v1993_v10 }
 0x6ef   : > { %v1832_v23 = vpop.f32.mrf.mxu1 }
 0x6f0   : > { %v1459_v25 = vadd.f32 %v1832_v23, %v1393_v16 }
 0x6f1   : > { %v1450_v24 = vpop.f32.mrf.mxu1 }
 0x6f2   : > { %v1467_v34 = vadd.f32 %v1459_v25, %v1088_v27  ;;  %v1451_v35 = vadd.f32 %v1450_v24, %v1383_v29 }
 0x6f3   : > { %v1833_v26 = vpop.f32.mrf.mxu1 }
 0x6f4   : > { %v1462_v30 = vadd.f32 %v1833_v26, %v1398_v17  ;;  %v1465_v41 = vadd.f32 %v1451_v35, %v1080_v38 }
 0x6f5   : > { %v1453_v33 = vpop.f32.mrf.mxu1 }
 0x6f6   : > { %v1468_v36 = vadd.f32 %v1462_v30, %v1091_v28  ;;  %v1454_v37 = vadd.f32 %v1453_v33, %v1388_v32 }
 0x6f8   : > { %v1471_v39 = vpack.c.bf16 %v1468_v36, %v1467_v34  ;;  %v1466_v40 = vadd.f32 %v1454_v37, %v1083_v31 }
 0x6fa   : > { %1835 = vmatpush3.bf16.msra.mxu1 %v1471_v39  ;;  %v1470_v4 = vpack.c.bf16 %v1466_v40, %v1465_v41 }
 0x6fb   : > { %1836 = vmatprep.subr.bf16.mxu1 %v1993_v10 }
 0x6fe   : > { %1837 = vmatpush3.bf16.msra.mxu1 %v1470_v4 }
 0x6ff   : > { %1842 = vmatprep.subr.bf16.mxu1 %v1993_v10 }
 0x701   : > { %1839 = vmatmul.mubr.msk.bf16.vlgmr.msra.gmra.mxu1 %vm941_vm7, %v1469_v6 }
 0x702   : > { %1844 = vmatprep.mubr.msk.bf16.mxu1 %vm1999_vm9, %v1993_v10  ;;  %v1531_v10 = vld [vmem:[%s2399_s2] sm:$0xf] }
 0x7c1   : > { %v1515_v7 = vpop.f32.mrf.mxu1 }
 0x7c2   : > { %v1516_v42 = vadd.f32 %v1515_v7, %v1476_v5 }
 0x7c3   : > { %v1840_v43 = vpop.f32.mrf.mxu1 }
 0x7c4   : > { %v1525_v44 = vsub.f32 0.0, %v1516_v42  ;;  %v1522_v48 = vrot.slane %v1516_v42, 4 }
 0x7c5   : > { %v1518_v45 = vpop.f32.mrf.mxu1 }
 0x7c6   : > { %v1526_v46 = vmul.f32 1.442695, %v1525_v44  ;;  %v1524_v50 = vsub.f32 %v1983_v49, %v1522_v48 }
 0x7c7   : > { %v1841_v47 = vpop.f32.mrf.mxu1 }
 0x7c8   : > { %1981 = vpow2.f32 %v1526_v46 }
 0x7d5   : > { %v1982_v51 = vpop.eup %1981 }
 0x7d6   : > { %v1528_v52 = vmul.f32 %v1982_v51, %v1524_v50 }
 0x7d8   : > { %v1530_v53 = vsel %vm1529_vm10, %v1983_v49, %v1528_v52 }
 0x7d9   : > { %v1532_v54 = vpack.c.bf16 %v1530_v53, %v1530_v53 }
 0x7db   : > { %v1538_v55 = vsel %vm1529_vm10, %v1532_v54, 0 }
 0x7dc   : > { %1843 = vmatpush3.bf16.msra.mxu1 %v1538_v55 }
 0x7df   : > { %1845 = vmatmul.mubr.msk.bf16.vlgmr.msra.gmra.mxu1 %vm1533_vm11, %v1531_v10 }
 0x89f   : > { %v1574_v56 = vpop.f32.mrf.mxu1 }
 0x8a0   : > { %1580 = vst [vmem:[%s455_s14] sm:$0xff] %v1574_v56 }
 0x8a1   : > { %v1846_v57 = vpop.f32.mrf.mxu1 }
 0x8a3   : > { %v1577_v58 = vpop.f32.mrf.mxu1 }
 0x8a5   : > { %v1847_v59 = vpop.f32.mrf.mxu1 }
 0x8a6 PF: > { %s23_s25 = sadd.s32 1, %s1990_s25  }
 0x8a7   : > { %p20_p4 = scmp.ge.s32.totalorder %s23_s25, 4  }
 0x8a9   :  { %22 = sbr.rel (!%p20_p4) target bundleno = 1 (0x1), region = 109 }

// kernel: _lambda_.10
= control target key start
LH: loop header
LB: loop body
LE: loop exit
PB: predicated region body
PF: predicated region fallthrough
CT: control target
= control target key end

     0   :  { %18 = vsyncpa [#allocation4], 0  ;;  %s2166_s25 = smov 0   ;;  %s2504_s0 = inlined_call_operand.vmem [shape: f32[2,8,128], index: 0, kind: input, shape index: {}]   ;;  %s2505_s1 = inlined_call_operand.vmem [shape: f32[2,512,128], index: 1, kind: input, shape index: {}]   ;;  %s2506_s2 = inlined_call_operand.vmem [shape: bf16[8,8], index: 2, kind: input, shape index: {}]   ;;  %s2507_s3 = inlined_call_operand.vmem [shape: bf16[32,4], index: 3, kind: input, shape index: {}]   ;;  %s2508_s4 = inlined_call_operand.vmem [shape: f32[32,1], index: 4, kind: input, shape index: {}]   ;;  %s2509_s5 = inlined_call_operand.vmem [shape: bf16[2,64,96], index: 5, kind: input, shape index: {}]   ;;  %s2510_s6 = inlined_call_operand.vmem [shape: f32[2,64,1], index: 6, kind: input, shape index: {}]   ;;  %s2511_s7 = inlined_call_operand.vmem [shape: bf16[1,32,32], index: 7, kind: input, shape index: {}]   ;;  %s2512_s8 = inlined_call_operand.vmem [shape: f32[1,32,1], index: 8, kind: input, shape index: {}]   ;;  %s2513_s9 = inlined_call_operand.vmem [shape: bf16[2,32,32], index: 9, kind: input, shape index: {}]   ;;  %s2514_s10 = inlined_call_operand.vmem [shape: f32[2,32,1], index: 10, kind: input, shape index: {}]   ;;  %s2515_s11 = inlined_call_operand.hbm [shape: bf16[8,32], index: 11, kind: input, shape index: {}]   ;;  %s2516_s12 = inlined_call_operand.vmem [shape: f32[8,1], index: 12, kind: input, shape index: {}]   ;;  %s2517_s13 = inlined_call_operand.vmem [shape: f32[2,8,128], index: 13, kind: output, shape index: {}]  }
   0x1 LB: > { %s1682_s26 = sadd.s32 4294967295, %s2085_s25   ;;  %p1684_p0 = scmp.ge.s32.totalorder %s2085_s25, 1  ;;  %s2085_s25 = sphi %s2166_s25, %s24_s25  }
   0x2   : > { %p338_p1 = scmp.lt.s32.totalorder %s2085_s25, 3  ;;  %p1911_p3 = scmp.eq.s32.totalorder %s1682_s26, 0 }
   0x3   : > { %s2087_s28 = smov [#allocation3]  }
   0x4   : > { %p2174_p2 = pnand %p1684_p0, %p338_p1  ;;  %s378_s29 = sshll.u32 %s2087_s28, 4  ;;  %s379_s29 = int_to_ptr.vmem [resolvable:$true] %s378_s29 }
   0x5   : > { %s2060_s30 = scalar_lea.vmem %s379_s29, 64  ;;  %p2068_p10 = scmp.lt.s32.totalorder %s379_s29, %s379_s29 }
   0x6   : > { %p1907_p4 = pneg %p2174_p2  ;;  %p2061_p7 = scmp.ne.s32.totalorder %s379_s29, %s2060_s30 }
   0x7   : > { %p2069_p11 = scmp.lt.s32.totalorder %s2060_s30, %s2060_s30 }
   0x8   : > { %p1908_p5 = pnand %p1911_p3, %p1907_p4 }
   0x9   : > { %p2070_p12 = por %p2069_p11, %p2068_p10 }
   0xa   : > { %p2051_p6 = pneg %p1908_p5 }
   0xc   : > { %p2063_p8 = pnand %p2061_p7, %p2051_p6 }
   0xe   : > { %p2064_p9 = pneg %p2063_p8 }
  0x10   : > { %p2071_p13 = pnand %p2070_p12, %p2064_p9 }
  0x12   : > { %2074 = shalt.err (!%p2071_p13)
}
  0x13   : > { %1910 = dma.hbm_to_vmem [thread:$0]  (!%p1908_p5), %s2515_s11, 64, %s379_s29, [#allocation4]  }
  0x14   : > { %410 = sbr.rel (%p2174_p2) target bundleno = 2235 (0x8bb), region = 72 }
  0x19   : > { %2080 = dma.done.wait (%p1911_p3), [#allocation4], 64  }
  0x1a   : > { %2082 = vsyncadd (%p1911_p3), [#allocation4], 4294967232  ;;  %p458_p0 = scmp.lt.s32.totalorder %s1682_s26, 1  ;;  %v2088_v0 = vmov 0   ;;  %vm515_vm0 = vcmask 31744   ;;  %v1982_v3 = vld [vmem:[%s2507_s3] sm:$0xff]  }
  0x1b   : > { %1930 = vset.pattern.permute.xlu0 %v2088_v0  ;;  %1931 = vset.pattern.permute.xlu1 %v2088_v0  ;;  %vm522_vm1 = vcmask 1041408   ;;  %v481_v4 = vld [vmem:[%s2508_s4 + $0x10] sm:$0xff]  ;;  %v1983_v6 = vld [vmem:[%s2507_s3 + $0x8] sm:$0xff]   ;;  %v482_v7 = vld [vmem:[%s2508_s4 + $0x18] sm:$0xff]  ;;  %v2089_v11 = vmov 0.0   ;;  %s2090_s18 = smov 2  }
  0x1c   : > { %s2520_s26 = smov (!%p458_p0, %s1682_s26), 1  ;;  %1820 = vmatprep.mubr.msk.bf16.mxu0 %vm515_vm0, %v1982_v3  ;;  %495 = vperm.xlu0 %1930, %v481_v4   ;;  %v479_v8 = vld [vmem:[%s2508_s4] sm:$0xff]  ;;  %v480_v10 = vld [vmem:[%s2508_s4 + $0x8] sm:$0xff]  ;;  %579 = vst [vmem:[#allocation2 + $0x20] sm:$0xff] %v2089_v11  ;;  %580 = vst.msk [vmem:[#allocation2 + $0x28] sm:$0xff] %vm515_vm0, %v2089_v11  ;;  %vm599_vm2 = vcmask 1047568  }
  0x1d   : > { %s1689_s16 = sshll.u32 %s2520_s26, 3  ;;  %485 = vperm.xlu1 %1931, %v479_v8   ;;  %575 = vst [vmem:[#allocation2] sm:$0xff] %v2089_v11  ;;  %576 = vst.msk [vmem:[#allocation2 + $0x8] sm:$0xff] %vm515_vm0, %v2089_v11  ;;  %vm601_vm3 = vcmask 15360   ;;  %s2091_s20 = smov 126   ;;  %vm653_vm4 = vcmask 1031168  }
  0x1e   : > { %s2196_s19 = scalar_lea.vmem %s2504_s0, %s1689_s16  ;;  %577 = vst [vmem:[#allocation2 + $0x10] sm:$0xff] %v2089_v11  ;;  %578 = vst.msk [vmem:[#allocation2 + $0x18] sm:$0xff] %vm515_vm0, %v2089_v11  ;;  %s2092_s21 = smov 1   ;;  %vm793_vm5 = vcmask 785408   ;;  %vm782_vm6 = vcmask 1039360   ;;  %vm959_vm7 = vcmask 261120  }
  0x1f   : > { %v473_v1 = vld [vmem:[%s2196_s19] sm:$0xff]  ;;  %581 = vst [vmem:[#allocation2 + $0x30] sm:$0xff] %v2089_v11  ;;  %582 = vst.msk [vmem:[#allocation2 + $0x38] sm:$0xff] %vm515_vm0, %v2089_v11  ;;  %s2093_s22 = smov 127   ;;  %vm1168_vm8 = vcmask 1014784   ;;  %vm2095_vm9 = vmmov 0  }
  0x20   : > { %v478_v2 = vpack.c.bf16 %v473_v1, %v473_v1  ;;  %500 = vperm.xlu0 %1930, %v482_v7   ;;  %v1984_v7 = vld [vmem:[%s2509_s5] sm:$0xff]   ;;  %vm1547_vm10 = vcmask 1043456   ;;  %vm1551_vm11 = vcmask 64512  }
  0x21   : > { %490 = vperm.xlu1 %1931, %v480_v10   ;;  %1836 = vmatprep.mubr.msk.bf16.mxu1 %vm793_vm5, %v1984_v7 }
  0x22   : > { %v514_v5 = vrot.slane %v478_v2, 2 }
  0x24   : > { %1902 = vmatprep.subr.msk.bf16.mxu0 %vm522_vm1, %v514_v5  ;;  %v524_v9 = vsel %vm522_vm1, %v514_v5, 0 }
  0x25   : > { %1819 = vmatpush3.bf16.msra.mxu0 %v524_v9 }
  0x28   : > { %1821 = vmatmul.mubr.msk.bf16.vlgmr.msra.gmra.mxu0 %vm515_vm0, %v1983_v6 }
  0x97   : > { %v496_v12 = vpop.permute.xlu0 %495 }
  0x98   : > { %v486_v15 = vpop.permute.xlu1 %485 }
  0x9b   : > { %v501_v17 = vpop.permute.xlu0 %500 }
  0x9c   : > { %v491_v22 = vpop.permute.xlu1 %490 }
  0xe8   : > { %v1822_v13 = vpop.f32.mrf.mxu0 }
  0xe9   : > { %v2231_v14 = vadd.f32 %v1822_v13, %v496_v12  ;;  %v691_v12 = vld [vmem:[%s2510_s6 + $0x38] sm:$0xff]  ;;  %v690_v13 = vld [vmem:[%s2510_s6 + $0x30] sm:$0xff] }
  0xea   : > { %v560_v16 = vpop.f32.mrf.mxu0 }
  0xeb   : > { %591 = vrot.lane.b32.xlu0 %v2231_v14, %s2090_s18  ;;  %v2235_v19 = vadd.f32 %v560_v16, %v486_v15  ;;  %v689_v15 = vld [vmem:[%s2510_s6 + $0x28] sm:$0xff]  ;;  %v688_v16 = vld [vmem:[%s2510_s6 + $0x20] sm:$0xff] }
  0xec   : > { %v1823_v18 = vpop.f32.mrf.mxu0 }
  0xed   : > { %v2237_v20 = vadd.f32 %v1823_v18, %v501_v17  ;;  %v687_v17 = vld [vmem:[%s2510_s6 + $0x18] sm:$0xff]  ;;  %v686_v18 = vld [vmem:[%s2510_s6 + $0x10] sm:$0xff] }
  0xee   : > { %v563_v21 = vpop.f32.mrf.mxu0 }
  0xef   : > { %593 = vrot.lane.b32.xlu1 %v2237_v20, %s2090_s18  ;;  %587 = vrot.lane.b32.xlu0 %v2235_v19, %s2090_s18  ;;  %v2243_v23 = vadd.f32 %v563_v21, %v491_v22  ;;  %v1952_v40 = vpack.i.bf16 %v2237_v20, %v2231_v14  ;;  %v685_v21 = vld [vmem:[%s2510_s6 + $0x8] sm:$0xff]  ;;  %v684_v22 = vld [vmem:[%s2510_s6] sm:$0xff] }
  0xf1   : > { %v1957_v41 = vpack.i.bf16 %v2243_v23, %v2235_v19 }
  0xf3   : > { %589 = vrot.lane.b32.xlu1 %v2243_v23, %s2090_s18 }
 0x15d   : > { %v592_v24 = vpop.permute.xlu0 %591 }
 0x15e   : > { %605 = vst.msk [vmem:[#allocation2 + $0x20] sm:$0xff] %vm599_vm2, %v592_v24 }
 0x15f   : > { %606 = vst.msk [vmem:[#allocation2 + $0x28] sm:$0xff] %vm601_vm3, %v592_v24  ;;  %v928_v24 = vld [vmem:[%s2512_s8 + $0x18] sm:$0xff] }
 0x161   : > { %v594_v25 = vpop.permute.xlu1 %593  ;;  %v588_v26 = vpop.permute.xlu0 %587 }
 0x162   : > { %607 = vst.msk [vmem:[#allocation2 + $0x30] sm:$0xff] %vm599_vm2, %v594_v25  ;;  %600 = vst.msk [vmem:[#allocation2] sm:$0xff] %vm599_vm2, %v588_v26 }
 0x163   : > { %608 = vst.msk [vmem:[#allocation2 + $0x38] sm:$0xff] %vm601_vm3, %v594_v25  ;;  %602 = vst.msk [vmem:[#allocation2 + $0x8] sm:$0xff] %vm601_vm3, %v588_v26  ;;  %v927_v25 = vld [vmem:[%s2512_s8 + $0x10] sm:$0xff]  ;;  %v926_v26 = vld [vmem:[%s2512_s8 + $0x8] sm:$0xff] }
 0x165   : > { %v590_v27 = vpop.permute.xlu1 %589  ;;  %v2253_v28 = vld [vmem:[#allocation2 + $0x20] sm:$0xff] }
 0x166   : > { %v2255_v29 = vld [vmem:[#allocation2 + $0x28] sm:$0xff]  ;;  %603 = vst.msk [vmem:[#allocation2 + $0x10] sm:$0xff] %vm599_vm2, %v590_v27 }
 0x167   : > { %604 = vst.msk [vmem:[#allocation2 + $0x18] sm:$0xff] %vm601_vm3, %v590_v27  ;;  %v1932_v30 = vpack.i.bf16 %v2255_v29, %v2253_v28  ;;  %v925_v27 = vld [vmem:[%s2512_s8] sm:$0xff] }
 0x169   : > { %1933 = vrot.lane.b32.xlu0 %v1932_v30, %s2091_s20  ;;  %v615_v31 = vld [vmem:[#allocation2 + $0x30] sm:$0xff]  ;;  %v609_v33 = vld [vmem:[#allocation2] sm:$0xff] }
 0x16a   : > { %v616_v32 = vld [vmem:[#allocation2 + $0x38] sm:$0xff]  ;;  %v610_v35 = vld [vmem:[#allocation2 + $0x8] sm:$0xff]  ;;  %v668_v8 = vpack.c.bf16 %v615_v31, %v2253_v28 }
 0x16b   : > { %v1942_v34 = vpack.i.bf16 %v616_v32, %v615_v31  ;;  %v1937_v36 = vpack.i.bf16 %v610_v35, %v609_v33  ;;  %v669_v6 = vpack.c.bf16 %v616_v32, %v2255_v29 }
 0x16d   : > { %1943 = vrot.lane.b32.xlu1 %v1942_v34, %s2091_s20  ;;  %1938 = vrot.lane.b32.xlu0 %v1937_v36, %s2091_s20  ;;  %v611_v37 = vld [vmem:[#allocation2 + $0x10] sm:$0xff] }
 0x16e   : > { %v612_v38 = vld [vmem:[#allocation2 + $0x18] sm:$0xff]  ;;  %v666_v10 = vpack.c.bf16 %v611_v37, %v609_v33 }
 0x16f   : > { %v1947_v39 = vpack.i.bf16 %v612_v38, %v611_v37  ;;  %v667_v9 = vpack.c.bf16 %v612_v38, %v610_v35 }
 0x171   : > { %1948 = vrot.lane.b32.xlu1 %v1947_v39, %s2091_s20  ;;  %1953 = vrot.lane.b32.xlu0 %v1952_v40, %s2092_s21  ;;  %s471_s20 = scalar_lea.vmem %s2517_s13, %s1689_s16 }
 0x175   : > { %1958 = vrot.lane.b32.xlu1 %v1957_v41, %s2092_s21  ;;  %s1777_s21 = sshll.u32 %s2520_s26, 9 }
 0x176   : > { %s2335_s24 = scalar_lea.vmem %s2505_s1, %s1777_s21 }
 0x1db   : > { %v1934_v42 = vpop.permute.xlu0 %1933 }
 0x1dc   : > { %v1936_v43 = vunpack.i.h.bf16 %v1934_v42  ;;  %v1935_v44 = vunpack.i.l.bf16 %v1934_v42  ;;  %v1985_v42 = vld [vmem:[%s2509_s5 + $0x8] sm:$0xff]  }
 0x1de   : > { %v656_v49 = vsel %vm653_vm4, %v1935_v44, %v1936_v43  ;;  %v1987_v44 = vld [vmem:[%s2509_s5 + $0x18] sm:$0xff]  }
 0x1df   : > { %v1944_v45 = vpop.permute.xlu1 %1943  ;;  %v1939_v48 = vpop.permute.xlu0 %1938 }
 0x1e0   : > { %v1946_v46 = vunpack.i.h.bf16 %v1944_v45  ;;  %v1945_v47 = vunpack.i.l.bf16 %v1944_v45  ;;  %v1941_v51 = vunpack.i.h.bf16 %v1939_v48  ;;  %v1940_v52 = vunpack.i.l.bf16 %v1939_v48  ;;  %v1988_v45 = vld [vmem:[%s2511_s7] sm:$0xff]  }
 0x1e1   : > { %1848 = vmatprep.mubr.msk.bf16.mxu0 %vm959_vm7, %v1988_v45 }
 0x1e2   : > { %v675_v50 = vpack.c.bf16 %v1946_v46, %v1936_v43  ;;  %v657_v53 = vsel %vm653_vm4, %v1945_v47, %v1946_v46  ;;  %v654_v60 = vsel %vm653_vm4, %v1940_v52, %v1941_v51  ;;  %v1986_v43 = vld [vmem:[%s2509_s5 + $0x10] sm:$0xff]  }
 0x1e3   : > { %v1949_v54 = vpop.permute.xlu1 %1948  ;;  %v674_v55 = vpack.c.bf16 %v657_v53, %v656_v49  ;;  %v1954_v58 = vpop.permute.xlu0 %1953  ;;  %v1711_v53 = vld [vmem:[%s2335_s24 + $0xb0] sm:$0xff] }
 0x1e4   : > { %v1951_v56 = vunpack.i.h.bf16 %v1949_v54  ;;  %v1950_v57 = vunpack.i.l.bf16 %v1949_v54  ;;  %780 = vrot.lane.b32.xlu1 %v675_v50, %s2093_s22  ;;  %v1956_v62 = vunpack.i.h.bf16 %v1954_v58  ;;  %v1955_v63 = vunpack.i.l.bf16 %v1954_v58 }
 0x1e5   : > { %778 = vrot.lane.b32.xlu0 %v674_v55, %s2093_s22 }
 0x1e6   : > { %v673_v59 = vpack.c.bf16 %v1951_v56, %v1941_v51  ;;  %v655_v61 = vsel %vm653_vm4, %v1950_v57, %v1951_v56  ;;  %v671_v5 = vpack.c.bf16 %v1956_v62, %v1955_v63  ;;  %v1709_v57 = vld [vmem:[%s2335_s24 + $0xa0] sm:$0xff] }
 0x1e7   : > { %v1959_v0 = vpop.permute.xlu1 %1958  ;;  %v672_v1 = vpack.c.bf16 %v655_v61, %v654_v60  ;;  %v1712_v61 = vld [vmem:[%s2335_s24 + $0xb8] sm:$0xff] }
 0x1e8   : > { %v1961_v2 = vunpack.i.h.bf16 %v1959_v0  ;;  %v1960_v3 = vunpack.i.l.bf16 %v1959_v0  ;;  %776 = vrot.lane.b32.xlu1 %v673_v59, %s2093_s22 }
 0x1e9   : > { %774 = vrot.lane.b32.xlu0 %v672_v1, %s2093_s22 }
 0x1ea   : > { %v670_v4 = vpack.c.bf16 %v1961_v2, %v1960_v3  ;;  %v1710_v3 = vld [vmem:[%s2335_s24 + $0xa8] sm:$0xff] }
 0x1ec   : > { %770 = vrot.lane.b32.xlu1 %v670_v4, %s2093_s22 }
 0x1ed   : > { %772 = vrot.lane.b32.xlu0 %v671_v5, %s2093_s22 }
 0x1f0   : > { %768 = vrot.lane.b32.xlu1 %v669_v6, %s2093_s22 }
 0x1f1   : > { %766 = vrot.lane.b32.xlu0 %v668_v8, %s2093_s22 }
 0x1f4   : > { %764 = vrot.lane.b32.xlu1 %v667_v9, %s2093_s22 }
 0x1f5   : > { %762 = vrot.lane.b32.xlu0 %v666_v10, %s2093_s22 }
 0x1f8   : > { %729 = vperm.xlu1 %1931, %v691_v12  }
 0x1f9   : > { %724 = vperm.xlu0 %1930, %v690_v13  }
 0x1fc   : > { %719 = vperm.xlu1 %1931, %v689_v15  }
 0x1fd   : > { %714 = vperm.xlu0 %1930, %v688_v16   ;;  %v1707_v16 = vld [vmem:[%s2335_s24 + $0x90] sm:$0xff] }
 0x200   : > { %709 = vperm.xlu1 %1931, %v687_v17  }
 0x201   : > { %704 = vperm.xlu0 %1930, %v686_v18   ;;  %v1705_v18 = vld [vmem:[%s2335_s24 + $0x80] sm:$0xff] }
 0x204   : > { %699 = vperm.xlu1 %1931, %v685_v21  }
 0x205   : > { %694 = vperm.xlu0 %1930, %v684_v22   ;;  %v1708_v22 = vld [vmem:[%s2335_s24 + $0x98] sm:$0xff] }
 0x208   : > { %946 = vperm.xlu1 %1931, %v928_v24  }
 0x209   : > { %941 = vperm.xlu0 %1930, %v927_v25  }
 0x20c   : > { %936 = vperm.xlu1 %1931, %v926_v26  }
 0x20d   : > { %931 = vperm.xlu0 %1930, %v925_v27  }
 0x256   : > { %v781_v28 = vpop.permute.xlu1 %780 }
 0x257   : > { %v779_v29 = vpop.permute.xlu0 %778 }
 0x258   : > { %v786_v30 = vsel %vm782_vm6, %v779_v29, %v781_v28 }
 0x259   : > { %1824 = vmatprep.subr.bf16.mxu1 %v786_v30 }
 0x25a   : > { %v777_v31 = vpop.permute.xlu1 %776  ;;  %1825 = vmatpush3.bf16.msra.mxu1 %v786_v30  ;;  %v1706_v30 = vld [vmem:[%s2335_s24 + $0x88] sm:$0xff] }
 0x25b   : > { %v775_v32 = vpop.permute.xlu0 %774 }
 0x25c   : > { %v785_v33 = vsel %vm782_vm6, %v775_v32, %v777_v31 }
 0x25d   : > { %1826 = vmatprep.subr.bf16.mxu1 %v785_v33 }
 0x25e   : > { %v771_v34 = vpop.permute.xlu1 %770  ;;  %1827 = vmatpush3.bf16.msra.mxu1 %v785_v33 }
 0x25f   : > { %v773_v35 = vpop.permute.xlu0 %772 }
 0x260   : > { %1828 = vmatprep.subr.bf16.mxu1 %v773_v35 }
 0x262   : > { %v769_v36 = vpop.permute.xlu1 %768  ;;  %1829 = vmatpush3.bf16.msra.mxu1 %v773_v35 }
 0x263   : > { %1830 = vmatprep.subr.bf16.mxu1 %v771_v34  ;;  %v767_v37 = vpop.permute.xlu0 %766 }
 0x264   : > { %v784_v38 = vsel %vm782_vm6, %v767_v37, %v769_v36 }
 0x266   : > { %1831 = vmatpush3.bf16.msra.mxu1 %v771_v34  ;;  %v765_v39 = vpop.permute.xlu1 %764 }
 0x267   : > { %1832 = vmatprep.subr.bf16.mxu1 %v784_v38  ;;  %v763_v40 = vpop.permute.xlu0 %762 }
 0x268   : > { %v783_v41 = vsel %vm782_vm6, %v763_v40, %v765_v39 }
 0x26a   : > { %1833 = vmatpush3.bf16.msra.mxu1 %v784_v38 }
 0x26b   : > { %1834 = vmatprep.subr.bf16.mxu1 %v783_v41 }
 0x26e   : > { %1835 = vmatpush3.bf16.msra.mxu1 %v783_v41 }
 0x271   : > { %1837 = vmatmul.mubr.msk.bf16.vlgmr.msra.gmra.mxu1 %vm793_vm5, %v1985_v42 }
 0x272   : > { %1840 = vmatprep.mubr.msk.bf16.mxu1 %vm793_vm5, %v1986_v43 }
 0x273   : > { %v730_v51 = vpop.permute.xlu1 %729 }
 0x274   : > { %v725_v48 = vpop.permute.xlu0 %724 }
 0x277   : > { %v720_v1 = vpop.permute.xlu1 %719 }
 0x278   : > { %v715_v55 = vpop.permute.xlu0 %714 }
 0x279   : > { %1841 = vmatmul.mubr.msk.bf16.gmra.mxu1 %vm793_vm5, %v1987_v44 }
 0x27b   : > { %v710_v12 = vpop.permute.xlu1 %709 }
 0x27c   : > { %v705_v7 = vpop.permute.xlu0 %704 }
 0x27f   : > { %v700_v25 = vpop.permute.xlu1 %699 }
 0x280   : > { %v695_v13 = vpop.permute.xlu0 %694 }
 0x331   : > { %v1838_v46 = vpop.f32.mrf.mxu1 }
 0x332   : > { %v849_v15 = vadd.f32 %v1838_v46, %v705_v7 }
 0x333   : > { %v840_v47 = vpop.f32.mrf.mxu1 }
 0x334   : > { %v841_v17 = vadd.f32 %v840_v47, %v695_v13  ;;  %v881_v24 = vadd.f32 %v1707_v16, %v849_v15 }
 0x335   : > { %v1839_v49 = vpop.f32.mrf.mxu1 }
 0x336   : > { %v852_v21 = vadd.f32 %v1839_v49, %v710_v12  ;;  %v879_v26 = vadd.f32 %v1705_v18, %v841_v17 }
 0x337   : > { %v843_v50 = vpop.f32.mrf.mxu1 }
 0x338   : > { %v882_v28 = vadd.f32 %v1708_v22, %v852_v21  ;;  %v844_v29 = vadd.f32 %v843_v50, %v700_v25 }
 0x339   : > { %v1842_v52 = vpop.f32.mrf.mxu1 }
 0x33a   : > { %v865_v54 = vadd.f32 %v1842_v52, %v725_v48  ;;  %v880_v35 = vadd.f32 %v1706_v30, %v844_v29  ;;  %v1740_v30 = vld [vmem:[%s2510_s6 + $0x78] sm:$0xff] }
 0x33b   : > { %v856_v56 = vpop.f32.mrf.mxu1 }
 0x33c   : > { %v885_v58 = vadd.f32 %v1711_v53, %v865_v54  ;;  %v857_v59 = vadd.f32 %v856_v56, %v715_v55  ;;  %v1989_v53 = vld [vmem:[%s2511_s7 + $0x8] sm:$0xff]   ;;  %v1990_v54 = vld [vmem:[%s2513_s9] sm:$0xff]   ;;  %v942_v56 = vpop.permute.xlu0 %941 }
 0x33d   : > { %v1843_v60 = vpop.f32.mrf.mxu1  ;;  %v1991_v55 = vld [vmem:[%s2513_s9 + $0x8] sm:$0xff]  }
 0x33e   : > { %v1715_v62 = vmul.f32 -1.442695, %v885_v58  ;;  %v883_v63 = vadd.f32 %v1709_v57, %v857_v59  ;;  %v868_v0 = vadd.f32 %v1843_v60, %v730_v51  ;;  %v947_v57 = vpop.permute.xlu1 %946 }
 0x33f   : > { %v859_v2 = vpop.f32.mrf.mxu1 }
 0x340   : > { %1998 = vpow2.f32 %v1715_v62  ;;  %v1713_v4 = vmul.f32 -1.442695, %v883_v63  ;;  %v886_v5 = vadd.f32 %v1712_v61, %v868_v0  ;;  %v860_v6 = vadd.f32 %v859_v2, %v720_v1  ;;  %v932_v60 = vpop.permute.xlu0 %931 }
 0x342   : > { %2000 = vpow2.f32 %v1713_v4  ;;  %v1716_v8 = vmul.f32 -1.442695, %v886_v5  ;;  %v884_v9 = vadd.f32 %v1710_v3, %v860_v6  ;;  %v937_v2 = vpop.permute.xlu1 %936 }
 0x344   : > { %2002 = vpow2.f32 %v1716_v8  ;;  %v1714_v10 = vmul.f32 -1.442695, %v884_v9 }
 0x346   : > { %2004 = vpow2.f32 %v1714_v10 }
 0x347   : > { %2006 = vtanh.f32 %v881_v24 }
 0x348   : > { %2008 = vtanh.f32 %v879_v26 }
 0x349   : > { %2010 = vtanh.f32 %v882_v28  ;;  %v1739_v28 = vld [vmem:[%s2510_s6 + $0x70] sm:$0xff] }
 0x34d   : > { %v1999_v27 = vpop.eup %1998 }
 0x34e   : > { %v905_v31 = vadd.f32 1.0, %v1999_v27 }
 0x34f   : > { %v2001_v32 = vpop.eup %2000 }
 0x350   : > { %v903_v33 = vadd.f32 1.0, %v2001_v32  ;;  %2012 = vrcp.f32 %v905_v31  ;;  %v1737_v31 = vld [vmem:[%s2510_s6 + $0x60] sm:$0xff]  ;;  %v1738_v32 = vld [vmem:[%s2510_s6 + $0x68] sm:$0xff] }
 0x351   : > { %v2003_v34 = vpop.eup %2002 }
 0x352   : > { %v906_v36 = vadd.f32 1.0, %v2003_v34  ;;  %2014 = vrcp.f32 %v903_v33  ;;  %v1735_v33 = vld [vmem:[%s2510_s6 + $0x50] sm:$0xff]  ;;  %v1736_v34 = vld [vmem:[%s2510_s6 + $0x58] sm:$0xff] }
 0x353   : > { %v2005_v37 = vpop.eup %2004 }
 0x354   : > { %2016 = vrcp.f32 %v906_v36  ;;  %v904_v38 = vadd.f32 1.0, %v2005_v37  ;;  %v2007_v39 = vpop.eup %2006  ;;  %v1733_v36 = vld [vmem:[%s2510_s6 + $0x40] sm:$0xff]  ;;  %v1734_v37 = vld [vmem:[%s2510_s6 + $0x48] sm:$0xff] }
 0x355   : > { %2018 = vtanh.f32 %v880_v35  ;;  %v2009_v40 = vpop.eup %2008  ;;  %v1992_v35 = vld [vmem:[%s2509_s5 + $0x20] sm:$0xff]  }
 0x356   : > { %2020 = vrcp.f32 %v904_v38  ;;  %v2011_v41 = vpop.eup %2010  ;;  %v1025_v38 = vld [vmem:[%s2514_s10 + $0x10] sm:$0xff] }
 0x35d   : > { %v2013_v42 = vpop.eup %2012 }
 0x35e   : > { %v917_v46 = vmul.f32 %v2013_v42, %v2007_v39  ;;  %v1026_v39 = vld [vmem:[%s2514_s10 + $0x18] sm:$0xff]  ;;  %v1023_v42 = vld [vmem:[%s2514_s10] sm:$0xff] }
 0x35f   : > { %v2015_v43 = vpop.eup %2014 }
 0x360   : > { %v915_v50 = vmul.f32 %v2015_v43, %v2009_v40  ;;  %v1767_v40 = vld [vmem:[%s2514_s10 + $0x30] sm:$0xff]  ;;  %v1024_v43 = vld [vmem:[%s2514_s10 + $0x8] sm:$0xff] }
 0x361   : > { %v2017_v44 = vpop.eup %2016 }
 0x362   : > { %v2019_v45 = vpop.eup %2018  ;;  %v918_v47 = vmul.f32 %v2017_v44, %v2011_v41  ;;  %v1768_v41 = vld [vmem:[%s2514_s10 + $0x38] sm:$0xff]  ;;  %v1765_v44 = vld [vmem:[%s2514_s10 + $0x20] sm:$0xff] }
 0x363   : > { %v2021_v48 = vpop.eup %2020 }
 0x364   : > { %v920_v49 = vpack.c.bf16 %v918_v47, %v917_v46  ;;  %v916_v51 = vmul.f32 %v2021_v48, %v2019_v45  ;;  %v1766_v45 = vld [vmem:[%s2514_s10 + $0x28] sm:$0xff]  ;;  %v1490_v46 = vld [vmem:[%s2516_s12] sm:$0xff] }
 0x366   : > { %1844 = vmatprep.subr.bf16.mxu0 %v920_v49  ;;  %v919_v52 = vpack.c.bf16 %v916_v51, %v915_v50 }
 0x367   : > { %1845 = vmatpush3.bf16.msra.mxu0 %v920_v49 }
 0x368   : > { %1846 = vmatprep.subr.bf16.mxu0 %v919_v52 }
 0x36b   : > { %1847 = vmatpush3.bf16.msra.mxu0 %v919_v52 }
 0x36c   : > { %1852 = vmatprep.subr.bf16.mxu0 %v920_v49 }
 0x36e   : > { %1849 = vmatmul.mubr.msk.bf16.vlgmr.msra.gmra.mxu0 %vm959_vm7, %v1989_v53 }
 0x36f   : > { %1853 = vmatpush3.bf16.msra.mxu0 %v920_v49  ;;  %1856 = vmatprep.mubr.msk.bf16.mxu0 %vm959_vm7, %v1990_v54 }
 0x370   : > { %1854 = vmatprep.subr.bf16.mxu0 %v919_v52 }
 0x373   : > { %1855 = vmatpush3.bf16.msra.mxu0 %v919_v52 }
 0x376   : > { %1857 = vmatmul.mubr.msk.bf16.vlgmr.msra.gmra.mxu0 %vm959_vm7, %v1991_v55 }
 0x377   : > { %1872 = vmatprep.mubr.msk.bf16.mxu0 %vm793_vm5, %v1992_v35 }
 0x42e   : > { %v1850_v58 = vpop.f32.mrf.mxu0 }
 0x42f   : > { %v1009_v59 = vadd.f32 %v1850_v58, %v942_v56 }
 0x430   : > { %v1000_v61 = vpop.f32.mrf.mxu0 }
 0x431   : > { %v1017_v62 = vadd.f32 %v1009_v59, %v2231_v14  ;;  %v1001_v63 = vadd.f32 %v1000_v61, %v932_v60 }
 0x432   : > { %v1851_v0 = vpop.f32.mrf.mxu0 }
 0x433   : > { %v1012_v1 = vadd.f32 %v1851_v0, %v947_v57  ;;  %1120 = vrot.lane.b32.xlu0 %v1017_v62, %s2090_s18  ;;  %v1015_v4 = vadd.f32 %v1001_v63, %v2235_v19 }
 0x434   : > { %v1003_v3 = vpop.f32.mrf.mxu0 }
 0x435   : > { %v1018_v5 = vadd.f32 %v1012_v1, %v2237_v20  ;;  %v1004_v6 = vadd.f32 %v1003_v3, %v937_v2  ;;  %v1993_v1 = vld [vmem:[%s2509_s5 + $0x28] sm:$0xff]   ;;  %v1994_v2 = vld [vmem:[%s2509_s5 + $0x30] sm:$0xff]   ;;  %v1995_v3 = vld [vmem:[%s2509_s5 + $0x38] sm:$0xff]  }
 0x437   : > { %v1016_v7 = vadd.f32 %v1004_v6, %v2243_v23  ;;  %1122 = vrot.lane.b32.xlu1 %v1018_v5, %s2090_s18  ;;  %1116 = vrot.lane.b32.xlu0 %v1015_v4, %s2090_s18  ;;  %v2364_v8 = vpack.c.bf16 %v1018_v5, %v1017_v62  ;;  %v2460_v5 = vpop.f32.mrf.mxu0 }
 0x439   : > { %v2366_v14 = vpack.c.bf16 %v1016_v7, %v1015_v4  ;;  %v1996_v4 = vld [vmem:[%s2513_s9 + $0x10] sm:$0xff]   ;;  %v2462_v6 = vpop.f32.mrf.mxu0 }
 0x43a   : > { %1884 = vmatprep.mubr.msk.bf16.mxu1 %vm959_vm7, %v1996_v4 }
 0x43b   : > { %1118 = vrot.lane.b32.xlu1 %v1016_v7, %s2090_s18  ;;  %s2094_s18 = smov 124   ;;  %v2464_v7 = vpop.f32.mrf.mxu0 }
 0x4a5   : > { %v1121_v9 = vpop.permute.xlu0 %1120 }
 0x4a6   : > { %1132 = vst.msk [vmem:[#allocation2 + $0x20] sm:$0xff] %vm599_vm2, %v1121_v9 }
 0x4a7   : > { %1133 = vst.msk [vmem:[#allocation2 + $0x28] sm:$0xff] %vm601_vm3, %v1121_v9 }
 0x4a9   : > { %v1123_v19 = vpop.permute.xlu1 %1122  ;;  %v1117_v20 = vpop.permute.xlu0 %1116 }
 0x4aa   : > { %1134 = vst.msk [vmem:[#allocation2 + $0x30] sm:$0xff] %vm599_vm2, %v1123_v19  ;;  %1128 = vst.msk [vmem:[#allocation2] sm:$0xff] %vm599_vm2, %v1117_v20 }
 0x4ab   : > { %1135 = vst.msk [vmem:[#allocation2 + $0x38] sm:$0xff] %vm601_vm3, %v1123_v19  ;;  %1129 = vst.msk [vmem:[#allocation2 + $0x8] sm:$0xff] %vm601_vm3, %v1117_v20 }
 0x4ad   : > { %v1119_v23 = vpop.permute.xlu1 %1118  ;;  %v1138_v10 = vld [vmem:[#allocation2 + $0x20] sm:$0xff] }
 0x4ae   : > { %v1142_v12 = vld [vmem:[#allocation2 + $0x28] sm:$0xff]  ;;  %1130 = vst.msk [vmem:[#allocation2 + $0x10] sm:$0xff] %vm599_vm2, %v1119_v23 }
 0x4af   : > { %1131 = vst.msk [vmem:[#allocation2 + $0x18] sm:$0xff] %vm601_vm3, %v1119_v23  ;;  %v1962_v13 = vpack.i.bf16 %v1142_v12, %v1138_v10 }
 0x4b1   : > { %1963 = vrot.lane.b32.xlu0 %v1962_v13, %s2094_s18  ;;  %v1139_v15 = vld [vmem:[#allocation2 + $0x30] sm:$0xff]  ;;  %v1136_v17 = vld [vmem:[#allocation2] sm:$0xff] }
 0x4b2   : > { %v1143_v16 = vld [vmem:[#allocation2 + $0x38] sm:$0xff]  ;;  %v1140_v21 = vld [vmem:[#allocation2 + $0x8] sm:$0xff]  ;;  %v2377_v22 = vpack.c.bf16 %v1139_v15, %v1138_v10  ;;  %v1755_v13 = vld [vmem:[%s2335_s24 + $0xf0] sm:$0xff] }
 0x4b3   : > { %v1972_v18 = vpack.i.bf16 %v1143_v16, %v1139_v15  ;;  %v1967_v24 = vpack.i.bf16 %v1140_v21, %v1136_v17 }
 0x4b5   : > { %1973 = vrot.lane.b32.xlu1 %v1972_v18, %s2094_s18  ;;  %1968 = vrot.lane.b32.xlu0 %v1967_v24, %s2094_s18  ;;  %v1137_v25 = vld [vmem:[#allocation2 + $0x10] sm:$0xff]  ;;  %v1753_v18 = vld [vmem:[%s2335_s24 + $0xe0] sm:$0xff] }
 0x4b6   : > { %v1141_v26 = vld [vmem:[#allocation2 + $0x18] sm:$0xff]  ;;  %v2382_v29 = vpack.c.bf16 %v1137_v25, %v1136_v17 }
 0x4b7   : > { %v1977_v27 = vpack.i.bf16 %v1141_v26, %v1137_v25  ;;  %v1756_v25 = vld [vmem:[%s2335_s24 + $0xf8] sm:$0xff] }
 0x4b9   : > { %1978 = vrot.lane.b32.xlu1 %v1977_v27, %s2094_s18  ;;  %1233 = vperm.xlu0 %1930, %v1739_v28  }
 0x4bd   : > { %1238 = vperm.xlu1 %1931, %v1740_v30   ;;  %1223 = vperm.xlu0 %1930, %v1737_v31   ;;  %v1754_v31 = vld [vmem:[%s2335_s24 + $0xe8] sm:$0xff] }
 0x4c1   : > { %1228 = vperm.xlu1 %1931, %v1738_v32   ;;  %1213 = vperm.xlu0 %1930, %v1735_v33  }
 0x4c5   : > { %1218 = vperm.xlu1 %1931, %v1736_v34   ;;  %1203 = vperm.xlu0 %1930, %v1733_v36  }
 0x4c9   : > { %1208 = vperm.xlu1 %1931, %v1734_v37   ;;  %1039 = vperm.xlu0 %1930, %v1025_v38  }
 0x4cd   : > { %1044 = vperm.xlu1 %1931, %v1026_v39   ;;  %1410 = vperm.xlu0 %1930, %v1767_v40  }
 0x4d1   : > { %1415 = vperm.xlu1 %1931, %v1768_v41   ;;  %1029 = vperm.xlu0 %1930, %v1023_v42   ;;  %v1751_v42 = vld [vmem:[%s2335_s24 + $0xd0] sm:$0xff] }
 0x4d5   : > { %1034 = vperm.xlu1 %1931, %v1024_v43   ;;  %1400 = vperm.xlu0 %1930, %v1765_v44   ;;  %v1749_v44 = vld [vmem:[%s2335_s24 + $0xc0] sm:$0xff] }
 0x4d9   : > { %1405 = vperm.xlu1 %1931, %v1766_v45   ;;  %1493 = vperm.xlu0 %1930, %v1490_v46   ;;  %v1752_v46 = vld [vmem:[%s2335_s24 + $0xd8] sm:$0xff] }
 0x523   : > { %v1964_v47 = vpop.permute.xlu0 %1963 }
 0x524   : > { %v1966_v48 = vunpack.i.h.bf16 %v1964_v47  ;;  %v1965_v49 = vunpack.i.l.bf16 %v1964_v47 }
 0x526   : > { %v1171_v56 = vsel %vm1168_vm8, %v1965_v49, %v1966_v48 }
 0x527   : > { %v1974_v50 = vpop.permute.xlu1 %1973  ;;  %v1969_v53 = vpop.permute.xlu0 %1968 }
 0x528   : > { %v1976_v51 = vunpack.i.h.bf16 %v1974_v50  ;;  %v1975_v52 = vunpack.i.l.bf16 %v1974_v50  ;;  %v1971_v54 = vunpack.i.h.bf16 %v1969_v53  ;;  %v1970_v55 = vunpack.i.l.bf16 %v1969_v53  ;;  %v1750_v53 = vld [vmem:[%s2335_s24 + $0xc8] sm:$0xff] }
 0x52a   : > { %v1172_v57 = vsel %vm1168_vm8, %v1975_v52, %v1976_v51  ;;  %v1169_v62 = vsel %vm1168_vm8, %v1970_v55, %v1971_v54 }
 0x52b   : > { %v1979_v58 = vpop.permute.xlu1 %1978  ;;  %v1182_v59 = vpack.c.bf16 %v1172_v57, %v1171_v56 }
 0x52c   : > { %v1981_v60 = vunpack.i.h.bf16 %v1979_v58  ;;  %v1980_v61 = vunpack.i.l.bf16 %v1979_v58 }
 0x52d   : > { %1860 = vmatprep.subr.bf16.mxu0 %v1182_v59 }
 0x52e   : > { %1861 = vmatpush3.bf16.msra.mxu0 %v1182_v59  ;;  %v1170_v63 = vsel %vm1168_vm8, %v1980_v61, %v1981_v60 }
 0x52f   : > { %v1181_v0 = vpack.c.bf16 %v1170_v63, %v1169_v62 }
 0x531   : > { %1862 = vmatprep.subr.bf16.mxu0 %v1181_v0 }
 0x532   : > { %1863 = vmatpush3.bf16.msra.mxu0 %v1181_v0 }
 0x533   : > { %1864 = vmatprep.subr.bf16.mxu0 %v2364_v8 }
 0x534   : > { %v1234_v19 = vpop.permute.xlu0 %1233 }
 0x536   : > { %1865 = vmatpush3.bf16.msra.mxu0 %v2364_v8  ;;  %v2466_v8 = vpop.f32.mrf.mxu0 }
 0x537   : > { %1866 = vmatprep.subr.bf16.mxu0 %v2366_v14 }
 0x538   : > { %v1239_v10 = vpop.permute.xlu1 %1238  ;;  %v1224_v16 = vpop.permute.xlu0 %1223 }
 0x53a   : > { %1867 = vmatpush3.bf16.msra.mxu0 %v2366_v14 }
 0x53b   : > { %1868 = vmatprep.subr.bf16.mxu0 %v2377_v22 }
 0x53c   : > { %v1214_v35 = vpop.permute.xlu0 %1213 }
 0x53e   : > { %1869 = vmatpush3.bf16.msra.mxu0 %v2377_v22 }
 0x53f   : > { %1870 = vmatprep.subr.bf16.mxu0 %v2382_v29 }
 0x540   : > { %v1204_v40 = vpop.permute.xlu0 %1203 }
 0x542   : > { %1871 = vmatpush3.bf16.msra.mxu0 %v2382_v29  ;;  %v1229_v29 = vpop.permute.xlu1 %1228 }
 0x545   : > { %1873 = vmatmul.mubr.msk.bf16.vlgmr.msra.gmra.mxu0 %vm793_vm5, %v1993_v1 }
 0x546   : > { %1876 = vmatprep.mubr.msk.bf16.mxu0 %vm793_vm5, %v1994_v2  ;;  %v1219_v39 = vpop.permute.xlu1 %1218 }
 0x54a   : > { %v1209_v48 = vpop.permute.xlu1 %1208 }
 0x54d   : > { %1877 = vmatmul.mubr.msk.bf16.gmra.mxu0 %vm793_vm5, %v1995_v3 }
 0x605   : > { %v1874_v14 = vpop.f32.mrf.mxu0 }
 0x606   : > { %v1316_v41 = vadd.f32 %v1874_v14, %v1214_v35 }
 0x607   : > { %v1307_v9 = vpop.f32.mrf.mxu0 }
 0x608   : > { %v1308_v43 = vadd.f32 %v1307_v9, %v1204_v40  ;;  %v1348_v47 = vadd.f32 %v1751_v42, %v1316_v41 }
 0x609   : > { %v1875_v20 = vpop.f32.mrf.mxu0 }
 0x60a   : > { %v1319_v45 = vadd.f32 %v1875_v20, %v1219_v39  ;;  %v1346_v49 = vadd.f32 %v1749_v44, %v1308_v43 }
 0x60b   : > { %v1310_v23 = vpop.f32.mrf.mxu0 }
 0x60c   : > { %v1349_v51 = vadd.f32 %v1752_v46, %v1319_v45  ;;  %v1311_v52 = vadd.f32 %v1310_v23, %v1209_v48 }
 0x60d   : > { %v1878_v12 = vpop.f32.mrf.mxu0 }
 0x60e   : > { %v1332_v15 = vadd.f32 %v1878_v12, %v1234_v19  ;;  %v1347_v58 = vadd.f32 %v1750_v53, %v1311_v52 }
 0x60f   : > { %v1323_v17 = vpop.f32.mrf.mxu0 }
 0x610   : > { %v1352_v21 = vadd.f32 %v1755_v13, %v1332_v15  ;;  %v1324_v22 = vadd.f32 %v1323_v17, %v1224_v16  ;;  %v1997_v13 = vld [vmem:[%s2513_s9 + $0x18] sm:$0xff]   ;;  %v1040_v15 = vpop.permute.xlu0 %1039  ;;  %v1045_v16 = vpop.permute.xlu1 %1044 }
 0x611   : > { %v1879_v24 = vpop.f32.mrf.mxu0 }
 0x612   : > { %v1759_v26 = vmul.f32 -1.442695, %v1352_v21  ;;  %v1350_v27 = vadd.f32 %v1753_v18, %v1324_v22  ;;  %v1335_v28 = vadd.f32 %v1879_v24, %v1239_v10 }
 0x613   : > { %v1326_v30 = vpop.f32.mrf.mxu0 }
 0x614   : > { %2022 = vpow2.f32 %v1759_v26  ;;  %v1757_v32 = vmul.f32 -1.442695, %v1350_v27  ;;  %v1353_v33 = vadd.f32 %v1756_v25, %v1335_v28  ;;  %v1327_v34 = vadd.f32 %v1326_v30, %v1229_v29  ;;  %v1411_v17 = vpop.permute.xlu0 %1410  ;;  %v1416_v18 = vpop.permute.xlu1 %1415 }
 0x615   : > { %v1106_v28 = vadd.f32 %v2460_v5, %v1040_v15  ;;  %v1109_v29 = vadd.f32 %v2464_v7, %v1045_v16  ;;  %v1487_v7 = vld [vmem:[#allocation3] sm:$0xf] }
 0x616   : > { %2024 = vpow2.f32 %v1757_v32  ;;  %v1760_v36 = vmul.f32 -1.442695, %v1353_v33  ;;  %v1351_v37 = vadd.f32 %v1754_v31, %v1327_v34 }
 0x618   : > { %2026 = vpow2.f32 %v1760_v36  ;;  %v1758_v38 = vmul.f32 -1.442695, %v1351_v37  ;;  %v1030_v21 = vpop.permute.xlu0 %1029  ;;  %v1035_v22 = vpop.permute.xlu1 %1034 }
 0x619   : > { %v1101_v32 = vadd.f32 %v2466_v8, %v1035_v22  ;;  %v1098_v39 = vadd.f32 %v2462_v6, %v1030_v21 }
 0x61a   : > { %2028 = vpow2.f32 %v1758_v38 }
 0x61b   : > { %2030 = vtanh.f32 %v1348_v47 }
 0x61c   : > { %2032 = vtanh.f32 %v1346_v49  ;;  %v1401_v30 = vpop.permute.xlu0 %1400  ;;  %v1406_v33 = vpop.permute.xlu1 %1405 }
 0x61d   : > { %2034 = vtanh.f32 %v1349_v51 }
 0x620   : > { %v1494_v8 = vpop.permute.xlu0 %1493 }
 0x621   : > { %v2023_v50 = vpop.eup %2022 }
 0x622   : > { %v1372_v54 = vadd.f32 1.0, %v2023_v50  ;;  %v2048_v50 = vld [vmem:[%s2196_s19] sm:$0xff] }
 0x623   : > { %v2025_v55 = vpop.eup %2024 }
 0x624   : > { %v1370_v56 = vadd.f32 1.0, %v2025_v55  ;;  %2036 = vrcp.f32 %v1372_v54 }
 0x625   : > { %v2027_v57 = vpop.eup %2026 }
 0x626   : > { %v1373_v59 = vadd.f32 1.0, %v2027_v57  ;;  %2038 = vrcp.f32 %v1370_v56 }
 0x627   : > { %v2029_v60 = vpop.eup %2028 }
 0x628   : > { %2040 = vrcp.f32 %v1373_v59  ;;  %v1371_v61 = vadd.f32 1.0, %v2029_v60  ;;  %v2031_v62 = vpop.eup %2030 }
 0x629   : > { %2042 = vtanh.f32 %v1347_v58  ;;  %v2033_v63 = vpop.eup %2032 }
 0x62a   : > { %2044 = vrcp.f32 %v1371_v61  ;;  %v2035_v0 = vpop.eup %2034 }
 0x631   : > { %v2037_v1 = vpop.eup %2036 }
 0x632   : > { %v1384_v14 = vmul.f32 %v2037_v1, %v2031_v62 }
 0x633   : > { %v2039_v2 = vpop.eup %2038 }
 0x634   : > { %v1382_v23 = vmul.f32 %v2039_v2, %v2033_v63 }
 0x635   : > { %v2041_v3 = vpop.eup %2040 }
 0x636   : > { %v2043_v4 = vpop.eup %2042  ;;  %v1385_v9 = vmul.f32 %v2041_v3, %v2035_v0 }
 0x637   : > { %v2045_v19 = vpop.eup %2044 }
 0x638   : > { %v1387_v20 = vpack.c.bf16 %v1385_v9, %v1384_v14  ;;  %v1383_v10 = vmul.f32 %v2045_v19, %v2043_v4 }
 0x63a   : > { %1880 = vmatprep.subr.bf16.mxu1 %v1387_v20  ;;  %v1386_v12 = vpack.c.bf16 %v1383_v10, %v1382_v23 }
 0x63b   : > { %1881 = vmatpush3.bf16.msra.mxu1 %v1387_v20 }
 0x63c   : > { %1882 = vmatprep.subr.bf16.mxu1 %v1386_v12 }
 0x63f   : > { %1883 = vmatpush3.bf16.msra.mxu1 %v1386_v12 }
 0x640   : > { %1888 = vmatprep.subr.bf16.mxu1 %v2089_v11 }
 0x642   : > { %1885 = vmatmul.mubr.msk.bf16.vlgmr.msra.gmra.mxu1 %vm959_vm7, %v1997_v13 }
 0x643   : > { %1892 = vmatprep.mubr.msk.bf16.mxu1 %vm2095_vm9, %v2089_v11 }
 0x702   : > { %v1886_v24 = vpop.f32.mrf.mxu1 }
 0x703   : > { %v1477_v26 = vadd.f32 %v1886_v24, %v1411_v17 }
 0x704   : > { %v1468_v25 = vpop.f32.mrf.mxu1 }
 0x705   : > { %v1485_v35 = vadd.f32 %v1477_v26, %v1106_v28  ;;  %v1469_v36 = vadd.f32 %v1468_v25, %v1401_v30 }
 0x706   : > { %v1887_v27 = vpop.f32.mrf.mxu1 }
 0x707   : > { %v1480_v31 = vadd.f32 %v1887_v27, %v1416_v18  ;;  %v1483_v42 = vadd.f32 %v1469_v36, %v1098_v39 }
 0x708   : > { %v1471_v34 = vpop.f32.mrf.mxu1 }
 0x709   : > { %v1486_v37 = vadd.f32 %v1480_v31, %v1109_v29  ;;  %v1472_v38 = vadd.f32 %v1471_v34, %v1406_v33 }
 0x70b   : > { %v1489_v40 = vpack.c.bf16 %v1486_v37, %v1485_v35  ;;  %v1484_v41 = vadd.f32 %v1472_v38, %v1101_v32 }
 0x70d   : > { %1889 = vmatpush3.bf16.msra.mxu1 %v1489_v40  ;;  %v1488_v5 = vpack.c.bf16 %v1484_v41, %v1483_v42 }
 0x70e   : > { %1890 = vmatprep.subr.bf16.mxu1 %v2089_v11 }
 0x711   : > { %1891 = vmatpush3.bf16.msra.mxu1 %v1488_v5 }
 0x712   : > { %1896 = vmatprep.subr.bf16.mxu1 %v2089_v11 }
 0x714   : > { %1893 = vmatmul.mubr.msk.bf16.vlgmr.msra.gmra.mxu1 %vm959_vm7, %v1487_v7 }
 0x715   : > { %1898 = vmatprep.mubr.msk.bf16.mxu1 %vm2095_vm9, %v2089_v11  ;;  %v1549_v11 = vld [vmem:[%s2506_s2] sm:$0xf] }
 0x7d4   : > { %v1533_v43 = vpop.f32.mrf.mxu1 }
 0x7d5   : > { %v1534_v6 = vadd.f32 %v1533_v43, %v1494_v8 }
 0x7d6   : > { %v1894_v44 = vpop.f32.mrf.mxu1 }
 0x7d7   : > { %v1540_v45 = vsub.f32 0.0, %v1534_v6  ;;  %v1539_v51 = vsub.f32 %v2048_v50, %v1534_v6 }
 0x7d8   : > { %v1536_v46 = vpop.f32.mrf.mxu1 }
 0x7d9   : > { %v1541_v47 = vmul.f32 1.442695, %v1540_v45 }
 0x7da   : > { %v1895_v48 = vpop.f32.mrf.mxu1 }
 0x7db   : > { %2046 = vpow2.f32 %v1541_v47 }
 0x7e8   : > { %v2047_v49 = vpop.eup %2046 }
 0x7e9   : > { %v1544_v52 = vrot.slane %v2047_v49, 4 }
 0x7eb   : > { %v1546_v53 = vmul.f32 %v1544_v52, %v1539_v51 }
 0x7ed   : > { %v1548_v54 = vsel %vm1547_vm10, %v1546_v53, %v2048_v50 }
 0x7ee   : > { %v1550_v55 = vpack.c.bf16 %v1548_v54, %v1548_v54 }
 0x7f0   : > { %v1556_v56 = vsel %vm1547_vm10, %v1550_v55, 0 }
 0x7f1   : > { %1897 = vmatpush3.bf16.msra.mxu1 %v1556_v56 }
 0x7f4   : > { %1899 = vmatmul.mubr.msk.bf16.vlgmr.msra.gmra.mxu1 %vm1551_vm11, %v1549_v11 }
 0x8b4   : > { %v1592_v57 = vpop.f32.mrf.mxu1 }
 0x8b5   : > { %1598 = vst [vmem:[%s471_s20] sm:$0xff] %v1592_v57 }
 0x8b6   : > { %v1900_v58 = vpop.f32.mrf.mxu1 }
 0x8b8   : > { %v1595_v59 = vpop.f32.mrf.mxu1 }
 0x8ba   : > { %v1901_v60 = vpop.f32.mrf.mxu1 }
 0x8bb PF: > { %s24_s25 = sadd.s32 1, %s2085_s25  }
 0x8bc   : > { %p21_p1 = scmp.ge.s32.totalorder %s24_s25, 4  }
 0x8be   :  { %23 = sbr.rel (!%p21_p1) target bundleno = 1 (0x1), region = 114 }
 0x8c3   :  { %1618 = vsyncpa [#allocation4], 1 }
 0x8c4   :  { %1620 = vsyncpa [#allocation4 + $0x1], 1 }

</bundles_post_ra>
